<compile_context>
chip_gen: v6e
topology: v6e:2x2x1
jax: 0.10.0
libtpu: 0.0.40
codegen_flags: <defaults>
</compile_context>

<pallas_src>
import functools

import numpy as np

import jax
import jax.numpy as jnp
from jax import lax
from jax.experimental import pallas as pl
from jax.experimental.pallas import tpu as pltpu


# --------------------------- model configuration ---------------------------

# VGG16 layer config, width-scaled /16 (original: 64,64,M,128,...,512,512,512,M)
CFG = [4, 4, 'M', 8, 8, 'M', 16, 16, 16, 'M', 32, 32, 32, 'M', 32, 32, 32, 'M']
IN_CHANNELS = 3
HIDDEN = 128          # analogous to VGG's 4096
SPATIAL = 32          # analogous to 224 (5 maxpools -> final spatial 1, cf. 7)
B_TILE = 8            # samples per grid step (tunable 8..32)


def build_meta():
    """Static per-conv-layer metadata: (cin, cout, h, w, pool_after)."""
    meta = []
    cin, h = IN_CHANNELS, SPATIAL
    for idx, v in enumerate(CFG):
        if v == 'M':
            continue
        pool = idx + 1 < len(CFG) and CFG[idx + 1] == 'M'
        meta.append((cin, v, h, h, pool))
        cin = v
        if pool:
            h //= 2
    return tuple(meta)


META = build_meta()
N_CONV = len(META)
N_POOL = sum(1 for m in META if m[4])
C_LAST = META[-1][1]
S_LAST = SPATIAL // (2 ** sum(1 for v in CFG if v == 'M'))
FLAT = C_LAST * S_LAST * S_LAST
LMAX = max(w * cin for (cin, _, _, w, _) in META)   # widest interleaved row (128)

# The channel-interleaved flatten equals PyTorch's NCHW flatten only because the
# final spatial size is 1 (like 7x7 -> here 1x1 after 5 pools on 32x32 input).
assert S_LAST == 1


# ------------------------------ fused kernel --------------------------------

def _vgg_fused_kernel(*refs, meta, b_tile, flat_dim):
    n_conv = len(meta)
    n_pool = sum(1 for m in meta if m[4])
    idx = 0
    x_ref = refs[idx]; idx += 1                       # (B, H0, W0*CIN0) f32
    conv_w = refs[idx:idx + n_conv]; idx += n_conv    # (3, w*cin, w*cout) bf16
    conv_b = refs[idx]; idx += 1                      # (13, 1, 128) f32 (tiled bias)
    pool_s = refs[idx:idx + n_pool]; idx += n_pool    # (2, w*cout, w*cout//2) bf16
    fc_w = refs[idx:idx + 2]; idx += 2                # (din, HIDDEN) bf16
    fc_b = refs[idx]; idx += 1                        # (2, 1, HIDDEN) f32
    feat_ref = refs[idx]; idx += 1                    # (B, C_LAST) f32
    y_ref = refs[idx]; idx += 1                       # (B, HIDDEN) f32
    pad_ref = refs[idx]                               # (B, H0+2, LMAX) f32 scratch

    act = x_ref[...]                                  # (B, h0, w0*cin0) f32
    pool_i = 0
    for i, (cin, cout, h, w, pool) in enumerate(meta):
        kdim = w * cin                                # interleaved row width
        ndim = w * cout
        # Row-haloed, channel-interleaved activation in the shared VMEM scratch.
        # Border-only init: just the two halo rows are zeroed; the column halo
        # is implemented by zero rows inside the block-Toeplitz weights.
        pad_ref[:, 0:1, 0:kdim] = jnp.zeros((b_tile, 1, kdim), jnp.float32)
        pad_ref[:, h + 1:h + 2, 0:kdim] = jnp.zeros((b_tile, 1, kdim), jnp.float32)
        pad_ref[:, 1:h + 1, 0:kdim] = act
        # 3x3 conv == 3 block-Toeplitz matmuls (one per kernel row dy), each
        # (B*h, w*cin) x (w*cin, w*cout): lane-dense M/K/N, no im2col concat.
        out = None
        for dy in range(3):
            a = pad_ref[:, dy:dy + h, 0:kdim].reshape(b_tile * h, kdim)
            d = jnp.dot(a.astype(jnp.bfloat16), conv_w[i][dy],
                        preferred_element_type=jnp.float32)
            out = d if out is None else out + d
        out = jnp.maximum(out + conv_b[i][:, 0:ndim], 0.0)   # bias + ReLU (dense)
        if pool:
            # Fused 2x2 maxpool: x-pairs via two 0/1 selection matmuls on the
            # idle MXU, y-pairs via a minor-preserving reshape + max.
            sel = pool_s[pool_i]; pool_i += 1
            ob = out.astype(jnp.bfloat16)
            xp = jnp.maximum(
                jnp.dot(ob, sel[0], preferred_element_type=jnp.float32),
                jnp.dot(ob, sel[1], preferred_element_type=jnp.float32))
            xp = xp.reshape(b_tile, h // 2, 2, (w // 2) * cout)
            act = jnp.max(xp, axis=2)                 # (B, h/2, (w/2)*cout)
        else:
            act = out.reshape(b_tile, h, ndim)

    # classifier[:-1]: (Linear -> ReLU -> Dropout) x 2, now with M = B_TILE.
    # (Interleaved flatten == PyTorch NCHW flatten since final spatial is 1.)
    y = act.reshape(b_tile, flat_dim)
    feat_ref[...] = y.astype(feat_ref.dtype)
    for j in range(2):
        y = jnp.dot(y.astype(jnp.bfloat16), fc_w[j][...],
                    preferred_element_type=jnp.float32) + fc_b[j]
        y = jnp.maximum(y, 0.0)
        # TODO(synk): nn.Dropout treated as identity (inference semantics); no RNG drop.
    y_ref[...] = y.astype(y_ref.dtype)


# ------------------------------- params / glue -------------------------------

def init_params(key):
    params = {'convs': [], 'fcs': []}
    for (cin, cout, _, _, _) in META:
        key, k1, k2 = jax.random.split(key, 3)
        w = jax.random.normal(k1, (3, 3, cin, cout), jnp.float32) * jnp.sqrt(
            2.0 / (9.0 * cin))
        b = 0.1 * jax.random.normal(k2, (cout,), jnp.float32)
        params['convs'].append((w, b))
    for din, dout in [(FLAT, HIDDEN), (HIDDEN, HIDDEN)]:
        key, k1, k2 = jax.random.split(key, 3)
        w = jax.random.normal(k1, (din, dout), jnp.float32) * jnp.sqrt(2.0 / din)
        b = 0.1 * jax.random.normal(k2, (dout,), jnp.float32)
        params['fcs'].append((w, b))
    return params


def pack_params(params):
    """Host-side (numpy) re-layout of weights for the kernel.

    conv layer i -> block-Toeplitz weights (3, w*cin, w*cout) bf16; its bias is
    tiled across the interleaved output row into row i of a single (13,1,128)
    f32 array.  Pool layers get a (2, w*cout, (w/2)*cout) 0/1 selection pair.
    """
    conv_ws, pool_sels = [], []
    conv_b_rows = np.zeros((N_CONV, 1, 128), np.float32)
    for i, ((w_hwio, b), (cin, cout, _, w, pool)) in enumerate(
            zip(params['convs'], META)):
        w_np = np.asarray(w_hwio, np.float32)          # (3, 3, cin, cout)
        b_np = np.asarray(b, np.float32)
        kdim, ndim = w * cin, w * cout
        wt = np.zeros((3, kdim, ndim), np.float32)
        for dy in range(3):
            for x in range(w):
                for kx in range(3):
                    xi = x + kx - 1                    # SAME conv, pad = 1
                    if 0 <= xi < w:
                        wt[dy, xi * cin:(xi + 1) * cin,
                           x * cout:(x + 1) * cout] = w_np[dy, kx]
        conv_ws.append(jnp.asarray(wt, jnp.bfloat16))
        conv_b_rows[i, 0, :ndim] = np.tile(b_np, w)
        if pool:
            sel = np.zeros((2, ndim, (w // 2) * cout), np.float32)
            for j in range(w // 2):
                for c in range(cout):
                    sel[0, (2 * j) * cout + c, j * cout + c] = 1.0
                    sel[1, (2 * j + 1) * cout + c, j * cout + c] = 1.0
            pool_sels.append(jnp.asarray(sel, jnp.bfloat16))
    fc_ws = [jnp.asarray(np.asarray(w, np.float32), jnp.bfloat16)
             for (w, _) in params['fcs']]
    fc_b_rows = np.zeros((2, 1, HIDDEN), np.float32)
    for j, (_, b) in enumerate(params['fcs']):
        fc_b_rows[j, 0, :] = np.asarray(b, np.float32)
    return {'conv_w': conv_ws, 'conv_b': jnp.asarray(conv_b_rows),
            'pool_sel': pool_sels, 'fc_w': fc_ws, 'fc_b': jnp.asarray(fc_b_rows)}


@jax.jit
def vgg16_modified_forward(packed, x_nchw):
    """Returns (features_nchw, y), mirroring the PyTorch module's forward."""
    n = x_nchw.shape[0]
    n_pad = ((n + B_TILE - 1) // B_TILE) * B_TILE
    # NCHW -> (N, H, W*C): channel-interleaved rows -> lane-dense, contiguous DMA.
    x = jnp.transpose(x_nchw, (0, 2, 3, 1)).reshape(
        n, SPATIAL, SPATIAL * IN_CHANNELS)
    if n_pad != n:
        x = jnp.pad(x, ((0, n_pad - n), (0, 0), (0, 0)))
    grid = (n_pad // B_TILE,)

    conv_w = packed['conv_w']
    conv_b = packed['conv_b']
    pool_sel = packed['pool_sel']
    fc_w = packed['fc_w']
    fc_b = packed['fc_b']
    weight_args = (*conv_w, conv_b, *pool_sel, *fc_w, fc_b)

    in_specs = [pl.BlockSpec((B_TILE, SPATIAL, SPATIAL * IN_CHANNELS),
                             lambda b: (b, 0, 0))]
    for arr in weight_args:                      # full-array blocks, constant maps
        in_specs.append(pl.BlockSpec(arr.shape,
                                     lambda b, nd=arr.ndim: (0,) * nd))

    out_shape = (
        jax.ShapeDtypeStruct((n_pad, C_LAST), jnp.float32),
        jax.ShapeDtypeStruct((n_pad, HIDDEN), jnp.float32),
    )
    out_specs = (
        pl.BlockSpec((B_TILE, C_LAST), lambda b: (b, 0)),
        pl.BlockSpec((B_TILE, HIDDEN), lambda b: (b, 0)),
    )
    # One shared row-halo scratch reused by every layer (region-0, ~160 KB).
    scratch_shapes = [pltpu.VMEM((B_TILE, SPATIAL + 2, LMAX), jnp.float32)]

    kernel = functools.partial(_vgg_fused_kernel, meta=META, b_tile=B_TILE,
                               flat_dim=FLAT)
    feats, y = pl.pallas_call(
        kernel,
        out_shape=out_shape,
        grid=grid,
        in_specs=in_specs,
        out_specs=out_specs,
        scratch_shapes=scratch_shapes,
        compiler_params=pltpu.CompilerParams(
            dimension_semantics=("parallel",),      # v7x: both TCs split the batch
            vmem_limit_bytes=32 * 1024 * 1024),
    )(x, *weight_args)

    feats = feats[:n]
    y = y[:n]
    features = jnp.transpose(feats.reshape(n, S_LAST, S_LAST, C_LAST),
                             (0, 3, 1, 2))           # back to NCHW like PyTorch
    return features, y


# --------------------------- pure-JAX reference -----------------------------

def _reference_forward(params, x_nchw):
    """Non-Pallas reference (same bf16 weight/bias quantization as the kernel)."""
    x = x_nchw
    ci = 0
    for v in CFG:
        if v == 'M':
            x = lax.reduce_window(x, -jnp.inf, lax.max,
                                  (1, 1, 2, 2), (1, 1, 2, 2), 'VALID')
        else:
            w_hwio, b = params['convs'][ci]
            ci += 1
            w_q = w_hwio.astype(jnp.bfloat16).astype(jnp.float32)
            b_q = b.astype(jnp.bfloat16).astype(jnp.float32)
            w_oihw = jnp.transpose(w_q, (3, 2, 0, 1))
            x = lax.conv_general_dilated(
                x, w_oihw, (1, 1), 'SAME',
                dimension_numbers=('NCHW', 'OIHW', 'NCHW'))
            x = jnp.maximum(x + b_q.reshape(1, -1, 1, 1), 0.0)
    features = x
    y = features.reshape(features.shape[0], -1)
    for w, b in params['fcs']:
        w_q = w.astype(jnp.bfloat16).astype(jnp.float32)
        b_q = b.astype(jnp.bfloat16).astype(jnp.float32)
        y = jnp.maximum(y @ w_q + b_q.reshape(1, -1), 0.0)
    return features, y


if __name__ == "__main__":
    key = jax.random.PRNGKey(0)
    key, xk = jax.random.split(key)
    n = 16                                     # 2 grid steps of B_TILE=8
    x = jax.random.normal(xk, (n, IN_CHANNELS, SPATIAL, SPATIAL), jnp.float32)
    params = init_params(key)
    packed = pack_params(params)

    features, y = vgg16_modified_forward(packed, x)
    jax.block_until_ready((features, y))

    assert features.shape == (n, C_LAST, S_LAST, S_LAST), features.shape
    assert y.shape == (n, HIDDEN), y.shape

    # Numerical sanity check (loose tolerance: kernel rounds activations to bf16
    # at each matmul input, the reference keeps activations in f32).
    f_ref, y_ref = _reference_forward(params, x)

    def rel(a, b):
        return float(jnp.max(jnp.abs(a - b)) / (jnp.max(jnp.abs(b)) + 1e-6))

    assert rel(features, f_ref) < 0.1, rel(features, f_ref)
    assert rel(y, y_ref) < 0.1, rel(y, y_ref)

    print("KERNEL_OK")
</pallas_src>

<mosaic_0001>
module attributes {stable_mosaic.version = 11 : i64} {
  func.func @_vgg_fused_kernel(%arg0: i32, %arg1: memref<8x32x96xf32, #tpu.memory_space<vmem>>, %arg2: memref<3x96x128xbf16, #tpu.memory_space<vmem>>, %arg3: memref<3x128x128xbf16, #tpu.memory_space<vmem>>, %arg4: memref<3x64x128xbf16, #tpu.memory_space<vmem>>, %arg5: memref<3x128x128xbf16, #tpu.memory_space<vmem>>, %arg6: memref<3x64x128xbf16, #tpu.memory_space<vmem>>, %arg7: memref<3x128x128xbf16, #tpu.memory_space<vmem>>, %arg8: memref<3x128x128xbf16, #tpu.memory_space<vmem>>, %arg9: memref<3x64x128xbf16, #tpu.memory_space<vmem>>, %arg10: memref<3x128x128xbf16, #tpu.memory_space<vmem>>, %arg11: memref<3x128x128xbf16, #tpu.memory_space<vmem>>, %arg12: memref<3x64x64xbf16, #tpu.memory_space<vmem>>, %arg13: memref<3x64x64xbf16, #tpu.memory_space<vmem>>, %arg14: memref<3x64x64xbf16, #tpu.memory_space<vmem>>, %arg15: memref<13x1x128xf32, #tpu.memory_space<vmem>>, %arg16: memref<2x128x64xbf16, #tpu.memory_space<vmem>>, %arg17: memref<2x128x64xbf16, #tpu.memory_space<vmem>>, %arg18: memref<2x128x64xbf16, #tpu.memory_space<vmem>>, %arg19: memref<2x128x64xbf16, #tpu.memory_space<vmem>>, %arg20: memref<2x64x32xbf16, #tpu.memory_space<vmem>>, %arg21: memref<32x128xbf16, #tpu.memory_space<vmem>>, %arg22: memref<128x128xbf16, #tpu.memory_space<vmem>>, %arg23: memref<2x1x128xf32, #tpu.memory_space<vmem>>, %arg24: memref<8x32xf32, #tpu.memory_space<vmem>>, %arg25: memref<8x128xf32, #tpu.memory_space<vmem>>, %arg26: memref<8x34x128xf32, #tpu.memory_space<vmem>>) attributes {dimension_semantics = [#tpu.dimension_semantics<parallel>], iteration_bounds = array<i64: 2>, scalar_prefetch = 0 : i64, scratch_operands = 1 : i64, tpu.core_type = #tpu.core_type<tc>, window_params = [{transform_indices = @transform_0, window_bounds = array<i64: 8, 32, 96>}, {pipeline_mode = #tpu.pipeline_mode<synchronous>, transform_indices = @transform_1, window_bounds = array<i64: 3, 96, 128>}, {pipeline_mode = #tpu.pipeline_mode<synchronous>, transform_indices = @transform_2, window_bounds = array<i64: 3, 128, 128>}, {pipeline_mode = #tpu.pipeline_mode<synchronous>, transform_indices = @transform_3, window_bounds = array<i64: 3, 64, 128>}, {pipeline_mode = #tpu.pipeline_mode<synchronous>, transform_indices = @transform_4, window_bounds = array<i64: 3, 128, 128>}, {pipeline_mode = #tpu.pipeline_mode<synchronous>, transform_indices = @transform_5, window_bounds = array<i64: 3, 64, 128>}, {pipeline_mode = #tpu.pipeline_mode<synchronous>, transform_indices = @transform_6, window_bounds = array<i64: 3, 128, 128>}, {pipeline_mode = #tpu.pipeline_mode<synchronous>, transform_indices = @transform_7, window_bounds = array<i64: 3, 128, 128>}, {pipeline_mode = #tpu.pipeline_mode<synchronous>, transform_indices = @transform_8, window_bounds = array<i64: 3, 64, 128>}, {pipeline_mode = #tpu.pipeline_mode<synchronous>, transform_indices = @transform_9, window_bounds = array<i64: 3, 128, 128>}, {pipeline_mode = #tpu.pipeline_mode<synchronous>, transform_indices = @transform_10, window_bounds = array<i64: 3, 128, 128>}, {pipeline_mode = #tpu.pipeline_mode<synchronous>, transform_indices = @transform_11, window_bounds = array<i64: 3, 64, 64>}, {pipeline_mode = #tpu.pipeline_mode<synchronous>, transform_indices = @transform_12, window_bounds = array<i64: 3, 64, 64>}, {pipeline_mode = #tpu.pipeline_mode<synchronous>, transform_indices = @transform_13, window_bounds = array<i64: 3, 64, 64>}, {pipeline_mode = #tpu.pipeline_mode<synchronous>, transform_indices = @transform_14, window_bounds = array<i64: 13, 1, 128>}, {pipeline_mode = #tpu.pipeline_mode<synchronous>, transform_indices = @transform_15, window_bounds = array<i64: 2, 128, 64>}, {pipeline_mode = #tpu.pipeline_mode<synchronous>, transform_indices = @transform_16, window_bounds = array<i64: 2, 128, 64>}, {pipeline_mode = #tpu.pipeline_mode<synchronous>, transform_indices = @transform_17, window_bounds = array<i64: 2, 128, 64>}, {pipeline_mode = #tpu.pipeline_mode<synchronous>, transform_indices = @transform_18, window_bounds = array<i64: 2, 128, 64>}, {pipeline_mode = #tpu.pipeline_mode<synchronous>, transform_indices = @transform_19, window_bounds = array<i64: 2, 64, 32>}, {pipeline_mode = #tpu.pipeline_mode<synchronous>, transform_indices = @transform_20, window_bounds = array<i64: 32, 128>}, {pipeline_mode = #tpu.pipeline_mode<synchronous>, transform_indices = @transform_21, window_bounds = array<i64: 128, 128>}, {pipeline_mode = #tpu.pipeline_mode<synchronous>, transform_indices = @transform_22, window_bounds = array<i64: 2, 1, 128>}, {transform_indices = @transform_23, window_bounds = array<i64: 8, 32>}, {transform_indices = @transform_24, window_bounds = array<i64: 8, 128>}]} {
    %c0 = arith.constant 0 : index
    %c0_0 = arith.constant 0 : index
    %c0_1 = arith.constant 0 : index
    %0 = vector.load %arg1[%c0, %c0_0, %c0_1] : memref<8x32x96xf32, #tpu.memory_space<vmem>>, vector<8x32x96xf32>
    %cst = arith.constant 0.000000e+00 : f32
    %1 = vector.broadcast %cst : f32 to vector<8x1x96xf32>
    %c0_2 = arith.constant 0 : index
    %c0_3 = arith.constant 0 : index
    %c0_4 = arith.constant 0 : index
    %2 = vector.load %arg26[%c0_2, %c0_3, %c0_4] : memref<8x34x128xf32, #tpu.memory_space<vmem>>, vector<8x1x96xf32>
    tpu.vector_store %arg26[%c0_2, %c0_3, %c0_4], %1 {strides = array<i32>} : memref<8x34x128xf32, #tpu.memory_space<vmem>>, vector<8x1x96xf32>,
    %cst_5 = arith.constant 0.000000e+00 : f32
    %3 = vector.broadcast %cst_5 : f32 to vector<8x1x96xf32>
    %c0_6 = arith.constant 0 : index
    %c33 = arith.constant 33 : index
    %c0_7 = arith.constant 0 : index
    %4 = vector.load %arg26[%c0_6, %c33, %c0_7] : memref<8x34x128xf32, #tpu.memory_space<vmem>>, vector<8x1x96xf32>
    tpu.vector_store %arg26[%c0_6, %c33, %c0_7], %3 {strides = array<i32>} : memref<8x34x128xf32, #tpu.memory_space<vmem>>, vector<8x1x96xf32>,
    %c0_8 = arith.constant 0 : index
    %c1 = arith.constant 1 : index
    %c0_9 = arith.constant 0 : index
    %5 = vector.load %arg26[%c0_8, %c1, %c0_9] : memref<8x34x128xf32, #tpu.memory_space<vmem>>, vector<8x32x96xf32>
    tpu.vector_store %arg26[%c0_8, %c1, %c0_9], %0 {strides = array<i32>} : memref<8x34x128xf32, #tpu.memory_space<vmem>>, vector<8x32x96xf32>,
    %c0_10 = arith.constant 0 : index
    %c0_11 = arith.constant 0 : index
    %c0_12 = arith.constant 0 : index
    %6 = vector.load %arg26[%c0_10, %c0_11, %c0_12] : memref<8x34x128xf32, #tpu.memory_space<vmem>>, vector<8x32x96xf32>
    %7 = vector.shape_cast %6 : vector<8x32x96xf32> to vector<256x96xf32>
    %8 = arith.truncf %7 : vector<256x96xf32> to vector<256x96xbf16>
    %c0_13 = arith.constant 0 : index
    %c0_14 = arith.constant 0 : index
    %c0_15 = arith.constant 0 : index
    %9 = vector.load %arg2[%c0_13, %c0_14, %c0_15] : memref<3x96x128xbf16, #tpu.memory_space<vmem>>, vector<1x96x128xbf16>
    %10 = vector.shape_cast %9 : vector<1x96x128xbf16> to vector<96x128xbf16>
    %cst_16 = arith.constant dense<0.000000e+00> : vector<256x128xf32>
    %11 = tpu.matmul %8, %10, %cst_16 {dimension_numbers = #tpu.dot_dimension_numbers<[1], [0], [0], [1], [0, 0, 1, 1], [], []>} : vector<256x96xbf16>, vector<96x128xbf16>, vector<256x128xf32> -> vector<256x128xf32>
    %c0_17 = arith.constant 0 : index
    %c1_18 = arith.constant 1 : index
    %c0_19 = arith.constant 0 : index
    %12 = vector.load %arg26[%c0_17, %c1_18, %c0_19] : memref<8x34x128xf32, #tpu.memory_space<vmem>>, vector<8x32x96xf32>
    %13 = vector.shape_cast %12 : vector<8x32x96xf32> to vector<256x96xf32>
    %14 = arith.truncf %13 : vector<256x96xf32> to vector<256x96xbf16>
    %c1_20 = arith.constant 1 : index
    %c0_21 = arith.constant 0 : index
    %c0_22 = arith.constant 0 : index
    %15 = vector.load %arg2[%c1_20, %c0_21, %c0_22] : memref<3x96x128xbf16, #tpu.memory_space<vmem>>, vector<1x96x128xbf16>
    %16 = vector.shape_cast %15 : vector<1x96x128xbf16> to vector<96x128xbf16>
    %cst_23 = arith.constant dense<0.000000e+00> : vector<256x128xf32>
    %17 = tpu.matmul %14, %16, %cst_23 {dimension_numbers = #tpu.dot_dimension_numbers<[1], [0], [0], [1], [0, 0, 1, 1], [], []>} : vector<256x96xbf16>, vector<96x128xbf16>, vector<256x128xf32> -> vector<256x128xf32>
    %18 = arith.addf %11, %17 : vector<256x128xf32>
    %c0_24 = arith.constant 0 : index
    %c2 = arith.constant 2 : index
    %c0_25 = arith.constant 0 : index
    %19 = vector.load %arg26[%c0_24, %c2, %c0_25] : memref<8x34x128xf32, #tpu.memory_space<vmem>>, vector<8x32x96xf32>
    %20 = vector.shape_cast %19 : vector<8x32x96xf32> to vector<256x96xf32>
    %21 = arith.truncf %20 : vector<256x96xf32> to vector<256x96xbf16>
    %c2_26 = arith.constant 2 : index
    %c0_27 = arith.constant 0 : index
    %c0_28 = arith.constant 0 : index
    %22 = vector.load %arg2[%c2_26, %c0_27, %c0_28] : memref<3x96x128xbf16, #tpu.memory_space<vmem>>, vector<1x96x128xbf16>
    %23 = vector.shape_cast %22 : vector<1x96x128xbf16> to vector<96x128xbf16>
    %cst_29 = arith.constant dense<0.000000e+00> : vector<256x128xf32>
    %24 = tpu.matmul %21, %23, %cst_29 {dimension_numbers = #tpu.dot_dimension_numbers<[1], [0], [0], [1], [0, 0, 1, 1], [], []>} : vector<256x96xbf16>, vector<96x128xbf16>, vector<256x128xf32> -> vector<256x128xf32>
    %25 = arith.addf %18, %24 : vector<256x128xf32>
    %c0_30 = arith.constant 0 : index
    %c0_31 = arith.constant 0 : index
    %c0_32 = arith.constant 0 : index
    %26 = vector.load %arg15[%c0_30, %c0_31, %c0_32] : memref<13x1x128xf32, #tpu.memory_space<vmem>>, vector<1x1x128xf32>
    %27 = vector.shape_cast %26 : vector<1x1x128xf32> to vector<1x128xf32>
    %28 = vector.broadcast %27 : vector<1x128xf32> to vector<256x128xf32>
    %29 = arith.addf %25, %28 : vector<256x128xf32>
    %cst_33 = arith.constant 0.000000e+00 : f32
    %30 = vector.broadcast %cst_33 : f32 to vector<256x128xf32>
    %31 = arith.maximumf %29, %30 : vector<256x128xf32>
    %32 = vector.shape_cast %31 : vector<256x128xf32> to vector<8x32x128xf32>
    %cst_34 = arith.constant 0.000000e+00 : f32
    %33 = vector.broadcast %cst_34 : f32 to vector<8x1x128xf32>
    %c0_35 = arith.constant 0 : index
    %c0_36 = arith.constant 0 : index
    %c0_37 = arith.constant 0 : index
    %34 = vector.load %arg26[%c0_35, %c0_36, %c0_37] : memref<8x34x128xf32, #tpu.memory_space<vmem>>, vector<8x1x128xf32>
    tpu.vector_store %arg26[%c0_35, %c0_36, %c0_37], %33 {strides = array<i32>} : memref<8x34x128xf32, #tpu.memory_space<vmem>>, vector<8x1x128xf32>,
    %cst_38 = arith.constant 0.000000e+00 : f32
    %35 = vector.broadcast %cst_38 : f32 to vector<8x1x128xf32>
    %c0_39 = arith.constant 0 : index
    %c33_40 = arith.constant 33 : index
    %c0_41 = arith.constant 0 : index
    %36 = vector.load %arg26[%c0_39, %c33_40, %c0_41] : memref<8x34x128xf32, #tpu.memory_space<vmem>>, vector<8x1x128xf32>
    tpu.vector_store %arg26[%c0_39, %c33_40, %c0_41], %35 {strides = array<i32>} : memref<8x34x128xf32, #tpu.memory_space<vmem>>, vector<8x1x128xf32>,
    %c0_42 = arith.constant 0 : index
    %c1_43 = arith.constant 1 : index
    %c0_44 = arith.constant 0 : index
    %37 = vector.load %arg26[%c0_42, %c1_43, %c0_44] : memref<8x34x128xf32, #tpu.memory_space<vmem>>, vector<8x32x128xf32>
    tpu.vector_store %arg26[%c0_42, %c1_43, %c0_44], %32 {strides = array<i32>} : memref<8x34x128xf32, #tpu.memory_space<vmem>>, vector<8x32x128xf32>,
    %c0_45 = arith.constant 0 : index
    %c0_46 = arith.constant 0 : index
    %c0_47 = arith.constant 0 : index
    %38 = vector.load %arg26[%c0_45, %c0_46, %c0_47] : memref<8x34x128xf32, #tpu.memory_space<vmem>>, vector<8x32x128xf32>
    %39 = vector.shape_cast %38 : vector<8x32x128xf32> to vector<256x128xf32>
    %40 = arith.truncf %39 : vector<256x128xf32> to vector<256x128xbf16>
    %c0_48 = arith.constant 0 : index
    %c0_49 = arith.constant 0 : index
    %c0_50 = arith.constant 0 : index
    %41 = vector.load %arg3[%c0_48, %c0_49, %c0_50] : memref<3x128x128xbf16, #tpu.memory_space<vmem>>, vector<1x128x128xbf16>
    %42 = vector.shape_cast %41 : vector<1x128x128xbf16> to vector<128x128xbf16>
    %cst_51 = arith.constant dense<0.000000e+00> : vector<256x128xf32>
    %43 = tpu.matmul %40, %42, %cst_51 {dimension_numbers = #tpu.dot_dimension_numbers<[1], [0], [0], [1], [0, 0, 1, 1], [], []>} : vector<256x128xbf16>, vector<128x128xbf16>, vector<256x128xf32> -> vector<256x128xf32>
    %c0_52 = arith.constant 0 : index
    %c1_53 = arith.constant 1 : index
    %c0_54 = arith.constant 0 : index
    %44 = vector.load %arg26[%c0_52, %c1_53, %c0_54] : memref<8x34x128xf32, #tpu.memory_space<vmem>>, vector<8x32x128xf32>
    %45 = vector.shape_cast %44 : vector<8x32x128xf32> to vector<256x128xf32>
    %46 = arith.truncf %45 : vector<256x128xf32> to vector<256x128xbf16>
    %c1_55 = arith.constant 1 : index
    %c0_56 = arith.constant 0 : index
    %c0_57 = arith.constant 0 : index
    %47 = vector.load %arg3[%c1_55, %c0_56, %c0_57] : memref<3x128x128xbf16, #tpu.memory_space<vmem>>, vector<1x128x128xbf16>
    %48 = vector.shape_cast %47 : vector<1x128x128xbf16> to vector<128x128xbf16>
    %cst_58 = arith.constant dense<0.000000e+00> : vector<256x128xf32>
    %49 = tpu.matmul %46, %48, %cst_58 {dimension_numbers = #tpu.dot_dimension_numbers<[1], [0], [0], [1], [0, 0, 1, 1], [], []>} : vector<256x128xbf16>, vector<128x128xbf16>, vector<256x128xf32> -> vector<256x128xf32>
    %50 = arith.addf %43, %49 : vector<256x128xf32>
    %c0_59 = arith.constant 0 : index
    %c2_60 = arith.constant 2 : index
    %c0_61 = arith.constant 0 : index
    %51 = vector.load %arg26[%c0_59, %c2_60, %c0_61] : memref<8x34x128xf32, #tpu.memory_space<vmem>>, vector<8x32x128xf32>
    %52 = vector.shape_cast %51 : vector<8x32x128xf32> to vector<256x128xf32>
    %53 = arith.truncf %52 : vector<256x128xf32> to vector<256x128xbf16>
    %c2_62 = arith.constant 2 : index
    %c0_63 = arith.constant 0 : index
    %c0_64 = arith.constant 0 : index
    %54 = vector.load %arg3[%c2_62, %c0_63, %c0_64] : memref<3x128x128xbf16, #tpu.memory_space<vmem>>, vector<1x128x128xbf16>
    %55 = vector.shape_cast %54 : vector<1x128x128xbf16> to vector<128x128xbf16>
    %cst_65 = arith.constant dense<0.000000e+00> : vector<256x128xf32>
    %56 = tpu.matmul %53, %55, %cst_65 {dimension_numbers = #tpu.dot_dimension_numbers<[1], [0], [0], [1], [0, 0, 1, 1], [], []>} : vector<256x128xbf16>, vector<128x128xbf16>, vector<256x128xf32> -> vector<256x128xf32>
    %57 = arith.addf %50, %56 : vector<256x128xf32>
    %c1_66 = arith.constant 1 : index
    %c0_67 = arith.constant 0 : index
    %c0_68 = arith.constant 0 : index
    %58 = vector.load %arg15[%c1_66, %c0_67, %c0_68] : memref<13x1x128xf32, #tpu.memory_space<vmem>>, vector<1x1x128xf32>
    %59 = vector.shape_cast %58 : vector<1x1x128xf32> to vector<1x128xf32>
    %60 = vector.broadcast %59 : vector<1x128xf32> to vector<256x128xf32>
    %61 = arith.addf %57, %60 : vector<256x128xf32>
    %cst_69 = arith.constant 0.000000e+00 : f32
    %62 = vector.broadcast %cst_69 : f32 to vector<256x128xf32>
    %63 = arith.maximumf %61, %62 : vector<256x128xf32>
    %64 = arith.truncf %63 : vector<256x128xf32> to vector<256x128xbf16>
    %c0_70 = arith.constant 0 : index
    %c0_71 = arith.constant 0 : index
    %c0_72 = arith.constant 0 : index
    %65 = vector.load %arg16[%c0_70, %c0_71, %c0_72] : memref<2x128x64xbf16, #tpu.memory_space<vmem>>, vector<1x128x64xbf16>
    %66 = vector.shape_cast %65 : vector<1x128x64xbf16> to vector<128x64xbf16>
    %cst_73 = arith.constant dense<0.000000e+00> : vector<256x64xf32>
    %67 = tpu.matmul %64, %66, %cst_73 {dimension_numbers = #tpu.dot_dimension_numbers<[1], [0], [0], [1], [0, 0, 1, 1], [], []>} : vector<256x128xbf16>, vector<128x64xbf16>, vector<256x64xf32> -> vector<256x64xf32>
    %c1_74 = arith.constant 1 : index
    %c0_75 = arith.constant 0 : index
    %c0_76 = arith.constant 0 : index
    %68 = vector.load %arg16[%c1_74, %c0_75, %c0_76] : memref<2x128x64xbf16, #tpu.memory_space<vmem>>, vector<1x128x64xbf16>
    %69 = vector.shape_cast %68 : vector<1x128x64xbf16> to vector<128x64xbf16>
    %cst_77 = arith.constant dense<0.000000e+00> : vector<256x64xf32>
    %70 = tpu.matmul %64, %69, %cst_77 {dimension_numbers = #tpu.dot_dimension_numbers<[1], [0], [0], [1], [0, 0, 1, 1], [], []>} : vector<256x128xbf16>, vector<128x64xbf16>, vector<256x64xf32> -> vector<256x64xf32>
    %71 = arith.maximumf %67, %70 : vector<256x64xf32>
    %72 = vector.shape_cast %71 : vector<256x64xf32> to vector<8x16x2x64xf32>
    %cst_78 = arith.constant dense<0xFF800000> : vector<8x16x64xf32>
    %73 = vector.multi_reduction <maximumf>, %72, %cst_78 [2] : vector<8x16x2x64xf32> to vector<8x16x64xf32>
    %cst_79 = arith.constant 0.000000e+00 : f32
    %74 = vector.broadcast %cst_79 : f32 to vector<8x1x64xf32>
    %c0_80 = arith.constant 0 : index
    %c0_81 = arith.constant 0 : index
    %c0_82 = arith.constant 0 : index
    %75 = vector.load %arg26[%c0_80, %c0_81, %c0_82] : memref<8x34x128xf32, #tpu.memory_space<vmem>>, vector<8x1x64xf32>
    tpu.vector_store %arg26[%c0_80, %c0_81, %c0_82], %74 {strides = array<i32>} : memref<8x34x128xf32, #tpu.memory_space<vmem>>, vector<8x1x64xf32>,
    %cst_83 = arith.constant 0.000000e+00 : f32
    %76 = vector.broadcast %cst_83 : f32 to vector<8x1x64xf32>
    %c0_84 = arith.constant 0 : index
    %c17 = arith.constant 17 : index
    %c0_85 = arith.constant 0 : index
    %77 = vector.load %arg26[%c0_84, %c17, %c0_85] : memref<8x34x128xf32, #tpu.memory_space<vmem>>, vector<8x1x64xf32>
    tpu.vector_store %arg26[%c0_84, %c17, %c0_85], %76 {strides = array<i32>} : memref<8x34x128xf32, #tpu.memory_space<vmem>>, vector<8x1x64xf32>,
    %c0_86 = arith.constant 0 : index
    %c1_87 = arith.constant 1 : index
    %c0_88 = arith.constant 0 : index
    %78 = vector.load %arg26[%c0_86, %c1_87, %c0_88] : memref<8x34x128xf32, #tpu.memory_space<vmem>>, vector<8x16x64xf32>
    tpu.vector_store %arg26[%c0_86, %c1_87, %c0_88], %73 {strides = array<i32>} : memref<8x34x128xf32, #tpu.memory_space<vmem>>, vector<8x16x64xf32>,
    %c0_89 = arith.constant 0 : index
    %c0_90 = arith.constant 0 : index
    %c0_91 = arith.constant 0 : index
    %79 = vector.load %arg26[%c0_89, %c0_90, %c0_91] : memref<8x34x128xf32, #tpu.memory_space<vmem>>, vector<8x16x64xf32>
    %80 = vector.shape_cast %79 : vector<8x16x64xf32> to vector<128x64xf32>
    %81 = arith.truncf %80 : vector<128x64xf32> to vector<128x64xbf16>
    %c0_92 = arith.constant 0 : index
    %c0_93 = arith.constant 0 : index
    %c0_94 = arith.constant 0 : index
    %82 = vector.load %arg4[%c0_92, %c0_93, %c0_94] : memref<3x64x128xbf16, #tpu.memory_space<vmem>>, vector<1x64x128xbf16>
    %83 = vector.shape_cast %82 : vector<1x64x128xbf16> to vector<64x128xbf16>
    %cst_95 = arith.constant dense<0.000000e+00> : vector<128x128xf32>
    %84 = tpu.matmul %81, %83, %cst_95 {dimension_numbers = #tpu.dot_dimension_numbers<[1], [0], [0], [1], [0, 0, 1, 1], [], []>} : vector<128x64xbf16>, vector<64x128xbf16>, vector<128x128xf32> -> vector<128x128xf32>
    %c0_96 = arith.constant 0 : index
    %c1_97 = arith.constant 1 : index
    %c0_98 = arith.constant 0 : index
    %85 = vector.load %arg26[%c0_96, %c1_97, %c0_98] : memref<8x34x128xf32, #tpu.memory_space<vmem>>, vector<8x16x64xf32>
    %86 = vector.shape_cast %85 : vector<8x16x64xf32> to vector<128x64xf32>
    %87 = arith.truncf %86 : vector<128x64xf32> to vector<128x64xbf16>
    %c1_99 = arith.constant 1 : index
    %c0_100 = arith.constant 0 : index
    %c0_101 = arith.constant 0 : index
    %88 = vector.load %arg4[%c1_99, %c0_100, %c0_101] : memref<3x64x128xbf16, #tpu.memory_space<vmem>>, vector<1x64x128xbf16>
    %89 = vector.shape_cast %88 : vector<1x64x128xbf16> to vector<64x128xbf16>
    %cst_102 = arith.constant dense<0.000000e+00> : vector<128x128xf32>
    %90 = tpu.matmul %87, %89, %cst_102 {dimension_numbers = #tpu.dot_dimension_numbers<[1], [0], [0], [1], [0, 0, 1, 1], [], []>} : vector<128x64xbf16>, vector<64x128xbf16>, vector<128x128xf32> -> vector<128x128xf32>
    %91 = arith.addf %84, %90 : vector<128x128xf32>
    %c0_103 = arith.constant 0 : index
    %c2_104 = arith.constant 2 : index
    %c0_105 = arith.constant 0 : index
    %92 = vector.load %arg26[%c0_103, %c2_104, %c0_105] : memref<8x34x128xf32, #tpu.memory_space<vmem>>, vector<8x16x64xf32>
    %93 = vector.shape_cast %92 : vector<8x16x64xf32> to vector<128x64xf32>
    %94 = arith.truncf %93 : vector<128x64xf32> to vector<128x64xbf16>
    %c2_106 = arith.constant 2 : index
    %c0_107 = arith.constant 0 : index
    %c0_108 = arith.constant 0 : index
    %95 = vector.load %arg4[%c2_106, %c0_107, %c0_108] : memref<3x64x128xbf16, #tpu.memory_space<vmem>>, vector<1x64x128xbf16>
    %96 = vector.shape_cast %95 : vector<1x64x128xbf16> to vector<64x128xbf16>
    %cst_109 = arith.constant dense<0.000000e+00> : vector<128x128xf32>
    %97 = tpu.matmul %94, %96, %cst_109 {dimension_numbers = #tpu.dot_dimension_numbers<[1], [0], [0], [1], [0, 0, 1, 1], [], []>} : vector<128x64xbf16>, vector<64x128xbf16>, vector<128x128xf32> -> vector<128x128xf32>
    %98 = arith.addf %91, %97 : vector<128x128xf32>
    %c2_110 = arith.constant 2 : index
    %c0_111 = arith.constant 0 : index
    %c0_112 = arith.constant 0 : index
    %99 = vector.load %arg15[%c2_110, %c0_111, %c0_112] : memref<13x1x128xf32, #tpu.memory_space<vmem>>, vector<1x1x128xf32>
    %100 = vector.shape_cast %99 : vector<1x1x128xf32> to vector<1x128xf32>
    %101 = vector.broadcast %100 : vector<1x128xf32> to vector<128x128xf32>
    %102 = arith.addf %98, %101 : vector<128x128xf32>
    %cst_113 = arith.constant 0.000000e+00 : f32
    %103 = vector.broadcast %cst_113 : f32 to vector<128x128xf32>
    %104 = arith.maximumf %102, %103 : vector<128x128xf32>
    %105 = vector.shape_cast %104 : vector<128x128xf32> to vector<8x16x128xf32>
    %cst_114 = arith.constant 0.000000e+00 : f32
    %106 = vector.broadcast %cst_114 : f32 to vector<8x1x128xf32>
    %c0_115 = arith.constant 0 : index
    %c0_116 = arith.constant 0 : index
    %c0_117 = arith.constant 0 : index
    %107 = vector.load %arg26[%c0_115, %c0_116, %c0_117] : memref<8x34x128xf32, #tpu.memory_space<vmem>>, vector<8x1x128xf32>
    tpu.vector_store %arg26[%c0_115, %c0_116, %c0_117], %106 {strides = array<i32>} : memref<8x34x128xf32, #tpu.memory_space<vmem>>, vector<8x1x128xf32>,
    %cst_118 = arith.constant 0.000000e+00 : f32
    %108 = vector.broadcast %cst_118 : f32 to vector<8x1x128xf32>
    %c0_119 = arith.constant 0 : index
    %c17_120 = arith.constant 17 : index
    %c0_121 = arith.constant 0 : index
    %109 = vector.load %arg26[%c0_119, %c17_120, %c0_121] : memref<8x34x128xf32, #tpu.memory_space<vmem>>, vector<8x1x128xf32>
    tpu.vector_store %arg26[%c0_119, %c17_120, %c0_121], %108 {strides = array<i32>} : memref<8x34x128xf32, #tpu.memory_space<vmem>>, vector<8x1x128xf32>,
    %c0_122 = arith.constant 0 : index
    %c1_123 = arith.constant 1 : index
    %c0_124 = arith.constant 0 : index
    %110 = vector.load %arg26[%c0_122, %c1_123, %c0_124] : memref<8x34x128xf32, #tpu.memory_space<vmem>>, vector<8x16x128xf32>
    tpu.vector_store %arg26[%c0_122, %c1_123, %c0_124], %105 {strides = array<i32>} : memref<8x34x128xf32, #tpu.memory_space<vmem>>, vector<8x16x128xf32>,
    %c0_125 = arith.constant 0 : index
    %c0_126 = arith.constant 0 : index
    %c0_127 = arith.constant 0 : index
    %111 = vector.load %arg26[%c0_125, %c0_126, %c0_127] : memref<8x34x128xf32, #tpu.memory_space<vmem>>, vector<8x16x128xf32>
    %112 = vector.shape_cast %111 : vector<8x16x128xf32> to vector<128x128xf32>
    %113 = arith.truncf %112 : vector<128x128xf32> to vector<128x128xbf16>
    %c0_128 = arith.constant 0 : index
    %c0_129 = arith.constant 0 : index
    %c0_130 = arith.constant 0 : index
    %114 = vector.load %arg5[%c0_128, %c0_129, %c0_130] : memref<3x128x128xbf16, #tpu.memory_space<vmem>>, vector<1x128x128xbf16>
    %115 = vector.shape_cast %114 : vector<1x128x128xbf16> to vector<128x128xbf16>
    %cst_131 = arith.constant dense<0.000000e+00> : vector<128x128xf32>
    %116 = tpu.matmul %113, %115, %cst_131 {dimension_numbers = #tpu.dot_dimension_numbers<[1], [0], [0], [1], [0, 0, 1, 1], [], []>} : vector<128x128xbf16>, vector<128x128xbf16>, vector<128x128xf32> -> vector<128x128xf32>
    %c0_132 = arith.constant 0 : index
    %c1_133 = arith.constant 1 : index
    %c0_134 = arith.constant 0 : index
    %117 = vector.load %arg26[%c0_132, %c1_133, %c0_134] : memref<8x34x128xf32, #tpu.memory_space<vmem>>, vector<8x16x128xf32>
    %118 = vector.shape_cast %117 : vector<8x16x128xf32> to vector<128x128xf32>
    %119 = arith.truncf %118 : vector<128x128xf32> to vector<128x128xbf16>
    %c1_135 = arith.constant 1 : index
    %c0_136 = arith.constant 0 : index
    %c0_137 = arith.constant 0 : index
    %120 = vector.load %arg5[%c1_135, %c0_136, %c0_137] : memref<3x128x128xbf16, #tpu.memory_space<vmem>>, vector<1x128x128xbf16>
    %121 = vector.shape_cast %120 : vector<1x128x128xbf16> to vector<128x128xbf16>
    %cst_138 = arith.constant dense<0.000000e+00> : vector<128x128xf32>
    %122 = tpu.matmul %119, %121, %cst_138 {dimension_numbers = #tpu.dot_dimension_numbers<[1], [0], [0], [1], [0, 0, 1, 1], [], []>} : vector<128x128xbf16>, vector<128x128xbf16>, vector<128x128xf32> -> vector<128x128xf32>
    %123 = arith.addf %116, %122 : vector<128x128xf32>
    %c0_139 = arith.constant 0 : index
    %c2_140 = arith.constant 2 : index
    %c0_141 = arith.constant 0 : index
    %124 = vector.load %arg26[%c0_139, %c2_140, %c0_141] : memref<8x34x128xf32, #tpu.memory_space<vmem>>, vector<8x16x128xf32>
    %125 = vector.shape_cast %124 : vector<8x16x128xf32> to vector<128x128xf32>
    %126 = arith.truncf %125 : vector<128x128xf32> to vector<128x128xbf16>
    %c2_142 = arith.constant 2 : index
    %c0_143 = arith.constant 0 : index
    %c0_144 = arith.constant 0 : index
    %127 = vector.load %arg5[%c2_142, %c0_143, %c0_144] : memref<3x128x128xbf16, #tpu.memory_space<vmem>>, vector<1x128x128xbf16>
    %128 = vector.shape_cast %127 : vector<1x128x128xbf16> to vector<128x128xbf16>
    %cst_145 = arith.constant dense<0.000000e+00> : vector<128x128xf32>
    %129 = tpu.matmul %126, %128, %cst_145 {dimension_numbers = #tpu.dot_dimension_numbers<[1], [0], [0], [1], [0, 0, 1, 1], [], []>} : vector<128x128xbf16>, vector<128x128xbf16>, vector<128x128xf32> -> vector<128x128xf32>
    %130 = arith.addf %123, %129 : vector<128x128xf32>
    %c3 = arith.constant 3 : index
    %c0_146 = arith.constant 0 : index
    %c0_147 = arith.constant 0 : index
    %131 = vector.load %arg15[%c3, %c0_146, %c0_147] : memref<13x1x128xf32, #tpu.memory_space<vmem>>, vector<1x1x128xf32>
    %132 = vector.shape_cast %131 : vector<1x1x128xf32> to vector<1x128xf32>
    %133 = vector.broadcast %132 : vector<1x128xf32> to vector<128x128xf32>
    %134 = arith.addf %130, %133 : vector<128x128xf32>
    %cst_148 = arith.constant 0.000000e+00 : f32
    %135 = vector.broadcast %cst_148 : f32 to vector<128x128xf32>
    %136 = arith.maximumf %134, %135 : vector<128x128xf32>
    %137 = arith.truncf %136 : vector<128x128xf32> to vector<128x128xbf16>
    %c0_149 = arith.constant 0 : index
    %c0_150 = arith.constant 0 : index
    %c0_151 = arith.constant 0 : index
    %138 = vector.load %arg17[%c0_149, %c0_150, %c0_151] : memref<2x128x64xbf16, #tpu.memory_space<vmem>>, vector<1x128x64xbf16>
    %139 = vector.shape_cast %138 : vector<1x128x64xbf16> to vector<128x64xbf16>
    %cst_152 = arith.constant dense<0.000000e+00> : vector<128x64xf32>
    %140 = tpu.matmul %137, %139, %cst_152 {dimension_numbers = #tpu.dot_dimension_numbers<[1], [0], [0], [1], [0, 0, 1, 1], [], []>} : vector<128x128xbf16>, vector<128x64xbf16>, vector<128x64xf32> -> vector<128x64xf32>
    %c1_153 = arith.constant 1 : index
    %c0_154 = arith.constant 0 : index
    %c0_155 = arith.constant 0 : index
    %141 = vector.load %arg17[%c1_153, %c0_154, %c0_155] : memref<2x128x64xbf16, #tpu.memory_space<vmem>>, vector<1x128x64xbf16>
    %142 = vector.shape_cast %141 : vector<1x128x64xbf16> to vector<128x64xbf16>
    %cst_156 = arith.constant dense<0.000000e+00> : vector<128x64xf32>
    %143 = tpu.matmul %137, %142, %cst_156 {dimension_numbers = #tpu.dot_dimension_numbers<[1], [0], [0], [1], [0, 0, 1, 1], [], []>} : vector<128x128xbf16>, vector<128x64xbf16>, vector<128x64xf32> -> vector<128x64xf32>
    %144 = arith.maximumf %140, %143 : vector<128x64xf32>
    %145 = vector.shape_cast %144 : vector<128x64xf32> to vector<8x8x2x64xf32>
    %cst_157 = arith.constant dense<0xFF800000> : vector<8x8x64xf32>
    %146 = vector.multi_reduction <maximumf>, %145, %cst_157 [2] : vector<8x8x2x64xf32> to vector<8x8x64xf32>
    %cst_158 = arith.constant 0.000000e+00 : f32
    %147 = vector.broadcast %cst_158 : f32 to vector<8x1x64xf32>
    %c0_159 = arith.constant 0 : index
    %c0_160 = arith.constant 0 : index
    %c0_161 = arith.constant 0 : index
    %148 = vector.load %arg26[%c0_159, %c0_160, %c0_161] : memref<8x34x128xf32, #tpu.memory_space<vmem>>, vector<8x1x64xf32>
    tpu.vector_store %arg26[%c0_159, %c0_160, %c0_161], %147 {strides = array<i32>} : memref<8x34x128xf32, #tpu.memory_space<vmem>>, vector<8x1x64xf32>,
    %cst_162 = arith.constant 0.000000e+00 : f32
    %149 = vector.broadcast %cst_162 : f32 to vector<8x1x64xf32>
    %c0_163 = arith.constant 0 : index
    %c9 = arith.constant 9 : index
    %c0_164 = arith.constant 0 : index
    %150 = vector.load %arg26[%c0_163, %c9, %c0_164] : memref<8x34x128xf32, #tpu.memory_space<vmem>>, vector<8x1x64xf32>
    tpu.vector_store %arg26[%c0_163, %c9, %c0_164], %149 {strides = array<i32>} : memref<8x34x128xf32, #tpu.memory_space<vmem>>, vector<8x1x64xf32>,
    %c0_165 = arith.constant 0 : index
    %c1_166 = arith.constant 1 : index
    %c0_167 = arith.constant 0 : index
    %151 = vector.load %arg26[%c0_165, %c1_166, %c0_167] : memref<8x34x128xf32, #tpu.memory_space<vmem>>, vector<8x8x64xf32>
    tpu.vector_store %arg26[%c0_165, %c1_166, %c0_167], %146 {strides = array<i32>} : memref<8x34x128xf32, #tpu.memory_space<vmem>>, vector<8x8x64xf32>,
    %c0_168 = arith.constant 0 : index
    %c0_169 = arith.constant 0 : index
    %c0_170 = arith.constant 0 : index
    %152 = vector.load %arg26[%c0_168, %c0_169, %c0_170] : memref<8x34x128xf32, #tpu.memory_space<vmem>>, vector<8x8x64xf32>
    %153 = vector.shape_cast %152 : vector<8x8x64xf32> to vector<64x64xf32>
    %154 = arith.truncf %153 : vector<64x64xf32> to vector<64x64xbf16>
    %c0_171 = arith.constant 0 : index
    %c0_172 = arith.constant 0 : index
    %c0_173 = arith.constant 0 : index
    %155 = vector.load %arg6[%c0_171, %c0_172, %c0_173] : memref<3x64x128xbf16, #tpu.memory_space<vmem>>, vector<1x64x128xbf16>
    %156 = vector.shape_cast %155 : vector<1x64x128xbf16> to vector<64x128xbf16>
    %cst_174 = arith.constant dense<0.000000e+00> : vector<64x128xf32>
    %157 = tpu.matmul %154, %156, %cst_174 {dimension_numbers = #tpu.dot_dimension_numbers<[1], [0], [0], [1], [0, 0, 1, 1], [], []>} : vector<64x64xbf16>, vector<64x128xbf16>, vector<64x128xf32> -> vector<64x128xf32>
    %c0_175 = arith.constant 0 : index
    %c1_176 = arith.constant 1 : index
    %c0_177 = arith.constant 0 : index
    %158 = vector.load %arg26[%c0_175, %c1_176, %c0_177] : memref<8x34x128xf32, #tpu.memory_space<vmem>>, vector<8x8x64xf32>
    %159 = vector.shape_cast %158 : vector<8x8x64xf32> to vector<64x64xf32>
    %160 = arith.truncf %159 : vector<64x64xf32> to vector<64x64xbf16>
    %c1_178 = arith.constant 1 : index
    %c0_179 = arith.constant 0 : index
    %c0_180 = arith.constant 0 : index
    %161 = vector.load %arg6[%c1_178, %c0_179, %c0_180] : memref<3x64x128xbf16, #tpu.memory_space<vmem>>, vector<1x64x128xbf16>
    %162 = vector.shape_cast %161 : vector<1x64x128xbf16> to vector<64x128xbf16>
    %cst_181 = arith.constant dense<0.000000e+00> : vector<64x128xf32>
    %163 = tpu.matmul %160, %162, %cst_181 {dimension_numbers = #tpu.dot_dimension_numbers<[1], [0], [0], [1], [0, 0, 1, 1], [], []>} : vector<64x64xbf16>, vector<64x128xbf16>, vector<64x128xf32> -> vector<64x128xf32>
    %164 = arith.addf %157, %163 : vector<64x128xf32>
    %c0_182 = arith.constant 0 : index
    %c2_183 = arith.constant 2 : index
    %c0_184 = arith.constant 0 : index
    %165 = vector.load %arg26[%c0_182, %c2_183, %c0_184] : memref<8x34x128xf32, #tpu.memory_space<vmem>>, vector<8x8x64xf32>
    %166 = vector.shape_cast %165 : vector<8x8x64xf32> to vector<64x64xf32>
    %167 = arith.truncf %166 : vector<64x64xf32> to vector<64x64xbf16>
    %c2_185 = arith.constant 2 : index
    %c0_186 = arith.constant 0 : index
    %c0_187 = arith.constant 0 : index
    %168 = vector.load %arg6[%c2_185, %c0_186, %c0_187] : memref<3x64x128xbf16, #tpu.memory_space<vmem>>, vector<1x64x128xbf16>
    %169 = vector.shape_cast %168 : vector<1x64x128xbf16> to vector<64x128xbf16>
    %cst_188 = arith.constant dense<0.000000e+00> : vector<64x128xf32>
    %170 = tpu.matmul %167, %169, %cst_188 {dimension_numbers = #tpu.dot_dimension_numbers<[1], [0], [0], [1], [0, 0, 1, 1], [], []>} : vector<64x64xbf16>, vector<64x128xbf16>, vector<64x128xf32> -> vector<64x128xf32>
    %171 = arith.addf %164, %170 : vector<64x128xf32>
    %c4 = arith.constant 4 : index
    %c0_189 = arith.constant 0 : index
    %c0_190 = arith.constant 0 : index
    %172 = vector.load %arg15[%c4, %c0_189, %c0_190] : memref<13x1x128xf32, #tpu.memory_space<vmem>>, vector<1x1x128xf32>
    %173 = vector.shape_cast %172 : vector<1x1x128xf32> to vector<1x128xf32>
    %174 = vector.broadcast %173 : vector<1x128xf32> to vector<64x128xf32>
    %175 = arith.addf %171, %174 : vector<64x128xf32>
    %cst_191 = arith.constant 0.000000e+00 : f32
    %176 = vector.broadcast %cst_191 : f32 to vector<64x128xf32>
    %177 = arith.maximumf %175, %176 : vector<64x128xf32>
    %178 = vector.shape_cast %177 : vector<64x128xf32> to vector<8x8x128xf32>
    %cst_192 = arith.constant 0.000000e+00 : f32
    %179 = vector.broadcast %cst_192 : f32 to vector<8x1x128xf32>
    %c0_193 = arith.constant 0 : index
    %c0_194 = arith.constant 0 : index
    %c0_195 = arith.constant 0 : index
    %180 = vector.load %arg26[%c0_193, %c0_194, %c0_195] : memref<8x34x128xf32, #tpu.memory_space<vmem>>, vector<8x1x128xf32>
    tpu.vector_store %arg26[%c0_193, %c0_194, %c0_195], %179 {strides = array<i32>} : memref<8x34x128xf32, #tpu.memory_space<vmem>>, vector<8x1x128xf32>,
    %cst_196 = arith.constant 0.000000e+00 : f32
    %181 = vector.broadcast %cst_196 : f32 to vector<8x1x128xf32>
    %c0_197 = arith.constant 0 : index
    %c9_198 = arith.constant 9 : index
    %c0_199 = arith.constant 0 : index
    %182 = vector.load %arg26[%c0_197, %c9_198, %c0_199] : memref<8x34x128xf32, #tpu.memory_space<vmem>>, vector<8x1x128xf32>
    tpu.vector_store %arg26[%c0_197, %c9_198, %c0_199], %181 {strides = array<i32>} : memref<8x34x128xf32, #tpu.memory_space<vmem>>, vector<8x1x128xf32>,
    %c0_200 = arith.constant 0 : index
    %c1_201 = arith.constant 1 : index
    %c0_202 = arith.constant 0 : index
    %183 = vector.load %arg26[%c0_200, %c1_201, %c0_202] : memref<8x34x128xf32, #tpu.memory_space<vmem>>, vector<8x8x128xf32>
    tpu.vector_store %arg26[%c0_200, %c1_201, %c0_202], %178 {strides = array<i32>} : memref<8x34x128xf32, #tpu.memory_space<vmem>>, vector<8x8x128xf32>,
    %c0_203 = arith.constant 0 : index
    %c0_204 = arith.constant 0 : index
    %c0_205 = arith.constant 0 : index
    %184 = vector.load %arg26[%c0_203, %c0_204, %c0_205] : memref<8x34x128xf32, #tpu.memory_space<vmem>>, vector<8x8x128xf32>
    %185 = vector.shape_cast %184 : vector<8x8x128xf32> to vector<64x128xf32>
    %186 = arith.truncf %185 : vector<64x128xf32> to vector<64x128xbf16>
    %c0_206 = arith.constant 0 : index
    %c0_207 = arith.constant 0 : index
    %c0_208 = arith.constant 0 : index
    %187 = vector.load %arg7[%c0_206, %c0_207, %c0_208] : memref<3x128x128xbf16, #tpu.memory_space<vmem>>, vector<1x128x128xbf16>
    %188 = vector.shape_cast %187 : vector<1x128x128xbf16> to vector<128x128xbf16>
    %cst_209 = arith.constant dense<0.000000e+00> : vector<64x128xf32>
    %189 = tpu.matmul %186, %188, %cst_209 {dimension_numbers = #tpu.dot_dimension_numbers<[1], [0], [0], [1], [0, 0, 1, 1], [], []>} : vector<64x128xbf16>, vector<128x128xbf16>, vector<64x128xf32> -> vector<64x128xf32>
    %c0_210 = arith.constant 0 : index
    %c1_211 = arith.constant 1 : index
    %c0_212 = arith.constant 0 : index
    %190 = vector.load %arg26[%c0_210, %c1_211, %c0_212] : memref<8x34x128xf32, #tpu.memory_space<vmem>>, vector<8x8x128xf32>
    %191 = vector.shape_cast %190 : vector<8x8x128xf32> to vector<64x128xf32>
    %192 = arith.truncf %191 : vector<64x128xf32> to vector<64x128xbf16>
    %c1_213 = arith.constant 1 : index
    %c0_214 = arith.constant 0 : index
    %c0_215 = arith.constant 0 : index
    %193 = vector.load %arg7[%c1_213, %c0_214, %c0_215] : memref<3x128x128xbf16, #tpu.memory_space<vmem>>, vector<1x128x128xbf16>
    %194 = vector.shape_cast %193 : vector<1x128x128xbf16> to vector<128x128xbf16>
    %cst_216 = arith.constant dense<0.000000e+00> : vector<64x128xf32>
    %195 = tpu.matmul %192, %194, %cst_216 {dimension_numbers = #tpu.dot_dimension_numbers<[1], [0], [0], [1], [0, 0, 1, 1], [], []>} : vector<64x128xbf16>, vector<128x128xbf16>, vector<64x128xf32> -> vector<64x128xf32>
    %196 = arith.addf %189, %195 : vector<64x128xf32>
    %c0_217 = arith.constant 0 : index
    %c2_218 = arith.constant 2 : index
    %c0_219 = arith.constant 0 : index
    %197 = vector.load %arg26[%c0_217, %c2_218, %c0_219] : memref<8x34x128xf32, #tpu.memory_space<vmem>>, vector<8x8x128xf32>
    %198 = vector.shape_cast %197 : vector<8x8x128xf32> to vector<64x128xf32>
    %199 = arith.truncf %198 : vector<64x128xf32> to vector<64x128xbf16>
    %c2_220 = arith.constant 2 : index
    %c0_221 = arith.constant 0 : index
    %c0_222 = arith.constant 0 : index
    %200 = vector.load %arg7[%c2_220, %c0_221, %c0_222] : memref<3x128x128xbf16, #tpu.memory_space<vmem>>, vector<1x128x128xbf16>
    %201 = vector.shape_cast %200 : vector<1x128x128xbf16> to vector<128x128xbf16>
    %cst_223 = arith.constant dense<0.000000e+00> : vector<64x128xf32>
    %202 = tpu.matmul %199, %201, %cst_223 {dimension_numbers = #tpu.dot_dimension_numbers<[1], [0], [0], [1], [0, 0, 1, 1], [], []>} : vector<64x128xbf16>, vector<128x128xbf16>, vector<64x128xf32> -> vector<64x128xf32>
    %203 = arith.addf %196, %202 : vector<64x128xf32>
    %c5 = arith.constant 5 : index
    %c0_224 = arith.constant 0 : index
    %c0_225 = arith.constant 0 : index
    %204 = vector.load %arg15[%c5, %c0_224, %c0_225] : memref<13x1x128xf32, #tpu.memory_space<vmem>>, vector<1x1x128xf32>
    %205 = vector.shape_cast %204 : vector<1x1x128xf32> to vector<1x128xf32>
    %206 = vector.broadcast %205 : vector<1x128xf32> to vector<64x128xf32>
    %207 = arith.addf %203, %206 : vector<64x128xf32>
    %cst_226 = arith.constant 0.000000e+00 : f32
    %208 = vector.broadcast %cst_226 : f32 to vector<64x128xf32>
    %209 = arith.maximumf %207, %208 : vector<64x128xf32>
    %210 = vector.shape_cast %209 : vector<64x128xf32> to vector<8x8x128xf32>
    %cst_227 = arith.constant 0.000000e+00 : f32
    %211 = vector.broadcast %cst_227 : f32 to vector<8x1x128xf32>
    %c0_228 = arith.constant 0 : index
    %c0_229 = arith.constant 0 : index
    %c0_230 = arith.constant 0 : index
    %212 = vector.load %arg26[%c0_228, %c0_229, %c0_230] : memref<8x34x128xf32, #tpu.memory_space<vmem>>, vector<8x1x128xf32>
    tpu.vector_store %arg26[%c0_228, %c0_229, %c0_230], %211 {strides = array<i32>} : memref<8x34x128xf32, #tpu.memory_space<vmem>>, vector<8x1x128xf32>,
    %cst_231 = arith.constant 0.000000e+00 : f32
    %213 = vector.broadcast %cst_231 : f32 to vector<8x1x128xf32>
    %c0_232 = arith.constant 0 : index
    %c9_233 = arith.constant 9 : index
    %c0_234 = arith.constant 0 : index
    %214 = vector.load %arg26[%c0_232, %c9_233, %c0_234] : memref<8x34x128xf32, #tpu.memory_space<vmem>>, vector<8x1x128xf32>
    tpu.vector_store %arg26[%c0_232, %c9_233, %c0_234], %213 {strides = array<i32>} : memref<8x34x128xf32, #tpu.memory_space<vmem>>, vector<8x1x128xf32>,
    %c0_235 = arith.constant 0 : index
    %c1_236 = arith.constant 1 : index
    %c0_237 = arith.constant 0 : index
    %215 = vector.load %arg26[%c0_235, %c1_236, %c0_237] : memref<8x34x128xf32, #tpu.memory_space<vmem>>, vector<8x8x128xf32>
    tpu.vector_store %arg26[%c0_235, %c1_236, %c0_237], %210 {strides = array<i32>} : memref<8x34x128xf32, #tpu.memory_space<vmem>>, vector<8x8x128xf32>,
    %c0_238 = arith.constant 0 : index
    %c0_239 = arith.constant 0 : index
    %c0_240 = arith.constant 0 : index
    %216 = vector.load %arg26[%c0_238, %c0_239, %c0_240] : memref<8x34x128xf32, #tpu.memory_space<vmem>>, vector<8x8x128xf32>
    %217 = vector.shape_cast %216 : vector<8x8x128xf32> to vector<64x128xf32>
    %218 = arith.truncf %217 : vector<64x128xf32> to vector<64x128xbf16>
    %c0_241 = arith.constant 0 : index
    %c0_242 = arith.constant 0 : index
    %c0_243 = arith.constant 0 : index
    %219 = vector.load %arg8[%c0_241, %c0_242, %c0_243] : memref<3x128x128xbf16, #tpu.memory_space<vmem>>, vector<1x128x128xbf16>
    %220 = vector.shape_cast %219 : vector<1x128x128xbf16> to vector<128x128xbf16>
    %cst_244 = arith.constant dense<0.000000e+00> : vector<64x128xf32>
    %221 = tpu.matmul %218, %220, %cst_244 {dimension_numbers = #tpu.dot_dimension_numbers<[1], [0], [0], [1], [0, 0, 1, 1], [], []>} : vector<64x128xbf16>, vector<128x128xbf16>, vector<64x128xf32> -> vector<64x128xf32>
    %c0_245 = arith.constant 0 : index
    %c1_246 = arith.constant 1 : index
    %c0_247 = arith.constant 0 : index
    %222 = vector.load %arg26[%c0_245, %c1_246, %c0_247] : memref<8x34x128xf32, #tpu.memory_space<vmem>>, vector<8x8x128xf32>
    %223 = vector.shape_cast %222 : vector<8x8x128xf32> to vector<64x128xf32>
    %224 = arith.truncf %223 : vector<64x128xf32> to vector<64x128xbf16>
    %c1_248 = arith.constant 1 : index
    %c0_249 = arith.constant 0 : index
    %c0_250 = arith.constant 0 : index
    %225 = vector.load %arg8[%c1_248, %c0_249, %c0_250] : memref<3x128x128xbf16, #tpu.memory_space<vmem>>, vector<1x128x128xbf16>
    %226 = vector.shape_cast %225 : vector<1x128x128xbf16> to vector<128x128xbf16>
    %cst_251 = arith.constant dense<0.000000e+00> : vector<64x128xf32>
    %227 = tpu.matmul %224, %226, %cst_251 {dimension_numbers = #tpu.dot_dimension_numbers<[1], [0], [0], [1], [0, 0, 1, 1], [], []>} : vector<64x128xbf16>, vector<128x128xbf16>, vector<64x128xf32> -> vector<64x128xf32>
    %228 = arith.addf %221, %227 : vector<64x128xf32>
    %c0_252 = arith.constant 0 : index
    %c2_253 = arith.constant 2 : index
    %c0_254 = arith.constant 0 : index
    %229 = vector.load %arg26[%c0_252, %c2_253, %c0_254] : memref<8x34x128xf32, #tpu.memory_space<vmem>>, vector<8x8x128xf32>
    %230 = vector.shape_cast %229 : vector<8x8x128xf32> to vector<64x128xf32>
    %231 = arith.truncf %230 : vector<64x128xf32> to vector<64x128xbf16>
    %c2_255 = arith.constant 2 : index
    %c0_256 = arith.constant 0 : index
    %c0_257 = arith.constant 0 : index
    %232 = vector.load %arg8[%c2_255, %c0_256, %c0_257] : memref<3x128x128xbf16, #tpu.memory_space<vmem>>, vector<1x128x128xbf16>
    %233 = vector.shape_cast %232 : vector<1x128x128xbf16> to vector<128x128xbf16>
    %cst_258 = arith.constant dense<0.000000e+00> : vector<64x128xf32>
    %234 = tpu.matmul %231, %233, %cst_258 {dimension_numbers = #tpu.dot_dimension_numbers<[1], [0], [0], [1], [0, 0, 1, 1], [], []>} : vector<64x128xbf16>, vector<128x128xbf16>, vector<64x128xf32> -> vector<64x128xf32>
    %235 = arith.addf %228, %234 : vector<64x128xf32>
    %c6 = arith.constant 6 : index
    %c0_259 = arith.constant 0 : index
    %c0_260 = arith.constant 0 : index
    %236 = vector.load %arg15[%c6, %c0_259, %c0_260] : memref<13x1x128xf32, #tpu.memory_space<vmem>>, vector<1x1x128xf32>
    %237 = vector.shape_cast %236 : vector<1x1x128xf32> to vector<1x128xf32>
    %238 = vector.broadcast %237 : vector<1x128xf32> to vector<64x128xf32>
    %239 = arith.addf %235, %238 : vector<64x128xf32>
    %cst_261 = arith.constant 0.000000e+00 : f32
    %240 = vector.broadcast %cst_261 : f32 to vector<64x128xf32>
    %241 = arith.maximumf %239, %240 : vector<64x128xf32>
    %242 = arith.truncf %241 : vector<64x128xf32> to vector<64x128xbf16>
    %c0_262 = arith.constant 0 : index
    %c0_263 = arith.constant 0 : index
    %c0_264 = arith.constant 0 : index
    %243 = vector.load %arg18[%c0_262, %c0_263, %c0_264] : memref<2x128x64xbf16, #tpu.memory_space<vmem>>, vector<1x128x64xbf16>
    %244 = vector.shape_cast %243 : vector<1x128x64xbf16> to vector<128x64xbf16>
    %cst_265 = arith.constant dense<0.000000e+00> : vector<64x64xf32>
    %245 = tpu.matmul %242, %244, %cst_265 {dimension_numbers = #tpu.dot_dimension_numbers<[1], [0], [0], [1], [0, 0, 1, 1], [], []>} : vector<64x128xbf16>, vector<128x64xbf16>, vector<64x64xf32> -> vector<64x64xf32>
    %c1_266 = arith.constant 1 : index
    %c0_267 = arith.constant 0 : index
    %c0_268 = arith.constant 0 : index
    %246 = vector.load %arg18[%c1_266, %c0_267, %c0_268] : memref<2x128x64xbf16, #tpu.memory_space<vmem>>, vector<1x128x64xbf16>
    %247 = vector.shape_cast %246 : vector<1x128x64xbf16> to vector<128x64xbf16>
    %cst_269 = arith.constant dense<0.000000e+00> : vector<64x64xf32>
    %248 = tpu.matmul %242, %247, %cst_269 {dimension_numbers = #tpu.dot_dimension_numbers<[1], [0], [0], [1], [0, 0, 1, 1], [], []>} : vector<64x128xbf16>, vector<128x64xbf16>, vector<64x64xf32> -> vector<64x64xf32>
    %249 = arith.maximumf %245, %248 : vector<64x64xf32>
    %250 = vector.shape_cast %249 : vector<64x64xf32> to vector<8x4x2x64xf32>
    %cst_270 = arith.constant dense<0xFF800000> : vector<8x4x64xf32>
    %251 = vector.multi_reduction <maximumf>, %250, %cst_270 [2] : vector<8x4x2x64xf32> to vector<8x4x64xf32>
    %cst_271 = arith.constant 0.000000e+00 : f32
    %252 = vector.broadcast %cst_271 : f32 to vector<8x1x64xf32>
    %c0_272 = arith.constant 0 : index
    %c0_273 = arith.constant 0 : index
    %c0_274 = arith.constant 0 : index
    %253 = vector.load %arg26[%c0_272, %c0_273, %c0_274] : memref<8x34x128xf32, #tpu.memory_space<vmem>>, vector<8x1x64xf32>
    tpu.vector_store %arg26[%c0_272, %c0_273, %c0_274], %252 {strides = array<i32>} : memref<8x34x128xf32, #tpu.memory_space<vmem>>, vector<8x1x64xf32>,
    %cst_275 = arith.constant 0.000000e+00 : f32
    %254 = vector.broadcast %cst_275 : f32 to vector<8x1x64xf32>
    %c0_276 = arith.constant 0 : index
    %c5_277 = arith.constant 5 : index
    %c0_278 = arith.constant 0 : index
    %255 = vector.load %arg26[%c0_276, %c5_277, %c0_278] : memref<8x34x128xf32, #tpu.memory_space<vmem>>, vector<8x1x64xf32>
    tpu.vector_store %arg26[%c0_276, %c5_277, %c0_278], %254 {strides = array<i32>} : memref<8x34x128xf32, #tpu.memory_space<vmem>>, vector<8x1x64xf32>,
    %c0_279 = arith.constant 0 : index
    %c1_280 = arith.constant 1 : index
    %c0_281 = arith.constant 0 : index
    %256 = vector.load %arg26[%c0_279, %c1_280, %c0_281] : memref<8x34x128xf32, #tpu.memory_space<vmem>>, vector<8x4x64xf32>
    tpu.vector_store %arg26[%c0_279, %c1_280, %c0_281], %251 {strides = array<i32>} : memref<8x34x128xf32, #tpu.memory_space<vmem>>, vector<8x4x64xf32>,
    %c0_282 = arith.constant 0 : index
    %c0_283 = arith.constant 0 : index
    %c0_284 = arith.constant 0 : index
    %257 = vector.load %arg26[%c0_282, %c0_283, %c0_284] : memref<8x34x128xf32, #tpu.memory_space<vmem>>, vector<8x4x64xf32>
    %258 = vector.shape_cast %257 : vector<8x4x64xf32> to vector<32x64xf32>
    %259 = arith.truncf %258 : vector<32x64xf32> to vector<32x64xbf16>
    %c0_285 = arith.constant 0 : index
    %c0_286 = arith.constant 0 : index
    %c0_287 = arith.constant 0 : index
    %260 = vector.load %arg9[%c0_285, %c0_286, %c0_287] : memref<3x64x128xbf16, #tpu.memory_space<vmem>>, vector<1x64x128xbf16>
    %261 = vector.shape_cast %260 : vector<1x64x128xbf16> to vector<64x128xbf16>
    %cst_288 = arith.constant dense<0.000000e+00> : vector<32x128xf32>
    %262 = tpu.matmul %259, %261, %cst_288 {dimension_numbers = #tpu.dot_dimension_numbers<[1], [0], [0], [1], [0, 0, 1, 1], [], []>} : vector<32x64xbf16>, vector<64x128xbf16>, vector<32x128xf32> -> vector<32x128xf32>
    %c0_289 = arith.constant 0 : index
    %c1_290 = arith.constant 1 : index
    %c0_291 = arith.constant 0 : index
    %263 = vector.load %arg26[%c0_289, %c1_290, %c0_291] : memref<8x34x128xf32, #tpu.memory_space<vmem>>, vector<8x4x64xf32>
    %264 = vector.shape_cast %263 : vector<8x4x64xf32> to vector<32x64xf32>
    %265 = arith.truncf %264 : vector<32x64xf32> to vector<32x64xbf16>
    %c1_292 = arith.constant 1 : index
    %c0_293 = arith.constant 0 : index
    %c0_294 = arith.constant 0 : index
    %266 = vector.load %arg9[%c1_292, %c0_293, %c0_294] : memref<3x64x128xbf16, #tpu.memory_space<vmem>>, vector<1x64x128xbf16>
    %267 = vector.shape_cast %266 : vector<1x64x128xbf16> to vector<64x128xbf16>
    %cst_295 = arith.constant dense<0.000000e+00> : vector<32x128xf32>
    %268 = tpu.matmul %265, %267, %cst_295 {dimension_numbers = #tpu.dot_dimension_numbers<[1], [0], [0], [1], [0, 0, 1, 1], [], []>} : vector<32x64xbf16>, vector<64x128xbf16>, vector<32x128xf32> -> vector<32x128xf32>
    %269 = arith.addf %262, %268 : vector<32x128xf32>
    %c0_296 = arith.constant 0 : index
    %c2_297 = arith.constant 2 : index
    %c0_298 = arith.constant 0 : index
    %270 = vector.load %arg26[%c0_296, %c2_297, %c0_298] : memref<8x34x128xf32, #tpu.memory_space<vmem>>, vector<8x4x64xf32>
    %271 = vector.shape_cast %270 : vector<8x4x64xf32> to vector<32x64xf32>
    %272 = arith.truncf %271 : vector<32x64xf32> to vector<32x64xbf16>
    %c2_299 = arith.constant 2 : index
    %c0_300 = arith.constant 0 : index
    %c0_301 = arith.constant 0 : index
    %273 = vector.load %arg9[%c2_299, %c0_300, %c0_301] : memref<3x64x128xbf16, #tpu.memory_space<vmem>>, vector<1x64x128xbf16>
    %274 = vector.shape_cast %273 : vector<1x64x128xbf16> to vector<64x128xbf16>
    %cst_302 = arith.constant dense<0.000000e+00> : vector<32x128xf32>
    %275 = tpu.matmul %272, %274, %cst_302 {dimension_numbers = #tpu.dot_dimension_numbers<[1], [0], [0], [1], [0, 0, 1, 1], [], []>} : vector<32x64xbf16>, vector<64x128xbf16>, vector<32x128xf32> -> vector<32x128xf32>
    %276 = arith.addf %269, %275 : vector<32x128xf32>
    %c7 = arith.constant 7 : index
    %c0_303 = arith.constant 0 : index
    %c0_304 = arith.constant 0 : index
    %277 = vector.load %arg15[%c7, %c0_303, %c0_304] : memref<13x1x128xf32, #tpu.memory_space<vmem>>, vector<1x1x128xf32>
    %278 = vector.shape_cast %277 : vector<1x1x128xf32> to vector<1x128xf32>
    %279 = vector.broadcast %278 : vector<1x128xf32> to vector<32x128xf32>
    %280 = arith.addf %276, %279 : vector<32x128xf32>
    %cst_305 = arith.constant 0.000000e+00 : f32
    %281 = vector.broadcast %cst_305 : f32 to vector<32x128xf32>
    %282 = arith.maximumf %280, %281 : vector<32x128xf32>
    %283 = vector.shape_cast %282 : vector<32x128xf32> to vector<8x4x128xf32>
    %cst_306 = arith.constant 0.000000e+00 : f32
    %284 = vector.broadcast %cst_306 : f32 to vector<8x1x128xf32>
    %c0_307 = arith.constant 0 : index
    %c0_308 = arith.constant 0 : index
    %c0_309 = arith.constant 0 : index
    %285 = vector.load %arg26[%c0_307, %c0_308, %c0_309] : memref<8x34x128xf32, #tpu.memory_space<vmem>>, vector<8x1x128xf32>
    tpu.vector_store %arg26[%c0_307, %c0_308, %c0_309], %284 {strides = array<i32>} : memref<8x34x128xf32, #tpu.memory_space<vmem>>, vector<8x1x128xf32>,
    %cst_310 = arith.constant 0.000000e+00 : f32
    %286 = vector.broadcast %cst_310 : f32 to vector<8x1x128xf32>
    %c0_311 = arith.constant 0 : index
    %c5_312 = arith.constant 5 : index
    %c0_313 = arith.constant 0 : index
    %287 = vector.load %arg26[%c0_311, %c5_312, %c0_313] : memref<8x34x128xf32, #tpu.memory_space<vmem>>, vector<8x1x128xf32>
    tpu.vector_store %arg26[%c0_311, %c5_312, %c0_313], %286 {strides = array<i32>} : memref<8x34x128xf32, #tpu.memory_space<vmem>>, vector<8x1x128xf32>,
    %c0_314 = arith.constant 0 : index
    %c1_315 = arith.constant 1 : index
    %c0_316 = arith.constant 0 : index
    %288 = vector.load %arg26[%c0_314, %c1_315, %c0_316] : memref<8x34x128xf32, #tpu.memory_space<vmem>>, vector<8x4x128xf32>
    tpu.vector_store %arg26[%c0_314, %c1_315, %c0_316], %283 {strides = array<i32>} : memref<8x34x128xf32, #tpu.memory_space<vmem>>, vector<8x4x128xf32>,
    %c0_317 = arith.constant 0 : index
    %c0_318 = arith.constant 0 : index
    %c0_319 = arith.constant 0 : index
    %289 = vector.load %arg26[%c0_317, %c0_318, %c0_319] : memref<8x34x128xf32, #tpu.memory_space<vmem>>, vector<8x4x128xf32>
    %290 = vector.shape_cast %289 : vector<8x4x128xf32> to vector<32x128xf32>
    %291 = arith.truncf %290 : vector<32x128xf32> to vector<32x128xbf16>
    %c0_320 = arith.constant 0 : index
    %c0_321 = arith.constant 0 : index
    %c0_322 = arith.constant 0 : index
    %292 = vector.load %arg10[%c0_320, %c0_321, %c0_322] : memref<3x128x128xbf16, #tpu.memory_space<vmem>>, vector<1x128x128xbf16>
    %293 = vector.shape_cast %292 : vector<1x128x128xbf16> to vector<128x128xbf16>
    %cst_323 = arith.constant dense<0.000000e+00> : vector<32x128xf32>
    %294 = tpu.matmul %291, %293, %cst_323 {dimension_numbers = #tpu.dot_dimension_numbers<[1], [0], [0], [1], [0, 0, 1, 1], [], []>} : vector<32x128xbf16>, vector<128x128xbf16>, vector<32x128xf32> -> vector<32x128xf32>
    %c0_324 = arith.constant 0 : index
    %c1_325 = arith.constant 1 : index
    %c0_326 = arith.constant 0 : index
    %295 = vector.load %arg26[%c0_324, %c1_325, %c0_326] : memref<8x34x128xf32, #tpu.memory_space<vmem>>, vector<8x4x128xf32>
    %296 = vector.shape_cast %295 : vector<8x4x128xf32> to vector<32x128xf32>
    %297 = arith.truncf %296 : vector<32x128xf32> to vector<32x128xbf16>
    %c1_327 = arith.constant 1 : index
    %c0_328 = arith.constant 0 : index
    %c0_329 = arith.constant 0 : index
    %298 = vector.load %arg10[%c1_327, %c0_328, %c0_329] : memref<3x128x128xbf16, #tpu.memory_space<vmem>>, vector<1x128x128xbf16>
    %299 = vector.shape_cast %298 : vector<1x128x128xbf16> to vector<128x128xbf16>
    %cst_330 = arith.constant dense<0.000000e+00> : vector<32x128xf32>
    %300 = tpu.matmul %297, %299, %cst_330 {dimension_numbers = #tpu.dot_dimension_numbers<[1], [0], [0], [1], [0, 0, 1, 1], [], []>} : vector<32x128xbf16>, vector<128x128xbf16>, vector<32x128xf32> -> vector<32x128xf32>
    %301 = arith.addf %294, %300 : vector<32x128xf32>
    %c0_331 = arith.constant 0 : index
    %c2_332 = arith.constant 2 : index
    %c0_333 = arith.constant 0 : index
    %302 = vector.load %arg26[%c0_331, %c2_332, %c0_333] : memref<8x34x128xf32, #tpu.memory_space<vmem>>, vector<8x4x128xf32>
    %303 = vector.shape_cast %302 : vector<8x4x128xf32> to vector<32x128xf32>
    %304 = arith.truncf %303 : vector<32x128xf32> to vector<32x128xbf16>
    %c2_334 = arith.constant 2 : index
    %c0_335 = arith.constant 0 : index
    %c0_336 = arith.constant 0 : index
    %305 = vector.load %arg10[%c2_334, %c0_335, %c0_336] : memref<3x128x128xbf16, #tpu.memory_space<vmem>>, vector<1x128x128xbf16>
    %306 = vector.shape_cast %305 : vector<1x128x128xbf16> to vector<128x128xbf16>
    %cst_337 = arith.constant dense<0.000000e+00> : vector<32x128xf32>
    %307 = tpu.matmul %304, %306, %cst_337 {dimension_numbers = #tpu.dot_dimension_numbers<[1], [0], [0], [1], [0, 0, 1, 1], [], []>} : vector<32x128xbf16>, vector<128x128xbf16>, vector<32x128xf32> -> vector<32x128xf32>
    %308 = arith.addf %301, %307 : vector<32x128xf32>
    %c8 = arith.constant 8 : index
    %c0_338 = arith.constant 0 : index
    %c0_339 = arith.constant 0 : index
    %309 = vector.load %arg15[%c8, %c0_338, %c0_339] : memref<13x1x128xf32, #tpu.memory_space<vmem>>, vector<1x1x128xf32>
    %310 = vector.shape_cast %309 : vector<1x1x128xf32> to vector<1x128xf32>
    %311 = vector.broadcast %310 : vector<1x128xf32> to vector<32x128xf32>
    %312 = arith.addf %308, %311 : vector<32x128xf32>
    %cst_340 = arith.constant 0.000000e+00 : f32
    %313 = vector.broadcast %cst_340 : f32 to vector<32x128xf32>
    %314 = arith.maximumf %312, %313 : vector<32x128xf32>
    %315 = vector.shape_cast %314 : vector<32x128xf32> to vector<8x4x128xf32>
    %cst_341 = arith.constant 0.000000e+00 : f32
    %316 = vector.broadcast %cst_341 : f32 to vector<8x1x128xf32>
    %c0_342 = arith.constant 0 : index
    %c0_343 = arith.constant 0 : index
    %c0_344 = arith.constant 0 : index
    %317 = vector.load %arg26[%c0_342, %c0_343, %c0_344] : memref<8x34x128xf32, #tpu.memory_space<vmem>>, vector<8x1x128xf32>
    tpu.vector_store %arg26[%c0_342, %c0_343, %c0_344], %316 {strides = array<i32>} : memref<8x34x128xf32, #tpu.memory_space<vmem>>, vector<8x1x128xf32>,
    %cst_345 = arith.constant 0.000000e+00 : f32
    %318 = vector.broadcast %cst_345 : f32 to vector<8x1x128xf32>
    %c0_346 = arith.constant 0 : index
    %c5_347 = arith.constant 5 : index
    %c0_348 = arith.constant 0 : index
    %319 = vector.load %arg26[%c0_346, %c5_347, %c0_348] : memref<8x34x128xf32, #tpu.memory_space<vmem>>, vector<8x1x128xf32>
    tpu.vector_store %arg26[%c0_346, %c5_347, %c0_348], %318 {strides = array<i32>} : memref<8x34x128xf32, #tpu.memory_space<vmem>>, vector<8x1x128xf32>,
    %c0_349 = arith.constant 0 : index
    %c1_350 = arith.constant 1 : index
    %c0_351 = arith.constant 0 : index
    %320 = vector.load %arg26[%c0_349, %c1_350, %c0_351] : memref<8x34x128xf32, #tpu.memory_space<vmem>>, vector<8x4x128xf32>
    tpu.vector_store %arg26[%c0_349, %c1_350, %c0_351], %315 {strides = array<i32>} : memref<8x34x128xf32, #tpu.memory_space<vmem>>, vector<8x4x128xf32>,
    %c0_352 = arith.constant 0 : index
    %c0_353 = arith.constant 0 : index
    %c0_354 = arith.constant 0 : index
    %321 = vector.load %arg26[%c0_352, %c0_353, %c0_354] : memref<8x34x128xf32, #tpu.memory_space<vmem>>, vector<8x4x128xf32>
    %322 = vector.shape_cast %321 : vector<8x4x128xf32> to vector<32x128xf32>
    %323 = arith.truncf %322 : vector<32x128xf32> to vector<32x128xbf16>
    %c0_355 = arith.constant 0 : index
    %c0_356 = arith.constant 0 : index
    %c0_357 = arith.constant 0 : index
    %324 = vector.load %arg11[%c0_355, %c0_356, %c0_357] : memref<3x128x128xbf16, #tpu.memory_space<vmem>>, vector<1x128x128xbf16>
    %325 = vector.shape_cast %324 : vector<1x128x128xbf16> to vector<128x128xbf16>
    %cst_358 = arith.constant dense<0.000000e+00> : vector<32x128xf32>
    %326 = tpu.matmul %323, %325, %cst_358 {dimension_numbers = #tpu.dot_dimension_numbers<[1], [0], [0], [1], [0, 0, 1, 1], [], []>} : vector<32x128xbf16>, vector<128x128xbf16>, vector<32x128xf32> -> vector<32x128xf32>
    %c0_359 = arith.constant 0 : index
    %c1_360 = arith.constant 1 : index
    %c0_361 = arith.constant 0 : index
    %327 = vector.load %arg26[%c0_359, %c1_360, %c0_361] : memref<8x34x128xf32, #tpu.memory_space<vmem>>, vector<8x4x128xf32>
    %328 = vector.shape_cast %327 : vector<8x4x128xf32> to vector<32x128xf32>
    %329 = arith.truncf %328 : vector<32x128xf32> to vector<32x128xbf16>
    %c1_362 = arith.constant 1 : index
    %c0_363 = arith.constant 0 : index
    %c0_364 = arith.constant 0 : index
    %330 = vector.load %arg11[%c1_362, %c0_363, %c0_364] : memref<3x128x128xbf16, #tpu.memory_space<vmem>>, vector<1x128x128xbf16>
    %331 = vector.shape_cast %330 : vector<1x128x128xbf16> to vector<128x128xbf16>
    %cst_365 = arith.constant dense<0.000000e+00> : vector<32x128xf32>
    %332 = tpu.matmul %329, %331, %cst_365 {dimension_numbers = #tpu.dot_dimension_numbers<[1], [0], [0], [1], [0, 0, 1, 1], [], []>} : vector<32x128xbf16>, vector<128x128xbf16>, vector<32x128xf32> -> vector<32x128xf32>
    %333 = arith.addf %326, %332 : vector<32x128xf32>
    %c0_366 = arith.constant 0 : index
    %c2_367 = arith.constant 2 : index
    %c0_368 = arith.constant 0 : index
    %334 = vector.load %arg26[%c0_366, %c2_367, %c0_368] : memref<8x34x128xf32, #tpu.memory_space<vmem>>, vector<8x4x128xf32>
    %335 = vector.shape_cast %334 : vector<8x4x128xf32> to vector<32x128xf32>
    %336 = arith.truncf %335 : vector<32x128xf32> to vector<32x128xbf16>
    %c2_369 = arith.constant 2 : index
    %c0_370 = arith.constant 0 : index
    %c0_371 = arith.constant 0 : index
    %337 = vector.load %arg11[%c2_369, %c0_370, %c0_371] : memref<3x128x128xbf16, #tpu.memory_space<vmem>>, vector<1x128x128xbf16>
    %338 = vector.shape_cast %337 : vector<1x128x128xbf16> to vector<128x128xbf16>
    %cst_372 = arith.constant dense<0.000000e+00> : vector<32x128xf32>
    %339 = tpu.matmul %336, %338, %cst_372 {dimension_numbers = #tpu.dot_dimension_numbers<[1], [0], [0], [1], [0, 0, 1, 1], [], []>} : vector<32x128xbf16>, vector<128x128xbf16>, vector<32x128xf32> -> vector<32x128xf32>
    %340 = arith.addf %333, %339 : vector<32x128xf32>
    %c9_373 = arith.constant 9 : index
    %c0_374 = arith.constant 0 : index
    %c0_375 = arith.constant 0 : index
    %341 = vector.load %arg15[%c9_373, %c0_374, %c0_375] : memref<13x1x128xf32, #tpu.memory_space<vmem>>, vector<1x1x128xf32>
    %342 = vector.shape_cast %341 : vector<1x1x128xf32> to vector<1x128xf32>
    %343 = vector.broadcast %342 : vector<1x128xf32> to vector<32x128xf32>
    %344 = arith.addf %340, %343 : vector<32x128xf32>
    %cst_376 = arith.constant 0.000000e+00 : f32
    %345 = vector.broadcast %cst_376 : f32 to vector<32x128xf32>
    %346 = arith.maximumf %344, %345 : vector<32x128xf32>
    %347 = arith.truncf %346 : vector<32x128xf32> to vector<32x128xbf16>
    %c0_377 = arith.constant 0 : index
    %c0_378 = arith.constant 0 : index
    %c0_379 = arith.constant 0 : index
    %348 = vector.load %arg19[%c0_377, %c0_378, %c0_379] : memref<2x128x64xbf16, #tpu.memory_space<vmem>>, vector<1x128x64xbf16>
    %349 = vector.shape_cast %348 : vector<1x128x64xbf16> to vector<128x64xbf16>
    %cst_380 = arith.constant dense<0.000000e+00> : vector<32x64xf32>
    %350 = tpu.matmul %347, %349, %cst_380 {dimension_numbers = #tpu.dot_dimension_numbers<[1], [0], [0], [1], [0, 0, 1, 1], [], []>} : vector<32x128xbf16>, vector<128x64xbf16>, vector<32x64xf32> -> vector<32x64xf32>
    %c1_381 = arith.constant 1 : index
    %c0_382 = arith.constant 0 : index
    %c0_383 = arith.constant 0 : index
    %351 = vector.load %arg19[%c1_381, %c0_382, %c0_383] : memref<2x128x64xbf16, #tpu.memory_space<vmem>>, vector<1x128x64xbf16>
    %352 = vector.shape_cast %351 : vector<1x128x64xbf16> to vector<128x64xbf16>
    %cst_384 = arith.constant dense<0.000000e+00> : vector<32x64xf32>
    %353 = tpu.matmul %347, %352, %cst_384 {dimension_numbers = #tpu.dot_dimension_numbers<[1], [0], [0], [1], [0, 0, 1, 1], [], []>} : vector<32x128xbf16>, vector<128x64xbf16>, vector<32x64xf32> -> vector<32x64xf32>
    %354 = arith.maximumf %350, %353 : vector<32x64xf32>
    %355 = vector.shape_cast %354 : vector<32x64xf32> to vector<8x2x2x64xf32>
    %cst_385 = arith.constant dense<0xFF800000> : vector<8x2x64xf32>
    %356 = vector.multi_reduction <maximumf>, %355, %cst_385 [2] : vector<8x2x2x64xf32> to vector<8x2x64xf32>
    %cst_386 = arith.constant 0.000000e+00 : f32
    %357 = vector.broadcast %cst_386 : f32 to vector<8x1x64xf32>
    %c0_387 = arith.constant 0 : index
    %c0_388 = arith.constant 0 : index
    %c0_389 = arith.constant 0 : index
    %358 = vector.load %arg26[%c0_387, %c0_388, %c0_389] : memref<8x34x128xf32, #tpu.memory_space<vmem>>, vector<8x1x64xf32>
    tpu.vector_store %arg26[%c0_387, %c0_388, %c0_389], %357 {strides = array<i32>} : memref<8x34x128xf32, #tpu.memory_space<vmem>>, vector<8x1x64xf32>,
    %cst_390 = arith.constant 0.000000e+00 : f32
    %359 = vector.broadcast %cst_390 : f32 to vector<8x1x64xf32>
    %c0_391 = arith.constant 0 : index
    %c3_392 = arith.constant 3 : index
    %c0_393 = arith.constant 0 : index
    %360 = vector.load %arg26[%c0_391, %c3_392, %c0_393] : memref<8x34x128xf32, #tpu.memory_space<vmem>>, vector<8x1x64xf32>
    tpu.vector_store %arg26[%c0_391, %c3_392, %c0_393], %359 {strides = array<i32>} : memref<8x34x128xf32, #tpu.memory_space<vmem>>, vector<8x1x64xf32>,
    %c0_394 = arith.constant 0 : index
    %c1_395 = arith.constant 1 : index
    %c0_396 = arith.constant 0 : index
    %361 = vector.load %arg26[%c0_394, %c1_395, %c0_396] : memref<8x34x128xf32, #tpu.memory_space<vmem>>, vector<8x2x64xf32>
    tpu.vector_store %arg26[%c0_394, %c1_395, %c0_396], %356 {strides = array<i32>} : memref<8x34x128xf32, #tpu.memory_space<vmem>>, vector<8x2x64xf32>,
    %c0_397 = arith.constant 0 : index
    %c0_398 = arith.constant 0 : index
    %c0_399 = arith.constant 0 : index
    %362 = vector.load %arg26[%c0_397, %c0_398, %c0_399] : memref<8x34x128xf32, #tpu.memory_space<vmem>>, vector<8x2x64xf32>
    %363 = vector.shape_cast %362 : vector<8x2x64xf32> to vector<16x64xf32>
    %364 = arith.truncf %363 : vector<16x64xf32> to vector<16x64xbf16>
    %c0_400 = arith.constant 0 : index
    %c0_401 = arith.constant 0 : index
    %c0_402 = arith.constant 0 : index
    %365 = vector.load %arg12[%c0_400, %c0_401, %c0_402] : memref<3x64x64xbf16, #tpu.memory_space<vmem>>, vector<1x64x64xbf16>
    %366 = vector.shape_cast %365 : vector<1x64x64xbf16> to vector<64x64xbf16>
    %cst_403 = arith.constant dense<0.000000e+00> : vector<16x64xf32>
    %367 = tpu.matmul %364, %366, %cst_403 {dimension_numbers = #tpu.dot_dimension_numbers<[1], [0], [0], [1], [0, 0, 1, 1], [], []>} : vector<16x64xbf16>, vector<64x64xbf16>, vector<16x64xf32> -> vector<16x64xf32>
    %c0_404 = arith.constant 0 : index
    %c1_405 = arith.constant 1 : index
    %c0_406 = arith.constant 0 : index
    %368 = vector.load %arg26[%c0_404, %c1_405, %c0_406] : memref<8x34x128xf32, #tpu.memory_space<vmem>>, vector<8x2x64xf32>
    %369 = vector.shape_cast %368 : vector<8x2x64xf32> to vector<16x64xf32>
    %370 = arith.truncf %369 : vector<16x64xf32> to vector<16x64xbf16>
    %c1_407 = arith.constant 1 : index
    %c0_408 = arith.constant 0 : index
    %c0_409 = arith.constant 0 : index
    %371 = vector.load %arg12[%c1_407, %c0_408, %c0_409] : memref<3x64x64xbf16, #tpu.memory_space<vmem>>, vector<1x64x64xbf16>
    %372 = vector.shape_cast %371 : vector<1x64x64xbf16> to vector<64x64xbf16>
    %cst_410 = arith.constant dense<0.000000e+00> : vector<16x64xf32>
    %373 = tpu.matmul %370, %372, %cst_410 {dimension_numbers = #tpu.dot_dimension_numbers<[1], [0], [0], [1], [0, 0, 1, 1], [], []>} : vector<16x64xbf16>, vector<64x64xbf16>, vector<16x64xf32> -> vector<16x64xf32>
    %374 = arith.addf %367, %373 : vector<16x64xf32>
    %c0_411 = arith.constant 0 : index
    %c2_412 = arith.constant 2 : index
    %c0_413 = arith.constant 0 : index
    %375 = vector.load %arg26[%c0_411, %c2_412, %c0_413] : memref<8x34x128xf32, #tpu.memory_space<vmem>>, vector<8x2x64xf32>
    %376 = vector.shape_cast %375 : vector<8x2x64xf32> to vector<16x64xf32>
    %377 = arith.truncf %376 : vector<16x64xf32> to vector<16x64xbf16>
    %c2_414 = arith.constant 2 : index
    %c0_415 = arith.constant 0 : index
    %c0_416 = arith.constant 0 : index
    %378 = vector.load %arg12[%c2_414, %c0_415, %c0_416] : memref<3x64x64xbf16, #tpu.memory_space<vmem>>, vector<1x64x64xbf16>
    %379 = vector.shape_cast %378 : vector<1x64x64xbf16> to vector<64x64xbf16>
    %cst_417 = arith.constant dense<0.000000e+00> : vector<16x64xf32>
    %380 = tpu.matmul %377, %379, %cst_417 {dimension_numbers = #tpu.dot_dimension_numbers<[1], [0], [0], [1], [0, 0, 1, 1], [], []>} : vector<16x64xbf16>, vector<64x64xbf16>, vector<16x64xf32> -> vector<16x64xf32>
    %381 = arith.addf %374, %380 : vector<16x64xf32>
    %c10 = arith.constant 10 : index
    %c0_418 = arith.constant 0 : index
    %c0_419 = arith.constant 0 : index
    %382 = vector.load %arg15[%c10, %c0_418, %c0_419] : memref<13x1x128xf32, #tpu.memory_space<vmem>>, vector<1x1x128xf32>
    %383 = vector.shape_cast %382 : vector<1x1x128xf32> to vector<1x128xf32>
    %384 = vector.extract_strided_slice %383 {offsets = [0, 0], sizes = [1, 64], strides = [1, 1]} : vector<1x128xf32> to vector<1x64xf32>
    %385 = vector.broadcast %384 : vector<1x64xf32> to vector<16x64xf32>
    %386 = arith.addf %381, %385 : vector<16x64xf32>
    %cst_420 = arith.constant 0.000000e+00 : f32
    %387 = vector.broadcast %cst_420 : f32 to vector<16x64xf32>
    %388 = arith.maximumf %386, %387 : vector<16x64xf32>
    %389 = vector.shape_cast %388 : vector<16x64xf32> to vector<8x2x64xf32>
    %cst_421 = arith.constant 0.000000e+00 : f32
    %390 = vector.broadcast %cst_421 : f32 to vector<8x1x64xf32>
    %c0_422 = arith.constant 0 : index
    %c0_423 = arith.constant 0 : index
    %c0_424 = arith.constant 0 : index
    %391 = vector.load %arg26[%c0_422, %c0_423, %c0_424] : memref<8x34x128xf32, #tpu.memory_space<vmem>>, vector<8x1x64xf32>
    tpu.vector_store %arg26[%c0_422, %c0_423, %c0_424], %390 {strides = array<i32>} : memref<8x34x128xf32, #tpu.memory_space<vmem>>, vector<8x1x64xf32>,
    %cst_425 = arith.constant 0.000000e+00 : f32
    %392 = vector.broadcast %cst_425 : f32 to vector<8x1x64xf32>
    %c0_426 = arith.constant 0 : index
    %c3_427 = arith.constant 3 : index
    %c0_428 = arith.constant 0 : index
    %393 = vector.load %arg26[%c0_426, %c3_427, %c0_428] : memref<8x34x128xf32, #tpu.memory_space<vmem>>, vector<8x1x64xf32>
    tpu.vector_store %arg26[%c0_426, %c3_427, %c0_428], %392 {strides = array<i32>} : memref<8x34x128xf32, #tpu.memory_space<vmem>>, vector<8x1x64xf32>,
    %c0_429 = arith.constant 0 : index
    %c1_430 = arith.constant 1 : index
    %c0_431 = arith.constant 0 : index
    %394 = vector.load %arg26[%c0_429, %c1_430, %c0_431] : memref<8x34x128xf32, #tpu.memory_space<vmem>>, vector<8x2x64xf32>
    tpu.vector_store %arg26[%c0_429, %c1_430, %c0_431], %389 {strides = array<i32>} : memref<8x34x128xf32, #tpu.memory_space<vmem>>, vector<8x2x64xf32>,
    %c0_432 = arith.constant 0 : index
    %c0_433 = arith.constant 0 : index
    %c0_434 = arith.constant 0 : index
    %395 = vector.load %arg26[%c0_432, %c0_433, %c0_434] : memref<8x34x128xf32, #tpu.memory_space<vmem>>, vector<8x2x64xf32>
    %396 = vector.shape_cast %395 : vector<8x2x64xf32> to vector<16x64xf32>
    %397 = arith.truncf %396 : vector<16x64xf32> to vector<16x64xbf16>
    %c0_435 = arith.constant 0 : index
    %c0_436 = arith.constant 0 : index
    %c0_437 = arith.constant 0 : index
    %398 = vector.load %arg13[%c0_435, %c0_436, %c0_437] : memref<3x64x64xbf16, #tpu.memory_space<vmem>>, vector<1x64x64xbf16>
    %399 = vector.shape_cast %398 : vector<1x64x64xbf16> to vector<64x64xbf16>
    %cst_438 = arith.constant dense<0.000000e+00> : vector<16x64xf32>
    %400 = tpu.matmul %397, %399, %cst_438 {dimension_numbers = #tpu.dot_dimension_numbers<[1], [0], [0], [1], [0, 0, 1, 1], [], []>} : vector<16x64xbf16>, vector<64x64xbf16>, vector<16x64xf32> -> vector<16x64xf32>
    %c0_439 = arith.constant 0 : index
    %c1_440 = arith.constant 1 : index
    %c0_441 = arith.constant 0 : index
    %401 = vector.load %arg26[%c0_439, %c1_440, %c0_441] : memref<8x34x128xf32, #tpu.memory_space<vmem>>, vector<8x2x64xf32>
    %402 = vector.shape_cast %401 : vector<8x2x64xf32> to vector<16x64xf32>
    %403 = arith.truncf %402 : vector<16x64xf32> to vector<16x64xbf16>
    %c1_442 = arith.constant 1 : index
    %c0_443 = arith.constant 0 : index
    %c0_444 = arith.constant 0 : index
    %404 = vector.load %arg13[%c1_442, %c0_443, %c0_444] : memref<3x64x64xbf16, #tpu.memory_space<vmem>>, vector<1x64x64xbf16>
    %405 = vector.shape_cast %404 : vector<1x64x64xbf16> to vector<64x64xbf16>
    %cst_445 = arith.constant dense<0.000000e+00> : vector<16x64xf32>
    %406 = tpu.matmul %403, %405, %cst_445 {dimension_numbers = #tpu.dot_dimension_numbers<[1], [0], [0], [1], [0, 0, 1, 1], [], []>} : vector<16x64xbf16>, vector<64x64xbf16>, vector<16x64xf32> -> vector<16x64xf32>
    %407 = arith.addf %400, %406 : vector<16x64xf32>
    %c0_446 = arith.constant 0 : index
    %c2_447 = arith.constant 2 : index
    %c0_448 = arith.constant 0 : index
    %408 = vector.load %arg26[%c0_446, %c2_447, %c0_448] : memref<8x34x128xf32, #tpu.memory_space<vmem>>, vector<8x2x64xf32>
    %409 = vector.shape_cast %408 : vector<8x2x64xf32> to vector<16x64xf32>
    %410 = arith.truncf %409 : vector<16x64xf32> to vector<16x64xbf16>
    %c2_449 = arith.constant 2 : index
    %c0_450 = arith.constant 0 : index
    %c0_451 = arith.constant 0 : index
    %411 = vector.load %arg13[%c2_449, %c0_450, %c0_451] : memref<3x64x64xbf16, #tpu.memory_space<vmem>>, vector<1x64x64xbf16>
    %412 = vector.shape_cast %411 : vector<1x64x64xbf16> to vector<64x64xbf16>
    %cst_452 = arith.constant dense<0.000000e+00> : vector<16x64xf32>
    %413 = tpu.matmul %410, %412, %cst_452 {dimension_numbers = #tpu.dot_dimension_numbers<[1], [0], [0], [1], [0, 0, 1, 1], [], []>} : vector<16x64xbf16>, vector<64x64xbf16>, vector<16x64xf32> -> vector<16x64xf32>
    %414 = arith.addf %407, %413 : vector<16x64xf32>
    %c11 = arith.constant 11 : index
    %c0_453 = arith.constant 0 : index
    %c0_454 = arith.constant 0 : index
    %415 = vector.load %arg15[%c11, %c0_453, %c0_454] : memref<13x1x128xf32, #tpu.memory_space<vmem>>, vector<1x1x128xf32>
    %416 = vector.shape_cast %415 : vector<1x1x128xf32> to vector<1x128xf32>
    %417 = vector.extract_strided_slice %416 {offsets = [0, 0], sizes = [1, 64], strides = [1, 1]} : vector<1x128xf32> to vector<1x64xf32>
    %418 = vector.broadcast %417 : vector<1x64xf32> to vector<16x64xf32>
    %419 = arith.addf %414, %418 : vector<16x64xf32>
    %cst_455 = arith.constant 0.000000e+00 : f32
    %420 = vector.broadcast %cst_455 : f32 to vector<16x64xf32>
    %421 = arith.maximumf %419, %420 : vector<16x64xf32>
    %422 = vector.shape_cast %421 : vector<16x64xf32> to vector<8x2x64xf32>
    %cst_456 = arith.constant 0.000000e+00 : f32
    %423 = vector.broadcast %cst_456 : f32 to vector<8x1x64xf32>
    %c0_457 = arith.constant 0 : index
    %c0_458 = arith.constant 0 : index
    %c0_459 = arith.constant 0 : index
    %424 = vector.load %arg26[%c0_457, %c0_458, %c0_459] : memref<8x34x128xf32, #tpu.memory_space<vmem>>, vector<8x1x64xf32>
    tpu.vector_store %arg26[%c0_457, %c0_458, %c0_459], %423 {strides = array<i32>} : memref<8x34x128xf32, #tpu.memory_space<vmem>>, vector<8x1x64xf32>,
    %cst_460 = arith.constant 0.000000e+00 : f32
    %425 = vector.broadcast %cst_460 : f32 to vector<8x1x64xf32>
    %c0_461 = arith.constant 0 : index
    %c3_462 = arith.constant 3 : index
    %c0_463 = arith.constant 0 : index
    %426 = vector.load %arg26[%c0_461, %c3_462, %c0_463] : memref<8x34x128xf32, #tpu.memory_space<vmem>>, vector<8x1x64xf32>
    tpu.vector_store %arg26[%c0_461, %c3_462, %c0_463], %425 {strides = array<i32>} : memref<8x34x128xf32, #tpu.memory_space<vmem>>, vector<8x1x64xf32>,
    %c0_464 = arith.constant 0 : index
    %c1_465 = arith.constant 1 : index
    %c0_466 = arith.constant 0 : index
    %427 = vector.load %arg26[%c0_464, %c1_465, %c0_466] : memref<8x34x128xf32, #tpu.memory_space<vmem>>, vector<8x2x64xf32>
    tpu.vector_store %arg26[%c0_464, %c1_465, %c0_466], %422 {strides = array<i32>} : memref<8x34x128xf32, #tpu.memory_space<vmem>>, vector<8x2x64xf32>,
    %c0_467 = arith.constant 0 : index
    %c0_468 = arith.constant 0 : index
    %c0_469 = arith.constant 0 : index
    %428 = vector.load %arg26[%c0_467, %c0_468, %c0_469] : memref<8x34x128xf32, #tpu.memory_space<vmem>>, vector<8x2x64xf32>
    %429 = vector.shape_cast %428 : vector<8x2x64xf32> to vector<16x64xf32>
    %430 = arith.truncf %429 : vector<16x64xf32> to vector<16x64xbf16>
    %c0_470 = arith.constant 0 : index
    %c0_471 = arith.constant 0 : index
    %c0_472 = arith.constant 0 : index
    %431 = vector.load %arg14[%c0_470, %c0_471, %c0_472] : memref<3x64x64xbf16, #tpu.memory_space<vmem>>, vector<1x64x64xbf16>
    %432 = vector.shape_cast %431 : vector<1x64x64xbf16> to vector<64x64xbf16>
    %cst_473 = arith.constant dense<0.000000e+00> : vector<16x64xf32>
    %433 = tpu.matmul %430, %432, %cst_473 {dimension_numbers = #tpu.dot_dimension_numbers<[1], [0], [0], [1], [0, 0, 1, 1], [], []>} : vector<16x64xbf16>, vector<64x64xbf16>, vector<16x64xf32> -> vector<16x64xf32>
    %c0_474 = arith.constant 0 : index
    %c1_475 = arith.constant 1 : index
    %c0_476 = arith.constant 0 : index
    %434 = vector.load %arg26[%c0_474, %c1_475, %c0_476] : memref<8x34x128xf32, #tpu.memory_space<vmem>>, vector<8x2x64xf32>
    %435 = vector.shape_cast %434 : vector<8x2x64xf32> to vector<16x64xf32>
    %436 = arith.truncf %435 : vector<16x64xf32> to vector<16x64xbf16>
    %c1_477 = arith.constant 1 : index
    %c0_478 = arith.constant 0 : index
    %c0_479 = arith.constant 0 : index
    %437 = vector.load %arg14[%c1_477, %c0_478, %c0_479] : memref<3x64x64xbf16, #tpu.memory_space<vmem>>, vector<1x64x64xbf16>
    %438 = vector.shape_cast %437 : vector<1x64x64xbf16> to vector<64x64xbf16>
    %cst_480 = arith.constant dense<0.000000e+00> : vector<16x64xf32>
    %439 = tpu.matmul %436, %438, %cst_480 {dimension_numbers = #tpu.dot_dimension_numbers<[1], [0], [0], [1], [0, 0, 1, 1], [], []>} : vector<16x64xbf16>, vector<64x64xbf16>, vector<16x64xf32> -> vector<16x64xf32>
    %440 = arith.addf %433, %439 : vector<16x64xf32>
    %c0_481 = arith.constant 0 : index
    %c2_482 = arith.constant 2 : index
    %c0_483 = arith.constant 0 : index
    %441 = vector.load %arg26[%c0_481, %c2_482, %c0_483] : memref<8x34x128xf32, #tpu.memory_space<vmem>>, vector<8x2x64xf32>
    %442 = vector.shape_cast %441 : vector<8x2x64xf32> to vector<16x64xf32>
    %443 = arith.truncf %442 : vector<16x64xf32> to vector<16x64xbf16>
    %c2_484 = arith.constant 2 : index
    %c0_485 = arith.constant 0 : index
    %c0_486 = arith.constant 0 : index
    %444 = vector.load %arg14[%c2_484, %c0_485, %c0_486] : memref<3x64x64xbf16, #tpu.memory_space<vmem>>, vector<1x64x64xbf16>
    %445 = vector.shape_cast %444 : vector<1x64x64xbf16> to vector<64x64xbf16>
    %cst_487 = arith.constant dense<0.000000e+00> : vector<16x64xf32>
    %446 = tpu.matmul %443, %445, %cst_487 {dimension_numbers = #tpu.dot_dimension_numbers<[1], [0], [0], [1], [0, 0, 1, 1], [], []>} : vector<16x64xbf16>, vector<64x64xbf16>, vector<16x64xf32> -> vector<16x64xf32>
    %447 = arith.addf %440, %446 : vector<16x64xf32>
    %c12 = arith.constant 12 : index
    %c0_488 = arith.constant 0 : index
    %c0_489 = arith.constant 0 : index
    %448 = vector.load %arg15[%c12, %c0_488, %c0_489] : memref<13x1x128xf32, #tpu.memory_space<vmem>>, vector<1x1x128xf32>
    %449 = vector.shape_cast %448 : vector<1x1x128xf32> to vector<1x128xf32>
    %450 = vector.extract_strided_slice %449 {offsets = [0, 0], sizes = [1, 64], strides = [1, 1]} : vector<1x128xf32> to vector<1x64xf32>
    %451 = vector.broadcast %450 : vector<1x64xf32> to vector<16x64xf32>
    %452 = arith.addf %447, %451 : vector<16x64xf32>
    %cst_490 = arith.constant 0.000000e+00 : f32
    %453 = vector.broadcast %cst_490 : f32 to vector<16x64xf32>
    %454 = arith.maximumf %452, %453 : vector<16x64xf32>
    %455 = arith.truncf %454 : vector<16x64xf32> to vector<16x64xbf16>
    %c0_491 = arith.constant 0 : index
    %c0_492 = arith.constant 0 : index
    %c0_493 = arith.constant 0 : index
    %456 = vector.load %arg20[%c0_491, %c0_492, %c0_493] : memref<2x64x32xbf16, #tpu.memory_space<vmem>>, vector<1x64x32xbf16>
    %457 = vector.shape_cast %456 : vector<1x64x32xbf16> to vector<64x32xbf16>
    %cst_494 = arith.constant dense<0.000000e+00> : vector<16x32xf32>
    %458 = tpu.matmul %455, %457, %cst_494 {dimension_numbers = #tpu.dot_dimension_numbers<[1], [0], [0], [1], [0, 0, 1, 1], [], []>} : vector<16x64xbf16>, vector<64x32xbf16>, vector<16x32xf32> -> vector<16x32xf32>
    %c1_495 = arith.constant 1 : index
    %c0_496 = arith.constant 0 : index
    %c0_497 = arith.constant 0 : index
    %459 = vector.load %arg20[%c1_495, %c0_496, %c0_497] : memref<2x64x32xbf16, #tpu.memory_space<vmem>>, vector<1x64x32xbf16>
    %460 = vector.shape_cast %459 : vector<1x64x32xbf16> to vector<64x32xbf16>
    %cst_498 = arith.constant dense<0.000000e+00> : vector<16x32xf32>
    %461 = tpu.matmul %455, %460, %cst_498 {dimension_numbers = #tpu.dot_dimension_numbers<[1], [0], [0], [1], [0, 0, 1, 1], [], []>} : vector<16x64xbf16>, vector<64x32xbf16>, vector<16x32xf32> -> vector<16x32xf32>
    %462 = arith.maximumf %458, %461 : vector<16x32xf32>
    %463 = vector.shape_cast %462 : vector<16x32xf32> to vector<8x1x2x32xf32>
    %cst_499 = arith.constant dense<0xFF800000> : vector<8x1x32xf32>
    %464 = vector.multi_reduction <maximumf>, %463, %cst_499 [2] : vector<8x1x2x32xf32> to vector<8x1x32xf32>
    %465 = vector.shape_cast %464 : vector<8x1x32xf32> to vector<8x32xf32>
    %c0_500 = arith.constant 0 : index
    %c0_501 = arith.constant 0 : index
    %466 = vector.load %arg24[%c0_500, %c0_501] : memref<8x32xf32, #tpu.memory_space<vmem>>, vector<8x32xf32>
    tpu.vector_store %arg24[%c0_500, %c0_501], %465 {strides = array<i32>} : memref<8x32xf32, #tpu.memory_space<vmem>>, vector<8x32xf32>,
    %467 = arith.truncf %465 : vector<8x32xf32> to vector<8x32xbf16>
    %c0_502 = arith.constant 0 : index
    %c0_503 = arith.constant 0 : index
    %468 = vector.load %arg21[%c0_502, %c0_503] : memref<32x128xbf16, #tpu.memory_space<vmem>>, vector<32x128xbf16>
    %cst_504 = arith.constant dense<0.000000e+00> : vector<8x128xf32>
    %469 = tpu.matmul %467, %468, %cst_504 {dimension_numbers = #tpu.dot_dimension_numbers<[1], [0], [0], [1], [0, 0, 1, 1], [], []>} : vector<8x32xbf16>, vector<32x128xbf16>, vector<8x128xf32> -> vector<8x128xf32>
    %c0_505 = arith.constant 0 : index
    %c0_506 = arith.constant 0 : index
    %c0_507 = arith.constant 0 : index
    %470 = vector.load %arg23[%c0_505, %c0_506, %c0_507] : memref<2x1x128xf32, #tpu.memory_space<vmem>>, vector<1x1x128xf32>
    %471 = vector.shape_cast %470 : vector<1x1x128xf32> to vector<1x128xf32>
    %472 = vector.broadcast %471 : vector<1x128xf32> to vector<8x128xf32>
    %473 = arith.addf %469, %472 : vector<8x128xf32>
    %cst_508 = arith.constant 0.000000e+00 : f32
    %474 = vector.broadcast %cst_508 : f32 to vector<8x128xf32>
    %475 = arith.maximumf %473, %474 : vector<8x128xf32>
    %476 = arith.truncf %475 : vector<8x128xf32> to vector<8x128xbf16>
    %c0_509 = arith.constant 0 : index
    %c0_510 = arith.constant 0 : index
    %477 = vector.load %arg22[%c0_509, %c0_510] : memref<128x128xbf16, #tpu.memory_space<vmem>>, vector<128x128xbf16>
    %cst_511 = arith.constant dense<0.000000e+00> : vector<8x128xf32>
    %478 = tpu.matmul %476, %477, %cst_511 {dimension_numbers = #tpu.dot_dimension_numbers<[1], [0], [0], [1], [0, 0, 1, 1], [], []>} : vector<8x128xbf16>, vector<128x128xbf16>, vector<8x128xf32> -> vector<8x128xf32>
    %c1_512 = arith.constant 1 : index
    %c0_513 = arith.constant 0 : index
    %c0_514 = arith.constant 0 : index
    %479 = vector.load %arg23[%c1_512, %c0_513, %c0_514] : memref<2x1x128xf32, #tpu.memory_space<vmem>>, vector<1x1x128xf32>
    %480 = vector.shape_cast %479 : vector<1x1x128xf32> to vector<1x128xf32>
    %481 = vector.broadcast %480 : vector<1x128xf32> to vector<8x128xf32>
    %482 = arith.addf %478, %481 : vector<8x128xf32>
    %cst_515 = arith.constant 0.000000e+00 : f32
    %483 = vector.broadcast %cst_515 : f32 to vector<8x128xf32>
    %484 = arith.maximumf %482, %483 : vector<8x128xf32>
    %c0_516 = arith.constant 0 : index
    %c0_517 = arith.constant 0 : index
    %485 = vector.load %arg25[%c0_516, %c0_517] : memref<8x128xf32, #tpu.memory_space<vmem>>, vector<8x128xf32>
    tpu.vector_store %arg25[%c0_516, %c0_517], %484 {strides = array<i32>} : memref<8x128xf32, #tpu.memory_space<vmem>>, vector<8x128xf32>,
    return
  }
  func.func @transform_0(%arg0: i32) -> (i32, i32, i32) {
    %c0_i32 = arith.constant 0 : i32
    %c0_i32_0 = arith.constant 0 : i32
    %c0_i32_1 = arith.constant 0 : i32
    return %arg0, %c0_i32, %c0_i32_0 : i32, i32, i32
  }
  func.func @transform_1(%arg0: i32) -> (i32, i32, i32) {
    %c0_i32 = arith.constant 0 : i32
    %c0_i32_0 = arith.constant 0 : i32
    %c0_i32_1 = arith.constant 0 : i32
    %c0_i32_2 = arith.constant 0 : i32
    return %c0_i32, %c0_i32_0, %c0_i32_1 : i32, i32, i32
  }
  func.func @transform_2(%arg0: i32) -> (i32, i32, i32) {
    %c0_i32 = arith.constant 0 : i32
    %c0_i32_0 = arith.constant 0 : i32
    %c0_i32_1 = arith.constant 0 : i32
    %c0_i32_2 = arith.constant 0 : i32
    return %c0_i32, %c0_i32_0, %c0_i32_1 : i32, i32, i32
  }
  func.func @transform_3(%arg0: i32) -> (i32, i32, i32) {
    %c0_i32 = arith.constant 0 : i32
    %c0_i32_0 = arith.constant 0 : i32
    %c0_i32_1 = arith.constant 0 : i32
    %c0_i32_2 = arith.constant 0 : i32
    return %c0_i32, %c0_i32_0, %c0_i32_1 : i32, i32, i32
  }
  func.func @transform_4(%arg0: i32) -> (i32, i32, i32) {
    %c0_i32 = arith.constant 0 : i32
    %c0_i32_0 = arith.constant 0 : i32
    %c0_i32_1 = arith.constant 0 : i32
    %c0_i32_2 = arith.constant 0 : i32
    return %c0_i32, %c0_i32_0, %c0_i32_1 : i32, i32, i32
  }
  func.func @transform_5(%arg0: i32) -> (i32, i32, i32) {
    %c0_i32 = arith.constant 0 : i32
    %c0_i32_0 = arith.constant 0 : i32
    %c0_i32_1 = arith.constant 0 : i32
    %c0_i32_2 = arith.constant 0 : i32
    return %c0_i32, %c0_i32_0, %c0_i32_1 : i32, i32, i32
  }
  func.func @transform_6(%arg0: i32) -> (i32, i32, i32) {
    %c0_i32 = arith.constant 0 : i32
    %c0_i32_0 = arith.constant 0 : i32
    %c0_i32_1 = arith.constant 0 : i32
    %c0_i32_2 = arith.constant 0 : i32
    return %c0_i32, %c0_i32_0, %c0_i32_1 : i32, i32, i32
  }
  func.func @transform_7(%arg0: i32) -> (i32, i32, i32) {
    %c0_i32 = arith.constant 0 : i32
    %c0_i32_0 = arith.constant 0 : i32
    %c0_i32_1 = arith.constant 0 : i32
    %c0_i32_2 = arith.constant 0 : i32
    return %c0_i32, %c0_i32_0, %c0_i32_1 : i32, i32, i32
  }
  func.func @transform_8(%arg0: i32) -> (i32, i32, i32) {
    %c0_i32 = arith.constant 0 : i32
    %c0_i32_0 = arith.constant 0 : i32
    %c0_i32_1 = arith.constant 0 : i32
    %c0_i32_2 = arith.constant 0 : i32
    return %c0_i32, %c0_i32_0, %c0_i32_1 : i32, i32, i32
  }
  func.func @transform_9(%arg0: i32) -> (i32, i32, i32) {
    %c0_i32 = arith.constant 0 : i32
    %c0_i32_0 = arith.constant 0 : i32
    %c0_i32_1 = arith.constant 0 : i32
    %c0_i32_2 = arith.constant 0 : i32
    return %c0_i32, %c0_i32_0, %c0_i32_1 : i32, i32, i32
  }
  func.func @transform_10(%arg0: i32) -> (i32, i32, i32) {
    %c0_i32 = arith.constant 0 : i32
    %c0_i32_0 = arith.constant 0 : i32
    %c0_i32_1 = arith.constant 0 : i32
    %c0_i32_2 = arith.constant 0 : i32
    return %c0_i32, %c0_i32_0, %c0_i32_1 : i32, i32, i32
  }
  func.func @transform_11(%arg0: i32) -> (i32, i32, i32) {
    %c0_i32 = arith.constant 0 : i32
    %c0_i32_0 = arith.constant 0 : i32
    %c0_i32_1 = arith.constant 0 : i32
    %c0_i32_2 = arith.constant 0 : i32
    return %c0_i32, %c0_i32_0, %c0_i32_1 : i32, i32, i32
  }
  func.func @transform_12(%arg0: i32) -> (i32, i32, i32) {
    %c0_i32 = arith.constant 0 : i32
    %c0_i32_0 = arith.constant 0 : i32
    %c0_i32_1 = arith.constant 0 : i32
    %c0_i32_2 = arith.constant 0 : i32
    return %c0_i32, %c0_i32_0, %c0_i32_1 : i32, i32, i32
  }
  func.func @transform_13(%arg0: i32) -> (i32, i32, i32) {
    %c0_i32 = arith.constant 0 : i32
    %c0_i32_0 = arith.constant 0 : i32
    %c0_i32_1 = arith.constant 0 : i32
    %c0_i32_2 = arith.constant 0 : i32
    return %c0_i32, %c0_i32_0, %c0_i32_1 : i32, i32, i32
  }
  func.func @transform_14(%arg0: i32) -> (i32, i32, i32) {
    %c0_i32 = arith.constant 0 : i32
    %c0_i32_0 = arith.constant 0 : i32
    %c0_i32_1 = arith.constant 0 : i32
    %c0_i32_2 = arith.constant 0 : i32
    return %c0_i32, %c0_i32_0, %c0_i32_1 : i32, i32, i32
  }
  func.func @transform_15(%arg0: i32) -> (i32, i32, i32) {
    %c0_i32 = arith.constant 0 : i32
    %c0_i32_0 = arith.constant 0 : i32
    %c0_i32_1 = arith.constant 0 : i32
    %c0_i32_2 = arith.constant 0 : i32
    return %c0_i32, %c0_i32_0, %c0_i32_1 : i32, i32, i32
  }
  func.func @transform_16(%arg0: i32) -> (i32, i32, i32) {
    %c0_i32 = arith.constant 0 : i32
    %c0_i32_0 = arith.constant 0 : i32
    %c0_i32_1 = arith.constant 0 : i32
    %c0_i32_2 = arith.constant 0 : i32
    return %c0_i32, %c0_i32_0, %c0_i32_1 : i32, i32, i32
  }
  func.func @transform_17(%arg0: i32) -> (i32, i32, i32) {
    %c0_i32 = arith.constant 0 : i32
    %c0_i32_0 = arith.constant 0 : i32
    %c0_i32_1 = arith.constant 0 : i32
    %c0_i32_2 = arith.constant 0 : i32
    return %c0_i32, %c0_i32_0, %c0_i32_1 : i32, i32, i32
  }
  func.func @transform_18(%arg0: i32) -> (i32, i32, i32) {
    %c0_i32 = arith.constant 0 : i32
    %c0_i32_0 = arith.constant 0 : i32
    %c0_i32_1 = arith.constant 0 : i32
    %c0_i32_2 = arith.constant 0 : i32
    return %c0_i32, %c0_i32_0, %c0_i32_1 : i32, i32, i32
  }
  func.func @transform_19(%arg0: i32) -> (i32, i32, i32) {
    %c0_i32 = arith.constant 0 : i32
    %c0_i32_0 = arith.constant 0 : i32
    %c0_i32_1 = arith.constant 0 : i32
    %c0_i32_2 = arith.constant 0 : i32
    return %c0_i32, %c0_i32_0, %c0_i32_1 : i32, i32, i32
  }
  func.func @transform_20(%arg0: i32) -> (i32, i32) {
    %c0_i32 = arith.constant 0 : i32
    %c0_i32_0 = arith.constant 0 : i32
    %c0_i32_1 = arith.constant 0 : i32
    return %c0_i32, %c0_i32_0 : i32, i32
  }
  func.func @transform_21(%arg0: i32) -> (i32, i32) {
    %c0_i32 = arith.constant 0 : i32
    %c0_i32_0 = arith.constant 0 : i32
    %c0_i32_1 = arith.constant 0 : i32
    return %c0_i32, %c0_i32_0 : i32, i32
  }
  func.func @transform_22(%arg0: i32) -> (i32, i32, i32) {
    %c0_i32 = arith.constant 0 : i32
    %c0_i32_0 = arith.constant 0 : i32
    %c0_i32_1 = arith.constant 0 : i32
    %c0_i32_2 = arith.constant 0 : i32
    return %c0_i32, %c0_i32_0, %c0_i32_1 : i32, i32, i32
  }
  func.func @transform_23(%arg0: i32) -> (i32, i32) {
    %c0_i32 = arith.constant 0 : i32
    %c0_i32_0 = arith.constant 0 : i32
    return %arg0, %c0_i32 : i32, i32
  }
  func.func @transform_24(%arg0: i32) -> (i32, i32) {
    %c0_i32 = arith.constant 0 : i32
    %c0_i32_0 = arith.constant 0 : i32
    return %arg0, %c0_i32 : i32, i32
  }
}

</mosaic_0001>

<bundles_post_ra>
// kernel: vgg16_modified_forward.1
= control target key start
LH: loop header
LB: loop body
LE: loop exit
PB: predicated region body
PF: predicated region fallthrough
CT: control target
= control target key end

     0   :  { %s20111_s0 = inlined_call_operand.vmem [shape: f32[16,32,96], index: 0, kind: input, shape index: {}]   ;;  %s20112_s1 = inlined_call_operand.vmem [shape: bf16[3,96,128], index: 1, kind: input, shape index: {}]   ;;  %s20113_s2 = inlined_call_operand.vmem [shape: bf16[3,128,128], index: 2, kind: input, shape index: {}]   ;;  %s20114_s3 = inlined_call_operand.vmem [shape: bf16[3,64,128], index: 3, kind: input, shape index: {}]   ;;  %s20115_s4 = inlined_call_operand.vmem [shape: bf16[3,128,128], index: 4, kind: input, shape index: {}]   ;;  %s20116_s5 = inlined_call_operand.vmem [shape: bf16[3,64,128], index: 5, kind: input, shape index: {}]   ;;  %s20117_s6 = inlined_call_operand.vmem [shape: bf16[3,128,128], index: 6, kind: input, shape index: {}]   ;;  %s20118_s7 = inlined_call_operand.vmem [shape: bf16[3,128,128], index: 7, kind: input, shape index: {}]   ;;  %s20119_s8 = inlined_call_operand.vmem [shape: bf16[3,64,128], index: 8, kind: input, shape index: {}]   ;;  %s20120_s9 = inlined_call_operand.vmem [shape: bf16[3,128,128], index: 9, kind: input, shape index: {}]   ;;  %s20121_s10 = inlined_call_operand.vmem [shape: bf16[3,128,128], index: 10, kind: input, shape index: {}]   ;;  %s20122_s11 = inlined_call_operand.vmem [shape: bf16[3,64,64], index: 11, kind: input, shape index: {}]   ;;  %s20123_s12 = inlined_call_operand.vmem [shape: bf16[3,64,64], index: 12, kind: input, shape index: {}]   ;;  %s20124_s13 = inlined_call_operand.vmem [shape: bf16[3,64,64], index: 13, kind: input, shape index: {}]   ;;  %s20125_s14 = inlined_call_operand.vmem [shape: f32[13,1,128], index: 14, kind: input, shape index: {}]   ;;  %s20126_s15 = inlined_call_operand.vmem [shape: bf16[2,128,64], index: 15, kind: input, shape index: {}]   ;;  %s20127_s16 = inlined_call_operand.vmem [shape: bf16[2,128,64], index: 16, kind: input, shape index: {}]   ;;  %s20128_s17 = inlined_call_operand.vmem [shape: bf16[2,128,64], index: 17, kind: input, shape index: {}]   ;;  %s20129_s18 = inlined_call_operand.vmem [shape: bf16[2,128,64], index: 18, kind: input, shape index: {}]   ;;  %s20130_s19 = inlined_call_operand.vmem [shape: bf16[2,64,32], index: 19, kind: input, shape index: {}]   ;;  %s20131_s20 = inlined_call_operand.vmem [shape: bf16[32,128], index: 20, kind: input, shape index: {}]   ;;  %s20132_s21 = inlined_call_operand.vmem [shape: bf16[128,128], index: 21, kind: input, shape index: {}]   ;;  %s20133_s22 = inlined_call_operand.vmem [shape: f32[2,1,128], index: 22, kind: input, shape index: {}]   ;;  %s20134_s23 = inlined_call_operand.hbm [shape: f32[16,32], index: 23, kind: output, shape index: {0}]   ;;  %s20135_s24 = inlined_call_operand.hbm [shape: f32[16,128], index: 24, kind: output, shape index: {1}]  }
   0x1   :  { %20162 = sst [smem:[#allocation17_spill]] %s20111_s0 }
   0x2   :  { %20163 = sst [smem:[#allocation18_spill]] %s20112_s1 }
   0x3   :  { %20164 = sst [smem:[#allocation19_spill]] %s20113_s2 }
   0x4   :  { %20165 = sst [smem:[#allocation20_spill]] %s20114_s3 }
   0x5   :  { %20166 = sst [smem:[#allocation21_spill]] %s20115_s4 }
   0x6   :  { %20167 = sst [smem:[#allocation22_spill]] %s20116_s5 }
   0x7   :  { %20168 = sst [smem:[#allocation23_spill]] %s20117_s6 }
   0x8   :  { %20169 = sst [smem:[#allocation24_spill]] %s20118_s7 }
   0x9   :  { %20170 = sst [smem:[#allocation25_spill]] %s20119_s8 }
   0xa   :  { %20171 = sst [smem:[#allocation26_spill]] %s20120_s9 }
   0xb   :  { %20172 = sst [smem:[#allocation27_spill]] %s20121_s10 }
   0xc   :  { %20173 = sst [smem:[#allocation28_spill]] %s20122_s11 }
   0xd   :  { %20174 = sst [smem:[#allocation29_spill]] %s20135_s24 }
   0xe   :  { %30 = vsyncpa [#allocation4], 0 }
   0xf   :  { %32 = vsyncpa [#allocation4 + $0x1], 0 }
  0x10   :  { %33 = vsyncpa [#allocation6], 0 }
  0x11   :  { %35 = vsyncpa [#allocation6 + $0x1], 0  ;;  %s16938_s5 = smov 0   ;;  %s16940_s26 = smov 0  }
  0x12   :  { %s16942_s27 = smov 0   ;;  %s16944_s28 = smov 0  }
  0x13 LB: > { %20175 = sst [smem:[#allocation9_spill]] %s16794_s5  ;;  %s16959_s6 = sadd.s32 4294967295, %s16806_s28   ;;  %s16806_s28 = sphi %s16944_s28, %s20212_s28   ;;  %s16802_s27 = sphi %s16942_s27, %s20214_s27   ;;  %s16798_s26 = sphi %s16940_s26, %s20216_s26   ;;  %s16794_s5 = sphi %s16938_s5, %s20215_s5  }
  0x14   : > { %20176 = sst [smem:[#allocation10_spill]] %s16802_s27  ;;  %s13631_s2 = sadd.s32 4294967294, %s16806_s28  }
  0x15   : > { %20177 = sst [smem:[#allocation11_spill]] %s16806_s28  ;;  %s16963_s29 = sadd.s32 1, %s16806_s28  }
  0x16   : > { %20178 = sst [smem:[#allocation12_spill]] %s16963_s29  ;;  %s536_s0 = sadd.s32 1, %s16802_s27 }
  0x17   : > { %s533_s7 = ssub.s32 %s16806_s28, %s16963_s29  ;;  %p546_p0 = scmp.ne.s32.totalorder %s16802_s27, %s16798_s26 }
  0x18   : > { %p534_p1 = scmp.eq.s32.totalorder %s533_s7, 0  ;;  %p547_p2 = scmp.eq.s32.totalorder %s16959_s6, 1 }
  0x19   : > { %p552_p3 = scmp.ne.s32.totalorder %s16798_s26, %s16794_s5  ;;  %p553_p4 = scmp.eq.s32.totalorder %s13631_s2, 1 }
  0x1a   : > { %s16974_s30 = scalar_select %p534_p1, %s16802_s27, %s536_s0  }
  0x1b   : > { %p16976_p5 = por %p547_p2, %p546_p0  ;;  %p16980_p6 = por %p553_p4, %p552_p3 }
  0x1c   : > { %20179 = sst [smem:[#allocation13_spill]] %s16974_s30  ;;  %p13634_p7 = scmp.ge.s32.totalorder %s16806_s28, 1 }
  0x1d   : > { %s20181_s25 = scalar_select %p16980_p6, 1, 0 }
  0x1e   : > { %p673_p8 = scmp.lt.s32.totalorder %s16806_s28, 3 }
  0x1f   : > { %20182 = sst [smem:[#allocation14_spill]] %s20181_s25 }
  0x20   : > { %p674_p9 = pnand %p13634_p7, %p673_p8 }
  0x22   : > { %677 = sbr.rel (%p674_p9) target bundleno = 5271 (0x1497), region = 112 }
  0x27   : > { %s20183_s1 = sld [smem:[#allocation18_spill]]  ;;  %s13637_s2 = sshll.u32 %s16959_s6, 3  ;;  %vm785_vm0 = vcmask 778240   ;;  %v20151_v6 = vmov 0.0   ;;  %vm802_vm1 = vcmask 785408   ;;  %vm4928_vm2 = vcmask 516096  }
  0x28   : > { %p746_p10 = scmp.lt.s32.totalorder %s13637_s2, 15  ;;  %786 = vst.msk [vmem:[#allocation2] sm:$0x1] %vm785_vm0, %v20151_v6  ;;  %787 = vst.msk [vmem:[#allocation2 + $0x28] sm:$0x1] %vm785_vm0, %v20151_v6  ;;  %s20184_s7 = sld [smem:[#allocation17_spill]] }
  0x29   : > { %788 = vst.msk [vmem:[#allocation2 + $0x50] sm:$0x1] %vm785_vm0, %v20151_v6  ;;  %789 = vst.msk [vmem:[#allocation2 + $0x78] sm:$0x1] %vm785_vm0, %v20151_v6  ;;  %s20185_s4 = sld [smem:[#allocation19_spill]]  ;;  %vm4031_vm3 = vcmask 517120  }
  0x2a   : > { %s20218_s2 = smov (!%p746_p10, %s13637_s2), 15  ;;  %790 = vst.msk [vmem:[#allocation2 + $0xa0] sm:$0x1] %vm785_vm0, %v20151_v6  ;;  %791 = vst.msk [vmem:[#allocation2 + $0xc8] sm:$0x1] %vm785_vm0, %v20151_v6  ;;  %s20195_s30 = sld [smem:[#allocation20_spill]] }
  0x2b   : > { %792 = vst.msk [vmem:[#allocation2 + $0xf0] sm:$0x1] %vm785_vm0, %v20151_v6  ;;  %793 = vst.msk [vmem:[#allocation2 + $0x118] sm:$0x1] %vm785_vm0, %v20151_v6  ;;  %s14476_s27 = sshll.u32 %s20218_s2, 5  ;;  %vm5073_vm4 = vcmask 1041409  }
  0x2c   : > { %794 = vst.msk [vmem:[#allocation2 + $0x21] sm:$0x1] %vm785_vm0, %v20151_v6  ;;  %795 = vst.msk [vmem:[#allocation2 + $0x49] sm:$0x1] %vm785_vm0, %v20151_v6  ;;  %vm5075_vm5 = vcmask 1042434   ;;  %vm5077_vm6 = vcmask 1043459  }
  0x2d   : > { %v16327_v0 = vld [vmem:[%s20183_s1 + $0x58] sm:$0xff]   ;;  %v16328_v1 = vld [vmem:[%s20183_s1 + $0x28] sm:$0xff]   ;;  %v16329_v2 = vld [vmem:[%s20183_s1 + $0x50] sm:$0xff]   ;;  %796 = vst.msk [vmem:[#allocation2 + $0x71] sm:$0x1] %vm785_vm0, %v20151_v6  ;;  %vm5079_vm7 = vcmask 1044484  }
  0x2e   : > { %15064 = vmatprep.subr.bf16.mxu0 %v16327_v0  ;;  %15108 = vmatprep.subr.bf16.mxu1 %v16328_v1  ;;  %v16330_v3 = vld [vmem:[%s20183_s1 + $0x20] sm:$0xff]   ;;  %v16331_v4 = vld [vmem:[%s20183_s1 + $0x48] sm:$0xff]   ;;  %v16332_v5 = vld [vmem:[%s20183_s1 + $0x18] sm:$0xff]   ;;  %797 = vst.msk [vmem:[#allocation2 + $0x99] sm:$0x1] %vm785_vm0, %v20151_v6  ;;  %s17049_s5 = scalar_lea.vmem %s20184_s7, %s14476_s27  ;;  %vm5081_vm8 = vcmask 1045509  }
  0x2f   : > { %15065 = vmatpush3.bf16.msra.mxu0 %v16327_v0  ;;  %15109 = vmatpush3.bf16.msra.mxu1 %v16328_v1  ;;  %798 = vst.msk [vmem:[#allocation2 + $0xc1] sm:$0x1] %vm785_vm0, %v20151_v6  ;;  %799 = vst.msk [vmem:[#allocation2 + $0xe9] sm:$0x1] %vm785_vm0, %v20151_v6  ;;  %v16333_v7 = vld [vmem:[%s20183_s1 + $0x40] sm:$0xff]   ;;  %v16334_v8 = vld [vmem:[%s20183_s1 + $0x10] sm:$0xff]  }
  0x30   : > { %15066 = vmatprep.subr.bf16.mxu0 %v16329_v2  ;;  %15110 = vmatprep.subr.bf16.mxu1 %v16330_v3  ;;  %800 = vst.msk [vmem:[#allocation2 + $0x111] sm:$0x1] %vm785_vm0, %v20151_v6  ;;  %801 = vst.msk [vmem:[#allocation2 + $0x139] sm:$0x1] %vm785_vm0, %v20151_v6  ;;  %v16335_v9 = vld [vmem:[%s20183_s1 + $0x38] sm:$0xff]   ;;  %v16336_v10 = vld [vmem:[%s20183_s1 + $0x8] sm:$0xff]  }
  0x31   : > { %v753_v11 = vld [vmem:[%s17049_s5] sm:$0xff]  ;;  %v754_v12 = vld [vmem:[%s17049_s5 + $0x8] sm:$0xff]  ;;  %v755_v13 = vld [vmem:[%s17049_s5 + $0x10] sm:$0xff]  ;;  %vm5083_vm9 = vcmask 1046534   ;;  %vm5085_vm10 = vcmask 1047559   ;;  %vm5208_vm11 = vcmask 523264  }
  0x32   : > { %803 = vst.msk [vmem:[#allocation2 + $0x1] sm:$0xff] %vm802_vm1, %v753_v11  ;;  %804 = vst.msk [vmem:[#allocation2 + $0x9] sm:$0xff] %vm802_vm1, %v754_v12  ;;  %v756_v14 = vld [vmem:[%s17049_s5 + $0x18] sm:$0xff]  ;;  %v16337_v15 = vld [vmem:[%s20183_s1 + $0x30] sm:$0xff]   ;;  %s20197_s7 = sld [smem:[#allocation21_spill]]  ;;  %vm9868_vm12 = vcmask 519168  }
  0x33   : > { %15067 = vmatpush3.bf16.msra.mxu0 %v16329_v2  ;;  %15111 = vmatpush3.bf16.msra.mxu1 %v16330_v3  ;;  %805 = vst.msk [vmem:[#allocation2 + $0x11] sm:$0xff] %vm802_vm1, %v755_v13  ;;  %806 = vst.msk [vmem:[#allocation2 + $0x19] sm:$0xff] %vm802_vm1, %v756_v14  ;;  %v757_v16 = vld [vmem:[%s17049_s5 + $0x20] sm:$0xff]  ;;  %v758_v17 = vld [vmem:[%s17049_s5 + $0x28] sm:$0xff]  ;;  %s20198_s28 = sld [smem:[#allocation22_spill]]  ;;  %vm16810_vm13 = vmmov 0  }
  0x34   : > { %15068 = vmatprep.subr.bf16.mxu0 %v16331_v4  ;;  %15112 = vmatprep.subr.bf16.mxu1 %v16332_v5  ;;  %807 = vst.msk [vmem:[#allocation2 + $0x29] sm:$0xff] %vm802_vm1, %v757_v16  ;;  %808 = vst.msk [vmem:[#allocation2 + $0x31] sm:$0xff] %vm802_vm1, %v758_v17  ;;  %v759_v18 = vld [vmem:[%s17049_s5 + $0x30] sm:$0xff]  ;;  %v760_v19 = vld [vmem:[%s17049_s5 + $0x38] sm:$0xff]  ;;  %s20200_s8 = sld [smem:[#allocation23_spill]]  ;;  %vm13219_vm14 = vcmask 254976  }
  0x35   : > { %v16338_v20 = vld [vmem:[%s20183_s1] sm:$0xff]   ;;  %809 = vst.msk [vmem:[#allocation2 + $0x39] sm:$0xff] %vm802_vm1, %v759_v18  ;;  %810 = vst.msk [vmem:[#allocation2 + $0x41] sm:$0xff] %vm802_vm1, %v760_v19  ;;  %v762_v22 = vld [vmem:[%s17049_s5 + $0x48] sm:$0xff]  ;;  %s20202_s2 = sld [smem:[#allocation25_spill]]  ;;  %s19981_s27 = sand.u32 1, %s16798_s26  }
  0x36   : > { %v761_v21 = vld [vmem:[%s17049_s5 + $0x40] sm:$0xff]  ;;  %v763_v23 = vld [vmem:[%s17049_s5 + $0x50] sm:$0xff]  ;;  %v764_v24 = vld [vmem:[%s17049_s5 + $0x58] sm:$0xff]  ;;  %812 = vst.msk [vmem:[#allocation2 + $0x59] sm:$0xff] %vm802_vm1, %v762_v22  ;;  %s20203_s9 = sld [smem:[#allocation26_spill]]  ;;  %vm13292_vm15 = vcmask 261120  }
  0x37   : > { %15069 = vmatpush3.bf16.msra.mxu0 %v16331_v4  ;;  %15113 = vmatpush3.bf16.msra.mxu1 %v16332_v5  ;;  %811 = vst.msk [vmem:[#allocation2 + $0x51] sm:$0xff] %vm802_vm1, %v761_v21  ;;  %813 = vst.msk [vmem:[#allocation2 + $0x61] sm:$0xff] %vm802_vm1, %v763_v23  ;;  %v765_v25 = vld [vmem:[%s17049_s5 + $0x60] sm:$0xff]  ;;  %v766_v26 = vld [vmem:[%s17049_s5 + $0x68] sm:$0xff]  ;;  %s20204_s10 = sld [smem:[#allocation27_spill]]  ;;  %s20161_s24 = sshll.u32 %s16959_s6, 7 }
  0x38   : > { %15070 = vmatprep.subr.bf16.mxu0 %v16333_v7  ;;  %15114 = vmatprep.subr.bf16.mxu1 %v16334_v8  ;;  %814 = vst.msk [vmem:[#allocation2 + $0x69] sm:$0xff] %vm802_vm1, %v764_v24  ;;  %v767_v27 = vld [vmem:[%s17049_s5 + $0x70] sm:$0xff]  ;;  %815 = vst.msk [vmem:[#allocation2 + $0x79] sm:$0xff] %vm802_vm1, %v765_v25  ;;  %v16339_v34 = vld [vmem:[%s20183_s1 + $0x88] sm:$0xff]   ;;  %s20205_s11 = sld [smem:[#allocation28_spill]]  ;;  %s13525_s0 = scalar_lea.hbm %s20134_s23, %s20161_s24 }
  0x39   : > { %v835_v28 = vld [vmem:[#allocation2] sm:$0xff]  ;;  %v896_v30 = vld [vmem:[#allocation2 + $0x9] sm:$0xff]  ;;  %816 = vst.msk [vmem:[#allocation2 + $0x81] sm:$0xff] %vm802_vm1, %v766_v26  ;;  %817 = vst.msk [vmem:[#allocation2 + $0x89] sm:$0xff] %vm802_vm1, %v767_v27  ;;  %s20199_s25 = smov %s20198_s28  ;;  %s16811_s29 = smov [#allocation3]  }
  0x3a   : > { %v895_v29 = vld [vmem:[#allocation2 + $0x1] sm:$0xff]  ;;  %1855 = vst [vmem:[#allocation2] sm:$0x1] %v20151_v6  ;;  %v897_v33 = vld [vmem:[#allocation2 + $0x11] sm:$0xff]  ;;  %v898_v36 = vld [vmem:[#allocation2 + $0x19] sm:$0xff] }
  0x3b   : > { %15071 = vmatpush3.bf16.msra.mxu0 %v16333_v7  ;;  %15115 = vmatpush3.bf16.msra.mxu1 %v16334_v8  ;;  %v927_v31 = vpack.c.bf16 %v896_v30, %v895_v29  ;;  %v836_v32 = vld [vmem:[#allocation2 + $0x8] sm:$0xff]  ;;  %v837_v37 = vld [vmem:[#allocation2 + $0x10] sm:$0xff]  ;;  %v838_v38 = vld [vmem:[#allocation2 + $0x18] sm:$0xff]  ;;  %v928_v39 = vpack.c.bf16 %v898_v36, %v897_v33 }
  0x3c   : > { %15072 = vmatprep.subr.bf16.mxu0 %v16335_v9  ;;  %15116 = vmatprep.subr.bf16.mxu1 %v16336_v10  ;;  %v867_v35 = vpack.c.bf16 %v836_v32, %v835_v28  ;;  %v868_v40 = vpack.c.bf16 %v838_v38, %v837_v37  ;;  %v839_v41 = vld [vmem:[#allocation2 + $0x28] sm:$0xff]  ;;  %v900_v43 = vld [vmem:[#allocation2 + $0x31] sm:$0xff]  ;;  %v16340_v47 = vld [vmem:[%s20183_s1 + $0x80] sm:$0xff]  }
  0x3d   : > { %15076 = vmatprep.mubr.msk.bf16.mxu0 %vm802_vm1, %v927_v31  ;;  %v899_v42 = vld [vmem:[#allocation2 + $0x29] sm:$0xff]  ;;  %1856 = vst [vmem:[#allocation2 + $0x28] sm:$0x1] %v20151_v6  ;;  %v16341_v49 = vld [vmem:[%s20183_s1 + $0x78] sm:$0xff]   ;;  %v902_v51 = vld [vmem:[#allocation2 + $0x41] sm:$0xff] }
  0x3e   : > { %15120 = vmatprep.mubr.msk.bf16.mxu1 %vm802_vm1, %v867_v35  ;;  %v929_v44 = vpack.c.bf16 %v900_v43, %v899_v42  ;;  %v840_v45 = vld [vmem:[#allocation2 + $0x30] sm:$0xff]  ;;  %v901_v50 = vld [vmem:[#allocation2 + $0x39] sm:$0xff]  ;;  %v770_v0 = vld [vmem:[%s17049_s5 + $0x88] sm:$0xff] }
  0x3f   : > { %15073 = vmatpush3.bf16.msra.mxu0 %v16335_v9  ;;  %15117 = vmatpush3.bf16.msra.mxu1 %v16336_v10  ;;  %v869_v46 = vpack.c.bf16 %v840_v45, %v839_v41  ;;  %v843_v48 = vld [vmem:[#allocation2 + $0x50] sm:$0xff]  ;;  %v841_v52 = vld [vmem:[#allocation2 + $0x38] sm:$0xff]  ;;  %v842_v53 = vld [vmem:[#allocation2 + $0x40] sm:$0xff]  ;;  %v930_v58 = vpack.c.bf16 %v902_v51, %v901_v50  ;;  %820 = vst.msk [vmem:[#allocation2 + $0xa9] sm:$0xff] %vm802_vm1, %v770_v0 }
  0x40   : > { %15074 = vmatprep.subr.bf16.mxu0 %v16337_v15  ;;  %15118 = vmatprep.subr.bf16.mxu1 %v16338_v20  ;;  %1857 = vst [vmem:[#allocation2 + $0x50] sm:$0x1] %v20151_v6  ;;  %v903_v54 = vld [vmem:[#allocation2 + $0x51] sm:$0xff]  ;;  %v904_v55 = vld [vmem:[#allocation2 + $0x59] sm:$0xff]  ;;  %v870_v60 = vpack.c.bf16 %v842_v53, %v841_v52  ;;  %v905_v3 = vld [vmem:[#allocation2 + $0x61] sm:$0xff] }
  0x41   : > { %v844_v56 = vld [vmem:[#allocation2 + $0x58] sm:$0xff]  ;;  %v931_v61 = vpack.c.bf16 %v904_v55, %v903_v54  ;;  %v769_v62 = vld [vmem:[%s17049_s5 + $0x80] sm:$0xff]  ;;  %v771_v1 = vld [vmem:[%s17049_s5 + $0x90] sm:$0xff] }
  0x42   : > { %v17111_v57 = vld [vmem:[#allocation2 + $0x78] sm:$0xff]  ;;  %v871_v63 = vpack.c.bf16 %v844_v56, %v843_v48  ;;  %819 = vst.msk [vmem:[#allocation2 + $0xa1] sm:$0xff] %vm802_vm1, %v769_v62  ;;  %v906_v4 = vld [vmem:[#allocation2 + $0x69] sm:$0xff]  ;;  %821 = vst.msk [vmem:[#allocation2 + $0xb1] sm:$0xff] %vm802_vm1, %v771_v1 }
  0x43   : > { %15075 = vmatpush3.bf16.msra.mxu0 %v16337_v15  ;;  %15119 = vmatpush3.bf16.msra.mxu1 %v16338_v20  ;;  %1858 = vst [vmem:[#allocation2 + $0x78] sm:$0x1] %v20151_v6  ;;  %v768_v59 = vld [vmem:[%s17049_s5 + $0x78] sm:$0xff]  ;;  %v16342_v5 = vld [vmem:[%s20183_s1 + $0x70] sm:$0xff]   ;;  %v845_v7 = vld [vmem:[#allocation2 + $0x60] sm:$0xff]  ;;  %v932_v21 = vpack.c.bf16 %v906_v4, %v905_v3 }
  0x44   : > { %15152 = vmatprep.subr.bf16.mxu0 %v16339_v34  ;;  %818 = vst.msk [vmem:[#allocation2 + $0x91] sm:$0xff] %vm802_vm1, %v768_v59  ;;  %v772_v2 = vld [vmem:[%s17049_s5 + $0x98] sm:$0xff]  ;;  %v846_v8 = vld [vmem:[#allocation2 + $0x68] sm:$0xff]  ;;  %v773_v11 = vld [vmem:[%s17049_s5 + $0xa0] sm:$0xff] }
  0x45   : > { %822 = vst.msk [vmem:[#allocation2 + $0xb9] sm:$0xff] %vm802_vm1, %v772_v2  ;;  %v907_v9 = vld [vmem:[#allocation2 + $0x79] sm:$0xff]  ;;  %v908_v10 = vld [vmem:[#allocation2 + $0x81] sm:$0xff]  ;;  %v775_v13 = vld [vmem:[%s17049_s5 + $0xb0] sm:$0xff]  ;;  %v872_v22 = vpack.c.bf16 %v846_v8, %v845_v7 }
  0x46   : > { %15077 = vmatmul.mubr.msk.bf16.vlgmr.msra.gmra.mxu0 %vm802_vm1, %v928_v39  ;;  %15121 = vmatmul.mubr.msk.bf16.vlgmr.msra.gmra.mxu1 %vm802_vm1, %v868_v40  ;;  %v774_v12 = vld [vmem:[%s17049_s5 + $0xa8] sm:$0xff]  ;;  %v848_v14 = vld [vmem:[#allocation2 + $0x80] sm:$0xff]  ;;  %823 = vst.msk [vmem:[#allocation2 + $0xc9] sm:$0xff] %vm802_vm1, %v773_v11  ;;  %v776_v15 = vld [vmem:[%s17049_s5 + $0xb8] sm:$0xff]  ;;  %v933_v23 = vpack.c.bf16 %v908_v10, %v907_v9 }
  0x47   : > { %15153 = vmatpush3.bf16.msra.mxu0 %v16339_v34  ;;  %15080 = vmatprep.mubr.msk.bf16.mxu0 %vm802_vm1, %v929_v44  ;;  %824 = vst.msk [vmem:[#allocation2 + $0xd1] sm:$0xff] %vm802_vm1, %v774_v12  ;;  %825 = vst.msk [vmem:[#allocation2 + $0xd9] sm:$0xff] %vm802_vm1, %v775_v13  ;;  %v16343_v16 = vld [vmem:[%s20183_s1 + $0x68] sm:$0xff]   ;;  %v777_v17 = vld [vmem:[%s17049_s5 + $0xc0] sm:$0xff]  ;;  %v873_v25 = vpack.c.bf16 %v848_v14, %v17111_v57 }
  0x48   : > { %15124 = vmatprep.mubr.msk.bf16.mxu1 %vm802_vm1, %v869_v46  ;;  %15154 = vmatprep.subr.bf16.mxu0 %v16340_v47  ;;  %826 = vst.msk [vmem:[#allocation2 + $0xe1] sm:$0xff] %vm802_vm1, %v776_v15  ;;  %v778_v18 = vld [vmem:[%s17049_s5 + $0xc8] sm:$0xff]  ;;  %827 = vst.msk [vmem:[#allocation2 + $0xf1] sm:$0xff] %vm802_vm1, %v777_v17  ;;  %v779_v19 = vld [vmem:[%s17049_s5 + $0xd0] sm:$0xff] }
  0x49   : > { %828 = vst.msk [vmem:[#allocation2 + $0xf9] sm:$0xff] %vm802_vm1, %v778_v18  ;;  %v780_v20 = vld [vmem:[%s17049_s5 + $0xd8] sm:$0xff]  ;;  %829 = vst.msk [vmem:[#allocation2 + $0x101] sm:$0xff] %vm802_vm1, %v779_v19  ;;  %v851_v24 = vld [vmem:[#allocation2 + $0xa0] sm:$0xff] }
  0x4a   : > { %830 = vst.msk [vmem:[#allocation2 + $0x109] sm:$0xff] %vm802_vm1, %v780_v20  ;;  %1859 = vst [vmem:[#allocation2 + $0xa0] sm:$0x1] %v20151_v6  ;;  %v16344_v26 = vld [vmem:[%s20183_s1 + $0x60] sm:$0xff]   ;;  %v909_v28 = vld [vmem:[#allocation2 + $0x89] sm:$0xff] }
  0x4b   : > { %15155 = vmatpush3.bf16.msra.mxu0 %v16340_v47  ;;  %v910_v29 = vld [vmem:[#allocation2 + $0x91] sm:$0xff]  ;;  %v849_v30 = vld [vmem:[#allocation2 + $0x88] sm:$0xff]  ;;  %v781_v40 = vld [vmem:[%s17049_s5 + $0xe0] sm:$0xff] }
  0x4c   : > { %15156 = vmatprep.subr.bf16.mxu0 %v16341_v49  ;;  %v850_v31 = vld [vmem:[#allocation2 + $0x90] sm:$0xff]  ;;  %v911_v32 = vld [vmem:[#allocation2 + $0xa1] sm:$0xff]  ;;  %v934_v36 = vpack.c.bf16 %v910_v29, %v909_v28  ;;  %831 = vst.msk [vmem:[#allocation2 + $0x119] sm:$0xff] %vm802_vm1, %v781_v40  ;;  %v784_v43 = vld [vmem:[%s17049_s5 + $0xf8] sm:$0xff] }
  0x4d   : > { %v17156_v27 = vld [vmem:[#allocation2 + $0xc8] sm:$0xff]  ;;  %v874_v37 = vpack.c.bf16 %v850_v31, %v849_v30  ;;  %v783_v42 = vld [vmem:[%s17049_s5 + $0xf0] sm:$0xff]  ;;  %v914_v45 = vld [vmem:[#allocation2 + $0xb9] sm:$0xff]  ;;  %834 = vst.msk [vmem:[#allocation2 + $0x131] sm:$0xff] %vm802_vm1, %v784_v43 }
  0x4e   : > { %15081 = vmatmul.mubr.msk.bf16.gmra.mxu0 %vm802_vm1, %v930_v58  ;;  %15125 = vmatmul.mubr.msk.bf16.gmra.mxu1 %vm802_vm1, %v870_v60  ;;  %1860 = vst [vmem:[#allocation2 + $0xc8] sm:$0x1] %v20151_v6  ;;  %v912_v33 = vld [vmem:[#allocation2 + $0xa9] sm:$0xff]  ;;  %v913_v44 = vld [vmem:[#allocation2 + $0xb1] sm:$0xff]  ;;  %833 = vst.msk [vmem:[#allocation2 + $0x129] sm:$0xff] %vm802_vm1, %v783_v42 }
  0x4f   : > { %15084 = vmatprep.mubr.msk.bf16.mxu0 %vm802_vm1, %v931_v61  ;;  %15128 = vmatprep.mubr.msk.bf16.mxu1 %vm802_vm1, %v871_v63  ;;  %v852_v34 = vld [vmem:[#allocation2 + $0xa8] sm:$0xff]  ;;  %v17162_v35 = vld [vmem:[#allocation2 + $0xf0] sm:$0xff]  ;;  %v935_v38 = vpack.c.bf16 %v912_v33, %v911_v32  ;;  %v17174_v46 = vld [vmem:[#allocation2 + $0x1a] sm:$0xff]  ;;  %v936_v55 = vpack.c.bf16 %v914_v45, %v913_v44 }
  0x50   : > { %15157 = vmatpush3.bf16.msra.mxu0 %v16341_v49  ;;  %1861 = vst [vmem:[#allocation2 + $0xf0] sm:$0x1] %v20151_v6  ;;  %v875_v39 = vpack.c.bf16 %v852_v34, %v851_v24  ;;  %v782_v41 = vld [vmem:[%s17049_s5 + $0xe8] sm:$0xff]  ;;  %v853_v47 = vld [vmem:[#allocation2 + $0xb0] sm:$0xff]  ;;  %v854_v48 = vld [vmem:[#allocation2 + $0xb8] sm:$0xff]  ;;  %s20159_s5 = sshll.u32 %s19981_s27, 3 }
  0x51   : > { %15158 = vmatprep.subr.bf16.mxu0 %v16342_v5  ;;  %832 = vst.msk [vmem:[#allocation2 + $0x121] sm:$0xff] %vm802_vm1, %v782_v41  ;;  %1863 = vst [vmem:[#allocation2 + $0x21] sm:$0x1] %v20151_v6  ;;  %v17179_v49 = vld [vmem:[#allocation2 + $0x42] sm:$0xff]  ;;  %v916_v51 = vld [vmem:[#allocation2 + $0xd1] sm:$0xff]  ;;  %v876_v57 = vpack.c.bf16 %v854_v48, %v853_v47 }
  0x52   : > { %v915_v50 = vld [vmem:[#allocation2 + $0xc9] sm:$0xff]  ;;  %1864 = vst [vmem:[#allocation2 + $0x49] sm:$0x1] %v20151_v6  ;;  %v17186_v54 = vld [vmem:[#allocation2 + $0x92] sm:$0xff]  ;;  %v17189_v56 = vld [vmem:[#allocation2 + $0xba] sm:$0xff] }
  0x53   : > { %v17183_v52 = vld [vmem:[#allocation2 + $0x6a] sm:$0xff]  ;;  %1866 = vst [vmem:[#allocation2 + $0x99] sm:$0x1] %v20151_v6  ;;  %v937_v58 = vpack.c.bf16 %v916_v51, %v915_v50  ;;  %1867 = vst [vmem:[#allocation2 + $0xc1] sm:$0x1] %v20151_v6  ;;  %v17192_v59 = vld [vmem:[#allocation2 + $0xe2] sm:$0xff] }
  0x54   : > { %15159 = vmatpush3.bf16.msra.mxu0 %v16342_v5  ;;  %v856_v53 = vld [vmem:[#allocation2 + $0xd0] sm:$0xff]  ;;  %1865 = vst [vmem:[#allocation2 + $0x71] sm:$0x1] %v20151_v6  ;;  %v863_v61 = vld [vmem:[#allocation2 + $0x118] sm:$0xff]  ;;  %1868 = vst [vmem:[#allocation2 + $0xe9] sm:$0x1] %v20151_v6 }
  0x55   : > { %15160 = vmatprep.subr.bf16.mxu0 %v16343_v16  ;;  %v877_v60 = vpack.c.bf16 %v856_v53, %v17156_v27  ;;  %v917_v62 = vld [vmem:[#allocation2 + $0xd9] sm:$0xff]  ;;  %1862 = vst [vmem:[#allocation2 + $0x118] sm:$0x1] %v20151_v6  ;;  %v918_v63 = vld [vmem:[#allocation2 + $0xe1] sm:$0xff]  ;;  %v919_v2 = vld [vmem:[#allocation2 + $0xf1] sm:$0xff] }
  0x56   : > { %15085 = vmatmul.mubr.msk.bf16.gmra.mxu0 %vm802_vm1, %v932_v21  ;;  %15129 = vmatmul.mubr.msk.bf16.gmra.mxu1 %vm802_vm1, %v872_v22  ;;  %v857_v0 = vld [vmem:[#allocation2 + $0xd8] sm:$0xff]  ;;  %v858_v1 = vld [vmem:[#allocation2 + $0xe0] sm:$0xff]  ;;  %v17200_v4 = vld [vmem:[#allocation2 + $0x10a] sm:$0xff]  ;;  %v938_v8 = vpack.c.bf16 %v918_v63, %v917_v62 }
  0x57   : > { %15088 = vmatprep.mubr.msk.bf16.mxu0 %vm802_vm1, %v933_v23  ;;  %15132 = vmatprep.mubr.msk.bf16.mxu1 %vm802_vm1, %v873_v25  ;;  %v920_v3 = vld [vmem:[#allocation2 + $0xf9] sm:$0xff]  ;;  %1869 = vst [vmem:[#allocation2 + $0x111] sm:$0x1] %v20151_v6  ;;  %v878_v9 = vpack.c.bf16 %v858_v1, %v857_v0  ;;  %v921_v12 = vld [vmem:[#allocation2 + $0x101] sm:$0xff]  ;;  %v922_v13 = vld [vmem:[#allocation2 + $0x109] sm:$0xff] }
  0x58   : > { %15161 = vmatpush3.bf16.msra.mxu0 %v16343_v16  ;;  %v860_v5 = vld [vmem:[#allocation2 + $0xf8] sm:$0xff]  ;;  %v939_v10 = vpack.c.bf16 %v920_v3, %v919_v2  ;;  %v861_v14 = vld [vmem:[#allocation2 + $0x100] sm:$0xff]  ;;  %v862_v15 = vld [vmem:[#allocation2 + $0x108] sm:$0xff]  ;;  %v940_v19 = vpack.c.bf16 %v922_v13, %v921_v12 }
  0x59   : > { %15162 = vmatprep.subr.bf16.mxu0 %v16344_v26  ;;  %v17204_v7 = vld [vmem:[#allocation2 + $0x132] sm:$0xff]  ;;  %v879_v11 = vpack.c.bf16 %v860_v5, %v17162_v35  ;;  %v924_v17 = vld [vmem:[#allocation2 + $0x121] sm:$0xff]  ;;  %v880_v20 = vpack.c.bf16 %v862_v15, %v861_v14  ;;  %v925_v23 = vld [vmem:[#allocation2 + $0x129] sm:$0xff] }
  0x5a   : > { %1870 = vst [vmem:[#allocation2 + $0x139] sm:$0x1] %v20151_v6  ;;  %v923_v16 = vld [vmem:[#allocation2 + $0x119] sm:$0xff]  ;;  %v926_v24 = vld [vmem:[#allocation2 + $0x131] sm:$0xff]  ;;  %v1446_v25 = vld [vmem:[#allocation2 + $0x2] sm:$0xff] }
  0x5b   : > { %v864_v18 = vld [vmem:[#allocation2 + $0x120] sm:$0xff]  ;;  %v941_v21 = vpack.c.bf16 %v924_v17, %v923_v16  ;;  %v866_v27 = vld [vmem:[#allocation2 + $0x130] sm:$0xff]  ;;  %v942_v29 = vpack.c.bf16 %v926_v24, %v925_v23  ;;  %v16347_v5 = vld [vmem:[%s20185_s4 + $0x68] sm:$0xff]  }
  0x5c   : > { %15163 = vmatpush3.bf16.msra.mxu0 %v16344_v26  ;;  %v881_v22 = vpack.c.bf16 %v864_v18, %v863_v61  ;;  %v865_v26 = vld [vmem:[#allocation2 + $0x128] sm:$0xff]  ;;  %v1448_v32 = vld [vmem:[#allocation2 + $0x12] sm:$0xff]  ;;  %v1458_v43 = vld [vmem:[#allocation2 + $0x7a] sm:$0xff] }
  0x5d   : > { %v1447_v28 = vld [vmem:[#allocation2 + $0xa] sm:$0xff]  ;;  %v882_v30 = vpack.c.bf16 %v866_v27, %v865_v26  ;;  %v1451_v34 = vld [vmem:[#allocation2 + $0x32] sm:$0xff]  ;;  %v1479_v35 = vpack.c.bf16 %v17174_v46, %v1448_v32  ;;  %v1456_v42 = vld [vmem:[#allocation2 + $0x62] sm:$0xff] }
  0x5e   : > { %15089 = vmatmul.mubr.msk.bf16.gmra.mxu0 %vm802_vm1, %v934_v36  ;;  %15133 = vmatmul.mubr.msk.bf16.gmra.mxu1 %vm802_vm1, %v874_v37  ;;  %v1478_v31 = vpack.c.bf16 %v1447_v28, %v1446_v25  ;;  %v1450_v33 = vld [vmem:[#allocation2 + $0x2a] sm:$0xff]  ;;  %v1452_v37 = vld [vmem:[#allocation2 + $0x3a] sm:$0xff]  ;;  %v1459_v44 = vld [vmem:[#allocation2 + $0x82] sm:$0xff]  ;;  %v1483_v45 = vpack.c.bf16 %v17183_v52, %v1456_v42 }
  0x5f   : > { %15092 = vmatprep.mubr.msk.bf16.mxu0 %vm802_vm1, %v935_v38  ;;  %15136 = vmatprep.mubr.msk.bf16.mxu1 %vm802_vm1, %v875_v39  ;;  %v1480_v36 = vpack.c.bf16 %v1451_v34, %v1450_v33  ;;  %v1454_v38 = vld [vmem:[#allocation2 + $0x52] sm:$0xff]  ;;  %v1455_v39 = vld [vmem:[#allocation2 + $0x5a] sm:$0xff]  ;;  %v1481_v40 = vpack.c.bf16 %v17179_v49, %v1452_v37  ;;  %v1484_v46 = vpack.c.bf16 %v1459_v44, %v1458_v43  ;;  %v1460_v47 = vld [vmem:[#allocation2 + $0x8a] sm:$0xff] }
  0x60   : > { %v1482_v41 = vpack.c.bf16 %v1455_v39, %v1454_v38  ;;  %v1462_v48 = vld [vmem:[#allocation2 + $0xa2] sm:$0xff]  ;;  %v1463_v50 = vld [vmem:[#allocation2 + $0xaa] sm:$0xff]  ;;  %v1485_v49 = vpack.c.bf16 %v17186_v54, %v1460_v47  ;;  %v1464_v53 = vld [vmem:[#allocation2 + $0xb2] sm:$0xff] }
  0x61   : > { %v1486_v51 = vpack.c.bf16 %v1463_v50, %v1462_v48  ;;  %v16345_v52 = vld [vmem:[%s20185_s4 + $0x78] sm:$0xff]   ;;  %v16346_v63 = vld [vmem:[%s20185_s4 + $0x70] sm:$0xff]   ;;  %v1475_v3 = vld [vmem:[#allocation2 + $0x122] sm:$0xff] }
  0x62   : > { %15196 = vmatprep.subr.bf16.mxu1 %v16345_v52  ;;  %v1468_v61 = vld [vmem:[#allocation2 + $0xda] sm:$0xff]  ;;  %v1470_v62 = vld [vmem:[#allocation2 + $0xf2] sm:$0xff]  ;;  %v16355_v16 = vld [vmem:[%s20185_s4 + $0x48] sm:$0xff]  }
  0x63   : > { %15197 = vmatpush3.bf16.msra.mxu1 %v16345_v52  ;;  %v1471_v54 = vld [vmem:[#allocation2 + $0xfa] sm:$0xff]  ;;  %v1489_v0 = vpack.c.bf16 %v17192_v59, %v1468_v61  ;;  %v1476_v59 = vld [vmem:[#allocation2 + $0x12a] sm:$0xff] }
  0x64   : > { %15198 = vmatprep.subr.bf16.mxu1 %v16346_v63  ;;  %v1490_v1 = vpack.c.bf16 %v1471_v54, %v1470_v62  ;;  %v1474_v2 = vld [vmem:[#allocation2 + $0x11a] sm:$0xff]  ;;  %v16351_v13 = vld [vmem:[%s20185_s4 + $0x30] sm:$0xff]  }
  0x65   : > { %v16349_v12 = vld [vmem:[%s20185_s4 + $0x58] sm:$0xff]   ;;  %v16352_v14 = vld [vmem:[%s20185_s4 + $0x50] sm:$0xff]   ;;  %v16354_v15 = vld [vmem:[%s20185_s4 + $0x20] sm:$0xff]  }
  0x66   : > { %15093 = vmatmul.mubr.msk.bf16.gmra.mxu0 %vm802_vm1, %v936_v55  ;;  %15137 = vmatmul.mubr.msk.bf16.gmra.mxu1 %vm802_vm1, %v876_v57  ;;  %v1466_v55 = vld [vmem:[#allocation2 + $0xca] sm:$0xff]  ;;  %v1467_v57 = vld [vmem:[#allocation2 + $0xd2] sm:$0xff] }
  0x67   : > { %15096 = vmatprep.mubr.msk.bf16.mxu0 %vm802_vm1, %v937_v58  ;;  %15140 = vmatprep.mubr.msk.bf16.mxu1 %vm802_vm1, %v877_v60  ;;  %v1487_v58 = vpack.c.bf16 %v17189_v56, %v1464_v53  ;;  %v1488_v60 = vpack.c.bf16 %v1467_v57, %v1466_v55  ;;  %v1472_v56 = vld [vmem:[#allocation2 + $0x102] sm:$0xff]  ;;  %v16356_v17 = vld [vmem:[%s20185_s4 + $0x18] sm:$0xff]   ;;  %v16357_v18 = vld [vmem:[%s20185_s4 + $0x10] sm:$0xff]  }
  0x68   : > { %15199 = vmatpush3.bf16.msra.mxu1 %v16346_v63 }
  0x69   : > { %15200 = vmatprep.subr.bf16.mxu1 %v16347_v5 }
  0x6c   : > { %15201 = vmatpush3.bf16.msra.mxu1 %v16347_v5 }
  0x6e   : > { %15097 = vmatmul.mubr.msk.bf16.gmra.mxu0 %vm802_vm1, %v938_v8  ;;  %15141 = vmatmul.mubr.msk.bf16.gmra.mxu1 %vm802_vm1, %v878_v9  ;;  %v1491_v8 = vpack.c.bf16 %v17200_v4, %v1472_v56  ;;  %v1492_v9 = vpack.c.bf16 %v1475_v3, %v1474_v2  ;;  %v16350_v4 = vld [vmem:[%s20185_s4 + $0x38] sm:$0xff]  }
  0x6f   : > { %15100 = vmatprep.mubr.msk.bf16.mxu0 %vm802_vm1, %v939_v10  ;;  %15144 = vmatprep.mubr.msk.bf16.mxu1 %vm802_vm1, %v879_v11  ;;  %v16348_v10 = vld [vmem:[%s20185_s4 + $0x60] sm:$0xff]   ;;  %v1493_v11 = vpack.c.bf16 %v17204_v7, %v1476_v59  ;;  %v16353_v7 = vld [vmem:[%s20185_s4 + $0x28] sm:$0xff]  }
  0x70   : > { %15202 = vmatprep.subr.bf16.mxu1 %v16348_v10  ;;  %15244 = vmatprep.subr.bf16.mxu0 %v16350_v4 }
  0x71   : > { %15203 = vmatpush3.bf16.msra.mxu1 %v16348_v10 }
  0x72   : > { %15204 = vmatprep.subr.bf16.mxu1 %v16349_v12 }
  0x75   : > { %15205 = vmatpush3.bf16.msra.mxu1 %v16349_v12  ;;  %v17373_v12 = vld [vmem:[%s20125_s14] ss:$0 sm:$0xff] }
  0x76   : > { %15101 = vmatmul.mubr.msk.bf16.gmra.mxu0 %vm802_vm1, %v940_v19  ;;  %15145 = vmatmul.mubr.msk.bf16.gmra.mxu1 %vm802_vm1, %v880_v20  ;;  %v16358_v19 = vld [vmem:[%s20185_s4 + $0x40] sm:$0xff]   ;;  %v16359_v20 = vld [vmem:[%s20185_s4 + $0x8] sm:$0xff]  }
  0x77   : > { %15104 = vmatprep.mubr.msk.bf16.mxu0 %vm802_vm1, %v941_v21  ;;  %15148 = vmatprep.mubr.msk.bf16.mxu1 %vm802_vm1, %v881_v22  ;;  %v16360_v21 = vld [vmem:[%s20185_s4] sm:$0xff]   ;;  %v17293_v22 = vld [vmem:[%s20185_s4 + $0xb8] sm:$0xff]  }
  0x78   : > { %15206 = vmatprep.subr.bf16.mxu1 %v16352_v14 }
  0x79   : > { %15207 = vmatpush3.bf16.msra.mxu1 %v16352_v14 }
  0x7a   : > { %15208 = vmatprep.subr.bf16.mxu1 %v16355_v16 }
  0x7d   : > { %15209 = vmatpush3.bf16.msra.mxu1 %v16355_v16 }
  0x7e   : > { %15105 = vmatmul.mubr.msk.bf16.gmra.mxu0 %vm802_vm1, %v942_v29  ;;  %15149 = vmatmul.mubr.msk.bf16.gmra.mxu1 %vm802_vm1, %v882_v30 }
  0x7f   : > { %15164 = vmatprep.mubr.msk.bf16.mxu0 %vm802_vm1, %v1478_v31  ;;  %15210 = vmatprep.subr.bf16.mxu1 %v16358_v19 }
  0x81   : > { %15211 = vmatpush3.bf16.msra.mxu1 %v16358_v19 }
  0x82   : > { %15292 = vmatprep.subr.bf16.mxu1 %v17293_v22 }
  0x86   : > { %15165 = vmatmul.mubr.msk.bf16.vlgmr.msra.gmra.mxu0 %vm802_vm1, %v1479_v35 }
  0x87   : > { %15168 = vmatprep.mubr.msk.bf16.mxu0 %vm802_vm1, %v1480_v36  ;;  %15245 = vmatpush3.bf16.msra.mxu0 %v16350_v4 }
  0x88   : > { %15246 = vmatprep.subr.bf16.mxu0 %v16351_v13 }
  0x8b   : > { %15247 = vmatpush3.bf16.msra.mxu0 %v16351_v13 }
  0x8c   : > { %15248 = vmatprep.subr.bf16.mxu0 %v16353_v7 }
  0x8e   : > { %15169 = vmatmul.mubr.msk.bf16.gmra.mxu0 %vm802_vm1, %v1481_v40 }
  0x8f   : > { %15172 = vmatprep.mubr.msk.bf16.mxu0 %vm802_vm1, %v1482_v41  ;;  %15249 = vmatpush3.bf16.msra.mxu0 %v16353_v7 }
  0x90   : > { %15250 = vmatprep.subr.bf16.mxu0 %v16354_v15 }
  0x93   : > { %15251 = vmatpush3.bf16.msra.mxu0 %v16354_v15 }
  0x94   : > { %15252 = vmatprep.subr.bf16.mxu0 %v16356_v17 }
  0x96   : > { %15173 = vmatmul.mubr.msk.bf16.gmra.mxu0 %vm802_vm1, %v1483_v45 }
  0x97   : > { %15176 = vmatprep.mubr.msk.bf16.mxu0 %vm802_vm1, %v1484_v46  ;;  %15253 = vmatpush3.bf16.msra.mxu0 %v16356_v17 }
  0x98   : > { %15254 = vmatprep.subr.bf16.mxu0 %v16357_v18 }
  0x9b   : > { %15255 = vmatpush3.bf16.msra.mxu0 %v16357_v18 }
  0x9c   : > { %15256 = vmatprep.subr.bf16.mxu0 %v16359_v20 }
  0x9e   : > { %15177 = vmatmul.mubr.msk.bf16.gmra.mxu0 %vm802_vm1, %v1485_v49 }
  0x9f   : > { %15180 = vmatprep.mubr.msk.bf16.mxu0 %vm802_vm1, %v1486_v51  ;;  %15257 = vmatpush3.bf16.msra.mxu0 %v16359_v20 }
  0xa0   : > { %15258 = vmatprep.subr.bf16.mxu0 %v16360_v21 }
  0xa3   : > { %15259 = vmatpush3.bf16.msra.mxu0 %v16360_v21 }
  0xa6   : > { %15181 = vmatmul.mubr.msk.bf16.gmra.mxu0 %vm802_vm1, %v1487_v58 }
  0xa7   : > { %15184 = vmatprep.mubr.msk.bf16.mxu0 %vm802_vm1, %v1488_v60 }
  0xae   : > { %15185 = vmatmul.mubr.msk.bf16.gmra.mxu0 %vm802_vm1, %v1489_v0 }
  0xaf   : > { %15188 = vmatprep.mubr.msk.bf16.mxu0 %vm802_vm1, %v1490_v1 }
  0xb6   : > { %15189 = vmatmul.mubr.msk.bf16.gmra.mxu0 %vm802_vm1, %v1491_v8 }
  0xb7   : > { %15192 = vmatprep.mubr.msk.bf16.mxu0 %vm802_vm1, %v1492_v9 }
  0xbe   : > { %15193 = vmatmul.mubr.msk.bf16.gmra.mxu0 %vm802_vm1, %v1493_v11 }
 0x106   : > { %v15078_v23 = vpop.f32.mrf.mxu0  ;;  %v15122_v24 = vpop.f32.mrf.mxu1 }
 0x107   : > { %v1328_v11 = vadd.f32 %v15122_v24, %v15078_v23 }
 0x108   : > { %v1074_v25 = vpop.f32.mrf.mxu0  ;;  %v1319_v26 = vpop.f32.mrf.mxu1 }
 0x109   : > { %v1320_v13 = vadd.f32 %v1319_v26, %v1074_v25 }
 0x10a   : > { %v15079_v27 = vpop.f32.mrf.mxu0  ;;  %v15123_v28 = vpop.f32.mrf.mxu1 }
 0x10b   : > { %v1331_v16 = vadd.f32 %v15123_v28, %v15079_v27 }
 0x10c   : > { %v1077_v29 = vpop.f32.mrf.mxu0  ;;  %v1322_v31 = vpop.f32.mrf.mxu1 }
 0x10d   : > { %v1323_v20 = vadd.f32 %v1322_v31, %v1077_v29 }
 0x10e   : > { %v15082_v30 = vpop.f32.mrf.mxu0  ;;  %v15126_v34 = vpop.f32.mrf.mxu1 }
 0x110   : > { %v17296_v32 = vpop.f32.mrf.mxu0  ;;  %v1335_v37 = vpop.f32.mrf.mxu1 }
 0x111   : > { %v1336_v27 = vadd.f32 %v1335_v37, %v17296_v32 }
 0x112   : > { %v17298_v33 = vpop.f32.mrf.mxu0  ;;  %v15127_v40 = vpop.f32.mrf.mxu1 }
 0x114   : > { %v17300_v35 = vpop.f32.mrf.mxu0  ;;  %v17312_v43 = vpop.f32.mrf.mxu1 }
 0x116   : > { %v17302_v36 = vpop.f32.mrf.mxu0  ;;  %v17318_v46 = vpop.f32.mrf.mxu1 }
 0x118   : > { %v17304_v38 = vpop.f32.mrf.mxu0  ;;  %v17324_v50 = vpop.f32.mrf.mxu1 }
 0x11a   : > { %v17306_v39 = vpop.f32.mrf.mxu0  ;;  %v17330_v53 = vpop.f32.mrf.mxu1 }
 0x11c   : > { %v17308_v41 = vpop.f32.mrf.mxu0  ;;  %v17336_v52 = vpop.f32.mrf.mxu1 }
 0x11e   : > { %v17310_v42 = vpop.f32.mrf.mxu0  ;;  %v17342_v61 = vpop.f32.mrf.mxu1 }
 0x120   : > { %v17314_v44 = vpop.f32.mrf.mxu0  ;;  %v17348_v63 = vpop.f32.mrf.mxu1 }
 0x122   : > { %v17316_v45 = vpop.f32.mrf.mxu0  ;;  %v17354_v56 = vpop.f32.mrf.mxu1 }
 0x124   : > { %v17320_v47 = vpop.f32.mrf.mxu0  ;;  %v17360_v5 = vpop.f32.mrf.mxu1 }
 0x126   : > { %v17322_v48 = vpop.f32.mrf.mxu0  ;;  %v17366_v59 = vpop.f32.mrf.mxu1 }
 0x128   : > { %v17326_v49 = vpop.f32.mrf.mxu0  ;;  %v17375_v7 = vpop.f32.mrf.mxu1 }
 0x12a   : > { %v17328_v51 = vpop.f32.mrf.mxu0  ;;  %v17378_v21 = vpop.f32.mrf.mxu1 }
 0x12c   : > { %v17332_v55 = vpop.f32.mrf.mxu0  ;;  %v17383_v28 = vpop.f32.mrf.mxu1 }
 0x12e   : > { %v17334_v57 = vpop.f32.mrf.mxu0  ;;  %v17392_v37 = vpop.f32.mrf.mxu1 }
 0x130   : > { %v17338_v58 = vpop.f32.mrf.mxu0 }
 0x132   : > { %v17340_v60 = vpop.f32.mrf.mxu0 }
 0x134   : > { %v17344_v62 = vpop.f32.mrf.mxu0 }
 0x136   : > { %v17346_v54 = vpop.f32.mrf.mxu0 }
 0x138   : > { %v17350_v0 = vpop.f32.mrf.mxu0 }
 0x13a   : > { %v17352_v1 = vpop.f32.mrf.mxu0 }
 0x13c   : > { %v17356_v2 = vpop.f32.mrf.mxu0 }
 0x13e   : > { %v17358_v3 = vpop.f32.mrf.mxu0 }
 0x140   : > { %v17362_v8 = vpop.f32.mrf.mxu0 }
 0x142   : > { %v17364_v9 = vpop.f32.mrf.mxu0 }
 0x143   : > { %20186 = vst [vmem:[#allocation15_spill] sm:$0xff] %v17364_v9  ;;  %v1344_v9 = vadd.f32 %v15126_v34, %v15082_v30 }
 0x144   : > { %v17368_v10 = vpop.f32.mrf.mxu0 }
 0x145   : > { %20187 = vst [vmem:[#allocation16_spill] sm:$0xff] %v17368_v10 }
 0x146   : > { %v15166_v4 = vpop.f32.mrf.mxu0 }
 0x147   : > { %v1754_v14 = vadd.f32 %v15166_v4, %v1328_v11 }
 0x148   : > { %v1625_v15 = vpop.f32.mrf.mxu0 }
 0x149   : > { %v1793_v17 = vadd.f32 %v17373_v12, %v1754_v14  ;;  %v1752_v18 = vadd.f32 %v1625_v15, %v1320_v13  ;;  %v1347_v15 = vadd.f32 %v15127_v40, %v17298_v33 }
 0x14a   : > { %v15167_v19 = vpop.f32.mrf.mxu0 }
 0x14b   : > { %v1825_v23 = vmax.f32 %v1793_v17, 0.0  ;;  %v1791_v24 = vadd.f32 %v17373_v12, %v1752_v18  ;;  %v1755_v6 = vadd.f32 %v15167_v19, %v1331_v16  ;;  %v16362_v19 = vld [vmem:[%s20185_s4 + $0xb0] sm:$0xff]  }
 0x14c   : > { %v1628_v10 = vpop.f32.mrf.mxu0 }
 0x14d   : > { %1873 = vst [vmem:[#allocation2 + $0x11] sm:$0xff] %v1825_v23  ;;  %v1823_v25 = vmax.f32 %v1791_v24, 0.0  ;;  %v1794_v26 = vadd.f32 %v17373_v12, %v1755_v6  ;;  %v1753_v11 = vadd.f32 %v1628_v10, %v1323_v20  ;;  %v1339_v10 = vadd.f32 %v17312_v43, %v17300_v35 }
 0x14e   : > { %v15170_v4 = vpop.f32.mrf.mxu0  ;;  %v1360_v20 = vadd.f32 %v17318_v46, %v17302_v36 }
 0x14f   : > { %1871 = vst [vmem:[#allocation2 + $0x1] sm:$0xff] %v1823_v25  ;;  %v1826_v29 = vmax.f32 %v1794_v26, 0.0  ;;  %v1792_v31 = vadd.f32 %v17373_v12, %v1753_v11  ;;  %v1758_v13 = vadd.f32 %v15170_v4, %v1344_v9  ;;  %v20188_v4 = vmov 0.0  }
 0x150   : > { %v1641_v14 = vpop.f32.mrf.mxu0 }
 0x151   : > { %1874 = vst [vmem:[#allocation2 + $0x19] sm:$0xff] %v1826_v29  ;;  %v1824_v30 = vmax.f32 %v1792_v31, 0.0  ;;  %v17388_v34 = vadd.f32 %v17373_v12, %v1758_v13  ;;  %v1756_v6 = vadd.f32 %v1641_v14, %v1336_v27  ;;  %v2000_v40 = vpack.c.bf16 %v1826_v29, %v1825_v23  ;;  %v16363_v31 = vld [vmem:[%s20185_s4 + $0xa8] sm:$0xff]  }
 0x152   : > { %v15171_v32 = vpop.f32.mrf.mxu0  ;;  %v1352_v23 = vadd.f32 %v17324_v50, %v17304_v38  ;;  %v1363_v38 = vadd.f32 %v17330_v53, %v17306_v39 }
 0x153   : > { %1872 = vst [vmem:[#allocation2 + $0x9] sm:$0xff] %v1824_v30  ;;  %v1829_v16 = vmax.f32 %v17388_v34, 0.0  ;;  %v1795_v9 = vadd.f32 %v17373_v12, %v1756_v6  ;;  %v1759_v17 = vadd.f32 %v15171_v32, %v1347_v15  ;;  %v1999_v18 = vpack.c.bf16 %v1824_v30, %v1823_v25  ;;  %v17404_v25 = vpop.f32.mrf.mxu1 }
 0x154   : > { %v1644_v33 = vpop.f32.mrf.mxu0  ;;  %v1355_v15 = vadd.f32 %v17336_v52, %v17308_v41 }
 0x155   : > { %1877 = vst [vmem:[#allocation2 + $0x39] sm:$0xff] %v1829_v16  ;;  %v1827_v35 = vmax.f32 %v1795_v9, 0.0  ;;  %v1798_v43 = vadd.f32 %v17373_v12, %v1759_v17  ;;  %v1757_v24 = vadd.f32 %v1644_v33, %v1339_v10  ;;  %15212 = vmatprep.mubr.bf16.mxu1 %v1999_v18  ;;  %v17420_v6 = vpop.f32.mrf.mxu1  ;;  %v1376_v18 = vadd.f32 %v17342_v61, %v17310_v42  ;;  %v16364_v42 = vld [vmem:[%s20185_s4 + $0xa0] sm:$0xff]  }
 0x156   : > { %v1903_v26 = vld [vmem:[#allocation2] sm:$0xff]  ;;  %v15174_v11 = vpop.f32.mrf.mxu0  ;;  %15213 = vmatmul.mubr.bf16.vlgmr.msra.gmra.mxu1 %v2000_v40 }
 0x157   : > { %4929 = vst.msk [vmem:[#allocation2] sm:$0x1] %vm4928_vm2, %v20188_v4  ;;  %1875 = vst [vmem:[#allocation2 + $0x29] sm:$0xff] %v1827_v35  ;;  %v1830_v36 = vmax.f32 %v1798_v43, 0.0  ;;  %v1796_v46 = vadd.f32 %v17373_v12, %v1757_v24  ;;  %v1762_v27 = vadd.f32 %v15174_v11, %v1360_v20  ;;  %15293 = vmatpush3.bf16.msra.mxu1 %v17293_v22 }
 0x158   : > { %v1657_v29 = vpop.f32.mrf.mxu0  ;;  %15294 = vmatprep.subr.bf16.mxu1 %v16362_v19  ;;  %v1906_v9 = vld [vmem:[#allocation2 + $0x18] sm:$0xff] }
 0x159   : > { %1878 = vst [vmem:[#allocation2 + $0x41] sm:$0xff] %v1830_v36  ;;  %v1828_v50 = vmax.f32 %v1796_v46, 0.0  ;;  %v17416_v13 = vadd.f32 %v17373_v12, %v1762_v27  ;;  %v1760_v14 = vadd.f32 %v1657_v29, %v1352_v23  ;;  %v1379_v46 = vadd.f32 %v17354_v56, %v17316_v45  ;;  %v16365_v29 = vld [vmem:[%s20185_s4 + $0x98] sm:$0xff]  }
 0x15a   : > { %v15175_v30 = vpop.f32.mrf.mxu0  ;;  %v1904_v22 = vld [vmem:[#allocation2 + $0x8] sm:$0xff]  ;;  %v1905_v34 = vld [vmem:[#allocation2 + $0x10] sm:$0xff] }
 0x15b   : > { %1876 = vst [vmem:[#allocation2 + $0x31] sm:$0xff] %v1828_v50  ;;  %v1833_v10 = vmax.f32 %v17416_v13, 0.0  ;;  %v1799_v32 = vadd.f32 %v17373_v12, %v1760_v14  ;;  %v1763_v39 = vadd.f32 %v15175_v30, %v1363_v38  ;;  %v1935_v53 = vpack.c.bf16 %v1904_v22, %v1903_v26  ;;  %15295 = vmatpush3.bf16.msra.mxu1 %v16362_v19  ;;  %v17424_v17 = vld [vmem:[#allocation2 + $0xa] sm:$0xff]  ;;  %v17438_v26 = vpop.f32.mrf.mxu1 }
 0x15c   : > { %v1660_v41 = vpop.f32.mrf.mxu0  ;;  %v1936_v52 = vpack.c.bf16 %v1906_v9, %v1905_v34  ;;  %v2001_v33 = vpack.c.bf16 %v1828_v50, %v1827_v35  ;;  %15296 = vmatprep.subr.bf16.mxu1 %v16363_v31  ;;  %4937 = vst.msk [vmem:[#allocation2 + $0x11] sm:$0x1] %vm4928_vm2, %v20188_v4  ;;  %v2002_v19 = vpack.c.bf16 %v1830_v36, %v1829_v16 }
 0x15d   : > { %1881 = vst [vmem:[#allocation2 + $0x61] sm:$0xff] %v1833_v10  ;;  %v1831_v40 = vmax.f32 %v1799_v32, 0.0  ;;  %v1802_v20 = vadd.f32 %v17373_v12, %v1763_v39  ;;  %v1761_v43 = vadd.f32 %v1660_v41, %v1355_v15  ;;  %15260 = vmatprep.mubr.bf16.mxu0 %v1935_v53  ;;  %v1368_v35 = vadd.f32 %v17348_v63, %v17314_v44  ;;  %v17453_v15 = vpop.f32.mrf.mxu1 }
 0x15e   : > { %v1907_v61 = vld [vmem:[#allocation2 + $0x28] sm:$0xff]  ;;  %v15178_v24 = vpop.f32.mrf.mxu0  ;;  %15261 = vmatmul.mubr.bf16.vlgmr.msra.gmra.mxu0 %v1936_v52  ;;  %15216 = vmatprep.mubr.bf16.mxu1 %v2001_v33  ;;  %v1371_v38 = vadd.f32 %v17360_v5, %v17320_v47  ;;  %v1392_v39 = vadd.f32 %v17366_v59, %v17322_v48  ;;  %v16366_v48 = vld [vmem:[%s20185_s4 + $0x90] sm:$0xff]  }
 0x15f   : > { %4930 = vst.msk [vmem:[#allocation2 + $0x28] sm:$0x1] %vm4928_vm2, %v20188_v4  ;;  %1879 = vst [vmem:[#allocation2 + $0x51] sm:$0xff] %v1831_v40  ;;  %v1834_v11 = vmax.f32 %v1802_v20, 0.0  ;;  %v1800_v16 = vadd.f32 %v17373_v12, %v1761_v43  ;;  %v1766_v23 = vadd.f32 %v15178_v24, %v1376_v18  ;;  %15217 = vmatmul.mubr.bf16.gmra.mxu1 %v2002_v19  ;;  %v17473_v20 = vpop.f32.mrf.mxu1  ;;  %v16367_v24 = vld [vmem:[%s20185_s4 + $0x88] sm:$0xff]  }
 0x160   : > { %v1673_v36 = vpop.f32.mrf.mxu0  ;;  %15297 = vmatpush3.bf16.msra.mxu1 %v16363_v31  ;;  %v1910_v34 = vld [vmem:[#allocation2 + $0x40] sm:$0xff] }
 0x161   : > { %1882 = vst [vmem:[#allocation2 + $0x69] sm:$0xff] %v1834_v11  ;;  %v1832_v27 = vmax.f32 %v1800_v16, 0.0  ;;  %v17446_v44 = vadd.f32 %v17373_v12, %v1766_v23  ;;  %v1764_v63 = vadd.f32 %v1673_v36, %v1368_v35  ;;  %15298 = vmatprep.subr.bf16.mxu1 %v16364_v42  ;;  %v2004_v52 = vpack.c.bf16 %v1834_v11, %v1833_v10  ;;  %v17488_v36 = vpop.f32.mrf.mxu1 }
 0x162   : > { %v15179_v50 = vpop.f32.mrf.mxu0  ;;  %v1908_v14 = vld [vmem:[#allocation2 + $0x30] sm:$0xff]  ;;  %v1909_v31 = vld [vmem:[#allocation2 + $0x38] sm:$0xff]  ;;  %v1387_v35 = vadd.f32 %v17383_v28, %v17332_v55 }
 0x163   : > { %1880 = vst [vmem:[#allocation2 + $0x59] sm:$0xff] %v1832_v27  ;;  %v1837_v45 = vmax.f32 %v17446_v44, 0.0  ;;  %v1803_v56 = vadd.f32 %v17373_v12, %v1764_v63  ;;  %v1767_v30 = vadd.f32 %v15179_v50, %v1379_v46  ;;  %v1937_v22 = vpack.c.bf16 %v1908_v14, %v1907_v61  ;;  %v17457_v32 = vld [vmem:[#allocation2 + $0x32] sm:$0xff] }
 0x164   : > { %v1676_v53 = vpop.f32.mrf.mxu0  ;;  %v1938_v47 = vpack.c.bf16 %v1910_v34, %v1909_v31  ;;  %v2003_v5 = vpack.c.bf16 %v1832_v27, %v1831_v40  ;;  %15299 = vmatpush3.bf16.msra.mxu1 %v16364_v42  ;;  %4938 = vst.msk [vmem:[#allocation2 + $0x39] sm:$0x1] %vm4928_vm2, %v20188_v4  ;;  %v1384_v40 = vadd.f32 %v17375_v7, %v17326_v49 }
 0x165   : > { %1885 = vst [vmem:[#allocation2 + $0x89] sm:$0xff] %v1837_v45  ;;  %v1835_v9 = vmax.f32 %v1803_v56, 0.0  ;;  %v1806_v18 = vadd.f32 %v17373_v12, %v1767_v30  ;;  %v1765_v41 = vadd.f32 %v1676_v53, %v1371_v38  ;;  %15264 = vmatprep.mubr.bf16.mxu0 %v1937_v22  ;;  %15300 = vmatprep.subr.bf16.mxu1 %v16365_v29 }
 0x166   : > { %v1911_v59 = vld [vmem:[#allocation2 + $0x50] sm:$0xff]  ;;  %v15182_v33 = vpop.f32.mrf.mxu0  ;;  %15265 = vmatmul.mubr.bf16.gmra.mxu0 %v1938_v47  ;;  %15220 = vmatprep.mubr.bf16.mxu1 %v2003_v5  ;;  %v1395_v42 = vadd.f32 %v17378_v21, %v17328_v51  ;;  %v1408_v38 = vadd.f32 %v17392_v37, %v17334_v57  ;;  %v16368_v57 = vld [vmem:[%s20185_s4 + $0x80] sm:$0xff]   ;;  %v1400_v34 = vadd.f32 %v17404_v25, %v17338_v58  ;;  %s20201_s4 = sld [smem:[#allocation24_spill]] }
 0x167   : > { %4931 = vst.msk [vmem:[#allocation2 + $0x50] sm:$0x1] %vm4928_vm2, %v20188_v4  ;;  %1883 = vst [vmem:[#allocation2 + $0x79] sm:$0xff] %v1835_v9  ;;  %v1838_v13 = vmax.f32 %v1806_v18, 0.0  ;;  %v1804_v10 = vadd.f32 %v17373_v12, %v1765_v41  ;;  %v1770_v43 = vadd.f32 %v15182_v33, %v1392_v39  ;;  %15221 = vmatmul.mubr.bf16.gmra.mxu1 %v2004_v52  ;;  %v1418_v39 = vpop.f32.mrf.mxu1 }
 0x168   : > { %v1689_v19 = vpop.f32.mrf.mxu0  ;;  %15301 = vmatpush3.bf16.msra.mxu1 %v16365_v29  ;;  %v1914_v63 = vld [vmem:[#allocation2 + $0x68] sm:$0xff]  ;;  %v1411_v5 = vadd.f32 %v17420_v6, %v17340_v60  ;;  %v1403_v25 = vadd.f32 %v17438_v26, %v17344_v62 }
 0x169   : > { %1886 = vst [vmem:[#allocation2 + $0x91] sm:$0xff] %v1838_v13  ;;  %v1836_v61 = vmax.f32 %v1804_v10, 0.0  ;;  %v17481_v49 = vadd.f32 %v17373_v12, %v1770_v43  ;;  %v1768_v7 = vadd.f32 %v1689_v19, %v1384_v40  ;;  %15302 = vmatprep.subr.bf16.mxu1 %v16366_v48  ;;  %v2006_v30 = vpack.c.bf16 %v1838_v13, %v1837_v45 }
 0x16a   : > { %v15183_v11 = vpop.f32.mrf.mxu0  ;;  %v1912_v16 = vld [vmem:[#allocation2 + $0x58] sm:$0xff]  ;;  %v1913_v23 = vld [vmem:[#allocation2 + $0x60] sm:$0xff]  ;;  %v1424_v43 = vadd.f32 %v17453_v15, %v17346_v54  ;;  %v1416_v54 = vadd.f32 %v17473_v20, %v17350_v0  ;;  %v1419_v20 = vadd.f32 %v1418_v39, %v17356_v2 }
 0x16b   : > { %1884 = vst [vmem:[#allocation2 + $0x81] sm:$0xff] %v1836_v61  ;;  %v1841_v51 = vmax.f32 %v17481_v49, 0.0  ;;  %v1807_v21 = vadd.f32 %v17373_v12, %v1768_v7  ;;  %v1771_v46 = vadd.f32 %v15183_v11, %v1395_v42  ;;  %v1939_v27 = vpack.c.bf16 %v1912_v16, %v1911_v59  ;;  %v17492_v29 = vld [vmem:[#allocation2 + $0x5a] sm:$0xff]  ;;  %v15150_v59 = vpop.f32.mrf.mxu1 }
 0x16c   : > { %v1692_v50 = vpop.f32.mrf.mxu0  ;;  %v1940_v55 = vpack.c.bf16 %v1914_v63, %v1913_v23  ;;  %v2005_v28 = vpack.c.bf16 %v1836_v61, %v1835_v9  ;;  %15303 = vmatpush3.bf16.msra.mxu1 %v16366_v48  ;;  %4939 = vst.msk [vmem:[#allocation2 + $0x61] sm:$0x1] %vm4928_vm2, %v20188_v4  ;;  %v1427_v49 = vadd.f32 %v17488_v36, %v17352_v1 }
 0x16d   : > { %1889 = vst [vmem:[#allocation2 + $0xb1] sm:$0xff] %v1841_v51  ;;  %v1839_v14 = vmax.f32 %v1807_v21, 0.0  ;;  %v1810_v31 = vadd.f32 %v17373_v12, %v1771_v46  ;;  %v1769_v56 = vadd.f32 %v1692_v50, %v1387_v35  ;;  %15268 = vmatprep.mubr.bf16.mxu0 %v1939_v27  ;;  %15304 = vmatprep.subr.bf16.mxu1 %v16367_v24  ;;  %v1431_v15 = vpop.f32.mrf.mxu1 }
 0x16e   : > { %v1915_v37 = vld [vmem:[#allocation2 + $0x78] sm:$0xff]  ;;  %v15186_v22 = vpop.f32.mrf.mxu0  ;;  %15269 = vmatmul.mubr.bf16.gmra.mxu0 %v1940_v55  ;;  %15224 = vmatprep.mubr.bf16.mxu1 %v2005_v28 }
 0x16f   : > { %4932 = vst.msk [vmem:[#allocation2 + $0x78] sm:$0x1] %vm4928_vm2, %v20188_v4  ;;  %1887 = vst [vmem:[#allocation2 + $0xa1] sm:$0xff] %v1839_v14  ;;  %v1842_v53 = vmax.f32 %v1810_v31, 0.0  ;;  %v1808_v44 = vadd.f32 %v17373_v12, %v1769_v56  ;;  %v1774_v45 = vadd.f32 %v15186_v22, %v1408_v38  ;;  %15225 = vmatmul.mubr.bf16.gmra.mxu1 %v2006_v30  ;;  %v15151_v55 = vpop.f32.mrf.mxu1 }
 0x170   : > { %v1705_v47 = vpop.f32.mrf.mxu0  ;;  %15305 = vmatpush3.bf16.msra.mxu1 %v16367_v24  ;;  %v1918_v13 = vld [vmem:[#allocation2 + $0x90] sm:$0xff]  ;;  %v1440_v30 = vadd.f32 %v15150_v59, %v17358_v3 }
 0x171   : > { %1890 = vst [vmem:[#allocation2 + $0xb9] sm:$0xff] %v1842_v53  ;;  %v1840_v9 = vmax.f32 %v1808_v44, 0.0  ;;  %v17514_v18 = vadd.f32 %v17373_v12, %v1774_v45  ;;  %v1772_v58 = vadd.f32 %v1705_v47, %v1400_v34  ;;  %15306 = vmatprep.subr.bf16.mxu1 %v16368_v57  ;;  %v2008_v24 = vpack.c.bf16 %v1842_v53, %v1841_v51  ;;  %v1434_v3 = vpop.f32.mrf.mxu1 }
 0x172   : > { %v15187_v41 = vpop.f32.mrf.mxu0  ;;  %v1916_v52 = vld [vmem:[#allocation2 + $0x80] sm:$0xff]  ;;  %v1917_v48 = vld [vmem:[#allocation2 + $0x88] sm:$0xff]  ;;  %v1432_v47 = vadd.f32 %v1431_v15, %v17362_v8 }
 0x173   : > { %1888 = vst [vmem:[#allocation2 + $0xa9] sm:$0xff] %v1840_v9  ;;  %v1845_v33 = vmax.f32 %v17514_v18, 0.0  ;;  %v1811_v40 = vadd.f32 %v17373_v12, %v1772_v58  ;;  %v1775_v60 = vadd.f32 %v15187_v41, %v1411_v5  ;;  %v1941_v6 = vpack.c.bf16 %v1916_v52, %v1915_v37  ;;  %v17520_v10 = vld [vmem:[#allocation2 + $0x82] sm:$0xff] }
 0x174   : > { %v1708_v19 = vpop.f32.mrf.mxu0  ;;  %v1942_v42 = vpack.c.bf16 %v1918_v13, %v1917_v48  ;;  %v2007_v62 = vpack.c.bf16 %v1840_v9, %v1839_v14  ;;  %15307 = vmatpush3.bf16.msra.mxu1 %v16368_v57  ;;  %4940 = vst.msk [vmem:[#allocation2 + $0x89] sm:$0x1] %vm4928_vm2, %v20188_v4 }
 0x175   : > { %1893 = vst [vmem:[#allocation2 + $0xd9] sm:$0xff] %v1845_v33  ;;  %v1843_v26 = vmax.f32 %v1811_v40, 0.0  ;;  %v1814_v61 = vadd.f32 %v17373_v12, %v1775_v60  ;;  %v1773_v7 = vadd.f32 %v1708_v19, %v1403_v25  ;;  %15272 = vmatprep.mubr.bf16.mxu0 %v1941_v6  ;;  %v20189_v25 = vld [vmem:[#allocation15_spill] sm:$0xff] }
 0x176   : > { %v1919_v35 = vld [vmem:[#allocation2 + $0xa0] sm:$0xff]  ;;  %v15190_v11 = vpop.f32.mrf.mxu0  ;;  %15273 = vmatmul.mubr.bf16.gmra.mxu0 %v1942_v42  ;;  %15228 = vmatprep.mubr.bf16.mxu1 %v2007_v62  ;;  %v1443_v41 = vadd.f32 %v15151_v55, %v20189_v25  ;;  %v2464_v25 = vld [vmem:[#allocation2 + $0x8a] sm:$0xff] }
 0x177   : > { %4933 = vst.msk [vmem:[#allocation2 + $0xa0] sm:$0x1] %vm4928_vm2, %v20188_v4  ;;  %1891 = vst [vmem:[#allocation2 + $0xc9] sm:$0xff] %v1843_v26  ;;  %v1846_v16 = vmax.f32 %v1814_v61, 0.0  ;;  %v1812_v23 = vadd.f32 %v17373_v12, %v1773_v7  ;;  %v1778_v21 = vadd.f32 %v15190_v11, %v1424_v43  ;;  %15229 = vmatmul.mubr.bf16.gmra.mxu1 %v2008_v24 }
 0x178   : > { %v1721_v46 = vpop.f32.mrf.mxu0  ;;  %v1922_v1 = vld [vmem:[#allocation2 + $0xb8] sm:$0xff] }
 0x179   : > { %1894 = vst [vmem:[#allocation2 + $0xe1] sm:$0xff] %v1846_v16  ;;  %v1844_v51 = vmax.f32 %v1812_v23, 0.0  ;;  %v17537_v27 = vadd.f32 %v17373_v12, %v1778_v21  ;;  %v1776_v0 = vadd.f32 %v1721_v46, %v1416_v54  ;;  %v2010_v53 = vpack.c.bf16 %v1846_v16, %v1845_v33  ;;  %v20190_v33 = vld [vmem:[#allocation16_spill] sm:$0xff] }
 0x17a   : > { %v15191_v63 = vpop.f32.mrf.mxu0  ;;  %v1920_v38 = vld [vmem:[#allocation2 + $0xa8] sm:$0xff]  ;;  %v1921_v50 = vld [vmem:[#allocation2 + $0xb0] sm:$0xff]  ;;  %v1435_v8 = vadd.f32 %v1434_v3, %v20190_v33  ;;  %v2469_v33 = vld [vmem:[#allocation2 + $0xba] sm:$0xff] }
 0x17b   : > { %1892 = vst [vmem:[#allocation2 + $0xd1] sm:$0xff] %v1844_v51  ;;  %v1849_v28 = vmax.f32 %v17537_v27, 0.0  ;;  %v1815_v14 = vadd.f32 %v17373_v12, %v1776_v0  ;;  %v1779_v31 = vadd.f32 %v15191_v63, %v1427_v49  ;;  %v1943_v56 = vpack.c.bf16 %v1920_v38, %v1919_v35  ;;  %v17542_v36 = vld [vmem:[#allocation2 + $0xaa] sm:$0xff]  ;;  %v2450_v0 = vld [vmem:[#allocation2 + $0x2] sm:$0xff] }
 0x17c   : > { %v1724_v57 = vpop.f32.mrf.mxu0  ;;  %v1944_v37 = vpack.c.bf16 %v1922_v1, %v1921_v50  ;;  %v2009_v22 = vpack.c.bf16 %v1844_v51, %v1843_v26  ;;  %4941 = vst.msk [vmem:[#allocation2 + $0xb1] sm:$0x1] %vm4928_vm2, %v20188_v4  ;;  %v2460_v3 = vld [vmem:[#allocation2 + $0x62] sm:$0xff] }
 0x17d   : > { %1897 = vst [vmem:[#allocation2 + $0x101] sm:$0xff] %v1849_v28  ;;  %v1847_v2 = vmax.f32 %v1815_v14, 0.0  ;;  %v1818_v34 = vadd.f32 %v17373_v12, %v1779_v31  ;;  %v1777_v39 = vadd.f32 %v1724_v57, %v1419_v20  ;;  %15276 = vmatprep.mubr.bf16.mxu0 %v1943_v56  ;;  %v2452_v14 = vld [vmem:[#allocation2 + $0x12] sm:$0xff]  ;;  %v2453_v31 = vld [vmem:[#allocation2 + $0x1a] sm:$0xff]  ;;  %v2454_v57 = vld [vmem:[#allocation2 + $0x2a] sm:$0xff] }
 0x17e   : > { %v1923_v44 = vld [vmem:[#allocation2 + $0xc8] sm:$0xff]  ;;  %v15194_v45 = vpop.f32.mrf.mxu0  ;;  %15277 = vmatmul.mubr.bf16.gmra.mxu0 %v1944_v37  ;;  %15232 = vmatprep.mubr.bf16.mxu1 %v2009_v22 }
 0x17f   : > { %4934 = vst.msk [vmem:[#allocation2 + $0xc8] sm:$0x1] %vm4928_vm2, %v20188_v4  ;;  %1895 = vst [vmem:[#allocation2 + $0xf1] sm:$0xff] %v1847_v2  ;;  %v1850_v5 = vmax.f32 %v1818_v34, 0.0  ;;  %v1816_v9 = vadd.f32 %v17373_v12, %v1777_v39  ;;  %v1782_v18 = vadd.f32 %v15194_v45, %v1440_v30  ;;  %15233 = vmatmul.mubr.bf16.gmra.mxu1 %v2010_v53  ;;  %v2456_v39 = vld [vmem:[#allocation2 + $0x3a] sm:$0xff]  ;;  %v2457_v53 = vld [vmem:[#allocation2 + $0x42] sm:$0xff] }
 0x180   : > { %v1737_v58 = vpop.f32.mrf.mxu0  ;;  %v1926_v62 = vld [vmem:[#allocation2 + $0xe0] sm:$0xff]  ;;  %v2484_v34 = vpack.c.bf16 %v17457_v32, %v2454_v57  ;;  %v2485_v45 = vpack.c.bf16 %v2457_v53, %v2456_v39  ;;  %v2465_v32 = vld [vmem:[#allocation2 + $0x92] sm:$0xff] }
 0x181   : > { %1898 = vst [vmem:[#allocation2 + $0x109] sm:$0xff] %v1850_v5  ;;  %v1848_v52 = vmax.f32 %v1816_v9, 0.0  ;;  %v1821_v48 = vadd.f32 %v17373_v12, %v1782_v18  ;;  %v1780_v59 = vadd.f32 %v1737_v58, %v1432_v47  ;;  %v2012_v15 = vpack.c.bf16 %v1850_v5, %v1849_v28  ;;  %v2461_v5 = vld [vmem:[#allocation2 + $0x6a] sm:$0xff]  ;;  %v2462_v9 = vld [vmem:[#allocation2 + $0x7a] sm:$0xff] }
 0x182   : > { %v15195_v40 = vpop.f32.mrf.mxu0  ;;  %v1924_v60 = vld [vmem:[#allocation2 + $0xd0] sm:$0xff]  ;;  %v1925_v6 = vld [vmem:[#allocation2 + $0xd8] sm:$0xff]  ;;  %v2482_v28 = vpack.c.bf16 %v17424_v17, %v2450_v0  ;;  %v2483_v17 = vpack.c.bf16 %v2453_v31, %v2452_v14  ;;  %v2487_v18 = vpack.c.bf16 %v2461_v5, %v2460_v3  ;;  %v2488_v58 = vpack.c.bf16 %v17520_v10, %v2462_v9 }
 0x183   : > { %1896 = vst [vmem:[#allocation2 + $0xf9] sm:$0xff] %v1848_v52  ;;  %v1853_v13 = vmax.f32 %v1821_v48, 0.0  ;;  %v1819_v43 = vadd.f32 %v17373_v12, %v1780_v59  ;;  %v1783_v19 = vadd.f32 %v15195_v40, %v1443_v41  ;;  %v1945_v42 = vpack.c.bf16 %v1924_v60, %v1923_v44  ;;  %v17556_v26 = vld [vmem:[#allocation2 + $0xd2] sm:$0xff]  ;;  %v2466_v41 = vld [vmem:[#allocation2 + $0xa2] sm:$0xff] }
 0x184   : > { %v1740_v61 = vpop.f32.mrf.mxu0  ;;  %v1946_v7 = vpack.c.bf16 %v1926_v62, %v1925_v6  ;;  %v2011_v24 = vpack.c.bf16 %v1848_v52, %v1847_v2  ;;  %4942 = vst.msk [vmem:[#allocation2 + $0xd9] sm:$0x1] %vm4928_vm2, %v20188_v4  ;;  %v2458_v44 = vld [vmem:[#allocation2 + $0x52] sm:$0xff]  ;;  %v2489_v52 = vpack.c.bf16 %v2465_v32, %v2464_v25  ;;  %v2490_v48 = vpack.c.bf16 %v17542_v36, %v2466_v41 }
 0x185   : > { %1901 = vst [vmem:[#allocation2 + $0x129] sm:$0xff] %v1853_v13  ;;  %v1851_v35 = vmax.f32 %v1819_v43, 0.0  ;;  %v1822_v11 = vadd.f32 %v17373_v12, %v1783_v19  ;;  %v1781_v54 = vadd.f32 %v1740_v61, %v1435_v8  ;;  %15280 = vmatprep.mubr.bf16.mxu0 %v1945_v42  ;;  %v2486_v47 = vpack.c.bf16 %v17492_v29, %v2458_v44  ;;  %v16369_v29 = vld [vmem:[%s20126_s15 + $0x38] sm:$0xff]   ;;  %v2470_v8 = vld [vmem:[#allocation2 + $0xca] sm:$0xff]  ;;  %v2473_v43 = vld [vmem:[#allocation2 + $0xe2] sm:$0xff] }
 0x186   : > { %v1927_v16 = vld [vmem:[#allocation2 + $0xf0] sm:$0xff]  ;;  %15281 = vmatmul.mubr.bf16.gmra.mxu0 %v1946_v7  ;;  %15236 = vmatprep.mubr.bf16.mxu1 %v2011_v24  ;;  %v16370_v59 = vld [vmem:[%s20126_s15 + $0x78] sm:$0xff]   ;;  %v2492_v36 = vpack.c.bf16 %v17556_v26, %v2470_v8  ;;  %v16373_v26 = vld [vmem:[%s20126_s15 + $0x28] sm:$0xff]  }
 0x187   : > { %4935 = vst.msk [vmem:[#allocation2 + $0xf0] sm:$0x1] %vm4928_vm2, %v20188_v4  ;;  %1899 = vst [vmem:[#allocation2 + $0x119] sm:$0xff] %v1851_v35  ;;  %v1854_v23 = vmax.f32 %v1822_v11, 0.0  ;;  %v1820_v21 = vadd.f32 %v17373_v12, %v1781_v54  ;;  %15237 = vmatmul.mubr.bf16.gmra.mxu1 %v2012_v15  ;;  %15340 = vmatprep.subr.bf16.mxu0 %v16369_v29  ;;  %v2468_v10 = vld [vmem:[#allocation2 + $0xb2] sm:$0xff]  ;;  %v16374_v61 = vld [vmem:[%s20126_s15 + $0x68] sm:$0xff]  }
 0x188   : > { %v1930_v27 = vld [vmem:[#allocation2 + $0x108] sm:$0xff]  ;;  %15388 = vmatprep.subr.bf16.mxu1 %v16370_v59  ;;  %15341 = vmatpush3.bf16.msra.mxu0 %v16369_v29  ;;  %v2491_v40 = vpack.c.bf16 %v2469_v33, %v2468_v10  ;;  %v16371_v60 = vld [vmem:[%s20126_s15 + $0x30] sm:$0xff]   ;;  %v16375_v15 = vld [vmem:[%s20126_s15 + $0x20] sm:$0xff]  }
 0x189   : > { %1902 = vst [vmem:[#allocation2 + $0x131] sm:$0xff] %v1854_v23  ;;  %v1852_v46 = vmax.f32 %v1820_v21, 0.0  ;;  %v2014_v55 = vpack.c.bf16 %v1854_v23, %v1853_v13  ;;  %v16372_v6 = vld [vmem:[%s20126_s15 + $0x70] sm:$0xff]   ;;  %15342 = vmatprep.subr.bf16.mxu0 %v16371_v60  ;;  %v2472_v13 = vld [vmem:[#allocation2 + $0xda] sm:$0xff]  ;;  %v2476_v7 = vld [vmem:[#allocation2 + $0x102] sm:$0xff] }
 0x18a   : > { %v1928_v49 = vld [vmem:[#allocation2 + $0xf8] sm:$0xff]  ;;  %v1929_v51 = vld [vmem:[#allocation2 + $0x100] sm:$0xff]  ;;  %v2493_v42 = vpack.c.bf16 %v2473_v43, %v2472_v13  ;;  %v2477_v24 = vld [vmem:[#allocation2 + $0x10a] sm:$0xff] }
 0x18b   : > { %1900 = vst [vmem:[#allocation2 + $0x121] sm:$0xff] %v1852_v46  ;;  %v1947_v20 = vpack.c.bf16 %v1928_v49, %v1927_v16  ;;  %v1948_v63 = vpack.c.bf16 %v1930_v27, %v1929_v51  ;;  %v2013_v38 = vpack.c.bf16 %v1852_v46, %v1851_v35  ;;  %v17564_v50 = vld [vmem:[#allocation2 + $0xfa] sm:$0xff]  ;;  %v2474_v19 = vld [vmem:[#allocation2 + $0xf2] sm:$0xff]  ;;  %v2495_v11 = vpack.c.bf16 %v2477_v24, %v2476_v7 }
 0x18c   : > { %4943 = vst.msk [vmem:[#allocation2 + $0x101] sm:$0x1] %vm4928_vm2, %v20188_v4  ;;  %15343 = vmatpush3.bf16.msra.mxu0 %v16371_v60  ;;  %v2494_v62 = vpack.c.bf16 %v17564_v50, %v2474_v19  ;;  %v16376_v16 = vld [vmem:[%s20126_s15 + $0x60] sm:$0xff]   ;;  %v16377_v49 = vld [vmem:[%s20126_s15 + $0x18] sm:$0xff]   ;;  %v16379_v27 = vld [vmem:[%s20126_s15 + $0x10] sm:$0xff]  }
 0x18d   : > { %15284 = vmatprep.mubr.bf16.mxu0 %v1947_v20  ;;  %15240 = vmatprep.mubr.bf16.mxu1 %v2013_v38  ;;  %v16378_v51 = vld [vmem:[%s20126_s15 + $0x58] sm:$0xff]   ;;  %v16380_v0 = vld [vmem:[%s20126_s15 + $0x50] sm:$0xff]   ;;  %v16381_v20 = vld [vmem:[%s20126_s15 + $0x8] sm:$0xff]  }
 0x18e   : > { %v1931_v12 = vld [vmem:[#allocation2 + $0x118] sm:$0xff]  ;;  %15285 = vmatmul.mubr.bf16.gmra.mxu0 %v1948_v63  ;;  %15344 = vmatprep.subr.bf16.mxu0 %v16373_v26  ;;  %v16382_v63 = vld [vmem:[%s20126_s15 + $0x48] sm:$0xff]   ;;  %v16383_v38 = vld [vmem:[%s20126_s15] sm:$0xff]  }
 0x18f   : > { %4936 = vst.msk [vmem:[#allocation2 + $0x118] sm:$0x1] %vm4928_vm2, %v20188_v4  ;;  %15241 = vmatmul.mubr.bf16.gmra.mxu1 %v2014_v55  ;;  %v16384_v50 = vld [vmem:[%s20126_s15 + $0x40] sm:$0xff]  }
 0x190   : > { %15308 = vmatprep.mubr.bf16.mxu1 %v2482_v28  ;;  %v1934_v30 = vld [vmem:[#allocation2 + $0x130] sm:$0xff]  ;;  %15345 = vmatpush3.bf16.msra.mxu0 %v16373_v26 }
 0x191   : > { %15346 = vmatprep.subr.bf16.mxu0 %v16375_v15  ;;  %v2480_v23 = vld [vmem:[#allocation2 + $0x12a] sm:$0xff]  ;;  %v2481_v21 = vld [vmem:[#allocation2 + $0x132] sm:$0xff] }
 0x192   : > { %v1932_v56 = vld [vmem:[#allocation2 + $0x120] sm:$0xff]  ;;  %v1933_v1 = vld [vmem:[#allocation2 + $0x128] sm:$0xff]  ;;  %v2497_v46 = vpack.c.bf16 %v2481_v21, %v2480_v23 }
 0x193   : > { %v1949_v37 = vpack.c.bf16 %v1932_v56, %v1931_v12  ;;  %v1950_v22 = vpack.c.bf16 %v1934_v30, %v1933_v1  ;;  %v17571_v2 = vld [vmem:[#allocation2 + $0x122] sm:$0xff]  ;;  %v2478_v35 = vld [vmem:[#allocation2 + $0x11a] sm:$0xff] }
 0x194   : > { %4944 = vst.msk [vmem:[#allocation2 + $0x129] sm:$0x1] %vm4928_vm2, %v20188_v4  ;;  %v2496_v54 = vpack.c.bf16 %v17571_v2, %v2478_v35  ;;  %15347 = vmatpush3.bf16.msra.mxu0 %v16375_v15 }
 0x195   : > { %15288 = vmatprep.mubr.bf16.mxu0 %v1949_v37  ;;  %15348 = vmatprep.subr.bf16.mxu0 %v16377_v49 }
 0x196   : > { %15289 = vmatmul.mubr.bf16.gmra.mxu0 %v1950_v22 }
 0x197   : > { %15309 = vmatmul.mubr.bf16.vlgmr.msra.gmra.mxu1 %v2483_v17 }
 0x198   : > { %15312 = vmatprep.mubr.bf16.mxu1 %v2484_v34  ;;  %15389 = vmatpush3.bf16.msra.mxu1 %v16370_v59 }
 0x199   : > { %15390 = vmatprep.subr.bf16.mxu1 %v16372_v6  ;;  %15349 = vmatpush3.bf16.msra.mxu0 %v16377_v49 }
 0x19a   : > { %15350 = vmatprep.subr.bf16.mxu0 %v16379_v27 }
 0x19c   : > { %15391 = vmatpush3.bf16.msra.mxu1 %v16372_v6 }
 0x19d   : > { %15392 = vmatprep.subr.bf16.mxu1 %v16374_v61  ;;  %15351 = vmatpush3.bf16.msra.mxu0 %v16379_v27 }
 0x19e   : > { %15352 = vmatprep.subr.bf16.mxu0 %v16381_v20 }
 0x19f   : > { %15313 = vmatmul.mubr.bf16.gmra.mxu1 %v2485_v45 }
 0x1a0   : > { %15316 = vmatprep.mubr.bf16.mxu1 %v2486_v47  ;;  %15393 = vmatpush3.bf16.msra.mxu1 %v16374_v61 }
 0x1a1   : > { %15394 = vmatprep.subr.bf16.mxu1 %v16376_v16  ;;  %15353 = vmatpush3.bf16.msra.mxu0 %v16381_v20 }
 0x1a2   : > { %15354 = vmatprep.subr.bf16.mxu0 %v16383_v38 }
 0x1a4   : > { %15395 = vmatpush3.bf16.msra.mxu1 %v16376_v16 }
 0x1a5   : > { %15396 = vmatprep.subr.bf16.mxu1 %v16378_v51  ;;  %15355 = vmatpush3.bf16.msra.mxu0 %v16383_v38 }
 0x1a7   : > { %15317 = vmatmul.mubr.bf16.gmra.mxu1 %v2487_v18 }
 0x1a8   : > { %15320 = vmatprep.mubr.bf16.mxu1 %v2488_v58  ;;  %15397 = vmatpush3.bf16.msra.mxu1 %v16378_v51 }
 0x1a9   : > { %15398 = vmatprep.subr.bf16.mxu1 %v16380_v0 }
 0x1ac   : > { %15399 = vmatpush3.bf16.msra.mxu1 %v16380_v0 }
 0x1ad   : > { %15400 = vmatprep.subr.bf16.mxu1 %v16382_v63 }
 0x1af   : > { %15321 = vmatmul.mubr.bf16.gmra.mxu1 %v2489_v52 }
 0x1b0   : > { %15324 = vmatprep.mubr.bf16.mxu1 %v2490_v48  ;;  %15401 = vmatpush3.bf16.msra.mxu1 %v16382_v63 }
 0x1b1   : > { %15402 = vmatprep.subr.bf16.mxu1 %v16384_v50 }
 0x1b4   : > { %15403 = vmatpush3.bf16.msra.mxu1 %v16384_v50 }
 0x1b7   : > { %15325 = vmatmul.mubr.bf16.gmra.mxu1 %v2491_v40 }
 0x1b8   : > { %15328 = vmatprep.mubr.bf16.mxu1 %v2492_v36 }
 0x1bf   : > { %15329 = vmatmul.mubr.bf16.gmra.mxu1 %v2493_v42 }
 0x1c0   : > { %15332 = vmatprep.mubr.bf16.mxu1 %v2494_v62 }
 0x1c7   : > { %15333 = vmatmul.mubr.bf16.gmra.mxu1 %v2495_v11 }
 0x1c8   : > { %15336 = vmatprep.mubr.bf16.mxu1 %v2496_v54 }
 0x1cf   : > { %15337 = vmatmul.mubr.bf16.gmra.mxu1 %v2497_v46  ;;  %v17705_v46 = vld [vmem:[%s20125_s14 + $0x1] ss:$0 sm:$0xff] }
 0x216   : > { %v15214_v55 = vpop.f32.mrf.mxu1 }
 0x218   : > { %v2114_v12 = vpop.f32.mrf.mxu1 }
 0x21a   : > { %v15215_v28 = vpop.f32.mrf.mxu1 }
 0x21c   : > { %v2117_v14 = vpop.f32.mrf.mxu1 }
 0x21e   : > { %v15262_v31 = vpop.f32.mrf.mxu0 }
 0x21f   : > { %v15218_v56 = vpop.f32.mrf.mxu1  ;;  %v2332_v54 = vadd.f32 %v15262_v31, %v15214_v55 }
 0x220   : > { %v2323_v1 = vpop.f32.mrf.mxu0 }
 0x221   : > { %v2130_v30 = vpop.f32.mrf.mxu1  ;;  %v2324_v16 = vadd.f32 %v2323_v1, %v2114_v12 }
 0x222   : > { %v15263_v57 = vpop.f32.mrf.mxu0 }
 0x223   : > { %v17630_v37 = vpop.f32.mrf.mxu1  ;;  %v2335_v51 = vadd.f32 %v15263_v57, %v15215_v28 }
 0x224   : > { %v2326_v22 = vpop.f32.mrf.mxu0 }
 0x225   : > { %v17632_v2 = vpop.f32.mrf.mxu1  ;;  %v2327_v20 = vadd.f32 %v2326_v22, %v2117_v14 }
 0x226   : > { %v15266_v17 = vpop.f32.mrf.mxu0 }
 0x227   : > { %v17634_v34 = vpop.f32.mrf.mxu1  ;;  %v2348_v12 = vadd.f32 %v15266_v17, %v15218_v56 }
 0x228   : > { %v2339_v39 = vpop.f32.mrf.mxu0 }
 0x229   : > { %v17636_v53 = vpop.f32.mrf.mxu1 }
 0x22a   : > { %v15267_v45 = vpop.f32.mrf.mxu0 }
 0x22b   : > { %v17638_v44 = vpop.f32.mrf.mxu1  ;;  %v2351_v14 = vadd.f32 %v15267_v45, %v17630_v37 }
 0x22c   : > { %v2342_v5 = vpop.f32.mrf.mxu0 }
 0x22d   : > { %v17640_v47 = vpop.f32.mrf.mxu1 }
 0x22e   : > { %v17648_v58 = vpop.f32.mrf.mxu0 }
 0x22f   : > { %v17642_v3 = vpop.f32.mrf.mxu1 }
 0x230   : > { %v17654_v41 = vpop.f32.mrf.mxu0 }
 0x231   : > { %v17644_v9 = vpop.f32.mrf.mxu1 }
 0x232   : > { %v17660_v29 = vpop.f32.mrf.mxu0 }
 0x233   : > { %v17646_v18 = vpop.f32.mrf.mxu1 }
 0x234   : > { %v17666_v33 = vpop.f32.mrf.mxu0 }
 0x235   : > { %v17650_v25 = vpop.f32.mrf.mxu1 }
 0x236   : > { %v17672_v36 = vpop.f32.mrf.mxu0 }
 0x237   : > { %v17652_v32 = vpop.f32.mrf.mxu1 }
 0x238   : > { %v17678_v13 = vpop.f32.mrf.mxu0 }
 0x239   : > { %v17656_v52 = vpop.f32.mrf.mxu1 }
 0x23a   : > { %v17684_v42 = vpop.f32.mrf.mxu0 }
 0x23b   : > { %v17658_v48 = vpop.f32.mrf.mxu1 }
 0x23c   : > { %v17690_v61 = vpop.f32.mrf.mxu0 }
 0x23d   : > { %v17662_v59 = vpop.f32.mrf.mxu1 }
 0x23e   : > { %v17696_v35 = vpop.f32.mrf.mxu0 }
 0x23f   : > { %v17664_v10 = vpop.f32.mrf.mxu1 }
 0x240   : > { %v17700_v21 = vpop.f32.mrf.mxu0 }
 0x241   : > { %v17668_v8 = vpop.f32.mrf.mxu1 }
 0x242   : > { %v17708_v50 = vpop.f32.mrf.mxu0 }
 0x243   : > { %v17670_v40 = vpop.f32.mrf.mxu1 }
 0x244   : > { %v17714_v22 = vpop.f32.mrf.mxu0 }
 0x245   : > { %v17674_v60 = vpop.f32.mrf.mxu1 }
 0x247   : > { %v17676_v6 = vpop.f32.mrf.mxu1 }
 0x249   : > { %v17680_v43 = vpop.f32.mrf.mxu1 }
 0x24b   : > { %v17682_v19 = vpop.f32.mrf.mxu1 }
 0x24d   : > { %v17686_v62 = vpop.f32.mrf.mxu1 }
 0x24f   : > { %v17688_v26 = vpop.f32.mrf.mxu1 }
 0x251   : > { %v17692_v7 = vpop.f32.mrf.mxu1 }
 0x253   : > { %v17694_v24 = vpop.f32.mrf.mxu1 }
 0x254   : > { %20191 = vst [vmem:[#allocation15_spill] sm:$0xff] %v17694_v24 }
 0x255   : > { %v17698_v11 = vpop.f32.mrf.mxu1 }
 0x256   : > { %20192 = vst [vmem:[#allocation16_spill] sm:$0xff] %v17698_v11 }
 0x257   : > { %v15310_v15 = vpop.f32.mrf.mxu1 }
 0x258   : > { %v2726_v23 = vadd.f32 %v15310_v15, %v2332_v54  ;;  %v2340_v15 = vadd.f32 %v2339_v39, %v2130_v30 }
 0x259   : > { %v2597_v49 = vpop.f32.mrf.mxu1 }
 0x25a   : > { %v2724_v27 = vadd.f32 %v2597_v49, %v2324_v16  ;;  %v2766_v63 = vadd.f32 %v17705_v46, %v2726_v23 }
 0x25b   : > { %v15311_v0 = vpop.f32.mrf.mxu1 }
 0x25c   : > { %v2727_v38 = vadd.f32 %v15311_v0, %v2335_v51  ;;  %v2764_v31 = vadd.f32 %v17705_v46, %v2724_v27  ;;  %v2798_v11 = vmax.f32 %v2766_v63, 0.0  ;;  %v2343_v27 = vadd.f32 %v2342_v5, %v17632_v2 }
 0x25d   : > { %v2600_v55 = vpop.f32.mrf.mxu1  ;;  %v2356_v2 = vadd.f32 %v17654_v41, %v17636_v53  ;;  %v2359_v53 = vadd.f32 %v17666_v33, %v17640_v47  ;;  %v2372_v47 = vadd.f32 %v17678_v13, %v17644_v9  ;;  %v2375_v9 = vadd.f32 %v17690_v61, %v17650_v25 }
 0x25e   : > { %v2767_v1 = vadd.f32 %v17705_v46, %v2727_v38  ;;  %v2725_v54 = vadd.f32 %v2600_v55, %v2327_v20  ;;  %v2796_v23 = vmax.f32 %v2764_v31, 0.0  ;;  %v2364_v20 = vadd.f32 %v17648_v58, %v17634_v34 }
 0x25f   : > { %v15314_v4 = vpop.f32.mrf.mxu1  ;;  %v2367_v55 = vadd.f32 %v17660_v29, %v17638_v44 }
 0x260   : > { %v2799_v24 = vmax.f32 %v2767_v1, 0.0  ;;  %v2765_v28 = vadd.f32 %v17705_v46, %v2725_v54  ;;  %v2730_v57 = vadd.f32 %v15314_v4, %v2348_v12  ;;  %v17720_v4 = vpop.f32.mrf.mxu0 }
 0x261   : > { %v2613_v16 = vpop.f32.mrf.mxu1 }
 0x262   : > { %v2829_v49 = vpack.c.bf16 %v2799_v24, %v2798_v11  ;;  %v2797_v56 = vmax.f32 %v2765_v28, 0.0  ;;  %v2728_v17 = vadd.f32 %v2613_v16, %v2340_v15  ;;  %v2770_v30 = vadd.f32 %v17705_v46, %v2730_v57  ;;  %v17729_v12 = vpop.f32.mrf.mxu0 }
 0x263   : > { %v15315_v51 = vpop.f32.mrf.mxu1 }
 0x264   : > { %v2731_v39 = vadd.f32 %v15315_v51, %v2351_v14  ;;  %v2828_v0 = vpack.c.bf16 %v2797_v56, %v2796_v23  ;;  %v2768_v45 = vadd.f32 %v17705_v46, %v2728_v17  ;;  %v2802_v11 = vmax.f32 %v2770_v30, 0.0 }
 0x265   : > { %v2616_v37 = vpop.f32.mrf.mxu1  ;;  %v2380_v23 = vadd.f32 %v17672_v36, %v17642_v3  ;;  %v2383_v30 = vadd.f32 %v17684_v42, %v17646_v18 }
 0x266   : > { %v2771_v63 = vadd.f32 %v17705_v46, %v2731_v39  ;;  %v2729_v24 = vadd.f32 %v2616_v37, %v2343_v27  ;;  %15356 = vmatprep.mubr.bf16.mxu0 %v2828_v0  ;;  %15404 = vmatprep.mubr.bf16.mxu1 %v2828_v0  ;;  %v2800_v1 = vmax.f32 %v2768_v45, 0.0 }
 0x267   : > { %v15318_v5 = vpop.f32.mrf.mxu1  ;;  %15357 = vmatmul.mubr.bf16.vlgmr.msra.gmra.mxu0 %v2829_v49  ;;  %15405 = vmatmul.mubr.bf16.vlgmr.msra.gmra.mxu1 %v2829_v49  ;;  %v17736_v49 = vpop.f32.mrf.mxu0 }
 0x268   : > { %v2803_v38 = vmax.f32 %v2771_v63, 0.0  ;;  %v2769_v34 = vadd.f32 %v17705_v46, %v2729_v24  ;;  %v2734_v58 = vadd.f32 %v15318_v5, %v2364_v20 }
 0x269   : > { %v2629_v31 = vpop.f32.mrf.mxu1  ;;  %v17745_v39 = vpop.f32.mrf.mxu0 }
 0x26a   : > { %v2801_v54 = vmax.f32 %v2769_v34, 0.0  ;;  %v2732_v15 = vadd.f32 %v2629_v31, %v2356_v2  ;;  %v2831_v28 = vpack.c.bf16 %v2803_v38, %v2802_v11  ;;  %v2774_v41 = vadd.f32 %v17705_v46, %v2734_v58 }
 0x26b   : > { %v15319_v57 = vpop.f32.mrf.mxu1  ;;  %v2396_v11 = vadd.f32 %v17696_v35, %v17652_v32  ;;  %v15286_v38 = vpop.f32.mrf.mxu0  ;;  %v2399_v35 = vadd.f32 %v17708_v50, %v17658_v48 }
 0x26c   : > { %v2735_v14 = vadd.f32 %v15319_v57, %v2367_v55  ;;  %v2830_v16 = vpack.c.bf16 %v2801_v54, %v2800_v1  ;;  %v2772_v29 = vadd.f32 %v17705_v46, %v2732_v15  ;;  %v2806_v51 = vmax.f32 %v2774_v41, 0.0 }
 0x26d   : > { %v2632_v44 = vpop.f32.mrf.mxu1  ;;  %v2388_v55 = vadd.f32 %v17700_v21, %v17656_v52  ;;  %v2419_v54 = vpop.f32.mrf.mxu0  ;;  %v2391_v52 = vadd.f32 %v17714_v22, %v17662_v59 }
 0x26e   : > { %v2775_v56 = vadd.f32 %v17705_v46, %v2735_v14  ;;  %v2733_v17 = vadd.f32 %v2632_v44, %v2359_v53  ;;  %15360 = vmatprep.mubr.bf16.mxu0 %v2830_v16  ;;  %15408 = vmatprep.mubr.bf16.mxu1 %v2830_v16  ;;  %v2804_v20 = vmax.f32 %v2772_v29, 0.0  ;;  %v2412_v44 = vadd.f32 %v17720_v4, %v17664_v10 }
 0x26f   : > { %v15322_v33 = vpop.f32.mrf.mxu1  ;;  %15361 = vmatmul.mubr.bf16.gmra.mxu0 %v2831_v28  ;;  %15409 = vmatmul.mubr.bf16.gmra.mxu1 %v2831_v28  ;;  %v15287_v29 = vpop.f32.mrf.mxu0  ;;  %v2415_v4 = vadd.f32 %v17736_v49, %v17670_v40 }
 0x270   : > { %v2807_v27 = vmax.f32 %v2775_v56, 0.0  ;;  %v2773_v3 = vadd.f32 %v17705_v46, %v2733_v17  ;;  %v2738_v36 = vadd.f32 %v15322_v33, %v2380_v23 }
 0x271   : > { %v2645_v0 = vpop.f32.mrf.mxu1 }
 0x272   : > { %v2805_v37 = vmax.f32 %v2773_v3, 0.0  ;;  %v2736_v45 = vadd.f32 %v2645_v0, %v2372_v47  ;;  %v2833_v63 = vpack.c.bf16 %v2807_v27, %v2806_v51  ;;  %v2778_v13 = vadd.f32 %v17705_v46, %v2738_v36  ;;  %v2422_v27 = vpop.f32.mrf.mxu0 }
 0x273   : > { %v15323_v24 = vpop.f32.mrf.mxu1  ;;  %v2404_v47 = vadd.f32 %v17729_v12, %v17668_v8  ;;  %v2407_v8 = vadd.f32 %v17745_v39, %v17674_v60 }
 0x274   : > { %v2739_v2 = vadd.f32 %v15323_v24, %v2383_v30  ;;  %v2832_v5 = vpack.c.bf16 %v2805_v37, %v2804_v20  ;;  %v2776_v42 = vadd.f32 %v17705_v46, %v2736_v45  ;;  %v2810_v61 = vmax.f32 %v2778_v13, 0.0 }
 0x275   : > { %v2648_v18 = vpop.f32.mrf.mxu1  ;;  %v2428_v24 = vadd.f32 %v15286_v38, %v17676_v6  ;;  %v2431_v6 = vadd.f32 %v15287_v29, %v17682_v19 }
 0x276   : > { %v2779_v34 = vadd.f32 %v17705_v46, %v2739_v2  ;;  %v2737_v58 = vadd.f32 %v2648_v18, %v2375_v9  ;;  %15364 = vmatprep.mubr.bf16.mxu0 %v2832_v5  ;;  %15412 = vmatprep.mubr.bf16.mxu1 %v2832_v5  ;;  %v2808_v28 = vmax.f32 %v2776_v42, 0.0  ;;  %v15290_v9 = vpop.f32.mrf.mxu0  ;;  %v2420_v5 = vadd.f32 %v2419_v54, %v17680_v43 }
 0x277   : > { %v15326_v25 = vpop.f32.mrf.mxu1  ;;  %15365 = vmatmul.mubr.bf16.gmra.mxu0 %v2833_v63  ;;  %15413 = vmatmul.mubr.bf16.gmra.mxu1 %v2833_v63  ;;  %v2444_v54 = vadd.f32 %v15290_v9, %v17688_v26  ;;  %v20193_v26 = vld [vmem:[#allocation15_spill] sm:$0xff]  ;;  %v3363_v9 = vlaneseq }
 0x278   : > { %v2811_v31 = vmax.f32 %v2779_v34, 0.0  ;;  %v2777_v1 = vadd.f32 %v17705_v46, %v2737_v58  ;;  %v2742_v32 = vadd.f32 %v15326_v25, %v2396_v11  ;;  %v2435_v38 = vpop.f32.mrf.mxu0 }
 0x279   : > { %v2661_v15 = vpop.f32.mrf.mxu1 }
 0x27a   : > { %v2809_v57 = vmax.f32 %v2777_v1, 0.0  ;;  %v2740_v53 = vadd.f32 %v2661_v15, %v2388_v55  ;;  %v2835_v41 = vpack.c.bf16 %v2811_v31, %v2810_v61  ;;  %v2782_v21 = vadd.f32 %v17705_v46, %v2742_v32  ;;  %v15291_v15 = vpop.f32.mrf.mxu0 }
 0x27b   : > { %v15327_v14 = vpop.f32.mrf.mxu1  ;;  %v2423_v1 = vadd.f32 %v2422_v27, %v17686_v62 }
 0x27c   : > { %v2743_v16 = vadd.f32 %v15327_v14, %v2399_v35  ;;  %v2834_v23 = vpack.c.bf16 %v2809_v57, %v2808_v28  ;;  %v2780_v48 = vadd.f32 %v17705_v46, %v2740_v53  ;;  %v2814_v22 = vmax.f32 %v2782_v21, 0.0 }
 0x27d   : > { %v2664_v56 = vpop.f32.mrf.mxu1 }
 0x27e   : > { %v2783_v50 = vadd.f32 %v17705_v46, %v2743_v16  ;;  %v2741_v17 = vadd.f32 %v2664_v56, %v2391_v52  ;;  %15368 = vmatprep.mubr.bf16.mxu0 %v2834_v23  ;;  %15416 = vmatprep.mubr.bf16.mxu1 %v2834_v23  ;;  %v2812_v36 = vmax.f32 %v2780_v48, 0.0  ;;  %v2447_v23 = vadd.f32 %v15291_v15, %v20193_v26 }
 0x27f   : > { %v15330_v59 = vpop.f32.mrf.mxu1  ;;  %15369 = vmatmul.mubr.bf16.gmra.mxu0 %v2835_v41  ;;  %15417 = vmatmul.mubr.bf16.gmra.mxu1 %v2835_v41  ;;  %v2436_v41 = vadd.f32 %v2435_v38, %v17692_v7 }
 0x280   : > { %v2815_v33 = vmax.f32 %v2783_v50, 0.0  ;;  %v2781_v51 = vadd.f32 %v17705_v46, %v2741_v17  ;;  %v2746_v10 = vadd.f32 %v15330_v59, %v2412_v44  ;;  %v2438_v44 = vpop.f32.mrf.mxu0  ;;  %v20194_v59 = vld [vmem:[#allocation16_spill] sm:$0xff] }
 0x281   : > { %v2677_v3 = vpop.f32.mrf.mxu1 }
 0x282   : > { %v2837_v30 = vpack.c.bf16 %v2815_v33, %v2814_v22  ;;  %v2813_v0 = vmax.f32 %v2781_v51, 0.0  ;;  %v2744_v20 = vadd.f32 %v2677_v3, %v2404_v47  ;;  %v2786_v12 = vadd.f32 %v17705_v46, %v2746_v10 }
 0x283   : > { %v15331_v37 = vpop.f32.mrf.mxu1  ;;  %v2439_v22 = vadd.f32 %v2438_v44, %v20194_v59 }
 0x284   : > { %v2747_v45 = vadd.f32 %v15331_v37, %v2415_v4  ;;  %v2836_v63 = vpack.c.bf16 %v2813_v0, %v2812_v36  ;;  %v2784_v40 = vadd.f32 %v17705_v46, %v2744_v20  ;;  %v2818_v60 = vmax.f32 %v2786_v12, 0.0 }
 0x285   : > { %v2680_v13 = vpop.f32.mrf.mxu1 }
 0x286   : > { %v2787_v49 = vadd.f32 %v17705_v46, %v2747_v45  ;;  %v2745_v2 = vadd.f32 %v2680_v13, %v2407_v8  ;;  %15372 = vmatprep.mubr.bf16.mxu0 %v2836_v63  ;;  %15420 = vmatprep.mubr.bf16.mxu1 %v2836_v63  ;;  %v2816_v58 = vmax.f32 %v2784_v40, 0.0  ;;  %v16385_v45 = vld [vmem:[%s20195_s30 + $0x38] sm:$0xff]   ;;  %v16386_v63 = vld [vmem:[%s20195_s30 + $0x30] sm:$0xff]   ;;  %v3364_v40 = vshrl.u32 %v3363_v9, 7 }
 0x287   : > { %v15334_v11 = vpop.f32.mrf.mxu1  ;;  %15373 = vmatmul.mubr.bf16.gmra.mxu0 %v2837_v30  ;;  %15421 = vmatmul.mubr.bf16.gmra.mxu1 %v2837_v30 }
 0x288   : > { %v2819_v39 = vmax.f32 %v2787_v49, 0.0  ;;  %v2785_v18 = vadd.f32 %v17705_v46, %v2745_v2  ;;  %v2750_v42 = vadd.f32 %v15334_v11, %v2428_v24  ;;  %15436 = vmatprep.subr.bf16.mxu0 %v16385_v45 }
 0x289   : > { %v2693_v34 = vpop.f32.mrf.mxu1  ;;  %15437 = vmatpush3.bf16.msra.mxu0 %v16385_v45 }
 0x28a   : > { %v2839_v55 = vpack.c.bf16 %v2819_v39, %v2818_v60  ;;  %v2817_v25 = vmax.f32 %v2785_v18, 0.0  ;;  %v2748_v61 = vadd.f32 %v2693_v34, %v2420_v5  ;;  %v2790_v43 = vadd.f32 %v17705_v46, %v2750_v42  ;;  %15438 = vmatprep.subr.bf16.mxu0 %v16386_v63 }
 0x28b   : > { %v15335_v31 = vpop.f32.mrf.mxu1 }
 0x28c   : > { %v2751_v32 = vadd.f32 %v15335_v31, %v2431_v6  ;;  %v2838_v35 = vpack.c.bf16 %v2817_v25, %v2816_v58  ;;  %v2788_v57 = vadd.f32 %v17705_v46, %v2748_v61  ;;  %v2822_v62 = vmax.f32 %v2790_v43, 0.0 }
 0x28d   : > { %v2696_v28 = vpop.f32.mrf.mxu1  ;;  %15439 = vmatpush3.bf16.msra.mxu0 %v16386_v63 }
 0x28e   : > { %v2791_v19 = vadd.f32 %v17705_v46, %v2751_v32  ;;  %v2749_v53 = vadd.f32 %v2696_v28, %v2423_v1  ;;  %15376 = vmatprep.mubr.bf16.mxu0 %v2838_v35  ;;  %15424 = vmatprep.mubr.bf16.mxu1 %v2838_v35  ;;  %v2820_v56 = vmax.f32 %v2788_v57, 0.0 }
 0x28f   : > { %v15338_v14 = vpop.f32.mrf.mxu1  ;;  %15377 = vmatmul.mubr.bf16.gmra.mxu0 %v2839_v55  ;;  %15425 = vmatmul.mubr.bf16.gmra.mxu1 %v2839_v55 }
 0x290   : > { %v2823_v52 = vmax.f32 %v2791_v19, 0.0  ;;  %v2789_v21 = vadd.f32 %v17705_v46, %v2749_v53  ;;  %v2754_v16 = vadd.f32 %v15338_v14, %v2444_v54 }
 0x291   : > { %v2709_v29 = vpop.f32.mrf.mxu1 }
 0x292   : > { %v2841_v48 = vpack.c.bf16 %v2823_v52, %v2822_v62  ;;  %v2821_v50 = vmax.f32 %v2789_v21, 0.0  ;;  %v2752_v17 = vadd.f32 %v2709_v29, %v2436_v41  ;;  %v2794_v7 = vadd.f32 %v17705_v46, %v2754_v16  ;;  %v16387_v21 = vld [vmem:[%s20195_s30 + $0x18] sm:$0xff]  }
 0x293   : > { %v15339_v47 = vpop.f32.mrf.mxu1  ;;  %15460 = vmatprep.subr.bf16.mxu1 %v16387_v21 }
 0x294   : > { %v2755_v33 = vadd.f32 %v15339_v47, %v2447_v23  ;;  %v2840_v51 = vpack.c.bf16 %v2821_v50, %v2820_v56  ;;  %v2792_v4 = vadd.f32 %v17705_v46, %v2752_v17  ;;  %v2826_v36 = vmax.f32 %v2794_v7, 0.0  ;;  %15461 = vmatpush3.bf16.msra.mxu1 %v16387_v21 }
 0x295   : > { %v2712_v10 = vpop.f32.mrf.mxu1 }
 0x296   : > { %v2795_v27 = vadd.f32 %v17705_v46, %v2755_v33  ;;  %v2753_v3 = vadd.f32 %v2712_v10, %v2439_v22  ;;  %15380 = vmatprep.mubr.bf16.mxu0 %v2840_v51  ;;  %15428 = vmatprep.mubr.bf16.mxu1 %v2840_v51  ;;  %v2824_v20 = vmax.f32 %v2792_v4, 0.0 }
 0x297   : > { %15381 = vmatmul.mubr.bf16.gmra.mxu0 %v2841_v48  ;;  %15429 = vmatmul.mubr.bf16.gmra.mxu1 %v2841_v48 }
 0x298   : > { %v2827_v30 = vmax.f32 %v2795_v27, 0.0  ;;  %v2793_v0 = vadd.f32 %v17705_v46, %v2753_v3  ;;  %v16809_v46 = vmov 1983009808  }
 0x299   : > { %v3361_v24 = vunpack.c.l.s4 %v16809_v46 }
 0x29a   : > { %v2843_v37 = vpack.c.bf16 %v2827_v30, %v2826_v36  ;;  %v2825_v8 = vmax.f32 %v2793_v0, 0.0 }
 0x29b   : > { %v3362_v13 = vunpack.c.0.s8 %v3361_v24 }
 0x29c   : > { %v2842_v12 = vpack.c.bf16 %v2825_v8, %v2824_v20 }
 0x29d   : > { %v17799_v49 = vsub.s32 %v3362_v13, %v3364_v40 }
 0x29e   : > { %15384 = vmatprep.mubr.bf16.mxu0 %v2842_v12  ;;  %15432 = vmatprep.mubr.bf16.mxu1 %v2842_v12 }
 0x29f   : > { %15385 = vmatmul.mubr.bf16.gmra.mxu0 %v2843_v37  ;;  %15433 = vmatmul.mubr.bf16.gmra.mxu1 %v2843_v37 }
 0x327   : > { %v15358_v2 = vpop.f32.mrf.mxu0  ;;  %v15406_v5 = vpop.f32.mrf.mxu1 }
 0x328   : > { %v3297_v11 = vmax.f32 %v15358_v2, %v15406_v5 }
 0x329   : > { %v2942_v60 = vpop.f32.mrf.mxu0  ;;  %v3168_v39 = vpop.f32.mrf.mxu1 }
 0x32a   : > { %v3393_v18 = vcombine.high %v3297_v11, %v3297_v11  ;;  %v3400_v42 = vrot.slane %v3297_v11, %v17799_v49  ;;  %v3295_v6 = vmax.f32 %v2942_v60, %v3168_v39 }
 0x32b   : > { %v15359_v38 = vpop.f32.mrf.mxu0  ;;  %v15407_v34 = vpop.f32.mrf.mxu1 }
 0x32c   : > { %v3407_v58 = vrot.slane %v3393_v18, %v17799_v49  ;;  %v3408_v55 = vcombine.high %v3400_v42, %v3400_v42  ;;  %v4088_v25 = vsel %vm4031_vm3, %v3400_v42, -inf  ;;  %v3359_v61 = vcombine.high %v3295_v6, %v3295_v6 }
 0x32d   : > { %v4089_v31 = vrot.slane %v4088_v25, 4  ;;  %v3366_v1 = vrot.slane %v3295_v6, %v17799_v49  ;;  %v17805_v43 = vmax.f32 %v15359_v38, %v15407_v34  ;;  %v2945_v6 = vpop.f32.mrf.mxu0  ;;  %v3171_v38 = vpop.f32.mrf.mxu1 }
 0x32e   : > { %v3409_v32 = vcombine.high %v3407_v58, %v3407_v58  ;;  %v4095_v35 = vsel %vm4031_vm3, %v3408_v55, -inf  ;;  %v4102_v54 = vsel %vm4031_vm3, %v3407_v58, -inf  ;;  %v3373_v15 = vrot.slane %v3359_v61, %v17799_v49 }
 0x32f   : > { %v4090_v28 = vmax.f32 %v4088_v25, %v4089_v31  ;;  %v4096_v57 = vrot.slane %v4095_v35, 4  ;;  %v4103_v19 = vrot.slane %v4102_v54, 4  ;;  %v3374_v53 = vcombine.high %v3366_v1, %v3366_v1 }
 0x330   : > { %v4109_v41 = vsel %vm4031_vm3, %v3409_v32, -inf  ;;  %v3375_v14 = vcombine.high %v3373_v15, %v3373_v15  ;;  %v4032_v62 = vsel %vm4031_vm3, %v3366_v1, -inf  ;;  %v4046_v52 = vsel %vm4031_vm3, %v3373_v15, -inf }
 0x331   : > { %v4091_v16 = vrot.slane %v4090_v28, 2  ;;  %v4097_v26 = vmax.f32 %v4095_v35, %v4096_v57  ;;  %v4104_v23 = vmax.f32 %v4102_v54, %v4103_v19  ;;  %v4110_v44 = vrot.slane %v4109_v41, 4 }
 0x332   : > { %v4033_v29 = vrot.slane %v4032_v62, 4  ;;  %v4039_v56 = vsel %vm4031_vm3, %v3374_v53, -inf  ;;  %v4047_v48 = vrot.slane %v4046_v52, 4  ;;  %v4053_v50 = vsel %vm4031_vm3, %v3375_v14, -inf  ;;  %v15362_v14 = vpop.f32.mrf.mxu0 }
 0x333   : > { %v4092_v17 = vmax.f32 %v4090_v28, %v4091_v16  ;;  %v4098_v47 = vrot.slane %v4097_v26, 2  ;;  %v4105_v59 = vrot.slane %v4104_v23, 2  ;;  %v4111_v22 = vmax.f32 %v4109_v41, %v4110_v44 }
 0x334   : > { %v4034_v7 = vmax.f32 %v4032_v62, %v4033_v29  ;;  %v4040_v33 = vrot.slane %v4039_v56, 4  ;;  %v4048_v51 = vmax.f32 %v4046_v52, %v4047_v48  ;;  %v4054_v10 = vrot.slane %v4053_v50, 4 }
 0x335   : > { %v4093_v4 = vrot.slane %v4092_v17, 1  ;;  %v4099_v27 = vmax.f32 %v4097_v26, %v4098_v47  ;;  %v4106_v3 = vmax.f32 %v4104_v23, %v4105_v59  ;;  %v4112_v36 = vrot.slane %v4111_v22, 2 }
 0x336   : > { %v4035_v30 = vrot.slane %v4034_v7, 2  ;;  %v4041_v0 = vmax.f32 %v4039_v56, %v4040_v33  ;;  %v4049_v20 = vrot.slane %v4048_v51, 2  ;;  %v4055_v37 = vmax.f32 %v4053_v50, %v4054_v10 }
 0x337   : > { %v4094_v8 = vmax.f32 %v4092_v17, %v4093_v4  ;;  %v4100_v12 = vrot.slane %v4099_v27, 1  ;;  %v4107_v45 = vrot.slane %v4106_v3, 1  ;;  %v4113_v63 = vmax.f32 %v4111_v22, %v4112_v36 }
 0x338   : > { %v4036_v46 = vmax.f32 %v4034_v7, %v4035_v30  ;;  %v4042_v24 = vrot.slane %v4041_v0, 2  ;;  %v4050_v9 = vmax.f32 %v4048_v51, %v4049_v20  ;;  %v4056_v13 = vrot.slane %v4055_v37, 2 }
 0x339   : > { %v4101_v40 = vmax.f32 %v4099_v27, %v4100_v12  ;;  %v4108_v2 = vmax.f32 %v4106_v3, %v4107_v45  ;;  %v4114_v5 = vrot.slane %v4113_v63, 1  ;;  %v3410_v11 = vcombine.high %v17805_v43, %v17805_v43  ;;  %v16388_v27 = vld [vmem:[%s20195_s30 + $0x10] sm:$0xff]  }
 0x33a   : > { %v4037_v60 = vrot.slane %v4036_v46, 1  ;;  %v4043_v39 = vmax.f32 %v4041_v0, %v4042_v24  ;;  %v4051_v18 = vrot.slane %v4050_v9, 1  ;;  %v4057_v42 = vmax.f32 %v4055_v37, %v4056_v13  ;;  %15462 = vmatprep.subr.bf16.mxu1 %v16388_v27 }
 0x33b   : > { %v4115_v34 = vmax.f32 %v4113_v63, %v4114_v5  ;;  %v5087_v58 = vsel %vm5073_vm4, %v4101_v40, %v4094_v8  ;;  %v3417_v55 = vrot.slane %v17805_v43, %v17799_v49  ;;  %v3424_v25 = vrot.slane %v3410_v11, %v17799_v49  ;;  %v15410_v43 = vpop.f32.mrf.mxu1  ;;  %15463 = vmatpush3.bf16.msra.mxu1 %v16388_v27 }
 0x33c   : > { %v5088_v61 = vsel %vm5075_vm5, %v4108_v2, %v5087_v58  ;;  %v4038_v31 = vmax.f32 %v4036_v46, %v4037_v60  ;;  %v4044_v1 = vrot.slane %v4043_v39, 1  ;;  %v4052_v32 = vmax.f32 %v4050_v9, %v4051_v18 }
 0x33d   : > { %v4058_v35 = vrot.slane %v4057_v42, 1  ;;  %v3425_v54 = vcombine.high %v3417_v55, %v3417_v55  ;;  %v3426_v15 = vcombine.high %v3424_v25, %v3424_v25  ;;  %v4116_v28 = vsel %vm4031_vm3, %v3417_v55, -inf }
 0x33e   : > { %v4045_v57 = vmax.f32 %v4043_v39, %v4044_v1  ;;  %v4117_v19 = vrot.slane %v4116_v28, 4  ;;  %v4130_v53 = vsel %vm4031_vm3, %v3424_v25, -inf  ;;  %v5089_v41 = vsel %vm5077_vm6, %v4115_v34, %v5088_v61 }
 0x33f   : > { %v4059_v62 = vmax.f32 %v4057_v42, %v4058_v35  ;;  %v4123_v52 = vsel %vm4031_vm3, %v3425_v54, -inf  ;;  %v4131_v21 = vrot.slane %v4130_v53, 4  ;;  %v4137_v16 = vsel %vm4031_vm3, %v3426_v15, -inf }
 0x340   : > { %v5074_v26 = vsel %vm5073_vm4, %v4045_v57, %v4038_v31  ;;  %v4118_v23 = vmax.f32 %v4116_v28, %v4117_v19  ;;  %v4124_v44 = vrot.slane %v4123_v52, 4  ;;  %v4138_v29 = vrot.slane %v4137_v16, 4 }
 0x341   : > { %v5076_v56 = vsel %vm5075_vm5, %v4052_v32, %v5074_v26  ;;  %v4132_v48 = vmax.f32 %v4130_v53, %v4131_v21  ;;  %v3296_v50 = vmax.f32 %v2945_v6, %v3171_v38  ;;  %v3301_v17 = vmax.f32 %v15362_v14, %v15410_v43  ;;  %v2958_v21 = vpop.f32.mrf.mxu0 }
 0x342   : > { %v4119_v47 = vrot.slane %v4118_v23, 2  ;;  %v4125_v59 = vmax.f32 %v4123_v52, %v4124_v44  ;;  %v4139_v22 = vmax.f32 %v4137_v16, %v4138_v29  ;;  %v17833_v7 = vsel %vm5077_vm6, %v4059_v62, %v5076_v56  ;;  %v3184_v16 = vpop.f32.mrf.mxu1 }
 0x343   : > { %v4133_v33 = vrot.slane %v4132_v48, 2  ;;  %v3376_v51 = vcombine.high %v3296_v50, %v3296_v50  ;;  %v3383_v10 = vrot.slane %v3296_v50, %v17799_v49  ;;  %v3461_v4 = vcombine.high %v3301_v17, %v3301_v17 }
 0x344   : > { %v4120_v3 = vmax.f32 %v4118_v23, %v4119_v47  ;;  %v4126_v36 = vrot.slane %v4125_v59, 2  ;;  %v4140_v30 = vrot.slane %v4139_v22, 2  ;;  %v3468_v0 = vrot.slane %v3301_v17, %v17799_v49 }
 0x345   : > { %v4134_v20 = vmax.f32 %v4132_v48, %v4133_v33  ;;  %v3390_v37 = vrot.slane %v3376_v51, %v17799_v49  ;;  %v3391_v8 = vcombine.high %v3383_v10, %v3383_v10  ;;  %v4060_v12 = vsel %vm4031_vm3, %v3383_v10, -inf }
 0x346   : > { %v4121_v45 = vrot.slane %v4120_v3, 1  ;;  %v4127_v63 = vmax.f32 %v4125_v59, %v4126_v36  ;;  %v4141_v46 = vmax.f32 %v4139_v22, %v4140_v30  ;;  %v4061_v24 = vrot.slane %v4060_v12, 4  ;;  %v15411_v36 = vpop.f32.mrf.mxu1 }
 0x347   : > { %v4135_v9 = vrot.slane %v4134_v20, 1  ;;  %v3392_v13 = vcombine.high %v3390_v37, %v3390_v37  ;;  %v4067_v40 = vsel %vm4031_vm3, %v3391_v8, -inf  ;;  %v4074_v2 = vsel %vm4031_vm3, %v3390_v37, -inf }
 0x348   : > { %v4122_v5 = vmax.f32 %v4120_v3, %v4121_v45  ;;  %v4128_v11 = vrot.slane %v4127_v63, 1  ;;  %v4142_v60 = vrot.slane %v4141_v46, 1  ;;  %v4062_v39 = vmax.f32 %v4060_v12, %v4061_v24  ;;  %v15363_v3 = vpop.f32.mrf.mxu0 }
 0x349   : > { %v4136_v18 = vmax.f32 %v4134_v20, %v4135_v9  ;;  %v4068_v42 = vrot.slane %v4067_v40, 4  ;;  %v4075_v6 = vrot.slane %v4074_v2, 4  ;;  %v4081_v38 = vsel %vm4031_vm3, %v3392_v13, -inf }
 0x34a   : > { %v4129_v34 = vmax.f32 %v4127_v63, %v4128_v11  ;;  %v4143_v58 = vmax.f32 %v4141_v46, %v4142_v60  ;;  %v5090_v55 = vsel %vm5079_vm7, %v4122_v5, %v5089_v41  ;;  %v4063_v25 = vrot.slane %v4062_v39, 2 }
 0x34b   : > { %v4069_v61 = vmax.f32 %v4067_v40, %v4068_v42  ;;  %v4076_v31 = vmax.f32 %v4074_v2, %v4075_v6  ;;  %v4082_v1 = vrot.slane %v4081_v38, 4  ;;  %v3475_v32 = vrot.slane %v3461_v4, %v17799_v49 }
 0x34c   : > { %v5091_v35 = vsel %vm5081_vm8, %v4129_v34, %v5090_v55  ;;  %v4064_v54 = vmax.f32 %v4062_v39, %v4063_v25  ;;  %v3476_v15 = vcombine.high %v3468_v0, %v3468_v0  ;;  %v4200_v28 = vsel %vm4031_vm3, %v3468_v0, -inf  ;;  %v16390_v55 = vld [vmem:[%s20195_s30 + $0x8] sm:$0xff]  }
 0x34d   : > { %v5092_v57 = vsel %vm5083_vm9, %v4136_v18, %v5091_v35  ;;  %v4070_v19 = vrot.slane %v4069_v61, 2  ;;  %v4077_v53 = vrot.slane %v4076_v31, 2  ;;  %v4083_v14 = vmax.f32 %v4081_v38, %v4082_v1  ;;  %15464 = vmatprep.subr.bf16.mxu1 %v16390_v55 }
 0x34e   : > { %v5093_v43 = vsel %vm5085_vm10, %v4143_v58, %v5092_v57  ;;  %v4065_v41 = vrot.slane %v4064_v54, 1  ;;  %v3477_v62 = vcombine.high %v3475_v32, %v3475_v32  ;;  %v4201_v52 = vrot.slane %v4200_v28, 4  ;;  %15465 = vmatpush3.bf16.msra.mxu1 %v16390_v55 }
 0x34f   : > { %v4071_v26 = vmax.f32 %v4069_v61, %v4070_v19  ;;  %v4078_v23 = vmax.f32 %v4076_v31, %v4077_v53  ;;  %v4084_v44 = vrot.slane %v4083_v14, 2  ;;  %v4207_v29 = vsel %vm4031_vm3, %v3476_v15, -inf  ;;  %5210 = vst.msk [vmem:[#allocation2 + $0x9] sm:$0xff] %vm5208_vm11, %v5093_v43 }
 0x350   : > { %v4066_v56 = vmax.f32 %v4064_v54, %v4065_v41  ;;  %v4202_v48 = vmax.f32 %v4200_v28, %v4201_v52  ;;  %v4208_v50 = vrot.slane %v4207_v29, 4  ;;  %v4214_v17 = vsel %vm4031_vm3, %v3475_v32, -inf }
 0x351   : > { %v4072_v47 = vrot.slane %v4071_v26, 1  ;;  %v4079_v59 = vrot.slane %v4078_v23, 1  ;;  %v4085_v22 = vmax.f32 %v4083_v14, %v4084_v44  ;;  %v4215_v33 = vrot.slane %v4214_v17, 4 }
 0x352   : > { %v5080_v51 = vsel %vm5079_vm7, %v4066_v56, %v17833_v7  ;;  %v4203_v10 = vrot.slane %v4202_v48, 2  ;;  %v4209_v4 = vmax.f32 %v4207_v29, %v4208_v50  ;;  %v4221_v27 = vsel %vm4031_vm3, %v3477_v62, -inf  ;;  %v16389_v7 = vld [vmem:[%s20195_s30 + $0x28] sm:$0xff]  }
 0x353   : > { %v4073_v30 = vmax.f32 %v4071_v26, %v4072_v47  ;;  %v4080_v0 = vmax.f32 %v4078_v23, %v4079_v59  ;;  %v4086_v20 = vrot.slane %v4085_v22, 1  ;;  %v4216_v37 = vmax.f32 %v4214_v17, %v4215_v33  ;;  %15440 = vmatprep.subr.bf16.mxu0 %v16389_v7 }
 0x354   : > { %v4204_v8 = vmax.f32 %v4202_v48, %v4203_v10  ;;  %v4210_v12 = vrot.slane %v4209_v4, 2  ;;  %v4222_v45 = vrot.slane %v4221_v27, 4  ;;  %v3299_v63 = vmax.f32 %v2958_v21, %v3184_v16  ;;  %15441 = vmatpush3.bf16.msra.mxu0 %v16389_v7 }
 0x355   : > { %v4087_v46 = vmax.f32 %v4085_v22, %v4086_v20  ;;  %v5082_v24 = vsel %vm5081_vm8, %v4073_v30, %v5080_v51  ;;  %v4217_v9 = vrot.slane %v4216_v37, 2  ;;  %v3302_v13 = vmax.f32 %v15363_v3, %v15411_v36 }
 0x356   : > { %v5084_v40 = vsel %vm5083_vm9, %v4080_v0, %v5082_v24  ;;  %v4205_v2 = vrot.slane %v4204_v8, 1  ;;  %v4211_v5 = vmax.f32 %v4209_v4, %v4210_v12  ;;  %v4223_v11 = vmax.f32 %v4221_v27, %v4222_v45 }
 0x357   : > { %v5086_v60 = vsel %vm5085_vm10, %v4087_v46, %v5084_v40  ;;  %v4218_v39 = vmax.f32 %v4216_v37, %v4217_v9  ;;  %v3427_v18 = vcombine.high %v3299_v63, %v3299_v63  ;;  %v3434_v42 = vrot.slane %v3299_v63, %v17799_v49  ;;  %v2961_v40 = vpop.f32.mrf.mxu0 }
 0x358   : > { %v4206_v6 = vmax.f32 %v4204_v8, %v4205_v2  ;;  %v4212_v38 = vrot.slane %v4211_v5, 1  ;;  %v4224_v34 = vrot.slane %v4223_v11, 2  ;;  %v3478_v58 = vcombine.high %v3302_v13, %v3302_v13  ;;  %5209 = vst.msk [vmem:[#allocation2 + $0x1] sm:$0xff] %vm5208_vm11, %v5086_v60  ;;  %v3187_v2 = vpop.f32.mrf.mxu1 }
 0x359   : > { %v4219_v25 = vrot.slane %v4218_v39, 1  ;;  %v3441_v61 = vrot.slane %v3427_v18, %v17799_v49  ;;  %v3442_v31 = vcombine.high %v3434_v42, %v3434_v42  ;;  %v4144_v1 = vsel %vm4031_vm3, %v3434_v42, -inf }
 0x35a   : > { %v4213_v32 = vmax.f32 %v4211_v5, %v4212_v38  ;;  %v4225_v35 = vmax.f32 %v4223_v11, %v4224_v34  ;;  %v4145_v54 = vrot.slane %v4144_v1, 4  ;;  %v3485_v15 = vrot.slane %v3302_v13, %v17799_v49 }
 0x35b   : > { %v4220_v28 = vmax.f32 %v4218_v39, %v4219_v25  ;;  %v3443_v57 = vcombine.high %v3441_v61, %v3441_v61  ;;  %v4151_v19 = vsel %vm4031_vm3, %v3442_v31, -inf  ;;  %v4158_v53 = vsel %vm4031_vm3, %v3441_v61, -inf  ;;  %v16391_v61 = vld [vmem:[%s20195_s30 + $0x20] sm:$0xff]  }
 0x35c   : > { %v4226_v14 = vrot.slane %v4225_v35, 1  ;;  %v5101_v43 = vsel %vm5073_vm4, %v4213_v32, %v4206_v6  ;;  %v4146_v41 = vmax.f32 %v4144_v1, %v4145_v54  ;;  %v4152_v62 = vrot.slane %v4151_v19, 4  ;;  %v16392_v31 = vld [vmem:[%s20195_s30] sm:$0xff]   ;;  %15442 = vmatprep.subr.bf16.mxu0 %v16391_v61 }
 0x35d   : > { %v5102_v52 = vsel %vm5075_vm5, %v4220_v28, %v5101_v43  ;;  %v4159_v21 = vrot.slane %v4158_v53, 4  ;;  %v4165_v16 = vsel %vm4031_vm3, %v3443_v57, -inf  ;;  %v3492_v26 = vrot.slane %v3478_v58, %v17799_v49  ;;  %v15414_v28 = vpop.f32.mrf.mxu1  ;;  %15466 = vmatprep.subr.bf16.mxu1 %v16392_v31  ;;  %15443 = vmatpush3.bf16.msra.mxu0 %v16391_v61 }
 0x35e   : > { %v4227_v23 = vmax.f32 %v4225_v35, %v4226_v14  ;;  %v4147_v44 = vrot.slane %v4146_v41, 2  ;;  %v4153_v29 = vmax.f32 %v4151_v19, %v4152_v62  ;;  %v4166_v56 = vrot.slane %v4165_v16, 4  ;;  %15467 = vmatpush3.bf16.msra.mxu1 %v16392_v31 }
 0x35f   : > { %v4160_v48 = vmax.f32 %v4158_v53, %v4159_v21  ;;  %v3493_v50 = vcombine.high %v3485_v15, %v3485_v15  ;;  %v3494_v17 = vcombine.high %v3492_v26, %v3492_v26  ;;  %v4228_v47 = vsel %vm4031_vm3, %v3485_v15, -inf  ;;  %v17878_v59 = vld [vmem:[#allocation2] sm:$0xff]  ;;  %v15366_v15 = vpop.f32.mrf.mxu0 }
 0x360   : > { %v4148_v22 = vmax.f32 %v4146_v41, %v4147_v44  ;;  %v4154_v33 = vrot.slane %v4153_v29, 2  ;;  %v4167_v51 = vmax.f32 %v4165_v16, %v4166_v56  ;;  %v4229_v10 = vrot.slane %v4228_v47, 4 }
 0x361   : > { %v20196_v4 = vmov 0.0   ;;  %v4161_v27 = vrot.slane %v4160_v48, 2  ;;  %v4235_v3 = vsel %vm4031_vm3, %v3493_v50, -inf  ;;  %v4242_v36 = vsel %vm4031_vm3, %v3492_v26, -inf }
 0x362   : > { %5814 = vst [vmem:[#allocation2] sm:$0x1] %v20196_v4  ;;  %v4249_v30 = vsel %vm4031_vm3, %v3494_v17, -inf  ;;  %v4149_v0 = vrot.slane %v4148_v22, 1  ;;  %v4155_v20 = vmax.f32 %v4153_v29, %v4154_v33  ;;  %v4168_v37 = vrot.slane %v4167_v51, 2 }
 0x363   : > { %v4230_v8 = vmax.f32 %v4228_v47, %v4229_v10  ;;  %v4162_v12 = vmax.f32 %v4160_v48, %v4161_v27  ;;  %v4236_v45 = vrot.slane %v4235_v3, 4  ;;  %v4243_v63 = vrot.slane %v4242_v36, 4 }
 0x364   : > { %v4250_v46 = vrot.slane %v4249_v30, 4  ;;  %v4150_v24 = vmax.f32 %v4148_v22, %v4149_v0  ;;  %v4156_v9 = vrot.slane %v4155_v20, 1  ;;  %v4169_v13 = vmax.f32 %v4167_v51, %v4168_v37 }
 0x365   : > { %v4231_v7 = vrot.slane %v4230_v8, 2  ;;  %v4163_v5 = vrot.slane %v4162_v12, 1  ;;  %v4237_v11 = vmax.f32 %v4235_v3, %v4236_v45  ;;  %v4244_v60 = vmax.f32 %v4242_v36, %v4243_v63 }
 0x366   : > { %v4251_v39 = vmax.f32 %v4249_v30, %v4250_v46  ;;  %v4157_v18 = vmax.f32 %v4155_v20, %v4156_v9  ;;  %v4170_v42 = vrot.slane %v4169_v13, 1  ;;  %v5103_v38 = vsel %vm5077_vm6, %v4227_v23, %v5102_v52 }
 0x367   : > { %v4232_v6 = vmax.f32 %v4230_v8, %v4231_v7  ;;  %v4164_v34 = vmax.f32 %v4162_v12, %v4163_v5  ;;  %v4238_v58 = vrot.slane %v4237_v11, 2  ;;  %v4245_v55 = vrot.slane %v4244_v60, 2 }
 0x368   : > { %v4252_v25 = vrot.slane %v4251_v39, 2  ;;  %v4171_v1 = vmax.f32 %v4169_v13, %v4170_v42  ;;  %v5094_v32 = vsel %vm5073_vm4, %v4157_v18, %v4150_v24  ;;  %v3300_v54 = vmax.f32 %v2961_v40, %v3187_v2 }
 0x369   : > { %v4233_v35 = vrot.slane %v4232_v6, 1  ;;  %v5095_v57 = vsel %vm5075_vm5, %v4164_v34, %v5094_v32  ;;  %v4239_v19 = vmax.f32 %v4237_v11, %v4238_v58  ;;  %v4246_v53 = vmax.f32 %v4244_v60, %v4245_v55  ;;  %v3200_v34 = vpop.f32.mrf.mxu1 }
 0x36a   : > { %v4253_v14 = vmax.f32 %v4251_v39, %v4252_v25  ;;  %v3444_v41 = vcombine.high %v3300_v54, %v3300_v54  ;;  %v3451_v62 = vrot.slane %v3300_v54, %v17799_v49  ;;  %v17895_v52 = vsel %vm5077_vm6, %v4171_v1, %v5095_v57 }
 0x36b   : > { %v4234_v43 = vmax.f32 %v4232_v6, %v4233_v35  ;;  %v4240_v21 = vrot.slane %v4239_v19, 1  ;;  %v4247_v16 = vrot.slane %v4246_v53, 1  ;;  %v3305_v23 = vmax.f32 %v15366_v15, %v15414_v28 }
 0x36c   : > { %v4254_v26 = vrot.slane %v4253_v14, 1  ;;  %v3458_v29 = vrot.slane %v3444_v41, %v17799_v49  ;;  %v3459_v56 = vcombine.high %v3451_v62, %v3451_v62  ;;  %v4172_v48 = vsel %vm4031_vm3, %v3451_v62, -inf  ;;  %v15415_v62 = vpop.f32.mrf.mxu1 }
 0x36d   : > { %v5104_v44 = vsel %vm5079_vm7, %v4234_v43, %v5103_v38  ;;  %v4241_v50 = vmax.f32 %v4239_v19, %v4240_v21  ;;  %v4248_v17 = vmax.f32 %v4246_v53, %v4247_v16  ;;  %v4173_v22 = vrot.slane %v4172_v48, 4  ;;  %v2974_v38 = vpop.f32.mrf.mxu0 }
 0x36e   : > { %v4255_v47 = vmax.f32 %v4253_v14, %v4254_v26  ;;  %v3460_v33 = vcombine.high %v3458_v29, %v3458_v29  ;;  %v4179_v51 = vsel %vm4031_vm3, %v3459_v56, -inf  ;;  %v4186_v10 = vsel %vm4031_vm3, %v3458_v29, -inf }
 0x36f   : > { %v3529_v27 = vcombine.high %v3305_v23, %v3305_v23  ;;  %v5105_v3 = vsel %vm5081_vm8, %v4241_v50, %v5104_v44  ;;  %v4174_v36 = vmax.f32 %v4172_v48, %v4173_v22  ;;  %v4180_v30 = vrot.slane %v4179_v51, 4  ;;  %v15367_v41 = vpop.f32.mrf.mxu0 }
 0x370   : > { %v4187_v0 = vrot.slane %v4186_v10, 4  ;;  %v5106_v20 = vsel %vm5083_vm9, %v4248_v17, %v5105_v3  ;;  %v4193_v37 = vsel %vm4031_vm3, %v3460_v33, -inf  ;;  %v3536_v8 = vrot.slane %v3305_v23, %v17799_v49 }
 0x371   : > { %v3543_v12 = vrot.slane %v3529_v27, %v17799_v49  ;;  %v5107_v45 = vsel %vm5085_vm10, %v4255_v47, %v5106_v20  ;;  %v4175_v63 = vrot.slane %v4174_v36, 2  ;;  %v4181_v46 = vmax.f32 %v4179_v51, %v4180_v30 }
 0x372   : > { %v4188_v24 = vmax.f32 %v4186_v10, %v4187_v0  ;;  %5212 = vst.msk [vmem:[#allocation2 + $0x31] sm:$0xff] %vm5208_vm11, %v5107_v45  ;;  %v4194_v9 = vrot.slane %v4193_v37, 4  ;;  %v3544_v13 = vcombine.high %v3536_v8, %v3536_v8  ;;  %v4312_v40 = vsel %vm4031_vm3, %v3536_v8, -inf }
 0x373   : > { %v3545_v7 = vcombine.high %v3543_v12, %v3543_v12  ;;  %v4176_v2 = vmax.f32 %v4174_v36, %v4175_v63  ;;  %v4182_v5 = vrot.slane %v4181_v46, 2  ;;  %v4313_v60 = vrot.slane %v4312_v40, 4 }
 0x374   : > { %v4189_v11 = vrot.slane %v4188_v24, 2  ;;  %v4195_v39 = vmax.f32 %v4193_v37, %v4194_v9  ;;  %v4319_v18 = vsel %vm4031_vm3, %v3544_v13, -inf  ;;  %v4326_v42 = vsel %vm4031_vm3, %v3543_v12, -inf }
 0x375   : > { %v4333_v6 = vsel %vm4031_vm3, %v3545_v7, -inf  ;;  %v4177_v58 = vrot.slane %v4176_v2, 1  ;;  %v4183_v55 = vmax.f32 %v4181_v46, %v4182_v5  ;;  %v4314_v61 = vmax.f32 %v4312_v40, %v4313_v60 }
 0x376   : > { %v4190_v25 = vmax.f32 %v4188_v24, %v4189_v11  ;;  %v4196_v31 = vrot.slane %v4195_v39, 2  ;;  %v4320_v1 = vrot.slane %v4319_v18, 4  ;;  %v4327_v32 = vrot.slane %v4326_v42, 4 }
 0x377   : > { %v4334_v35 = vrot.slane %v4333_v6, 4  ;;  %v4178_v54 = vmax.f32 %v4176_v2, %v4177_v58  ;;  %v4184_v15 = vrot.slane %v4183_v55, 1  ;;  %v4315_v57 = vrot.slane %v4314_v61, 2 }
 0x378   : > { %v4191_v28 = vrot.slane %v4190_v25, 1  ;;  %v4197_v19 = vmax.f32 %v4195_v39, %v4196_v31  ;;  %v4321_v53 = vmax.f32 %v4319_v18, %v4320_v1  ;;  %v4328_v14 = vmax.f32 %v4326_v42, %v4327_v32 }
 0x379   : > { %v4335_v43 = vmax.f32 %v4333_v6, %v4334_v35  ;;  %v4185_v21 = vmax.f32 %v4183_v55, %v4184_v15  ;;  %v5097_v26 = vsel %vm5079_vm7, %v4178_v54, %v17895_v52  ;;  %v4316_v23 = vmax.f32 %v4314_v61, %v4315_v57 }
 0x37a   : > { %v4192_v16 = vmax.f32 %v4190_v25, %v4191_v28  ;;  %v4198_v44 = vrot.slane %v4197_v19, 1  ;;  %v4322_v29 = vrot.slane %v4321_v53, 2  ;;  %v4329_v56 = vrot.slane %v4328_v14, 2 }
 0x37b   : > { %v4336_v48 = vrot.slane %v4335_v43, 2  ;;  %v5098_v50 = vsel %vm5081_vm8, %v4185_v21, %v5097_v26  ;;  %v4317_v17 = vrot.slane %v4316_v23, 1  ;;  %v3303_v47 = vmax.f32 %v2974_v38, %v3200_v34  ;;  %v2977_v21 = vpop.f32.mrf.mxu0 }
 0x37c   : > { %v3306_v22 = vmax.f32 %v15367_v41, %v15415_v62  ;;  %v4199_v33 = vmax.f32 %v4197_v19, %v4198_v44  ;;  %v5099_v51 = vsel %vm5083_vm9, %v4192_v16, %v5098_v50  ;;  %v4323_v10 = vmax.f32 %v4321_v53, %v4322_v29  ;;  %v3203_v16 = vpop.f32.mrf.mxu1 }
 0x37d   : > { %v4330_v27 = vmax.f32 %v4328_v14, %v4329_v56  ;;  %v4318_v3 = vmax.f32 %v4316_v23, %v4317_v17  ;;  %v4337_v36 = vmax.f32 %v4335_v43, %v4336_v48  ;;  %v3495_v30 = vcombine.high %v3303_v47, %v3303_v47 }
 0x37e   : > { %v3502_v52 = vrot.slane %v3303_v47, %v17799_v49  ;;  %v5100_v0 = vsel %vm5085_vm10, %v4199_v33, %v5099_v51  ;;  %v4324_v20 = vrot.slane %v4323_v10, 1  ;;  %v3546_v8 = vcombine.high %v3306_v22, %v3306_v22 }
 0x37f   : > { %v4331_v37 = vrot.slane %v4330_v27, 1  ;;  %5211 = vst.msk [vmem:[#allocation2 + $0x29] sm:$0xff] %vm5208_vm11, %v5100_v0  ;;  %v4338_v12 = vrot.slane %v4337_v36, 1  ;;  %v3509_v45 = vrot.slane %v3495_v30, %v17799_v49  ;;  %v3553_v7 = vrot.slane %v3306_v22, %v17799_v49  ;;  %v15370_v30 = vpop.f32.mrf.mxu0 }
 0x380   : > { %v3510_v63 = vcombine.high %v3502_v52, %v3502_v52  ;;  %v4256_v46 = vsel %vm4031_vm3, %v3502_v52, -inf  ;;  %v4325_v24 = vmax.f32 %v4323_v10, %v4324_v20  ;;  %v3560_v34 = vrot.slane %v3546_v8, %v17799_v49  ;;  %v15418_v52 = vpop.f32.mrf.mxu1 }
 0x381   : > { %v4332_v9 = vmax.f32 %v4330_v27, %v4331_v37  ;;  %v4257_v13 = vrot.slane %v4256_v46, 4  ;;  %v4339_v40 = vmax.f32 %v4337_v36, %v4338_v12  ;;  %v3511_v2 = vcombine.high %v3509_v45, %v3509_v45 }
 0x382   : > { %v4263_v5 = vsel %vm4031_vm3, %v3510_v63, -inf  ;;  %v4270_v11 = vsel %vm4031_vm3, %v3509_v45, -inf  ;;  %v5115_v60 = vsel %vm5073_vm4, %v4325_v24, %v4318_v3  ;;  %v3561_v58 = vcombine.high %v3553_v7, %v3553_v7 }
 0x383   : > { %v4258_v39 = vmax.f32 %v4256_v46, %v4257_v13  ;;  %v4264_v18 = vrot.slane %v4263_v5, 4  ;;  %v4271_v42 = vrot.slane %v4270_v11, 4  ;;  %v5116_v6 = vsel %vm5075_vm5, %v4332_v9, %v5115_v60 }
 0x384   : > { %v4277_v38 = vsel %vm4031_vm3, %v3511_v2, -inf  ;;  %v3562_v1 = vcombine.high %v3560_v34, %v3560_v34  ;;  %v4340_v32 = vsel %vm4031_vm3, %v3553_v7, -inf  ;;  %v4347_v35 = vsel %vm4031_vm3, %v3561_v58, -inf }
 0x385   : > { %v4259_v55 = vrot.slane %v4258_v39, 2  ;;  %v4265_v25 = vmax.f32 %v4263_v5, %v4264_v18  ;;  %v4272_v61 = vmax.f32 %v4270_v11, %v4271_v42  ;;  %v4278_v31 = vrot.slane %v4277_v38, 4 }
 0x386   : > { %v4354_v54 = vsel %vm4031_vm3, %v3560_v34, -inf  ;;  %v17932_v15 = vld [vmem:[#allocation2 + $0x28] sm:$0xff]  ;;  %v4341_v14 = vrot.slane %v4340_v32, 4  ;;  %v4348_v43 = vrot.slane %v4347_v35, 4  ;;  %v4361_v62 = vsel %vm4031_vm3, %v3562_v1, -inf }
 0x387   : > { %v4260_v28 = vmax.f32 %v4258_v39, %v4259_v55  ;;  %v4266_v57 = vrot.slane %v4265_v25, 2  ;;  %v4273_v19 = vrot.slane %v4272_v61, 2  ;;  %v4279_v53 = vmax.f32 %v4277_v38, %v4278_v31  ;;  %5815 = vst [vmem:[#allocation2 + $0x28] sm:$0x1] %v20196_v4 }
 0x388   : > { %v4355_v41 = vrot.slane %v4354_v54, 4  ;;  %v4342_v56 = vmax.f32 %v4340_v32, %v4341_v14  ;;  %v4349_v48 = vmax.f32 %v4347_v35, %v4348_v43  ;;  %v4362_v17 = vrot.slane %v4361_v62, 4 }
 0x389   : > { %v4261_v26 = vrot.slane %v4260_v28, 1  ;;  %v4267_v23 = vmax.f32 %v4265_v25, %v4266_v57  ;;  %v4274_v44 = vmax.f32 %v4272_v61, %v4273_v19  ;;  %v4280_v29 = vrot.slane %v4279_v53, 2 }
 0x38a   : > { %v4356_v50 = vmax.f32 %v4354_v54, %v4355_v41  ;;  %v4343_v10 = vrot.slane %v4342_v56, 2  ;;  %v4350_v27 = vrot.slane %v4349_v48, 2  ;;  %v4363_v36 = vmax.f32 %v4361_v62, %v4362_v17 }
 0x38b   : > { %v4262_v47 = vmax.f32 %v4260_v28, %v4261_v26  ;;  %v4268_v22 = vrot.slane %v4267_v23, 1  ;;  %v4275_v33 = vrot.slane %v4274_v44, 1  ;;  %v4281_v51 = vmax.f32 %v4279_v53, %v4280_v29 }
 0x38c   : > { %v4357_v3 = vrot.slane %v4356_v50, 2  ;;  %v5117_v8 = vsel %vm5077_vm6, %v4339_v40, %v5116_v6  ;;  %v4344_v12 = vmax.f32 %v4342_v56, %v4343_v10  ;;  %v4351_v45 = vmax.f32 %v4349_v48, %v4350_v27 }
 0x38d   : > { %v4269_v0 = vmax.f32 %v4267_v23, %v4268_v22  ;;  %v4276_v20 = vmax.f32 %v4274_v44, %v4275_v33  ;;  %v4282_v37 = vrot.slane %v4281_v51, 1  ;;  %v4364_v46 = vrot.slane %v4363_v36, 2 }
 0x38e   : > { %v4358_v63 = vmax.f32 %v4356_v50, %v4357_v3  ;;  %v3304_v13 = vmax.f32 %v2977_v21, %v3203_v16  ;;  %v3309_v7 = vmax.f32 %v15370_v30, %v15418_v52  ;;  %v4345_v5 = vrot.slane %v4344_v12, 1 }
 0x38f   : > { %v4283_v24 = vmax.f32 %v4281_v51, %v4282_v37  ;;  %v5108_v9 = vsel %vm5073_vm4, %v4269_v0, %v4262_v47  ;;  %v4352_v11 = vrot.slane %v4351_v45, 1  ;;  %v4365_v39 = vmax.f32 %v4363_v36, %v4364_v46  ;;  %v2990_v0 = vpop.f32.mrf.mxu0 }
 0x390   : > { %v5109_v2 = vsel %vm5075_vm5, %v4276_v20, %v5108_v9  ;;  %v4359_v60 = vrot.slane %v4358_v63, 1  ;;  %v3512_v18 = vcombine.high %v3304_v13, %v3304_v13  ;;  %v3519_v42 = vrot.slane %v3304_v13, %v17799_v49  ;;  %v3216_v20 = vpop.f32.mrf.mxu1 }
 0x391   : > { %v17941_v40 = vsel %vm5077_vm6, %v4283_v24, %v5109_v2  ;;  %v4346_v6 = vmax.f32 %v4344_v12, %v4345_v5  ;;  %v4353_v38 = vmax.f32 %v4351_v45, %v4352_v11  ;;  %v3597_v58 = vcombine.high %v3309_v7, %v3309_v7 }
 0x392   : > { %v4360_v34 = vmax.f32 %v4358_v63, %v4359_v60  ;;  %v4366_v55 = vrot.slane %v4365_v39, 1  ;;  %v3526_v25 = vrot.slane %v3512_v18, %v17799_v49  ;;  %v3527_v61 = vcombine.high %v3519_v42, %v3519_v42 }
 0x393   : > { %v4284_v31 = vsel %vm4031_vm3, %v3519_v42, -inf  ;;  %v5118_v1 = vsel %vm5079_vm7, %v4346_v6, %v5117_v8  ;;  %v3604_v35 = vrot.slane %v3309_v7, %v17799_v49  ;;  %v3611_v54 = vrot.slane %v3597_v58, %v17799_v49  ;;  %v15371_v42 = vpop.f32.mrf.mxu0  ;;  %v15419_v6 = vpop.f32.mrf.mxu1 }
 0x394   : > { %v4285_v32 = vrot.slane %v4284_v31, 4  ;;  %v4367_v28 = vmax.f32 %v4365_v39, %v4366_v55  ;;  %v5119_v57 = vsel %vm5081_vm8, %v4353_v38, %v5118_v1  ;;  %v3528_v19 = vcombine.high %v3526_v25, %v3526_v25 }
 0x395   : > { %v4291_v53 = vsel %vm4031_vm3, %v3527_v61, -inf  ;;  %v5120_v14 = vsel %vm5083_vm9, %v4360_v34, %v5119_v57  ;;  %v4298_v62 = vsel %vm4031_vm3, %v3526_v25, -inf  ;;  %v3612_v23 = vcombine.high %v3604_v35, %v3604_v35 }
 0x396   : > { %v4286_v43 = vmax.f32 %v4284_v31, %v4285_v32  ;;  %v4292_v41 = vrot.slane %v4291_v53, 4  ;;  %v5121_v21 = vsel %vm5085_vm10, %v4367_v28, %v5120_v14  ;;  %v4299_v16 = vrot.slane %v4298_v62, 4 }
 0x397   : > { %v4305_v26 = vsel %vm4031_vm3, %v3528_v19, -inf  ;;  %5214 = vst.msk [vmem:[#allocation2 + $0x59] sm:$0xff] %vm5208_vm11, %v5121_v21  ;;  %v3613_v48 = vcombine.high %v3611_v54, %v3611_v54  ;;  %v4424_v17 = vsel %vm4031_vm3, %v3604_v35, -inf  ;;  %v4431_v47 = vsel %vm4031_vm3, %v3612_v23, -inf }
 0x398   : > { %v4287_v44 = vrot.slane %v4286_v43, 2  ;;  %v4293_v29 = vmax.f32 %v4291_v53, %v4292_v41  ;;  %v4306_v56 = vrot.slane %v4305_v26, 4  ;;  %v4300_v50 = vmax.f32 %v4298_v62, %v4299_v16  ;;  %v3219_v41 = vpop.f32.mrf.mxu1 }
 0x399   : > { %v4438_v22 = vsel %vm4031_vm3, %v3611_v54, -inf  ;;  %v4425_v27 = vrot.slane %v4424_v17, 4  ;;  %v4432_v36 = vrot.slane %v4431_v47, 4  ;;  %v4445_v52 = vsel %vm4031_vm3, %v3613_v48, -inf }
 0x39a   : > { %v4288_v33 = vmax.f32 %v4286_v43, %v4287_v44  ;;  %v4294_v51 = vrot.slane %v4293_v29, 2  ;;  %v4307_v10 = vmax.f32 %v4305_v26, %v4306_v56  ;;  %v4301_v3 = vrot.slane %v4300_v50, 2  ;;  %v2993_v43 = vpop.f32.mrf.mxu0 }
 0x39b   : > { %v4439_v30 = vrot.slane %v4438_v22, 4  ;;  %v4426_v45 = vmax.f32 %v4424_v17, %v4425_v27  ;;  %v4433_v46 = vmax.f32 %v4431_v47, %v4432_v36  ;;  %v4446_v9 = vrot.slane %v4445_v52, 4 }
 0x39c   : > { %v4289_v37 = vrot.slane %v4288_v33, 1  ;;  %v4295_v8 = vmax.f32 %v4293_v29, %v4294_v51  ;;  %v4308_v12 = vrot.slane %v4307_v10, 2  ;;  %v4302_v63 = vmax.f32 %v4300_v50, %v4301_v3 }
 0x39d   : > { %v4440_v24 = vmax.f32 %v4438_v22, %v4439_v30  ;;  %v4427_v5 = vrot.slane %v4426_v45, 2  ;;  %v4434_v60 = vrot.slane %v4433_v46, 2  ;;  %v4447_v18 = vmax.f32 %v4445_v52, %v4446_v9 }
 0x39e   : > { %v4290_v13 = vmax.f32 %v4288_v33, %v4289_v37  ;;  %v4296_v7 = vrot.slane %v4295_v8, 1  ;;  %v4309_v2 = vmax.f32 %v4307_v10, %v4308_v12  ;;  %v4303_v11 = vrot.slane %v4302_v63, 1 }
 0x39f   : > { %v4441_v39 = vrot.slane %v4440_v24, 2  ;;  %v4428_v55 = vmax.f32 %v4426_v45, %v4427_v5  ;;  %v4435_v61 = vmax.f32 %v4433_v46, %v4434_v60  ;;  %v4448_v1 = vrot.slane %v4447_v18, 2 }
 0x3a0   : > { %v4297_v38 = vmax.f32 %v4295_v8, %v4296_v7  ;;  %v4310_v34 = vrot.slane %v4309_v2, 1  ;;  %v5111_v58 = vsel %vm5079_vm7, %v4290_v13, %v17941_v40  ;;  %v4304_v25 = vmax.f32 %v4302_v63, %v4303_v11 }
 0x3a1   : > { %v4442_v31 = vmax.f32 %v4440_v24, %v4441_v39  ;;  %v4429_v54 = vrot.slane %v4428_v55, 1  ;;  %v3307_v28 = vmax.f32 %v2990_v0, %v3216_v20  ;;  %v4436_v19 = vrot.slane %v4435_v61, 1 }
 0x3a2   : > { %v4311_v32 = vmax.f32 %v4309_v2, %v4310_v34  ;;  %v5112_v35 = vsel %vm5081_vm8, %v4297_v38, %v5111_v58  ;;  %v4449_v14 = vmax.f32 %v4447_v18, %v4448_v1  ;;  %v3310_v29 = vmax.f32 %v15371_v42, %v15419_v6 }
 0x3a3   : > { %v5113_v57 = vsel %vm5083_vm9, %v4304_v25, %v5112_v35  ;;  %v4443_v53 = vrot.slane %v4442_v31, 1  ;;  %v4430_v40 = vmax.f32 %v4428_v55, %v4429_v54  ;;  %v3563_v21 = vcombine.high %v3307_v28, %v3307_v28 }
 0x3a4   : > { %v5114_v62 = vsel %vm5085_vm10, %v4311_v32, %v5113_v57  ;;  %v3570_v16 = vrot.slane %v3307_v28, %v17799_v49  ;;  %v4437_v26 = vmax.f32 %v4435_v61, %v4436_v19  ;;  %v4450_v44 = vrot.slane %v4449_v14, 1 }
 0x3a5   : > { %5213 = vst.msk [vmem:[#allocation2 + $0x51] sm:$0xff] %vm5208_vm11, %v5114_v62  ;;  %v4444_v23 = vmax.f32 %v4442_v31, %v4443_v53  ;;  %v3577_v56 = vrot.slane %v3563_v21, %v17799_v49  ;;  %v3308_v17 = vmax.f32 %v2993_v43, %v3219_v41  ;;  %v3614_v51 = vcombine.high %v3310_v29, %v3310_v29 }
 0x3a6   : > { %v3578_v48 = vcombine.high %v3570_v16, %v3570_v16  ;;  %v4368_v50 = vsel %vm4031_vm3, %v3570_v16, -inf  ;;  %v4451_v47 = vmax.f32 %v4449_v14, %v4450_v44  ;;  %v5129_v22 = vsel %vm5073_vm4, %v4437_v26, %v4430_v40 }
 0x3a7   : > { %v4369_v33 = vrot.slane %v4368_v50, 4  ;;  %v5130_v10 = vsel %vm5075_vm5, %v4444_v23, %v5129_v22  ;;  %v3579_v27 = vcombine.high %v3577_v56, %v3577_v56  ;;  %v4382_v36 = vsel %vm4031_vm3, %v3577_v56, -inf }
 0x3a8   : > { %v4375_v3 = vsel %vm4031_vm3, %v3578_v48, -inf  ;;  %v4383_v0 = vrot.slane %v4382_v36, 4  ;;  %v3621_v20 = vrot.slane %v3310_v29, %v17799_v49  ;;  %v3628_v8 = vrot.slane %v3614_v51, %v17799_v49 }
 0x3a9   : > { %v4370_v30 = vmax.f32 %v4368_v50, %v4369_v33  ;;  %v4376_v52 = vrot.slane %v4375_v3, 4  ;;  %v4389_v37 = vsel %vm4031_vm3, %v3579_v27, -inf  ;;  %v17976_v12 = vsel %vm5077_vm6, %v4451_v47, %v5130_v10 }
 0x3aa   : > { %v3580_v45 = vcombine.high %v3308_v17, %v3308_v17  ;;  %v4384_v24 = vmax.f32 %v4382_v36, %v4383_v0  ;;  %v4390_v9 = vrot.slane %v4389_v37, 4  ;;  %v3629_v13 = vcombine.high %v3621_v20, %v3621_v20  ;;  %v15422_v36 = vpop.f32.mrf.mxu1 }
 0x3ab   : > { %v4371_v63 = vrot.slane %v4370_v30, 2  ;;  %v4377_v46 = vmax.f32 %v4375_v3, %v4376_v52  ;;  %v3630_v7 = vcombine.high %v3628_v8, %v3628_v8  ;;  %v4452_v2 = vsel %vm4031_vm3, %v3621_v20, -inf  ;;  %v15374_v3 = vpop.f32.mrf.mxu0 }
 0x3ac   : > { %v4466_v5 = vsel %vm4031_vm3, %v3628_v8, -inf  ;;  %v17980_v11 = vld [vmem:[#allocation2 + $0x50] sm:$0xff]  ;;  %v4385_v18 = vrot.slane %v4384_v24, 2  ;;  %v4391_v42 = vmax.f32 %v4389_v37, %v4390_v9  ;;  %v4453_v6 = vrot.slane %v4452_v2, 4 }
 0x3ad   : > { %v4372_v60 = vmax.f32 %v4370_v30, %v4371_v63  ;;  %v4378_v39 = vrot.slane %v4377_v46, 2  ;;  %5816 = vst [vmem:[#allocation2 + $0x50] sm:$0x1] %v20196_v4  ;;  %v4459_v38 = vsel %vm4031_vm3, %v3629_v13, -inf  ;;  %v4467_v34 = vrot.slane %v4466_v5, 4 }
 0x3ae   : > { %v4473_v58 = vsel %vm4031_vm3, %v3630_v7, -inf  ;;  %v4386_v61 = vmax.f32 %v4384_v24, %v4385_v18  ;;  %v4392_v31 = vrot.slane %v4391_v42, 2  ;;  %v4454_v1 = vmax.f32 %v4452_v2, %v4453_v6 }
 0x3af   : > { %v4373_v55 = vrot.slane %v4372_v60, 1  ;;  %v4379_v25 = vmax.f32 %v4377_v46, %v4378_v39  ;;  %v4460_v32 = vrot.slane %v4459_v38, 4  ;;  %v4468_v35 = vmax.f32 %v4466_v5, %v4467_v34  ;;  %v3232_v39 = vpop.f32.mrf.mxu1  ;;  %v17996_v34 = vld [vmem:[#allocation2 + $0xa] sm:$0xff] }
 0x3b0   : > { %v4474_v54 = vrot.slane %v4473_v58, 4  ;;  %v4387_v19 = vrot.slane %v4386_v61, 1  ;;  %v4393_v53 = vmax.f32 %v4391_v42, %v4392_v31  ;;  %v4455_v14 = vrot.slane %v4454_v1, 2  ;;  %5822 = vst [vmem:[#allocation2 + $0x11] sm:$0x1] %v20196_v4 }
 0x3b1   : > { %v4374_v28 = vmax.f32 %v4372_v60, %v4373_v55  ;;  %v4380_v57 = vrot.slane %v4379_v25, 1  ;;  %v4461_v43 = vmax.f32 %v4459_v38, %v4460_v32  ;;  %v4469_v41 = vrot.slane %v4468_v35, 2  ;;  %v3006_v60 = vpop.f32.mrf.mxu0 }
 0x3b2   : > { %v4475_v62 = vmax.f32 %v4473_v58, %v4474_v54  ;;  %v4388_v21 = vmax.f32 %v4386_v61, %v4387_v19  ;;  %v4394_v16 = vrot.slane %v4393_v53, 1  ;;  %v3587_v26 = vrot.slane %v3308_v17, %v17799_v49 }
 0x3b3   : > { %v4381_v40 = vmax.f32 %v4379_v25, %v4380_v57  ;;  %v4456_v23 = vmax.f32 %v4454_v1, %v4455_v14  ;;  %v4462_v44 = vrot.slane %v4461_v43, 2  ;;  %v4470_v29 = vmax.f32 %v4468_v35, %v4469_v41 }
 0x3b4   : > { %v4476_v56 = vrot.slane %v4475_v62, 2  ;;  %v4395_v48 = vmax.f32 %v4393_v53, %v4394_v16  ;;  %v3594_v47 = vrot.slane %v3580_v45, %v17799_v49  ;;  %v3595_v22 = vcombine.high %v3587_v26, %v3587_v26 }
 0x3b5   : > { %v5122_v50 = vsel %vm5073_vm4, %v4381_v40, %v4374_v28  ;;  %v4457_v51 = vrot.slane %v4456_v23, 1  ;;  %v4463_v10 = vmax.f32 %v4461_v43, %v4462_v44  ;;  %v4471_v27 = vrot.slane %v4470_v29, 1 }
 0x3b6   : > { %v5123_v33 = vsel %vm5075_vm5, %v4388_v21, %v5122_v50  ;;  %v4477_v30 = vmax.f32 %v4475_v62, %v4476_v56  ;;  %v3596_v52 = vcombine.high %v3594_v47, %v3594_v47  ;;  %v4396_v17 = vsel %vm4031_vm3, %v3587_v26, -inf }
 0x3b7   : > { %v4403_v0 = vsel %vm4031_vm3, %v3595_v22, -inf  ;;  %v4458_v20 = vmax.f32 %v4456_v23, %v4457_v51  ;;  %v4464_v37 = vrot.slane %v4463_v10, 1  ;;  %v4472_v8 = vmax.f32 %v4470_v29, %v4471_v27 }
 0x3b8   : > { %v4397_v63 = vrot.slane %v4396_v17, 4  ;;  %v4478_v46 = vrot.slane %v4477_v30, 1  ;;  %v4404_v45 = vrot.slane %v4403_v0, 4  ;;  %v4410_v24 = vsel %vm4031_vm3, %v3594_v47, -inf }
 0x3b9   : > { %v4417_v9 = vsel %vm4031_vm3, %v3596_v52, -inf  ;;  %v4465_v13 = vmax.f32 %v4463_v10, %v4464_v37  ;;  %v5132_v7 = vsel %vm5079_vm7, %v4458_v20, %v17976_v12  ;;  %v4411_v5 = vrot.slane %v4410_v24, 4 }
 0x3ba   : > { %v4398_v2 = vmax.f32 %v4396_v17, %v4397_v63  ;;  %v4479_v18 = vmax.f32 %v4477_v30, %v4478_v46  ;;  %v4405_v42 = vmax.f32 %v4403_v0, %v4404_v45  ;;  %v4418_v6 = vrot.slane %v4417_v9, 4 }
 0x3bb   : > { %v5124_v38 = vsel %vm5077_vm6, %v4395_v48, %v5123_v33  ;;  %v5133_v58 = vsel %vm5081_vm8, %v4465_v13, %v5132_v7  ;;  %v4412_v25 = vmax.f32 %v4410_v24, %v4411_v5  ;;  %v3313_v61 = vmax.f32 %v15374_v3, %v15422_v36 }
 0x3bc   : > { %v4399_v55 = vrot.slane %v4398_v2, 2  ;;  %v5134_v12 = vsel %vm5083_vm9, %v4472_v8, %v5133_v58  ;;  %v4406_v31 = vrot.slane %v4405_v42, 2  ;;  %v4419_v1 = vmax.f32 %v4417_v9, %v4418_v6 }
 0x3bd   : > { %v3311_v32 = vmax.f32 %v3006_v60, %v3232_v39  ;;  %v5135_v35 = vsel %vm5085_vm10, %v4479_v18, %v5134_v12  ;;  %v4413_v28 = vrot.slane %v4412_v25, 2  ;;  %v3665_v57 = vcombine.high %v3313_v61, %v3313_v61 }
 0x3be   : > { %v4400_v54 = vmax.f32 %v4398_v2, %v4399_v55  ;;  %5216 = vst.msk [vmem:[#allocation2 + $0x81] sm:$0xff] %vm5208_vm11, %v5135_v35  ;;  %v4407_v19 = vmax.f32 %v4405_v42, %v4406_v31  ;;  %v4420_v53 = vrot.slane %v4419_v1, 2  ;;  %v3672_v14 = vrot.slane %v3313_v61, %v17799_v49 }
 0x3bf   : > { %v3631_v43 = vcombine.high %v3311_v32, %v3311_v32  ;;  %v4414_v62 = vmax.f32 %v4412_v25, %v4413_v28  ;;  %v3679_v40 = vrot.slane %v3665_v57, %v17799_v49  ;;  %v3638_v21 = vrot.slane %v3311_v32, %v17799_v49  ;;  %v15423_v32 = vpop.f32.mrf.mxu1 }
 0x3c0   : > { %v4401_v41 = vrot.slane %v4400_v54, 1  ;;  %v4408_v16 = vrot.slane %v4407_v19, 1  ;;  %v4421_v26 = vmax.f32 %v4419_v1, %v4420_v53  ;;  %v3680_v23 = vcombine.high %v3672_v14, %v3672_v14  ;;  %v15375_v1 = vpop.f32.mrf.mxu0 }
 0x3c1   : > { %v4536_v44 = vsel %vm4031_vm3, %v3672_v14, -inf  ;;  %v4415_v56 = vrot.slane %v4414_v62, 1  ;;  %v3681_v48 = vcombine.high %v3679_v40, %v3679_v40  ;;  %v4550_v51 = vsel %vm4031_vm3, %v3679_v40, -inf }
 0x3c2   : > { %v4402_v29 = vmax.f32 %v4400_v54, %v4401_v41  ;;  %v4537_v50 = vrot.slane %v4536_v44, 4  ;;  %v4409_v47 = vmax.f32 %v4407_v19, %v4408_v16  ;;  %v4422_v22 = vrot.slane %v4421_v26, 1 }
 0x3c3   : > { %v4543_v33 = vsel %vm4031_vm3, %v3680_v23, -inf  ;;  %v4416_v10 = vmax.f32 %v4414_v62, %v4415_v56  ;;  %v4551_v17 = vrot.slane %v4550_v51, 4  ;;  %v4557_v0 = vsel %vm4031_vm3, %v3681_v48, -inf }
 0x3c4   : > { %v5125_v27 = vsel %vm5079_vm7, %v4402_v29, %v5124_v38  ;;  %v4538_v3 = vmax.f32 %v4536_v44, %v4537_v50  ;;  %v4544_v36 = vrot.slane %v4543_v33, 4  ;;  %v4423_v30 = vmax.f32 %v4421_v26, %v4422_v22  ;;  %v3009_v22 = vpop.f32.mrf.mxu0 }
 0x3c5   : > { %v5126_v52 = vsel %vm5081_vm8, %v4409_v47, %v5125_v27  ;;  %v4558_v63 = vrot.slane %v4557_v0, 4  ;;  %v4552_v45 = vmax.f32 %v4550_v51, %v4551_v17  ;;  %v3645_v24 = vrot.slane %v3631_v43, %v17799_v49 }
 0x3c6   : > { %v5127_v20 = vsel %vm5083_vm9, %v4416_v10, %v5126_v52  ;;  %v4539_v37 = vrot.slane %v4538_v3, 2  ;;  %v4545_v8 = vmax.f32 %v4543_v33, %v4544_v36  ;;  %v3646_v9 = vcombine.high %v3638_v21, %v3638_v21  ;;  %v3235_v33 = vpop.f32.mrf.mxu1 }
 0x3c7   : > { %v5128_v46 = vsel %vm5085_vm10, %v4423_v30, %v5127_v20  ;;  %v4559_v2 = vmax.f32 %v4557_v0, %v4558_v63  ;;  %v4480_v5 = vsel %vm4031_vm3, %v3638_v21, -inf  ;;  %v4553_v60 = vrot.slane %v4552_v45, 2 }
 0x3c8   : > { %5215 = vst.msk [vmem:[#allocation2 + $0x79] sm:$0xff] %vm5208_vm11, %v5128_v46  ;;  %v4540_v13 = vmax.f32 %v4538_v3, %v4539_v37  ;;  %v4546_v7 = vrot.slane %v4545_v8, 2  ;;  %v3647_v39 = vcombine.high %v3645_v24, %v3645_v24  ;;  %v4481_v18 = vrot.slane %v4480_v5, 4 }
 0x3c9   : > { %v4487_v42 = vsel %vm4031_vm3, %v3646_v9, -inf  ;;  %v4560_v58 = vrot.slane %v4559_v2, 2  ;;  %v4554_v25 = vmax.f32 %v4552_v45, %v4553_v60  ;;  %v4494_v12 = vsel %vm4031_vm3, %v3645_v24, -inf }
 0x3ca   : > { %v4541_v6 = vrot.slane %v4540_v13, 1  ;;  %v4547_v38 = vmax.f32 %v4545_v8, %v4546_v7  ;;  %v4488_v55 = vrot.slane %v4487_v42, 4  ;;  %v4482_v61 = vmax.f32 %v4480_v5, %v4481_v18 }
 0x3cb   : > { %v4501_v31 = vsel %vm4031_vm3, %v3647_v39, -inf  ;;  %v4561_v28 = vmax.f32 %v4559_v2, %v4560_v58  ;;  %v4555_v19 = vrot.slane %v4554_v25, 1  ;;  %v4495_v14 = vrot.slane %v4494_v12, 4 }
 0x3cc   : > { %v4542_v35 = vmax.f32 %v4540_v13, %v4541_v6  ;;  %v4548_v54 = vrot.slane %v4547_v38, 1  ;;  %v4489_v57 = vmax.f32 %v4487_v42, %v4488_v55  ;;  %v4483_v53 = vrot.slane %v4482_v61, 2  ;;  %v5257_v42 = vld [vmem:[#allocation2 + $0x1] sm:$0xff] }
 0x3cd   : > { %v4502_v43 = vrot.slane %v4501_v31, 4  ;;  %v4562_v62 = vrot.slane %v4561_v28, 1  ;;  %v3314_v21 = vmax.f32 %v15375_v1, %v15423_v32  ;;  %v4556_v26 = vmax.f32 %v4554_v25, %v4555_v19  ;;  %v5258_v1 = vld [vmem:[#allocation2 + $0x9] sm:$0xff] }
 0x3ce   : > { %v4549_v41 = vmax.f32 %v4547_v38, %v4548_v54  ;;  %v4490_v40 = vrot.slane %v4489_v57, 2  ;;  %v4484_v23 = vmax.f32 %v4482_v61, %v4483_v53  ;;  %v4496_v44 = vmax.f32 %v4494_v12, %v4495_v14 }
 0x3cf   : > { %v18020_v16 = vld [vmem:[#allocation2 + $0x78] sm:$0xff]  ;;  %v4503_v29 = vmax.f32 %v4501_v31, %v4502_v43  ;;  %v4563_v56 = vmax.f32 %v4561_v28, %v4562_v62  ;;  %v3682_v47 = vcombine.high %v3314_v21, %v3314_v21  ;;  %v3689_v30 = vrot.slane %v3314_v21, %v17799_v49 }
 0x3d0   : > { %5817 = vst [vmem:[#allocation2 + $0x78] sm:$0x1] %v20196_v4  ;;  %v5143_v48 = vsel %vm5073_vm4, %v4549_v41, %v4542_v35  ;;  %v4491_v50 = vmax.f32 %v4489_v57, %v4490_v40  ;;  %v4485_v10 = vrot.slane %v4484_v23, 1  ;;  %v4497_v27 = vrot.slane %v4496_v44, 2 }
 0x3d1   : > { %v5144_v51 = vsel %vm5075_vm5, %v4556_v26, %v5143_v48  ;;  %v4504_v3 = vrot.slane %v4503_v29, 2  ;;  %v3696_v52 = vrot.slane %v3682_v47, %v17799_v49  ;;  %v3312_v8 = vmax.f32 %v3009_v22, %v3235_v33  ;;  %v15378_v47 = vpop.f32.mrf.mxu0  ;;  %v15426_v22 = vpop.f32.mrf.mxu1 }
 0x3d2   : > { %v4492_v36 = vrot.slane %v4491_v50, 1  ;;  %v18028_v17 = vsel %vm5077_vm6, %v4563_v56, %v5144_v51  ;;  %v4486_v0 = vmax.f32 %v4484_v23, %v4485_v10  ;;  %v4498_v20 = vmax.f32 %v4496_v44, %v4497_v27 }
 0x3d3   : > { %v4505_v37 = vmax.f32 %v4503_v29, %v4504_v3  ;;  %v3697_v46 = vcombine.high %v3689_v30, %v3689_v30  ;;  %v3698_v45 = vcombine.high %v3696_v52, %v3696_v52  ;;  %v4564_v24 = vsel %vm4031_vm3, %v3689_v30, -inf }
 0x3d4   : > { %v4493_v63 = vmax.f32 %v4491_v50, %v4492_v36  ;;  %v4499_v9 = vrot.slane %v4498_v20, 1  ;;  %v4565_v7 = vrot.slane %v4564_v24, 4  ;;  %v4578_v2 = vsel %vm4031_vm3, %v3696_v52, -inf }
 0x3d5   : > { %v4506_v13 = vrot.slane %v4505_v37, 1  ;;  %v4571_v60 = vsel %vm4031_vm3, %v3697_v46, -inf  ;;  %v4579_v39 = vrot.slane %v4578_v2, 4  ;;  %v4585_v18 = vsel %vm4031_vm3, %v3698_v45, -inf }
 0x3d6   : > { %v5136_v5 = vsel %vm5073_vm4, %v4493_v63, %v4486_v0  ;;  %v4500_v6 = vmax.f32 %v4498_v20, %v4499_v9  ;;  %v4566_v58 = vmax.f32 %v4564_v24, %v4565_v7  ;;  %v4572_v55 = vrot.slane %v4571_v60, 4  ;;  %v5226_v0 = vld [vmem:[#allocation2 + $0x8] sm:$0xff]  ;;  %v18044_v20 = vld [vmem:[#allocation2 + $0x32] sm:$0xff]  ;;  %v3022_v7 = vpop.f32.mrf.mxu0 }
 0x3d7   : > { %v4507_v38 = vmax.f32 %v4505_v37, %v4506_v13  ;;  %v4580_v25 = vmax.f32 %v4578_v2, %v4579_v39  ;;  %v4586_v61 = vrot.slane %v4585_v18, 4  ;;  %v3648_v12 = vcombine.high %v3312_v8, %v3312_v8  ;;  %5823 = vst [vmem:[#allocation2 + $0x39] sm:$0x1] %v20196_v4  ;;  %v3248_v2 = vpop.f32.mrf.mxu1 }
 0x3d8   : > { %v3655_v31 = vrot.slane %v3312_v8, %v17799_v49  ;;  %v5137_v32 = vsel %vm5075_vm5, %v4500_v6, %v5136_v5  ;;  %v4567_v35 = vrot.slane %v4566_v58, 2  ;;  %v4573_v54 = vmax.f32 %v4571_v60, %v4572_v55 }
 0x3d9   : > { %v5273_v28 = vpack.c.bf16 %v5258_v1, %v5257_v42  ;;  %v4581_v57 = vrot.slane %v4580_v25, 2  ;;  %v4587_v19 = vmax.f32 %v4585_v18, %v4586_v61  ;;  %v3662_v53 = vrot.slane %v3648_v12, %v17799_v49 }
 0x3da   : > { %v3663_v14 = vcombine.high %v3655_v31, %v3655_v31  ;;  %v4568_v43 = vmax.f32 %v4566_v58, %v4567_v35  ;;  %v4574_v41 = vrot.slane %v4573_v54, 2  ;;  %v4508_v62 = vsel %vm4031_vm3, %v3655_v31, -inf }
 0x3db   : > { %v5138_v40 = vsel %vm5077_vm6, %v4507_v38, %v5137_v32  ;;  %15444 = vmatprep.mubr.msk.bf16.mxu0 %vm5208_vm11, %v5273_v28  ;;  %v4582_v21 = vmax.f32 %v4580_v25, %v4581_v57  ;;  %v4588_v26 = vrot.slane %v4587_v19, 2  ;;  %v3664_v23 = vcombine.high %v3662_v53, %v3662_v53 }
 0x3dc   : > { %v4509_v44 = vrot.slane %v4508_v62, 4  ;;  %v4569_v29 = vrot.slane %v4568_v43, 1  ;;  %v4575_v56 = vmax.f32 %v4573_v54, %v4574_v41  ;;  %v4515_v48 = vsel %vm4031_vm3, %v3663_v14, -inf }
 0x3dd   : > { %v4522_v50 = vsel %vm4031_vm3, %v3662_v53, -inf  ;;  %v4583_v33 = vrot.slane %v4582_v21, 1  ;;  %v4589_v51 = vmax.f32 %v4587_v19, %v4588_v26  ;;  %v4516_v27 = vrot.slane %v4515_v48, 4 }
 0x3de   : > { %v4510_v10 = vmax.f32 %v4508_v62, %v4509_v44  ;;  %v4570_v3 = vmax.f32 %v4568_v43, %v4569_v29  ;;  %v4576_v36 = vrot.slane %v4575_v56, 1  ;;  %v4523_v30 = vrot.slane %v4522_v50, 4  ;;  %v18061_v43 = vld [vmem:[%s20195_s30 + $0x58] sm:$0xff]  }
 0x3df   : > { %v4529_v52 = vsel %vm4031_vm3, %v3664_v23, -inf  ;;  %v4584_v37 = vmax.f32 %v4582_v21, %v4583_v33  ;;  %v4590_v8 = vrot.slane %v4589_v51, 1  ;;  %v4517_v46 = vmax.f32 %v4515_v48, %v4516_v27  ;;  %v18065_v23 = vld [vmem:[#allocation2 + $0x5a] sm:$0xff]  ;;  %15484 = vmatprep.subr.bf16.mxu0 %v18061_v43 }
 0x3e0   : > { %v4511_v63 = vrot.slane %v4510_v10, 2  ;;  %v4577_v45 = vmax.f32 %v4575_v56, %v4576_v36  ;;  %v5146_v24 = vsel %vm5079_vm7, %v4570_v3, %v18028_v17  ;;  %v4524_v9 = vmax.f32 %v4522_v50, %v4523_v30  ;;  %5824 = vst [vmem:[#allocation2 + $0x61] sm:$0x1] %v20196_v4 }
 0x3e1   : > { %v4530_v13 = vrot.slane %v4529_v52, 4  ;;  %v4591_v5 = vmax.f32 %v4589_v51, %v4590_v8  ;;  %v4518_v39 = vrot.slane %v4517_v46, 2  ;;  %v5241_v18 = vpack.c.bf16 %v5226_v0, %v17878_v59 }
 0x3e2   : > { %v4512_v60 = vmax.f32 %v4510_v10, %v4511_v63  ;;  %v5147_v42 = vsel %vm5081_vm8, %v4577_v45, %v5146_v24  ;;  %v4525_v6 = vrot.slane %v4524_v9, 2  ;;  %v3317_v58 = vmax.f32 %v15378_v47, %v15426_v22 }
 0x3e3   : > { %v4531_v38 = vmax.f32 %v4529_v52, %v4530_v13  ;;  %v5148_v55 = vsel %vm5083_vm9, %v4584_v37, %v5147_v42  ;;  %v4519_v61 = vmax.f32 %v4517_v46, %v4518_v39  ;;  %15468 = vmatprep.mubr.msk.bf16.mxu1 %vm5208_vm11, %v5241_v18  ;;  %v3315_v17 = vmax.f32 %v3022_v7, %v3248_v2 }
 0x3e4   : > { %v4513_v25 = vrot.slane %v4512_v60, 1  ;;  %v5149_v12 = vsel %vm5085_vm10, %v4591_v5, %v5148_v55  ;;  %v4526_v31 = vmax.f32 %v4524_v9, %v4525_v6  ;;  %v3733_v32 = vcombine.high %v3317_v58, %v3317_v58 }
 0x3e5   : > { %v4532_v1 = vrot.slane %v4531_v38, 2  ;;  %5218 = vst.msk [vmem:[#allocation2 + $0xa9] sm:$0xff] %vm5208_vm11, %v5149_v12  ;;  %v4520_v35 = vrot.slane %v4519_v61, 1  ;;  %v3740_v54 = vrot.slane %v3317_v58, %v17799_v49  ;;  %v3699_v28 = vcombine.high %v3315_v17, %v3315_v17 }
 0x3e6   : > { %v4514_v59 = vmax.f32 %v4512_v60, %v4513_v25  ;;  %v4527_v57 = vrot.slane %v4526_v31, 1  ;;  %v3747_v53 = vrot.slane %v3733_v32, %v17799_v49  ;;  %v3706_v14 = vrot.slane %v3315_v17, %v17799_v49  ;;  %v18080_v60 = vld [vmem:[#allocation2 + $0x82] sm:$0xff]  ;;  %v15427_v32 = vpop.f32.mrf.mxu1 }
 0x3e7   : > { %v4533_v19 = vmax.f32 %v4531_v38, %v4532_v1  ;;  %v4521_v41 = vmax.f32 %v4519_v61, %v4520_v35  ;;  %v3748_v21 = vcombine.high %v3740_v54, %v3740_v54  ;;  %v4648_v26 = vsel %vm4031_vm3, %v3740_v54, -inf  ;;  %5825 = vst [vmem:[#allocation2 + $0x89] sm:$0x1] %v20196_v4  ;;  %v15379_v1 = vpop.f32.mrf.mxu0 }
 0x3e8   : > { %v5139_v62 = vsel %vm5079_vm7, %v4514_v59, %v5138_v40  ;;  %v4528_v44 = vmax.f32 %v4526_v31, %v4527_v57  ;;  %v3749_v56 = vcombine.high %v3747_v53, %v3747_v53  ;;  %v4649_v48 = vrot.slane %v4648_v26, 4 }
 0x3e9   : > { %v4534_v29 = vrot.slane %v4533_v19, 1  ;;  %v5140_v50 = vsel %vm5081_vm8, %v4521_v41, %v5139_v62  ;;  %v4655_v47 = vsel %vm4031_vm3, %v3748_v21, -inf  ;;  %v4662_v22 = vsel %vm4031_vm3, %v3747_v53, -inf }
 0x3ea   : > { %v3713_v40 = vrot.slane %v3699_v28, %v17799_v49  ;;  %v5141_v51 = vsel %vm5083_vm9, %v4528_v44, %v5140_v50  ;;  %v4650_v10 = vmax.f32 %v4648_v26, %v4649_v48  ;;  %v4656_v27 = vrot.slane %v4655_v47, 4 }
 0x3eb   : > { %v4535_v33 = vmax.f32 %v4533_v19, %v4534_v29  ;;  %v4663_v3 = vrot.slane %v4662_v22, 4  ;;  %v4669_v36 = vsel %vm4031_vm3, %v3749_v56, -inf  ;;  %v3714_v30 = vcombine.high %v3706_v14, %v3706_v14 }
 0x3ec   : > { %v3715_v52 = vcombine.high %v3713_v40, %v3713_v40  ;;  %v4651_v37 = vrot.slane %v4650_v10, 2  ;;  %v4657_v8 = vmax.f32 %v4655_v47, %v4656_v27  ;;  %v4670_v63 = vrot.slane %v4669_v36, 4  ;;  %v18088_v27 = vld [vmem:[#allocation2 + $0xaa] sm:$0xff] }
 0x3ed   : > { %v5142_v0 = vsel %vm5085_vm10, %v4535_v33, %v5141_v51  ;;  %v4664_v46 = vmax.f32 %v4662_v22, %v4663_v3  ;;  %v4592_v45 = vsel %vm4031_vm3, %v3706_v14, -inf  ;;  %v4599_v24 = vsel %vm4031_vm3, %v3714_v30, -inf  ;;  %v3025_v51 = vpop.f32.mrf.mxu0  ;;  %5826 = vst [vmem:[#allocation2 + $0xb1] sm:$0x1] %v20196_v4 }
 0x3ee   : > { %5217 = vst.msk [vmem:[#allocation2 + $0xa1] sm:$0xff] %vm5208_vm11, %v5142_v0  ;;  %v4606_v9 = vsel %vm4031_vm3, %v3713_v40, -inf  ;;  %v4652_v13 = vmax.f32 %v4650_v10, %v4651_v37  ;;  %v4658_v7 = vrot.slane %v4657_v8, 2  ;;  %v4671_v2 = vmax.f32 %v4669_v36, %v4670_v63  ;;  %v3251_v10 = vpop.f32.mrf.mxu1 }
 0x3ef   : > { %v4593_v5 = vrot.slane %v4592_v45, 4  ;;  %v4665_v39 = vrot.slane %v4664_v46, 2  ;;  %v4600_v18 = vrot.slane %v4599_v24, 4  ;;  %v4607_v42 = vrot.slane %v4606_v9, 4 }
 0x3f0   : > { %v4613_v6 = vsel %vm4031_vm3, %v3715_v52, -inf  ;;  %v4653_v38 = vrot.slane %v4652_v13, 1  ;;  %v4659_v58 = vmax.f32 %v4657_v8, %v4658_v7  ;;  %v4672_v55 = vrot.slane %v4671_v2, 2 }
 0x3f1   : > { %v4594_v25 = vmax.f32 %v4592_v45, %v4593_v5  ;;  %v4666_v61 = vmax.f32 %v4664_v46, %v4665_v39  ;;  %v4601_v17 = vmax.f32 %v4599_v24, %v4600_v18  ;;  %v4608_v12 = vmax.f32 %v4606_v9, %v4607_v42 }
 0x3f2   : > { %v4614_v31 = vrot.slane %v4613_v6, 4  ;;  %v4654_v59 = vmax.f32 %v4652_v13, %v4653_v38  ;;  %v4660_v35 = vrot.slane %v4659_v58, 1  ;;  %v4673_v54 = vmax.f32 %v4671_v2, %v4672_v55  ;;  %v5259_v38 = vld [vmem:[#allocation2 + $0x29] sm:$0xff] }
 0x3f3   : > { %v4595_v28 = vrot.slane %v4594_v25, 2  ;;  %v4667_v57 = vrot.slane %v4666_v61, 1  ;;  %v4602_v19 = vrot.slane %v4601_v17, 2  ;;  %v4609_v53 = vrot.slane %v4608_v12, 2 }
 0x3f4   : > { %v4615_v14 = vmax.f32 %v4613_v6, %v4614_v31  ;;  %v4661_v41 = vmax.f32 %v4659_v58, %v4660_v35  ;;  %v4674_v62 = vrot.slane %v4673_v54, 1  ;;  %v3318_v26 = vmax.f32 %v15379_v1, %v15427_v32  ;;  %v5260_v32 = vld [vmem:[#allocation2 + $0x31] sm:$0xff] }
 0x3f5   : > { %v4596_v21 = vmax.f32 %v4594_v25, %v4595_v28  ;;  %v18084_v44 = vld [vmem:[#allocation2 + $0xa0] sm:$0xff]  ;;  %v4668_v29 = vmax.f32 %v4666_v61, %v4667_v57  ;;  %v4603_v56 = vmax.f32 %v4601_v17, %v4602_v19  ;;  %v4610_v48 = vmax.f32 %v4608_v12, %v4609_v53  ;;  %v15382_v57 = vpop.f32.mrf.mxu0  ;;  %v15430_v19 = vpop.f32.mrf.mxu1  ;;  %v16394_v53 = vld [vmem:[%s20195_s30 + $0x50] sm:$0xff]  }
 0x3f6   : > { %v4616_v50 = vrot.slane %v4615_v14, 2  ;;  %5818 = vst [vmem:[#allocation2 + $0xa0] sm:$0x1] %v20196_v4  ;;  %v4675_v47 = vmax.f32 %v4673_v54, %v4674_v62  ;;  %v5157_v22 = vsel %vm5073_vm4, %v4661_v41, %v4654_v59  ;;  %v3750_v33 = vcombine.high %v3318_v26, %v3318_v26 }
 0x3f7   : > { %v4597_v40 = vrot.slane %v4596_v21, 1  ;;  %v5158_v3 = vsel %vm5075_vm5, %v4668_v29, %v5157_v22  ;;  %v4604_v36 = vrot.slane %v4603_v56, 1  ;;  %v4611_v30 = vrot.slane %v4610_v48, 1 }
 0x3f8   : > { %v4617_v52 = vmax.f32 %v4615_v14, %v4616_v50  ;;  %v3757_v37 = vrot.slane %v3318_v26, %v17799_v49  ;;  %v3764_v8 = vrot.slane %v3750_v33, %v17799_v49  ;;  %v18095_v63 = vsel %vm5077_vm6, %v4675_v47, %v5158_v3 }
 0x3f9   : > { %v4598_v0 = vmax.f32 %v4596_v21, %v4597_v40  ;;  %v4605_v46 = vmax.f32 %v4603_v56, %v4604_v36  ;;  %v4612_v45 = vmax.f32 %v4610_v48, %v4611_v30  ;;  %v3316_v9 = vmax.f32 %v3025_v51, %v3251_v10  ;;  %v3038_v36 = vpop.f32.mrf.mxu0  ;;  %v3264_v30 = vpop.f32.mrf.mxu1 }
 0x3fa   : > { %v4618_v24 = vrot.slane %v4617_v52, 1  ;;  %v3765_v13 = vcombine.high %v3757_v37, %v3757_v37  ;;  %v3766_v7 = vcombine.high %v3764_v8, %v3764_v8  ;;  %v4676_v2 = vsel %vm4031_vm3, %v3757_v37, -inf }
 0x3fb   : > { %v4690_v5 = vsel %vm4031_vm3, %v3764_v8, -inf  ;;  %v5150_v18 = vsel %vm5073_vm4, %v4605_v46, %v4598_v0  ;;  %v4677_v42 = vrot.slane %v4676_v2, 4  ;;  %v3716_v61 = vcombine.high %v3316_v9, %v3316_v9 }
 0x3fc   : > { %v4619_v39 = vmax.f32 %v4617_v52, %v4618_v24  ;;  %v4691_v6 = vrot.slane %v4690_v5, 4  ;;  %v5151_v58 = vsel %vm5075_vm5, %v4612_v45, %v5150_v18  ;;  %v4683_v55 = vsel %vm4031_vm3, %v3765_v13, -inf  ;;  %v16395_v52 = vld [vmem:[%s20195_s30 + $0x48] sm:$0xff]   ;;  %v5228_v13 = vld [vmem:[#allocation2 + $0x30] sm:$0xff] }
 0x3fd   : > { %v4697_v25 = vsel %vm4031_vm3, %v3766_v7, -inf  ;;  %v4678_v17 = vmax.f32 %v4676_v2, %v4677_v42  ;;  %v4684_v12 = vrot.slane %v4683_v55, 4  ;;  %v3723_v59 = vrot.slane %v3316_v9, %v17799_v49 }
 0x3fe   : > { %v4692_v31 = vmax.f32 %v4690_v5, %v4691_v6  ;;  %v4698_v1 = vrot.slane %v4697_v25, 4  ;;  %v3730_v35 = vrot.slane %v3716_v61, %v17799_v49  ;;  %v18106_v54 = vsel %vm5077_vm6, %v4619_v39, %v5151_v58  ;;  %v15383_v58 = vpop.f32.mrf.mxu0 }
 0x3ff   : > { %v5274_v28 = vpack.c.bf16 %v5260_v32, %v5259_v38  ;;  %v4679_v14 = vrot.slane %v4678_v17, 2  ;;  %v4685_v41 = vmax.f32 %v4683_v55, %v4684_v12  ;;  %v3731_v26 = vcombine.high %v3723_v59, %v3723_v59  ;;  %v15431_v55 = vpop.f32.mrf.mxu1 }
 0x400   : > { %v4693_v62 = vrot.slane %v4692_v31, 2  ;;  %v4699_v21 = vmax.f32 %v4697_v25, %v4698_v1  ;;  %v3732_v29 = vcombine.high %v3730_v35, %v3730_v35  ;;  %v4620_v56 = vsel %vm4031_vm3, %v3723_v59, -inf }
 0x401   : > { %v4634_v48 = vsel %vm4031_vm3, %v3730_v35, -inf  ;;  %15445 = vmatmul.mubr.msk.bf16.vlgmr.msra.gmra.mxu0 %vm5208_vm11, %v5274_v28  ;;  %v4680_v50 = vmax.f32 %v4678_v17, %v4679_v14  ;;  %v4686_v47 = vrot.slane %v4685_v41, 2  ;;  %v4621_v33 = vrot.slane %v4620_v56, 4 }
 0x402   : > { %v4694_v22 = vmax.f32 %v4692_v31, %v4693_v62  ;;  %v4700_v40 = vrot.slane %v4699_v21, 2  ;;  %15485 = vmatpush3.bf16.msra.mxu0 %v18061_v43  ;;  %v4627_v51 = vsel %vm4031_vm3, %v3731_v26, -inf  ;;  %v4635_v10 = vrot.slane %v4634_v48, 4  ;;  %v16396_v31 = vld [vmem:[%s20195_s30 + $0x40] sm:$0xff]  }
 0x403   : > { %v4641_v3 = vsel %vm4031_vm3, %v3732_v29, -inf  ;;  %15486 = vmatprep.subr.bf16.mxu0 %v16394_v53  ;;  %v4681_v0 = vrot.slane %v4680_v50, 1  ;;  %v4687_v37 = vmax.f32 %v4685_v41, %v4686_v47  ;;  %v4622_v45 = vmax.f32 %v4620_v56, %v4621_v33 }
 0x404   : > { %v4695_v8 = vrot.slane %v4694_v22, 1  ;;  %v4701_v46 = vmax.f32 %v4699_v21, %v4700_v40  ;;  %v4628_v24 = vrot.slane %v4627_v51, 4  ;;  %v4636_v43 = vmax.f32 %v4634_v48, %v4635_v10 }
 0x405   : > { %v4642_v9 = vrot.slane %v4641_v3, 4  ;;  %v4682_v7 = vmax.f32 %v4680_v50, %v4681_v0  ;;  %v4688_v2 = vrot.slane %v4687_v37, 1  ;;  %v4623_v18 = vrot.slane %v4622_v45, 2 }
 0x406   : > { %v4696_v5 = vmax.f32 %v4694_v22, %v4695_v8  ;;  %v4702_v39 = vrot.slane %v4701_v46, 1  ;;  %15487 = vmatpush3.bf16.msra.mxu0 %v16394_v53  ;;  %v4629_v42 = vmax.f32 %v4627_v51, %v4628_v24  ;;  %v4637_v6 = vrot.slane %v4636_v43, 2 }
 0x407   : > { %v4643_v38 = vmax.f32 %v4641_v3, %v4642_v9  ;;  %15488 = vmatprep.subr.bf16.mxu0 %v16395_v52  ;;  %v4689_v25 = vmax.f32 %v4687_v37, %v4688_v2  ;;  %v5160_v17 = vsel %vm5079_vm7, %v4682_v7, %v18095_v63  ;;  %v5242_v12 = vpack.c.bf16 %v5228_v13, %v17932_v15 }
 0x408   : > { %v4703_v61 = vmax.f32 %v4701_v46, %v4702_v39  ;;  %v4624_v1 = vmax.f32 %v4622_v45, %v4623_v18  ;;  %v4630_v32 = vrot.slane %v4629_v42, 2  ;;  %v4638_v59 = vmax.f32 %v4636_v43, %v4637_v6 }
 0x409   : > { %v4644_v35 = vrot.slane %v4643_v38, 2  ;;  %v5161_v28 = vsel %vm5081_vm8, %v4689_v25, %v5160_v17  ;;  %15469 = vmatmul.mubr.msk.bf16.vlgmr.msra.gmra.mxu1 %vm5208_vm11, %v5242_v12  ;;  %v3321_v53 = vmax.f32 %v15382_v57, %v15430_v19  ;;  %v3319_v14 = vmax.f32 %v3038_v36, %v3264_v30 }
 0x40a   : > { %v18128_v41 = vmax.f32 %v15383_v58, %v15431_v55  ;;  %v5162_v63 = vsel %vm5083_vm9, %v4696_v5, %v5161_v28  ;;  %v4625_v62 = vrot.slane %v4624_v1, 1  ;;  %v4631_v15 = vmax.f32 %v4629_v42, %v4630_v32  ;;  %15489 = vmatpush3.bf16.msra.mxu0 %v16395_v52 }
 0x40b   : > { %v4639_v21 = vrot.slane %v4638_v59, 1  ;;  %v5163_v26 = vsel %vm5085_vm10, %v4703_v61, %v5162_v63  ;;  %v4645_v29 = vmax.f32 %v4643_v38, %v4644_v35  ;;  %v3801_v56 = vcombine.high %v3321_v53, %v3321_v53  ;;  %15490 = vmatprep.subr.bf16.mxu0 %v16396_v31 }
 0x40c   : > { %v3808_v48 = vrot.slane %v3321_v53, %v17799_v49  ;;  %5220 = vst.msk [vmem:[#allocation2 + $0xd1] sm:$0xff] %vm5208_vm11, %v5163_v26  ;;  %v4626_v50 = vmax.f32 %v4624_v1, %v4625_v62  ;;  %v4632_v57 = vrot.slane %v4631_v15, 1  ;;  %v3767_v47 = vcombine.high %v3319_v14, %v3319_v14 }
 0x40d   : > { %v4640_v19 = vmax.f32 %v4638_v59, %v4639_v21  ;;  %v4646_v22 = vrot.slane %v4645_v29, 1  ;;  %v3815_v40 = vrot.slane %v3801_v56, %v17799_v49  ;;  %v3774_v30 = vrot.slane %v3319_v14, %v17799_v49 }
 0x40e   : > { %v3816_v33 = vcombine.high %v3808_v48, %v3808_v48  ;;  %v4760_v51 = vsel %vm4031_vm3, %v3808_v48, -inf  ;;  %v4633_v10 = vmax.f32 %v4631_v15, %v4632_v57  ;;  %v5153_v3 = vsel %vm5079_vm7, %v4626_v50, %v18106_v54  ;;  %15491 = vmatpush3.bf16.msra.mxu0 %v16396_v31 }
 0x40f   : > { %v4761_v36 = vrot.slane %v4760_v51, 4  ;;  %v4647_v52 = vmax.f32 %v4645_v29, %v4646_v22  ;;  %v3817_v0 = vcombine.high %v3815_v40, %v3815_v40  ;;  %v4774_v8 = vsel %vm4031_vm3, %v3815_v40, -inf }
 0x410   : > { %v4767_v37 = vsel %vm4031_vm3, %v3816_v33, -inf  ;;  %v5154_v46 = vsel %vm5081_vm8, %v4633_v10, %v5153_v3  ;;  %v4775_v43 = vrot.slane %v4774_v8, 4  ;;  %v3781_v54 = vrot.slane %v3767_v47, %v17799_v49 }
 0x411   : > { %v4762_v45 = vmax.f32 %v4760_v51, %v4761_v36  ;;  %v4768_v24 = vrot.slane %v4767_v37, 4  ;;  %v5155_v9 = vsel %vm5083_vm9, %v4640_v19, %v5154_v46  ;;  %v4781_v13 = vsel %vm4031_vm3, %v3817_v0, -inf }
 0x412   : > { %v3782_v7 = vcombine.high %v3774_v30, %v3774_v30  ;;  %v5156_v2 = vsel %vm5085_vm10, %v4647_v52, %v5155_v9  ;;  %v4776_v18 = vmax.f32 %v4774_v8, %v4775_v43  ;;  %v4782_v42 = vrot.slane %v4781_v13, 4 }
 0x413   : > { %v4763_v5 = vrot.slane %v4762_v45, 2  ;;  %v4769_v39 = vmax.f32 %v4767_v37, %v4768_v24  ;;  %5219 = vst.msk [vmem:[#allocation2 + $0xc9] sm:$0xff] %vm5208_vm11, %v5156_v2  ;;  %v3783_v6 = vcombine.high %v3781_v54, %v3781_v54  ;;  %v4704_v38 = vsel %vm4031_vm3, %v3774_v30, -inf  ;;  %v18149_v55 = vld [vmem:[#allocation2 + $0xd2] sm:$0xff] }
 0x414   : > { %v4711_v58 = vsel %vm4031_vm3, %v3782_v7, -inf  ;;  %v4777_v17 = vrot.slane %v4776_v18, 2  ;;  %v4705_v12 = vrot.slane %v4704_v38, 4  ;;  %5827 = vst [vmem:[#allocation2 + $0xd9] sm:$0x1] %v20196_v4  ;;  %v4783_v31 = vmax.f32 %v4781_v13, %v4782_v42 }
 0x415   : > { %v4764_v25 = vmax.f32 %v4762_v45, %v4763_v5  ;;  %v4770_v61 = vrot.slane %v4769_v39, 2  ;;  %v4712_v1 = vrot.slane %v4711_v58, 4  ;;  %v4718_v32 = vsel %vm4031_vm3, %v3781_v54, -inf }
 0x416   : > { %v4725_v59 = vsel %vm4031_vm3, %v3783_v6, -inf  ;;  %v4778_v53 = vmax.f32 %v4776_v18, %v4777_v17  ;;  %v4706_v14 = vmax.f32 %v4704_v38, %v4705_v12  ;;  %v4784_v63 = vrot.slane %v4783_v31, 2 }
 0x417   : > { %v4765_v35 = vrot.slane %v4764_v25, 1  ;;  %v4771_v28 = vmax.f32 %v4769_v39, %v4770_v61  ;;  %v4713_v62 = vmax.f32 %v4711_v58, %v4712_v1  ;;  %v4719_v15 = vrot.slane %v4718_v32, 4  ;;  %v3267_v61 = vpop.f32.mrf.mxu1 }
 0x418   : > { %v4726_v21 = vrot.slane %v4725_v59, 4  ;;  %v4779_v56 = vrot.slane %v4778_v53, 1  ;;  %v4707_v48 = vrot.slane %v4706_v14, 2  ;;  %v4785_v50 = vmax.f32 %v4783_v31, %v4784_v63 }
 0x419   : > { %v4766_v26 = vmax.f32 %v4764_v25, %v4765_v35  ;;  %v4772_v29 = vrot.slane %v4771_v28, 1  ;;  %v4714_v57 = vrot.slane %v4713_v62, 2  ;;  %v4720_v19 = vmax.f32 %v4718_v32, %v4719_v15  ;;  %v3041_v25 = vpop.f32.mrf.mxu0 }
 0x41a   : > { %v4727_v47 = vmax.f32 %v4725_v59, %v4726_v21  ;;  %v18154_v22 = vld [vmem:[#allocation2 + $0xc8] sm:$0xff]  ;;  %v4780_v33 = vmax.f32 %v4778_v53, %v4779_v56  ;;  %v4708_v51 = vmax.f32 %v4706_v14, %v4707_v48  ;;  %v3818_v10 = vcombine.high %v18128_v41, %v18128_v41  ;;  %v5261_v53 = vld [vmem:[#allocation2 + $0x51] sm:$0xff] }
 0x41b   : > { %v4773_v40 = vmax.f32 %v4771_v28, %v4772_v29  ;;  %5819 = vst [vmem:[#allocation2 + $0xc8] sm:$0x1] %v20196_v4  ;;  %v4786_v3 = vrot.slane %v4785_v50, 1  ;;  %v4715_v36 = vmax.f32 %v4713_v62, %v4714_v57  ;;  %v4721_v30 = vrot.slane %v4720_v19, 2  ;;  %v5230_v21 = vld [vmem:[#allocation2 + $0x58] sm:$0xff] }
 0x41c   : > { %v4728_v52 = vrot.slane %v4727_v47, 2  ;;  %v4709_v37 = vrot.slane %v4708_v51, 1  ;;  %v3825_v8 = vrot.slane %v18128_v41, %v17799_v49  ;;  %v3832_v46 = vrot.slane %v3818_v10, %v17799_v49 }
 0x41d   : > { %v5171_v0 = vsel %vm5073_vm4, %v4773_v40, %v4766_v26  ;;  %v4787_v45 = vmax.f32 %v4785_v50, %v4786_v3  ;;  %v4716_v43 = vrot.slane %v4715_v36, 1  ;;  %v4722_v9 = vmax.f32 %v4720_v19, %v4721_v30  ;;  %v5262_v50 = vld [vmem:[#allocation2 + $0x59] sm:$0xff] }
 0x41e   : > { %v5172_v24 = vsel %vm5075_vm5, %v4780_v33, %v5171_v0  ;;  %v4710_v13 = vmax.f32 %v4708_v51, %v4709_v37  ;;  %v4729_v54 = vmax.f32 %v4727_v47, %v4728_v52  ;;  %v3833_v7 = vcombine.high %v3825_v8, %v3825_v8  ;;  %v15386_v37 = vpop.f32.mrf.mxu0 }
 0x41f   : > { %v3834_v2 = vcombine.high %v3832_v46, %v3832_v46  ;;  %v4717_v5 = vmax.f32 %v4715_v36, %v4716_v43  ;;  %v4723_v39 = vrot.slane %v4722_v9, 1  ;;  %v4788_v18 = vsel %vm4031_vm3, %v3825_v8, -inf  ;;  %v15434_v8 = vpop.f32.mrf.mxu1 }
 0x420   : > { %v4802_v42 = vsel %vm4031_vm3, %v3832_v46, -inf  ;;  %v4730_v6 = vrot.slane %v4729_v54, 1  ;;  %v4789_v38 = vrot.slane %v4788_v18, 4  ;;  %v4795_v41 = vsel %vm4031_vm3, %v3833_v7, -inf }
 0x421   : > { %v4803_v58 = vrot.slane %v4802_v42, 4  ;;  %v4724_v17 = vmax.f32 %v4722_v9, %v4723_v39  ;;  %v5164_v12 = vsel %vm5073_vm4, %v4717_v5, %v4710_v13  ;;  %v4796_v31 = vrot.slane %v4795_v41, 4 }
 0x422   : > { %v4809_v1 = vsel %vm4031_vm3, %v3834_v2, -inf  ;;  %v4731_v32 = vmax.f32 %v4729_v54, %v4730_v6  ;;  %v4790_v59 = vmax.f32 %v4788_v18, %v4789_v38  ;;  %v5173_v62 = vsel %vm5077_vm6, %v4787_v45, %v5172_v24 }
 0x423   : > { %v4804_v35 = vmax.f32 %v4802_v42, %v4803_v58  ;;  %v4810_v28 = vrot.slane %v4809_v1, 4  ;;  %v5165_v14 = vsel %vm5075_vm5, %v4724_v17, %v5164_v12  ;;  %v4797_v63 = vmax.f32 %v4795_v41, %v4796_v31  ;;  %v3054_v41 = vpop.f32.mrf.mxu0  ;;  %v3280_v58 = vpop.f32.mrf.mxu1 }
 0x424   : > { %v3320_v15 = vmax.f32 %v3041_v25, %v3267_v61  ;;  %v4791_v26 = vrot.slane %v4790_v59, 2  ;;  %v18172_v48 = vsel %vm5077_vm6, %v4731_v32, %v5165_v14  ;;  %v5275_v40 = vpack.c.bf16 %v5262_v50, %v5261_v53 }
 0x425   : > { %v4805_v29 = vrot.slane %v4804_v35, 2  ;;  %v4811_v56 = vmax.f32 %v4809_v1, %v4810_v28  ;;  %v4798_v57 = vrot.slane %v4797_v63, 2  ;;  %v5243_v3 = vpack.c.bf16 %v5230_v21, %v17980_v11 }
 0x426   : > { %v3784_v19 = vcombine.high %v3320_v15, %v3320_v15  ;;  %v3791_v47 = vrot.slane %v3320_v15, %v17799_v49  ;;  %v4792_v33 = vmax.f32 %v4790_v59, %v4791_v26  ;;  %15448 = vmatprep.mubr.msk.bf16.mxu0 %vm5208_vm11, %v5275_v40  ;;  %v3325_v59 = vmax.f32 %v15386_v37, %v15434_v8 }
 0x427   : > { %v4806_v51 = vmax.f32 %v4804_v35, %v4805_v29  ;;  %v4812_v10 = vrot.slane %v4811_v56, 2  ;;  %v4799_v36 = vmax.f32 %v4797_v63, %v4798_v57  ;;  %15472 = vmatprep.mubr.msk.bf16.mxu1 %vm5208_vm11, %v5243_v3  ;;  %v3323_v14 = vmax.f32 %v3054_v41, %v3280_v58 }
 0x428   : > { %v3798_v30 = vrot.slane %v3784_v19, %v17799_v49  ;;  %v3799_v52 = vcombine.high %v3791_v47, %v3791_v47  ;;  %v4732_v0 = vsel %vm4031_vm3, %v3791_v47, -inf  ;;  %v4793_v46 = vrot.slane %v4792_v33, 1 }
 0x429   : > { %v4807_v45 = vrot.slane %v4806_v51, 1  ;;  %v4813_v24 = vmax.f32 %v4811_v56, %v4812_v10  ;;  %v4733_v43 = vrot.slane %v4732_v0, 4  ;;  %v4800_v9 = vrot.slane %v4799_v36, 1 }
 0x42a   : > { %v3800_v13 = vcombine.high %v3798_v30, %v3798_v30  ;;  %v4739_v11 = vsel %vm4031_vm3, %v3799_v52, -inf  ;;  %v4746_v54 = vsel %vm4031_vm3, %v3798_v30, -inf  ;;  %v4794_v7 = vmax.f32 %v4792_v33, %v4793_v46 }
 0x42b   : > { %v4808_v2 = vmax.f32 %v4806_v51, %v4807_v45  ;;  %v4814_v5 = vrot.slane %v4813_v24, 1  ;;  %v4734_v39 = vmax.f32 %v4732_v0, %v4733_v43  ;;  %v4801_v18 = vmax.f32 %v4799_v36, %v4800_v9 }
 0x42c   : > { %v4740_v42 = vrot.slane %v4739_v11, 4  ;;  %v4747_v6 = vrot.slane %v4746_v54, 4  ;;  %v4753_v38 = vsel %vm4031_vm3, %v3800_v13, -inf  ;;  %v5174_v61 = vsel %vm5079_vm7, %v4794_v7, %v5173_v62 }
 0x42d   : > { %v4815_v25 = vmax.f32 %v4813_v24, %v4814_v5  ;;  %v4735_v17 = vrot.slane %v4734_v39, 2  ;;  %v4754_v12 = vrot.slane %v4753_v38, 4  ;;  %v5175_v31 = vsel %vm5081_vm8, %v4801_v18, %v5174_v61 }
 0x42e   : > { %v4741_v1 = vmax.f32 %v4739_v11, %v4740_v42  ;;  %v4748_v32 = vmax.f32 %v4746_v54, %v4747_v6  ;;  %v5176_v35 = vsel %vm5083_vm9, %v4808_v2, %v5175_v31  ;;  %v3869_v26 = vcombine.high %v3325_v59, %v3325_v59 }
 0x42f   : > { %v4736_v28 = vmax.f32 %v4734_v39, %v4735_v17  ;;  %v4755_v53 = vmax.f32 %v4753_v38, %v4754_v12  ;;  %v5177_v63 = vsel %vm5085_vm10, %v4815_v25, %v5176_v35  ;;  %v3876_v56 = vrot.slane %v3325_v59, %v17799_v49 }
 0x430   : > { %v4742_v15 = vrot.slane %v4741_v1, 2  ;;  %v4749_v21 = vrot.slane %v4748_v32, 2  ;;  %5222 = vst.msk [vmem:[#allocation2 + $0xf9] sm:$0xff] %vm5208_vm11, %v5177_v63  ;;  %v3835_v50 = vcombine.high %v3323_v14, %v3323_v14  ;;  %v3883_v47 = vrot.slane %v3869_v26, %v17799_v49 }
 0x431   : > { %v4737_v62 = vrot.slane %v4736_v28, 1  ;;  %v4756_v29 = vrot.slane %v4755_v53, 2  ;;  %v3842_v40 = vrot.slane %v3323_v14, %v17799_v49  ;;  %v3884_v10 = vcombine.high %v3876_v56, %v3876_v56 }
 0x432   : > { %v4743_v57 = vmax.f32 %v4741_v1, %v4742_v15  ;;  %v4750_v19 = vmax.f32 %v4748_v32, %v4749_v21  ;;  %v4872_v3 = vsel %vm4031_vm3, %v3876_v56, -inf  ;;  %v3885_v52 = vcombine.high %v3883_v47, %v3883_v47 }
 0x433   : > { %v4738_v33 = vmax.f32 %v4736_v28, %v4737_v62  ;;  %v4757_v51 = vmax.f32 %v4755_v53, %v4756_v29  ;;  %v4873_v0 = vrot.slane %v4872_v3, 4  ;;  %v4879_v46 = vsel %vm4031_vm3, %v3884_v10, -inf  ;;  %v15387_v62 = vpop.f32.mrf.mxu0  ;;  %v15435_v29 = vpop.f32.mrf.mxu1 }
 0x434   : > { %v4744_v36 = vrot.slane %v4743_v57, 1  ;;  %v4751_v30 = vrot.slane %v4750_v19, 1  ;;  %v4886_v45 = vsel %vm4031_vm3, %v3883_v47, -inf  ;;  %v4880_v13 = vrot.slane %v4879_v46, 4 }
 0x435   : > { %v4758_v37 = vrot.slane %v4757_v51, 1  ;;  %v5167_v8 = vsel %vm5079_vm7, %v4738_v33, %v18172_v48  ;;  %v4874_v9 = vmax.f32 %v4872_v3, %v4873_v0  ;;  %v4887_v54 = vrot.slane %v4886_v45, 4 }
 0x436   : > { %v4745_v24 = vmax.f32 %v4743_v57, %v4744_v36  ;;  %v4752_v43 = vmax.f32 %v4750_v19, %v4751_v30  ;;  %v4893_v7 = vsel %vm4031_vm3, %v3885_v52, -inf  ;;  %v3849_v2 = vrot.slane %v3835_v50, %v17799_v49 }
 0x437   : > { %v4759_v11 = vmax.f32 %v4757_v51, %v4758_v37  ;;  %v4875_v39 = vrot.slane %v4874_v9, 2  ;;  %v4881_v18 = vmax.f32 %v4879_v46, %v4880_v13  ;;  %v4894_v42 = vrot.slane %v4893_v7, 4  ;;  %v18199_v48 = vld [vmem:[#allocation2 + $0xfa] sm:$0xff]  ;;  %v3283_v13 = vpop.f32.mrf.mxu1 }
 0x438   : > { %v5168_v5 = vsel %vm5081_vm8, %v4745_v24, %v5167_v8  ;;  %v4888_v38 = vmax.f32 %v4886_v45, %v4887_v54  ;;  %v3850_v41 = vcombine.high %v3842_v40, %v3842_v40  ;;  %v3851_v58 = vcombine.high %v3849_v2, %v3849_v2  ;;  %5828 = vst [vmem:[#allocation2 + $0x101] sm:$0x1] %v20196_v4 }
 0x439   : > { %v5169_v6 = vsel %vm5083_vm9, %v4752_v43, %v5168_v5  ;;  %v4876_v61 = vmax.f32 %v4874_v9, %v4875_v39  ;;  %v4882_v17 = vrot.slane %v4881_v18, 2  ;;  %v4895_v12 = vmax.f32 %v4893_v7, %v4894_v42  ;;  %v3057_v9 = vpop.f32.mrf.mxu0 }
 0x43a   : > { %v5170_v25 = vsel %vm5085_vm10, %v4759_v11, %v5169_v6  ;;  %v4889_v31 = vrot.slane %v4888_v38, 2  ;;  %v4816_v1 = vsel %vm4031_vm3, %v3842_v40, -inf  ;;  %v4823_v32 = vsel %vm4031_vm3, %v3850_v41, -inf }
 0x43b   : > { %5221 = vst.msk [vmem:[#allocation2 + $0xf1] sm:$0xff] %vm5208_vm11, %v5170_v25  ;;  %v4830_v59 = vsel %vm4031_vm3, %v3849_v2, -inf  ;;  %v4877_v35 = vrot.slane %v4876_v61, 1  ;;  %v4883_v28 = vmax.f32 %v4881_v18, %v4882_v17  ;;  %v4896_v53 = vrot.slane %v4895_v12, 2 }
 0x43c   : > { %v4817_v14 = vrot.slane %v4816_v1, 4  ;;  %v4890_v63 = vmax.f32 %v4888_v38, %v4889_v31  ;;  %v4824_v15 = vrot.slane %v4823_v32, 4  ;;  %v4831_v21 = vrot.slane %v4830_v59, 4 }
 0x43d   : > { %v4837_v26 = vsel %vm4031_vm3, %v3851_v58, -inf  ;;  %v4878_v56 = vmax.f32 %v4876_v61, %v4877_v35  ;;  %v4884_v50 = vrot.slane %v4883_v28, 1  ;;  %v4897_v57 = vmax.f32 %v4895_v12, %v4896_v53 }
 0x43e   : > { %v4818_v19 = vmax.f32 %v4816_v1, %v4817_v14  ;;  %v4891_v47 = vrot.slane %v4890_v63, 1  ;;  %v4825_v40 = vmax.f32 %v4823_v32, %v4824_v15  ;;  %v4832_v33 = vmax.f32 %v4830_v59, %v4831_v21 }
 0x43f   : > { %v4838_v51 = vrot.slane %v4837_v26, 4  ;;  %v4885_v10 = vmax.f32 %v4883_v28, %v4884_v50  ;;  %v4898_v3 = vrot.slane %v4897_v57, 1  ;;  %v3326_v30 = vmax.f32 %v15387_v62, %v15435_v29 }
 0x440   : > { %v4819_v36 = vrot.slane %v4818_v19, 2  ;;  %v4892_v52 = vmax.f32 %v4890_v63, %v4891_v47  ;;  %v4826_v0 = vrot.slane %v4825_v40, 2  ;;  %v4833_v37 = vrot.slane %v4832_v33, 2 }
 0x441   : > { %v4839_v8 = vmax.f32 %v4837_v26, %v4838_v51  ;;  %v4899_v46 = vmax.f32 %v4897_v57, %v4898_v3  ;;  %v5185_v45 = vsel %vm5073_vm4, %v4885_v10, %v4878_v56  ;;  %v3886_v43 = vcombine.high %v3326_v30, %v3326_v30 }
 0x442   : > { %v4820_v24 = vmax.f32 %v4818_v19, %v4819_v36  ;;  %v18210_v11 = vld [vmem:[#allocation2 + $0xf0] sm:$0xff]  ;;  %v5186_v54 = vsel %vm5075_vm5, %v4892_v52, %v5185_v45  ;;  %v4827_v7 = vmax.f32 %v4825_v40, %v4826_v0  ;;  %v4834_v2 = vmax.f32 %v4832_v33, %v4833_v37 }
 0x443   : > { %v4840_v5 = vrot.slane %v4839_v8, 2  ;;  %5820 = vst [vmem:[#allocation2 + $0xf0] sm:$0x1] %v20196_v4  ;;  %v3893_v18 = vrot.slane %v3326_v30, %v17799_v49  ;;  %v3900_v42 = vrot.slane %v3886_v43, %v17799_v49  ;;  %v5187_v6 = vsel %vm5077_vm6, %v4899_v46, %v5186_v54 }
 0x444   : > { %v4821_v39 = vrot.slane %v4820_v24, 1  ;;  %v4828_v38 = vrot.slane %v4827_v7, 1  ;;  %v4835_v41 = vrot.slane %v4834_v2, 1  ;;  %v3324_v25 = vmax.f32 %v3057_v9, %v3283_v13 }
 0x445   : > { %v4841_v58 = vmax.f32 %v4839_v8, %v4840_v5  ;;  %v3901_v17 = vcombine.high %v3893_v18, %v3893_v18  ;;  %v3902_v12 = vcombine.high %v3900_v42, %v3900_v42  ;;  %v4900_v31 = vsel %vm4031_vm3, %v3893_v18, -inf }
 0x446   : > { %v4822_v61 = vmax.f32 %v4820_v24, %v4821_v39  ;;  %v4829_v1 = vmax.f32 %v4827_v7, %v4828_v38  ;;  %v4836_v32 = vmax.f32 %v4834_v2, %v4835_v41  ;;  %v4901_v35 = vrot.slane %v4900_v31, 4 }
 0x447   : > { %v4842_v59 = vrot.slane %v4841_v58, 1  ;;  %v4907_v28 = vsel %vm4031_vm3, %v3901_v17, -inf  ;;  %v4914_v53 = vsel %vm4031_vm3, %v3900_v42, -inf  ;;  %v4921_v14 = vsel %vm4031_vm3, %v3902_v12, -inf  ;;  %v5263_v12 = vld [vmem:[#allocation2 + $0x79] sm:$0xff] }
 0x448   : > { %v3852_v63 = vcombine.high %v3324_v25, %v3324_v25  ;;  %v5178_v21 = vsel %vm5073_vm4, %v4829_v1, %v4822_v61  ;;  %v4902_v26 = vmax.f32 %v4900_v31, %v4901_v35  ;;  %v4908_v62 = vrot.slane %v4907_v28, 4  ;;  %v5232_v35 = vld [vmem:[#allocation2 + $0x80] sm:$0xff] }
 0x449   : > { %v4843_v15 = vmax.f32 %v4841_v58, %v4842_v59  ;;  %v5179_v29 = vsel %vm5075_vm5, %v4836_v32, %v5178_v21  ;;  %v4915_v56 = vrot.slane %v4914_v53, 4  ;;  %v4922_v50 = vrot.slane %v4921_v14, 4  ;;  %v5265_v21 = vld [vmem:[#allocation2 + $0xa1] sm:$0xff] }
 0x44a   : > { %v3859_v57 = vrot.slane %v3324_v25, %v17799_v49  ;;  %v4903_v19 = vrot.slane %v4902_v26, 2  ;;  %v4909_v47 = vmax.f32 %v4907_v28, %v4908_v62  ;;  %v3866_v40 = vrot.slane %v3852_v63, %v17799_v49 }
 0x44b   : > { %v18226_v33 = vsel %vm5077_vm6, %v4843_v15, %v5179_v29  ;;  %v4916_v51 = vmax.f32 %v4914_v53, %v4915_v56  ;;  %v4923_v10 = vmax.f32 %v4921_v14, %v4922_v50  ;;  %v5264_v15 = vld [vmem:[#allocation2 + $0x81] sm:$0xff] }
 0x44c   : > { %v3867_v3 = vcombine.high %v3859_v57, %v3859_v57  ;;  %v4844_v36 = vsel %vm4031_vm3, %v3859_v57, -inf  ;;  %v4904_v30 = vmax.f32 %v4902_v26, %v4903_v19  ;;  %v4910_v52 = vrot.slane %v4909_v47, 2  ;;  %v5234_v50 = vld [vmem:[#allocation2 + $0xa8] sm:$0xff] }
 0x44d   : > { %v3868_v0 = vcombine.high %v3866_v40, %v3866_v40  ;;  %v4845_v37 = vrot.slane %v4844_v36, 4  ;;  %v4917_v8 = vrot.slane %v4916_v51, 2  ;;  %v4924_v46 = vrot.slane %v4923_v10, 2 }
 0x44e   : > { %v4851_v45 = vsel %vm4031_vm3, %v3867_v3, -inf  ;;  %v4858_v24 = vsel %vm4031_vm3, %v3866_v40, -inf  ;;  %v4905_v43 = vrot.slane %v4904_v30, 1  ;;  %v4911_v9 = vmax.f32 %v4909_v47, %v4910_v52  ;;  %v5266_v40 = vld [vmem:[#allocation2 + $0xa9] sm:$0xff] }
 0x44f   : > { %v4846_v13 = vmax.f32 %v4844_v36, %v4845_v37  ;;  %v4852_v54 = vrot.slane %v4851_v45, 4  ;;  %v4918_v7 = vmax.f32 %v4916_v51, %v4917_v8  ;;  %v4925_v2 = vmax.f32 %v4923_v10, %v4924_v46  ;;  %v5267_v37 = vld [vmem:[#allocation2 + $0xc9] sm:$0xff] }
 0x450   : > { %v4859_v5 = vrot.slane %v4858_v24, 4  ;;  %v4865_v39 = vsel %vm4031_vm3, %v3868_v0, -inf  ;;  %v4906_v18 = vmax.f32 %v4904_v30, %v4905_v43  ;;  %v4912_v42 = vrot.slane %v4911_v9, 1  ;;  %v5236_v46 = vld [vmem:[#allocation2 + $0xd0] sm:$0xff] }
 0x451   : > { %v4847_v38 = vrot.slane %v4846_v13, 2  ;;  %v4853_v41 = vmax.f32 %v4851_v45, %v4852_v54  ;;  %v4919_v58 = vrot.slane %v4918_v7, 1  ;;  %v4926_v25 = vrot.slane %v4925_v2, 1  ;;  %v5269_v45 = vld [vmem:[#allocation2 + $0xf1] sm:$0xff] }
 0x452   : > { %v4860_v61 = vmax.f32 %v4858_v24, %v4859_v5  ;;  %v4866_v17 = vrot.slane %v4865_v39, 4  ;;  %v4913_v31 = vmax.f32 %v4911_v9, %v4912_v42  ;;  %v5188_v1 = vsel %vm5079_vm7, %v4906_v18, %v5187_v6  ;;  %v5268_v9 = vld [vmem:[#allocation2 + $0xd1] sm:$0xff] }
 0x453   : > { %v4848_v32 = vmax.f32 %v4846_v13, %v4847_v38  ;;  %v4854_v59 = vrot.slane %v4853_v41, 2  ;;  %v4920_v28 = vmax.f32 %v4918_v7, %v4919_v58  ;;  %v4927_v53 = vmax.f32 %v4925_v2, %v4926_v25  ;;  %v5238_v13 = vld [vmem:[#allocation2 + $0xf8] sm:$0xff] }
 0x454   : > { %v4861_v14 = vrot.slane %v4860_v61, 2  ;;  %v4867_v63 = vmax.f32 %v4865_v39, %v4866_v17  ;;  %v5189_v26 = vsel %vm5081_vm8, %v4913_v31, %v5188_v1  ;;  %v5276_v56 = vpack.c.bf16 %v5264_v15, %v5263_v12  ;;  %v5270_v2 = vld [vmem:[#allocation2 + $0xf9] sm:$0xff]  ;;  %v5582_v31 = vld [vmem:[#allocation2 + $0x2a] sm:$0xff] }
 0x455   : > { %v4849_v62 = vrot.slane %v4848_v32, 1  ;;  %v4855_v29 = vmax.f32 %v4853_v41, %v4854_v59  ;;  %v5190_v57 = vsel %vm5083_vm9, %v4920_v28, %v5189_v26  ;;  %v5244_v6 = vpack.c.bf16 %v5232_v35, %v18020_v16  ;;  %v5580_v41 = vld [vmem:[#allocation2 + $0x2] sm:$0xff]  ;;  %v5584_v1 = vld [vmem:[#allocation2 + $0x52] sm:$0xff]  ;;  %v5586_v35 = vld [vmem:[#allocation2 + $0x7a] sm:$0xff] }
 0x456   : > { %v4862_v19 = vmax.f32 %v4860_v61, %v4861_v14  ;;  %v4868_v47 = vrot.slane %v4867_v63, 2  ;;  %v5191_v51 = vsel %vm5085_vm10, %v4927_v53, %v5190_v57  ;;  %15449 = vmatmul.mubr.msk.bf16.gmra.mxu0 %vm5208_vm11, %v5276_v56  ;;  %v5277_v36 = vpack.c.bf16 %v5266_v40, %v5265_v21  ;;  %v5588_v28 = vld [vmem:[#allocation2 + $0xa2] sm:$0xff]  ;;  %v5590_v14 = vld [vmem:[#allocation2 + $0xca] sm:$0xff]  ;;  %v16406_v57 = vld [vmem:[%s20197_s7 + $0x18] sm:$0xff]  }
 0x457   : > { %v4850_v10 = vmax.f32 %v4848_v32, %v4849_v62  ;;  %v4856_v3 = vrot.slane %v4855_v29, 1  ;;  %5224 = vst.msk [vmem:[#allocation2 + $0x121] sm:$0xff] %vm5208_vm11, %v5191_v51  ;;  %15473 = vmatmul.mubr.msk.bf16.gmra.mxu1 %vm5208_vm11, %v5244_v6  ;;  %v5245_v0 = vpack.c.bf16 %v5234_v50, %v18084_v44  ;;  %v5278_v7 = vpack.c.bf16 %v5268_v9, %v5267_v37  ;;  %v16401_v26 = vld [vmem:[%s20197_s7 + $0x68] sm:$0xff]   ;;  %v16404_v56 = vld [vmem:[%s20197_s7 + $0x20] sm:$0xff]   ;;  %v16405_v50 = vld [vmem:[%s20197_s7 + $0x58] sm:$0xff]  }
 0x458   : > { %v4863_v30 = vrot.slane %v4862_v19, 1  ;;  %v4869_v52 = vmax.f32 %v4867_v63, %v4868_v47  ;;  %15452 = vmatprep.mubr.msk.bf16.mxu0 %vm5208_vm11, %v5277_v36  ;;  %v5246_v39 = vpack.c.bf16 %v5236_v46, %v18154_v22  ;;  %v5247_v18 = vpack.c.bf16 %v5238_v13, %v18210_v11  ;;  %v5592_v63 = vld [vmem:[#allocation2 + $0xf2] sm:$0xff]  ;;  %v16402_v62 = vld [vmem:[%s20197_s7 + $0x28] sm:$0xff]   ;;  %v16411_v51 = vld [vmem:[%s20197_s7 + $0x40] sm:$0xff]  }
 0x459   : > { %v4857_v8 = vmax.f32 %v4855_v29, %v4856_v3  ;;  %v5181_v16 = vsel %vm5079_vm7, %v4850_v10, %v18226_v33  ;;  %15476 = vmatprep.mubr.msk.bf16.mxu1 %vm5208_vm11, %v5245_v0  ;;  %v5279_v33 = vpack.c.bf16 %v5270_v2, %v5269_v45  ;;  %v5596_v12 = vpack.c.bf16 %v17996_v34, %v5580_v41  ;;  %v16403_v29 = vld [vmem:[%s20197_s7 + $0x60] sm:$0xff]   ;;  %v16408_v47 = vld [vmem:[%s20197_s7 + $0x10] sm:$0xff]   ;;  %v16409_v6 = vld [vmem:[%s20197_s7 + $0x48] sm:$0xff]  }
 0x45a   : > { %v4864_v24 = vmax.f32 %v4862_v19, %v4863_v30  ;;  %v4870_v43 = vrot.slane %v4869_v52, 1  ;;  %v5597_v32 = vpack.c.bf16 %v18044_v20, %v5582_v31  ;;  %v5598_v59 = vpack.c.bf16 %v18065_v23, %v5584_v1  ;;  %v16407_v19 = vld [vmem:[%s20197_s7 + $0x50] sm:$0xff]   ;;  %v16410_v40 = vld [vmem:[%s20197_s7 + $0x8] sm:$0xff]   ;;  %v16412_v10 = vld [vmem:[%s20197_s7] sm:$0xff]  }
 0x45b   : > { %v5182_v54 = vsel %vm5081_vm8, %v4857_v8, %v5181_v16  ;;  %v5599_v34 = vpack.c.bf16 %v18080_v60, %v5586_v35  ;;  %v5600_v53 = vpack.c.bf16 %v18088_v27, %v5588_v28  ;;  %v5601_v20 = vpack.c.bf16 %v18149_v55, %v5590_v14  ;;  %v16397_v60 = vld [vmem:[%s20197_s7 + $0x78] sm:$0xff]   ;;  %v16399_v55 = vld [vmem:[%s20197_s7 + $0x70] sm:$0xff]  }
 0x45c   : > { %v4871_v44 = vmax.f32 %v4869_v52, %v4870_v43  ;;  %v5183_v5 = vsel %vm5083_vm9, %v4864_v24, %v5182_v54  ;;  %v5602_v23 = vpack.c.bf16 %v18199_v48, %v5592_v63  ;;  %v16398_v27 = vld [vmem:[%s20197_s7 + $0x38] sm:$0xff]   ;;  %15508 = vmatprep.subr.bf16.mxu1 %v16397_v60  ;;  %v16400_v48 = vld [vmem:[%s20197_s7 + $0x30] sm:$0xff]  }
 0x45d   : > { %15540 = vmatprep.subr.bf16.mxu0 %v16398_v27  ;;  %15509 = vmatpush3.bf16.msra.mxu1 %v16397_v60  ;;  %v18325_v3 = vld [vmem:[%s20197_s7 + $0xb8] sm:$0xff]  }
 0x45e   : > { %v5184_v42 = vsel %vm5085_vm10, %v4871_v44, %v5183_v5  ;;  %15453 = vmatmul.mubr.msk.bf16.gmra.mxu0 %vm5208_vm11, %v5278_v7  ;;  %v5595_v38 = vld [vmem:[#allocation2 + $0x122] sm:$0xff]  ;;  %15510 = vmatprep.subr.bf16.mxu1 %v16399_v55 }
 0x45f   : > { %5223 = vst.msk [vmem:[#allocation2 + $0x119] sm:$0xff] %vm5208_vm11, %v5184_v42  ;;  %15477 = vmatmul.mubr.msk.bf16.gmra.mxu1 %vm5208_vm11, %v5246_v39  ;;  %15456 = vmatprep.mubr.msk.bf16.mxu0 %vm5208_vm11, %v5279_v33  ;;  %5829 = vst [vmem:[#allocation2 + $0x129] sm:$0x1] %v20196_v4  ;;  %v5272_v25 = vld [vmem:[#allocation2 + $0x121] sm:$0xff] }
 0x460   : > { %15480 = vmatprep.mubr.msk.bf16.mxu1 %vm5208_vm11, %v5247_v18 }
 0x461   : > { %15511 = vmatpush3.bf16.msra.mxu1 %v16399_v55 }
 0x462   : > { %15512 = vmatprep.subr.bf16.mxu1 %v16401_v26 }
 0x465   : > { %15513 = vmatpush3.bf16.msra.mxu1 %v16401_v26 }
 0x466   : > { %v5239_v22 = vld [vmem:[#allocation2 + $0x118] sm:$0xff]  ;;  %v5240_v61 = vld [vmem:[#allocation2 + $0x120] sm:$0xff]  ;;  %15514 = vmatprep.subr.bf16.mxu1 %v16403_v29 }
 0x467   : > { %v5271_v58 = vld [vmem:[#allocation2 + $0x119] sm:$0xff]  ;;  %5821 = vst [vmem:[#allocation2 + $0x118] sm:$0x1] %v20196_v4  ;;  %v5248_v17 = vpack.c.bf16 %v5240_v61, %v5239_v22 }
 0x468   : > { %v5280_v11 = vpack.c.bf16 %v5272_v25, %v5271_v58  ;;  %v5594_v15 = vld [vmem:[#allocation2 + $0x11a] sm:$0xff] }
 0x469   : > { %15481 = vmatmul.mubr.msk.bf16.gmra.mxu1 %vm5208_vm11, %v5248_v17  ;;  %v5603_v21 = vpack.c.bf16 %v5595_v38, %v5594_v15 }
 0x46a   : > { %15457 = vmatmul.mubr.msk.bf16.gmra.mxu0 %vm5208_vm11, %v5280_v11  ;;  %15515 = vmatpush3.bf16.msra.mxu1 %v16403_v29  ;;  %v18345_v11 = vld [vmem:[%s20125_s14 + $0x2] ss:$0 sm:$0xff] }
 0x46b   : > { %15492 = vmatprep.mubr.msk.bf16.mxu0 %vm5208_vm11, %v5596_v12  ;;  %15516 = vmatprep.subr.bf16.mxu1 %v16405_v50 }
 0x46e   : > { %15517 = vmatpush3.bf16.msra.mxu1 %v16405_v50 }
 0x46f   : > { %15518 = vmatprep.subr.bf16.mxu1 %v16407_v19 }
 0x472   : > { %15493 = vmatmul.mubr.msk.bf16.vlgmr.msra.gmra.mxu0 %vm5208_vm11, %v5597_v32  ;;  %15519 = vmatpush3.bf16.msra.mxu1 %v16407_v19 }
 0x473   : > { %15496 = vmatprep.mubr.msk.bf16.mxu0 %vm5208_vm11, %v5598_v59  ;;  %15541 = vmatpush3.bf16.msra.mxu0 %v16398_v27 }
 0x474   : > { %15542 = vmatprep.subr.bf16.mxu0 %v16400_v48  ;;  %15520 = vmatprep.subr.bf16.mxu1 %v16409_v6 }
 0x476   : > { %15521 = vmatpush3.bf16.msra.mxu1 %v16409_v6 }
 0x477   : > { %15543 = vmatpush3.bf16.msra.mxu0 %v16400_v48  ;;  %15522 = vmatprep.subr.bf16.mxu1 %v16411_v51 }
 0x478   : > { %15544 = vmatprep.subr.bf16.mxu0 %v16402_v62 }
 0x47a   : > { %15497 = vmatmul.mubr.msk.bf16.gmra.mxu0 %vm5208_vm11, %v5599_v34  ;;  %15523 = vmatpush3.bf16.msra.mxu1 %v16411_v51 }
 0x47b   : > { %15500 = vmatprep.mubr.msk.bf16.mxu0 %vm5208_vm11, %v5600_v53  ;;  %15545 = vmatpush3.bf16.msra.mxu0 %v16402_v62 }
 0x47c   : > { %15546 = vmatprep.subr.bf16.mxu0 %v16404_v56  ;;  %15572 = vmatprep.subr.bf16.mxu1 %v18325_v3 }
 0x47f   : > { %15547 = vmatpush3.bf16.msra.mxu0 %v16404_v56 }
 0x480   : > { %15548 = vmatprep.subr.bf16.mxu0 %v16406_v57 }
 0x482   : > { %15501 = vmatmul.mubr.msk.bf16.gmra.mxu0 %vm5208_vm11, %v5601_v20 }
 0x483   : > { %15504 = vmatprep.mubr.msk.bf16.mxu0 %vm5208_vm11, %v5602_v23  ;;  %15549 = vmatpush3.bf16.msra.mxu0 %v16406_v57 }
 0x484   : > { %15550 = vmatprep.subr.bf16.mxu0 %v16408_v47 }
 0x487   : > { %15551 = vmatpush3.bf16.msra.mxu0 %v16408_v47 }
 0x488   : > { %15552 = vmatprep.subr.bf16.mxu0 %v16410_v40 }
 0x48a   : > { %15505 = vmatmul.mubr.msk.bf16.gmra.mxu0 %vm5208_vm11, %v5603_v21 }
 0x48b   : > { %15553 = vmatpush3.bf16.msra.mxu0 %v16410_v40 }
 0x48c   : > { %15554 = vmatprep.subr.bf16.mxu0 %v16412_v10 }
 0x48f   : > { %15555 = vmatpush3.bf16.msra.mxu0 %v16412_v10 }
 0x4c1   : > { %v15446_v36 = vpop.f32.mrf.mxu0 }
 0x4c3   : > { %v5372_v30 = vpop.f32.mrf.mxu0 }
 0x4c5   : > { %v15447_v52 = vpop.f32.mrf.mxu0 }
 0x4c7   : > { %v5375_v37 = vpop.f32.mrf.mxu0 }
 0x4c9   : > { %v15470_v0 = vpop.f32.mrf.mxu1 }
 0x4ca   : > { %v5526_v22 = vadd.f32 %v15470_v0, %v15446_v36 }
 0x4cb   : > { %v5517_v16 = vpop.f32.mrf.mxu1 }
 0x4cc   : > { %v5518_v61 = vadd.f32 %v5517_v16, %v5372_v30  ;;  %v16414_v16 = vld [vmem:[%s20197_s7 + $0xb0] sm:$0xff]  }
 0x4cd   : > { %v15471_v24 = vpop.f32.mrf.mxu1 }
 0x4ce   : > { %v5529_v31 = vadd.f32 %v15471_v24, %v15447_v52 }
 0x4cf   : > { %v5520_v13 = vpop.f32.mrf.mxu1 }
 0x4d0   : > { %v5521_v28 = vadd.f32 %v5520_v13, %v5375_v37 }
 0x516   : > { %v15450_v8 = vpop.f32.mrf.mxu0 }
 0x517   : > { %v15474_v7 = vpop.f32.mrf.mxu1 }
 0x518   : > { %v5388_v46 = vpop.f32.mrf.mxu0  ;;  %v5542_v20 = vadd.f32 %v15474_v7, %v15450_v8 }
 0x519   : > { %v5533_v44 = vpop.f32.mrf.mxu1 }
 0x51a   : > { %v15451_v45 = vpop.f32.mrf.mxu0  ;;  %v5534_v55 = vadd.f32 %v5533_v44, %v5388_v46 }
 0x51b   : > { %v15475_v33 = vpop.f32.mrf.mxu1 }
 0x51c   : > { %v5391_v43 = vpop.f32.mrf.mxu0  ;;  %v5545_v56 = vadd.f32 %v15475_v33, %v15451_v45 }
 0x51d   : > { %v5536_v38 = vpop.f32.mrf.mxu1 }
 0x51e   : > { %v15454_v9 = vpop.f32.mrf.mxu0  ;;  %v5537_v6 = vadd.f32 %v5536_v38, %v5391_v43 }
 0x51f   : > { %v15478_v58 = vpop.f32.mrf.mxu1 }
 0x520   : > { %v18328_v54 = vpop.f32.mrf.mxu0  ;;  %v5558_v46 = vadd.f32 %v15478_v58, %v15454_v9 }
 0x521   : > { %v5549_v1 = vpop.f32.mrf.mxu1 }
 0x522   : > { %v18330_v2 = vpop.f32.mrf.mxu0  ;;  %v5550_v44 = vadd.f32 %v5549_v1, %v18328_v54  ;;  %v16415_v54 = vld [vmem:[%s20197_s7 + $0xa8] sm:$0xff]  }
 0x523   : > { %v15479_v23 = vpop.f32.mrf.mxu1 }
 0x524   : > { %v18332_v5 = vpop.f32.mrf.mxu0 }
 0x525   : > { %v5552_v50 = vpop.f32.mrf.mxu1 }
 0x529   : > { %v15482_v51 = vpop.f32.mrf.mxu1 }
 0x52a   : > { %v18334_v39 = vpop.f32.mrf.mxu0 }
 0x52b   : > { %v5565_v33 = vpop.f32.mrf.mxu1 }
 0x52c   : > { %v18336_v18 = vpop.f32.mrf.mxu0 }
 0x52e   : > { %v18338_v42 = vpop.f32.mrf.mxu0 }
 0x530   : > { %v18340_v41 = vpop.f32.mrf.mxu0 }
 0x532   : > { %v15494_v25 = vpop.f32.mrf.mxu0 }
 0x533   : > { %v5760_v17 = vadd.f32 %v15494_v25, %v5526_v22 }
 0x534   : > { %v5695_v12 = vpop.f32.mrf.mxu0 }
 0x535   : > { %v5784_v32 = vadd.f32 %v18345_v11, %v5760_v17  ;;  %v5758_v59 = vadd.f32 %v5695_v12, %v5518_v61  ;;  %v5561_v17 = vadd.f32 %v15479_v23, %v18330_v2 }
 0x536   : > { %v15495_v35 = vpop.f32.mrf.mxu0 }
 0x537   : > { %v5800_v34 = vmax.f32 %v5784_v32, 0.0  ;;  %v5782_v53 = vadd.f32 %v18345_v11, %v5758_v59  ;;  %v5761_v14 = vadd.f32 %v15495_v35, %v5529_v31 }
 0x538   : > { %v5698_v63 = vpop.f32.mrf.mxu0 }
 0x539   : > { %5832 = vst [vmem:[#allocation2 + $0x29] sm:$0xff] %v5800_v34  ;;  %v5798_v15 = vmax.f32 %v5782_v53, 0.0  ;;  %v5785_v21 = vadd.f32 %v18345_v11, %v5761_v14  ;;  %v5759_v60 = vadd.f32 %v5698_v63, %v5521_v28  ;;  %v15483_v28 = vpop.f32.mrf.mxu1  ;;  %v5574_v63 = vadd.f32 %v15482_v51, %v18334_v39  ;;  %v16416_v39 = vld [vmem:[%s20197_s7 + $0xa0] sm:$0xff]  }
 0x53a   : > { %v15498_v27 = vpop.f32.mrf.mxu0 }
 0x53b   : > { %5830 = vst [vmem:[#allocation2 + $0x1] sm:$0xff] %v5798_v15  ;;  %v5801_v48 = vmax.f32 %v5785_v21, 0.0  ;;  %v5783_v26 = vadd.f32 %v18345_v11, %v5759_v60  ;;  %v5764_v62 = vadd.f32 %v15498_v27, %v5542_v20 }
 0x53c   : > { %v5711_v29 = vpop.f32.mrf.mxu0 }
 0x53d   : > { %5833 = vst [vmem:[#allocation2 + $0x31] sm:$0xff] %v5801_v48  ;;  %v5799_v57 = vmax.f32 %v5783_v26, 0.0  ;;  %v18352_v19 = vadd.f32 %v18345_v11, %v5764_v62  ;;  %v5762_v47 = vadd.f32 %v5711_v29, %v5534_v55  ;;  %v5903_v8 = vpack.c.bf16 %v5801_v48, %v5800_v34  ;;  %v5568_v29 = vpop.f32.mrf.mxu1 }
 0x53e   : > { %v15499_v40 = vpop.f32.mrf.mxu0  ;;  %v5566_v62 = vadd.f32 %v5565_v33, %v18336_v18 }
 0x53f   : > { %5831 = vst [vmem:[#allocation2 + $0x9] sm:$0xff] %v5799_v57  ;;  %v5804_v10 = vmax.f32 %v18352_v19, 0.0  ;;  %v5786_v36 = vadd.f32 %v18345_v11, %v5762_v47  ;;  %v5765_v30 = vadd.f32 %v15499_v40, %v5545_v56  ;;  %v5902_v52 = vpack.c.bf16 %v5799_v57, %v5798_v15 }
 0x540   : > { %v5714_v0 = vpop.f32.mrf.mxu0  ;;  %v5848_v37 = vld [vmem:[#allocation2 + $0x28] sm:$0xff]  ;;  %v5577_v40 = vadd.f32 %v15483_v28, %v18338_v42 }
 0x541   : > { %5836 = vst [vmem:[#allocation2 + $0x79] sm:$0xff] %v5804_v10  ;;  %v5802_v45 = vmax.f32 %v5786_v36, 0.0  ;;  %v5789_v24 = vadd.f32 %v18345_v11, %v5765_v30  ;;  %v5763_v43 = vadd.f32 %v5714_v0, %v5537_v6  ;;  %15524 = vmatprep.mubr.bf16.mxu1 %v5902_v52  ;;  %7607 = vst.msk [vmem:[#allocation2 + $0x28] sm:$0x1] %vm4928_vm2, %v20196_v4  ;;  %v16417_v36 = vld [vmem:[%s20197_s7 + $0x98] sm:$0xff]  }
 0x542   : > { %v15502_v13 = vpop.f32.mrf.mxu0  ;;  %v5846_v7 = vld [vmem:[#allocation2] sm:$0xff]  ;;  %15525 = vmatmul.mubr.bf16.vlgmr.msra.gmra.mxu1 %v5903_v8  ;;  %v5569_v30 = vadd.f32 %v5568_v29, %v18340_v41 }
 0x543   : > { %5834 = vst [vmem:[#allocation2 + $0x51] sm:$0xff] %v5802_v45  ;;  %v5805_v38 = vmax.f32 %v5789_v24, 0.0  ;;  %v5787_v22 = vadd.f32 %v18345_v11, %v5763_v43  ;;  %v5768_v9 = vadd.f32 %v15502_v13, %v5558_v46  ;;  %7606 = vst.msk [vmem:[#allocation2] sm:$0x1] %vm4928_vm2, %v20196_v4  ;;  %15573 = vmatpush3.bf16.msra.mxu1 %v18325_v3 }
 0x544   : > { %v5727_v58 = vpop.f32.mrf.mxu0  ;;  %v18367_v25 = vld [vmem:[#allocation2 + $0x2a] sm:$0xff]  ;;  %15574 = vmatprep.subr.bf16.mxu1 %v16414_v16  ;;  %v5553_v3 = vadd.f32 %v5552_v50, %v18332_v5 }
 0x545   : > { %v5849_v61 = vld [vmem:[#allocation2 + $0x30] sm:$0xff]  ;;  %5837 = vst [vmem:[#allocation2 + $0x81] sm:$0xff] %v5805_v38  ;;  %v5803_v12 = vmax.f32 %v5787_v22, 0.0  ;;  %v18374_v31 = vadd.f32 %v18345_v11, %v5768_v9  ;;  %v5766_v1 = vadd.f32 %v5727_v58, %v5550_v44  ;;  %v5905_v55 = vpack.c.bf16 %v5805_v38, %v5804_v10 }
 0x546   : > { %7615 = vst.msk [vmem:[#allocation2 + $0x31] sm:$0x1] %vm4928_vm2, %v20196_v4  ;;  %v15503_v32 = vpop.f32.mrf.mxu0  ;;  %v18379_v59 = vld [vmem:[#allocation2 + $0x2] sm:$0xff]  ;;  %v5863_v5 = vpack.c.bf16 %v5849_v61, %v5848_v37  ;;  %v16418_v38 = vld [vmem:[%s20197_s7 + $0x90] sm:$0xff]  }
 0x547   : > { %v5847_v35 = vld [vmem:[#allocation2 + $0x8] sm:$0xff]  ;;  %5835 = vst [vmem:[#allocation2 + $0x59] sm:$0xff] %v5803_v12  ;;  %v5808_v34 = vmax.f32 %v18374_v31, 0.0  ;;  %v5790_v2 = vadd.f32 %v18345_v11, %v5766_v1  ;;  %v5769_v53 = vadd.f32 %v15503_v32, %v5561_v17  ;;  %15575 = vmatpush3.bf16.msra.mxu1 %v16414_v16  ;;  %v5904_v23 = vpack.c.bf16 %v5803_v12, %v5802_v45 }
 0x548   : > { %v5862_v14 = vpack.c.bf16 %v5847_v35, %v5846_v7  ;;  %7614 = vst.msk [vmem:[#allocation2 + $0x9] sm:$0x1] %vm4928_vm2, %v20196_v4  ;;  %v5730_v20 = vpop.f32.mrf.mxu0  ;;  %v5852_v15 = vld [vmem:[#allocation2 + $0x78] sm:$0xff]  ;;  %15576 = vmatprep.subr.bf16.mxu1 %v16415_v54  ;;  %v16419_v1 = vld [vmem:[%s20197_s7 + $0x88] sm:$0xff]  }
 0x549   : > { %5840 = vst [vmem:[#allocation2 + $0xc9] sm:$0xff] %v5808_v34  ;;  %v5806_v21 = vmax.f32 %v5790_v2, 0.0  ;;  %v5793_v60 = vadd.f32 %v18345_v11, %v5769_v53  ;;  %v5767_v27 = vadd.f32 %v5730_v20, %v5553_v3  ;;  %7609 = vst.msk [vmem:[#allocation2 + $0x78] sm:$0x1] %vm4928_vm2, %v20196_v4  ;;  %15528 = vmatprep.mubr.bf16.mxu1 %v5904_v23  ;;  %v6218_v32 = vld [vmem:[#allocation2 + $0xa] sm:$0xff]  ;;  %v16420_v2 = vld [vmem:[%s20197_s7 + $0x80] sm:$0xff]  }
 0x54a   : > { %15556 = vmatprep.mubr.bf16.mxu0 %v5862_v14  ;;  %v15506_v48 = vpop.f32.mrf.mxu0  ;;  %v5850_v26 = vld [vmem:[#allocation2 + $0x50] sm:$0xff]  ;;  %15529 = vmatmul.mubr.bf16.gmra.mxu1 %v5905_v55  ;;  %v6233_v14 = vpack.c.bf16 %v6218_v32, %v18379_v59 }
 0x54b   : > { %15557 = vmatmul.mubr.bf16.vlgmr.msra.gmra.mxu0 %v5863_v5  ;;  %5838 = vst [vmem:[#allocation2 + $0xa1] sm:$0xff] %v5806_v21  ;;  %v5809_v56 = vmax.f32 %v5793_v60, 0.0  ;;  %v5791_v50 = vadd.f32 %v18345_v11, %v5767_v27  ;;  %v5772_v57 = vadd.f32 %v15506_v48, %v5574_v63  ;;  %7608 = vst.msk [vmem:[#allocation2 + $0x50] sm:$0x1] %vm4928_vm2, %v20196_v4  ;;  %15577 = vmatpush3.bf16.msra.mxu1 %v16415_v54 }
 0x54c   : > { %v5743_v19 = vpop.f32.mrf.mxu0  ;;  %v18398_v47 = vld [vmem:[#allocation2 + $0x7a] sm:$0xff]  ;;  %15578 = vmatprep.subr.bf16.mxu1 %v16416_v39 }
 0x54d   : > { %v5853_v6 = vld [vmem:[#allocation2 + $0x80] sm:$0xff]  ;;  %5841 = vst [vmem:[#allocation2 + $0xd1] sm:$0xff] %v5809_v56  ;;  %v5807_v51 = vmax.f32 %v5791_v50, 0.0  ;;  %v5796_v18 = vadd.f32 %v18345_v11, %v5772_v57  ;;  %v5770_v10 = vadd.f32 %v5743_v19, %v5566_v62  ;;  %v5907_v33 = vpack.c.bf16 %v5809_v56, %v5808_v34 }
 0x54e   : > { %7617 = vst.msk [vmem:[#allocation2 + $0x81] sm:$0x1] %vm4928_vm2, %v20196_v4  ;;  %v15507_v52 = vpop.f32.mrf.mxu0  ;;  %v18408_v0 = vld [vmem:[#allocation2 + $0x52] sm:$0xff]  ;;  %v5865_v24 = vpack.c.bf16 %v5853_v6, %v5852_v15  ;;  %v6222_v59 = vld [vmem:[#allocation2 + $0x5a] sm:$0xff] }
 0x54f   : > { %v5851_v37 = vld [vmem:[#allocation2 + $0x58] sm:$0xff]  ;;  %5839 = vst [vmem:[#allocation2 + $0xa9] sm:$0xff] %v5807_v51  ;;  %v5812_v42 = vmax.f32 %v5796_v18, 0.0  ;;  %v5794_v8 = vadd.f32 %v18345_v11, %v5770_v10  ;;  %v5773_v16 = vadd.f32 %v15507_v52, %v5577_v40  ;;  %15579 = vmatpush3.bf16.msra.mxu1 %v16416_v39  ;;  %v5906_v43 = vpack.c.bf16 %v5807_v51, %v5806_v21  ;;  %v6224_v39 = vld [vmem:[#allocation2 + $0x82] sm:$0xff] }
 0x550   : > { %v5864_v46 = vpack.c.bf16 %v5851_v37, %v5850_v26  ;;  %7616 = vst.msk [vmem:[#allocation2 + $0x59] sm:$0x1] %vm4928_vm2, %v20196_v4  ;;  %v5746_v45 = vpop.f32.mrf.mxu0  ;;  %v5856_v13 = vld [vmem:[#allocation2 + $0xc8] sm:$0xff]  ;;  %15580 = vmatprep.subr.bf16.mxu1 %v16417_v36  ;;  %v6220_v15 = vld [vmem:[#allocation2 + $0x32] sm:$0xff]  ;;  %v6235_v55 = vpack.c.bf16 %v6222_v59, %v18408_v0  ;;  %v6236_v26 = vpack.c.bf16 %v6224_v39, %v18398_v47  ;;  %v16424_v51 = vld [vmem:[%s20127_s16 + $0x20] sm:$0xff]  }
 0x551   : > { %5844 = vst [vmem:[#allocation2 + $0x119] sm:$0xff] %v5812_v42  ;;  %v5810_v41 = vmax.f32 %v5794_v8, 0.0  ;;  %v5797_v7 = vadd.f32 %v18345_v11, %v5773_v16  ;;  %v5771_v44 = vadd.f32 %v5746_v45, %v5569_v30  ;;  %7611 = vst.msk [vmem:[#allocation2 + $0xc8] sm:$0x1] %vm4928_vm2, %v20196_v4  ;;  %15532 = vmatprep.mubr.bf16.mxu1 %v5906_v43  ;;  %v16421_v6 = vld [vmem:[%s20127_s16 + $0x38] sm:$0xff]   ;;  %v16422_v47 = vld [vmem:[%s20127_s16 + $0x30] sm:$0xff]  }
 0x552   : > { %15560 = vmatprep.mubr.bf16.mxu0 %v5864_v46  ;;  %v5854_v22 = vld [vmem:[#allocation2 + $0xa0] sm:$0xff]  ;;  %15533 = vmatmul.mubr.bf16.gmra.mxu1 %v5907_v33  ;;  %v6234_v27 = vpack.c.bf16 %v6220_v15, %v18367_v25  ;;  %v16423_v40 = vld [vmem:[%s20127_s16 + $0x28] sm:$0xff]   ;;  %v16425_v18 = vld [vmem:[%s20127_s16 + $0x18] sm:$0xff]  }
 0x553   : > { %15561 = vmatmul.mubr.bf16.gmra.mxu0 %v5865_v24  ;;  %5842 = vst [vmem:[#allocation2 + $0xf1] sm:$0xff] %v5810_v41  ;;  %v5813_v9 = vmax.f32 %v5797_v7, 0.0  ;;  %v5795_v58 = vadd.f32 %v18345_v11, %v5771_v44  ;;  %7610 = vst.msk [vmem:[#allocation2 + $0xa0] sm:$0x1] %vm4928_vm2, %v20196_v4  ;;  %15581 = vmatpush3.bf16.msra.mxu1 %v16417_v36  ;;  %v18464_v10 = vld [vmem:[%s20127_s16 + $0x78] sm:$0xff]   ;;  %v16427_v36 = vld [vmem:[%s20127_s16 + $0x10] sm:$0xff]  }
 0x554   : > { %v6227_v61 = vld [vmem:[#allocation2 + $0xca] sm:$0xff]  ;;  %15582 = vmatprep.subr.bf16.mxu1 %v16418_v38  ;;  %v6228_v29 = vld [vmem:[#allocation2 + $0xd2] sm:$0xff]  ;;  %15604 = vmatprep.subr.bf16.mxu0 %v16421_v6  ;;  %v16431_v37 = vld [vmem:[%s20127_s16] sm:$0xff]  }
 0x555   : > { %v5857_v54 = vld [vmem:[#allocation2 + $0xd0] sm:$0xff]  ;;  %5845 = vst [vmem:[#allocation2 + $0x121] sm:$0xff] %v5813_v9  ;;  %v5811_v17 = vmax.f32 %v5795_v58, 0.0  ;;  %v5909_v34 = vpack.c.bf16 %v5813_v9, %v5812_v42  ;;  %v6238_v50 = vpack.c.bf16 %v6228_v29, %v6227_v61  ;;  %15605 = vmatpush3.bf16.msra.mxu0 %v16421_v6  ;;  %v16429_v52 = vld [vmem:[%s20127_s16 + $0x8] sm:$0xff]   ;;  %v18494_v42 = vld [vmem:[%s20127_s16 + $0x60] sm:$0xff]  }
 0x556   : > { %7619 = vst.msk [vmem:[#allocation2 + $0xd1] sm:$0x1] %vm4928_vm2, %v20196_v4  ;;  %v6225_v12 = vld [vmem:[#allocation2 + $0xa2] sm:$0xff]  ;;  %v5867_v35 = vpack.c.bf16 %v5857_v54, %v5856_v13  ;;  %v6226_v48 = vld [vmem:[#allocation2 + $0xaa] sm:$0xff]  ;;  %15606 = vmatprep.subr.bf16.mxu0 %v16422_v47  ;;  %v18500_v8 = vld [vmem:[%s20127_s16 + $0x58] sm:$0xff]  }
 0x557   : > { %v5855_v31 = vld [vmem:[#allocation2 + $0xa8] sm:$0xff]  ;;  %5843 = vst [vmem:[#allocation2 + $0xf9] sm:$0xff] %v5811_v17  ;;  %v5908_v3 = vpack.c.bf16 %v5811_v17, %v5810_v41  ;;  %15583 = vmatpush3.bf16.msra.mxu1 %v16418_v38  ;;  %v6237_v62 = vpack.c.bf16 %v6226_v48, %v6225_v12  ;;  %v18474_v30 = vld [vmem:[%s20127_s16 + $0x70] sm:$0xff]   ;;  %v18523_v45 = vld [vmem:[%s20127_s16 + $0x40] sm:$0xff]  }
 0x558   : > { %v5866_v11 = vpack.c.bf16 %v5855_v31, %v5854_v22  ;;  %7618 = vst.msk [vmem:[#allocation2 + $0xa9] sm:$0x1] %vm4928_vm2, %v20196_v4  ;;  %v5860_v28 = vld [vmem:[#allocation2 + $0x118] sm:$0xff]  ;;  %15584 = vmatprep.subr.bf16.mxu1 %v16419_v1  ;;  %v18483_v0 = vld [vmem:[%s20127_s16 + $0x68] sm:$0xff]   ;;  %v18509_v16 = vld [vmem:[%s20127_s16 + $0x50] sm:$0xff]  }
 0x559   : > { %15536 = vmatprep.mubr.bf16.mxu1 %v5908_v3  ;;  %7613 = vst.msk [vmem:[#allocation2 + $0x118] sm:$0x1] %vm4928_vm2, %v20196_v4  ;;  %15607 = vmatpush3.bf16.msra.mxu0 %v16422_v47  ;;  %v18515_v46 = vld [vmem:[%s20127_s16 + $0x48] sm:$0xff]  }
 0x55a   : > { %15564 = vmatprep.mubr.bf16.mxu0 %v5866_v11  ;;  %v5858_v53 = vld [vmem:[#allocation2 + $0xf0] sm:$0xff]  ;;  %15537 = vmatmul.mubr.bf16.gmra.mxu1 %v5909_v34 }
 0x55b   : > { %15565 = vmatmul.mubr.bf16.gmra.mxu0 %v5867_v35  ;;  %7612 = vst.msk [vmem:[#allocation2 + $0xf0] sm:$0x1] %vm4928_vm2, %v20196_v4  ;;  %15585 = vmatpush3.bf16.msra.mxu1 %v16419_v1 }
 0x55c   : > { %v6231_v63 = vld [vmem:[#allocation2 + $0x11a] sm:$0xff]  ;;  %15588 = vmatprep.mubr.bf16.mxu1 %v6233_v14  ;;  %15586 = vmatprep.subr.bf16.mxu1 %v16420_v2  ;;  %v6232_v19 = vld [vmem:[#allocation2 + $0x122] sm:$0xff] }
 0x55d   : > { %v5861_v20 = vld [vmem:[#allocation2 + $0x120] sm:$0xff]  ;;  %v6240_v25 = vpack.c.bf16 %v6232_v19, %v6231_v63  ;;  %15608 = vmatprep.subr.bf16.mxu0 %v16423_v40 }
 0x55e   : > { %7621 = vst.msk [vmem:[#allocation2 + $0x121] sm:$0x1] %vm4928_vm2, %v20196_v4  ;;  %v6229_v5 = vld [vmem:[#allocation2 + $0xf2] sm:$0xff]  ;;  %v5869_v60 = vpack.c.bf16 %v5861_v20, %v5860_v28  ;;  %v6230_v56 = vld [vmem:[#allocation2 + $0xfa] sm:$0xff]  ;;  %15609 = vmatpush3.bf16.msra.mxu0 %v16423_v40 }
 0x55f   : > { %v5859_v23 = vld [vmem:[#allocation2 + $0xf8] sm:$0xff]  ;;  %15587 = vmatpush3.bf16.msra.mxu1 %v16420_v2  ;;  %v6239_v57 = vpack.c.bf16 %v6230_v56, %v6229_v5  ;;  %15610 = vmatprep.subr.bf16.mxu0 %v16424_v51 }
 0x560   : > { %v5868_v21 = vpack.c.bf16 %v5859_v23, %v5858_v53  ;;  %7620 = vst.msk [vmem:[#allocation2 + $0xf9] sm:$0x1] %vm4928_vm2, %v20196_v4  ;;  %16264 = vmatprep.subr.bf16.mxu1 %v18464_v10 }
 0x562   : > { %15568 = vmatprep.mubr.bf16.mxu0 %v5868_v21  ;;  %15589 = vmatmul.mubr.bf16.vlgmr.msra.gmra.mxu1 %v6234_v27 }
 0x563   : > { %15569 = vmatmul.mubr.bf16.gmra.mxu0 %v5869_v60  ;;  %15592 = vmatprep.mubr.bf16.mxu1 %v6235_v55  ;;  %v18540_v55 = vld [vmem:[%s20125_s14 + $0x3] ss:$0 sm:$0xff] }
 0x564   : > { %15611 = vmatpush3.bf16.msra.mxu0 %v16424_v51  ;;  %16272 = vmatpush3.bf16.msra.mxu1 %v18464_v10 }
 0x565   : > { %15612 = vmatprep.subr.bf16.mxu0 %v16425_v18  ;;  %16265 = vmatprep.subr.bf16.mxu1 %v18474_v30 }
 0x568   : > { %15613 = vmatpush3.bf16.msra.mxu0 %v16425_v18  ;;  %16273 = vmatpush3.bf16.msra.mxu1 %v18474_v30 }
 0x569   : > { %15614 = vmatprep.subr.bf16.mxu0 %v16427_v36  ;;  %16266 = vmatprep.subr.bf16.mxu1 %v18483_v0 }
 0x56a   : > { %15593 = vmatmul.mubr.bf16.gmra.mxu1 %v6236_v26 }
 0x56b   : > { %15596 = vmatprep.mubr.bf16.mxu1 %v6237_v62 }
 0x56c   : > { %15615 = vmatpush3.bf16.msra.mxu0 %v16427_v36  ;;  %16274 = vmatpush3.bf16.msra.mxu1 %v18483_v0 }
 0x56d   : > { %15616 = vmatprep.subr.bf16.mxu0 %v16429_v52  ;;  %16267 = vmatprep.subr.bf16.mxu1 %v18494_v42 }
 0x570   : > { %15617 = vmatpush3.bf16.msra.mxu0 %v16429_v52  ;;  %16275 = vmatpush3.bf16.msra.mxu1 %v18494_v42 }
 0x571   : > { %15618 = vmatprep.subr.bf16.mxu0 %v16431_v37  ;;  %16268 = vmatprep.subr.bf16.mxu1 %v18500_v8 }
 0x572   : > { %15597 = vmatmul.mubr.bf16.gmra.mxu1 %v6238_v50 }
 0x573   : > { %15600 = vmatprep.mubr.bf16.mxu1 %v6239_v57 }
 0x574   : > { %15619 = vmatpush3.bf16.msra.mxu0 %v16431_v37  ;;  %16276 = vmatpush3.bf16.msra.mxu1 %v18500_v8 }
 0x575   : > { %15636 = vmatprep.subr.bf16.mxu0 %v18464_v10  ;;  %16269 = vmatprep.subr.bf16.mxu1 %v18509_v16 }
 0x578   : > { %16277 = vmatpush3.bf16.msra.mxu1 %v18509_v16 }
 0x579   : > { %16270 = vmatprep.subr.bf16.mxu1 %v18515_v46 }
 0x57a   : > { %15601 = vmatmul.mubr.bf16.gmra.mxu1 %v6240_v25 }
 0x57c   : > { %16278 = vmatpush3.bf16.msra.mxu1 %v18515_v46 }
 0x57d   : > { %16271 = vmatprep.subr.bf16.mxu1 %v18523_v45 }
 0x580   : > { %16279 = vmatpush3.bf16.msra.mxu1 %v18523_v45 }
 0x602   : > { %v15526_v24 = vpop.f32.mrf.mxu1 }
 0x604   : > { %v6009_v43 = vpop.f32.mrf.mxu1 }
 0x606   : > { %v15527_v13 = vpop.f32.mrf.mxu1 }
 0x608   : > { %v6012_v41 = vpop.f32.mrf.mxu1 }
 0x60a   : > { %v15530_v44 = vpop.f32.mrf.mxu1 }
 0x60b   : > { %v15558_v7 = vpop.f32.mrf.mxu0 }
 0x60c   : > { %v6025_v38 = vpop.f32.mrf.mxu1  ;;  %v6163_v20 = vadd.f32 %v15558_v7, %v15526_v24 }
 0x60d   : > { %v6154_v33 = vpop.f32.mrf.mxu0 }
 0x60e   : > { %v15531_v9 = vpop.f32.mrf.mxu1  ;;  %v6155_v63 = vadd.f32 %v6154_v33, %v6009_v43 }
 0x60f   : > { %v15559_v22 = vpop.f32.mrf.mxu0 }
 0x610   : > { %v6028_v61 = vpop.f32.mrf.mxu1  ;;  %v6166_v15 = vadd.f32 %v15559_v22, %v15527_v13 }
 0x611   : > { %v6157_v58 = vpop.f32.mrf.mxu0 }
 0x612   : > { %v15534_v17 = vpop.f32.mrf.mxu1  ;;  %v6158_v27 = vadd.f32 %v6157_v58, %v6012_v41 }
 0x613   : > { %v15562_v54 = vpop.f32.mrf.mxu0 }
 0x614   : > { %v6041_v31 = vpop.f32.mrf.mxu1  ;;  %v6179_v6 = vadd.f32 %v15562_v54, %v15530_v44 }
 0x615   : > { %v6170_v12 = vpop.f32.mrf.mxu0 }
 0x616   : > { %v15535_v1 = vpop.f32.mrf.mxu1  ;;  %v6171_v19 = vadd.f32 %v6170_v12, %v6025_v38 }
 0x617   : > { %v15563_v11 = vpop.f32.mrf.mxu0 }
 0x618   : > { %v18527_v3 = vpop.f32.mrf.mxu1  ;;  %v6182_v18 = vadd.f32 %v15563_v11, %v15531_v9 }
 0x619   : > { %v6173_v35 = vpop.f32.mrf.mxu0 }
 0x61a   : > { %v18529_v32 = vpop.f32.mrf.mxu1  ;;  %v6174_v41 = vadd.f32 %v6173_v35, %v6028_v61 }
 0x61b   : > { %v15566_v2 = vpop.f32.mrf.mxu0 }
 0x61c   : > { %v18531_v28 = vpop.f32.mrf.mxu1 }
 0x61d   : > { %v6186_v5 = vpop.f32.mrf.mxu0 }
 0x61e   : > { %v18533_v34 = vpop.f32.mrf.mxu1  ;;  %v6187_v61 = vadd.f32 %v6186_v5, %v6041_v31 }
 0x61f   : > { %v15567_v48 = vpop.f32.mrf.mxu0 }
 0x620   : > { %v18535_v53 = vpop.f32.mrf.mxu1 }
 0x621   : > { %v6189_v47 = vpop.f32.mrf.mxu0 }
 0x622   : > { %v15590_v14 = vpop.f32.mrf.mxu1 }
 0x623   : > { %v6405_v59 = vadd.f32 %v15590_v14, %v6163_v20  ;;  %v15570_v22 = vpop.f32.mrf.mxu0  ;;  %v6195_v14 = vadd.f32 %v15566_v2, %v15534_v17 }
 0x624   : > { %v6340_v23 = vpop.f32.mrf.mxu1 }
 0x625   : > { %v6403_v21 = vadd.f32 %v6340_v23, %v6155_v63  ;;  %v6429_v50 = vadd.f32 %v18540_v55, %v6405_v59  ;;  %v6202_v63 = vpop.f32.mrf.mxu0 }
 0x626   : > { %v15591_v60 = vpop.f32.mrf.mxu1 }
 0x627   : > { %v6406_v39 = vadd.f32 %v15591_v60, %v6166_v15  ;;  %v6427_v62 = vadd.f32 %v18540_v55, %v6403_v21  ;;  %v6445_v24 = vmax.f32 %v6429_v50, 0.0  ;;  %v6198_v15 = vadd.f32 %v15567_v48, %v15535_v1 }
 0x628   : > { %v6343_v26 = vpop.f32.mrf.mxu1 }
 0x629   : > { %v6430_v29 = vadd.f32 %v18540_v55, %v6406_v39  ;;  %v6404_v56 = vadd.f32 %v6343_v26, %v6158_v27  ;;  %v6443_v36 = vmax.f32 %v6427_v62, 0.0  ;;  %v6190_v62 = vadd.f32 %v6189_v47, %v18527_v3 }
 0x62a   : > { %v15594_v57 = vpop.f32.mrf.mxu1  ;;  %v6203_v3 = vadd.f32 %v6202_v63, %v18531_v28 }
 0x62b   : > { %v6428_v25 = vadd.f32 %v18540_v55, %v6404_v56  ;;  %v6446_v40 = vmax.f32 %v6430_v29, 0.0  ;;  %v6409_v43 = vadd.f32 %v15594_v57, %v6179_v6  ;;  %v6211_v57 = vadd.f32 %v15570_v22, %v18529_v32 }
 0x62c   : > { %v6356_v51 = vpop.f32.mrf.mxu1 }
 0x62d   : > { %v6444_v52 = vmax.f32 %v6428_v25, 0.0  ;;  %v6407_v37 = vadd.f32 %v6356_v51, %v6171_v19  ;;  %v18548_v58 = vpack.c.bf16 %v6446_v40, %v6445_v24  ;;  %v6433_v9 = vadd.f32 %v18540_v55, %v6409_v43 }
 0x62e   : > { %v15595_v13 = vpop.f32.mrf.mxu1 }
 0x62f   : > { %v6410_v7 = vadd.f32 %v15595_v13, %v6182_v18  ;;  %v18546_v33 = vpack.c.bf16 %v6444_v52, %v6443_v36  ;;  %v6431_v44 = vadd.f32 %v18540_v55, %v6407_v37  ;;  %v6449_v27 = vmax.f32 %v6433_v9, 0.0 }
 0x630   : > { %v6359_v38 = vpop.f32.mrf.mxu1 }
 0x631   : > { %v6434_v54 = vadd.f32 %v18540_v55, %v6410_v7  ;;  %v6408_v12 = vadd.f32 %v6359_v38, %v6174_v41  ;;  %15620 = vmatprep.mubr.bf16.mxu0 %v18546_v33  ;;  %v6447_v21 = vmax.f32 %v6431_v44, 0.0 }
 0x632   : > { %v15598_v11 = vpop.f32.mrf.mxu1  ;;  %15621 = vmatmul.mubr.bf16.vlgmr.msra.gmra.mxu0 %v18548_v58 }
 0x633   : > { %v6432_v35 = vadd.f32 %v18540_v55, %v6408_v12  ;;  %15637 = vmatpush3.bf16.msra.mxu0 %v18464_v10  ;;  %v6450_v20 = vmax.f32 %v6434_v54, 0.0  ;;  %v6413_v39 = vadd.f32 %v15598_v11, %v6195_v14  ;;  %v15571_v10 = vpop.f32.mrf.mxu0 }
 0x634   : > { %v6372_v23 = vpop.f32.mrf.mxu1  ;;  %15638 = vmatprep.subr.bf16.mxu0 %v18474_v30  ;;  %v6214_v47 = vadd.f32 %v15571_v10, %v18533_v34 }
 0x635   : > { %v6448_v59 = vmax.f32 %v6432_v35, 0.0  ;;  %v6411_v60 = vadd.f32 %v6372_v23, %v6187_v61  ;;  %v6462_v17 = vpack.c.bf16 %v6450_v20, %v6449_v27  ;;  %v6437_v56 = vadd.f32 %v18540_v55, %v6413_v39  ;;  %v6205_v19 = vpop.f32.mrf.mxu0 }
 0x636   : > { %v15599_v26 = vpop.f32.mrf.mxu1  ;;  %v6206_v28 = vadd.f32 %v6205_v19, %v18535_v53 }
 0x637   : > { %v6414_v31 = vadd.f32 %v15599_v26, %v6198_v15  ;;  %15639 = vmatpush3.bf16.msra.mxu0 %v18474_v30  ;;  %v6461_v5 = vpack.c.bf16 %v6448_v59, %v6447_v21  ;;  %v6435_v29 = vadd.f32 %v18540_v55, %v6411_v60  ;;  %v6453_v36 = vmax.f32 %v6437_v56, 0.0 }
 0x638   : > { %v6375_v2 = vpop.f32.mrf.mxu1  ;;  %15640 = vmatprep.subr.bf16.mxu0 %v18483_v0 }
 0x639   : > { %v6438_v1 = vadd.f32 %v18540_v55, %v6414_v31  ;;  %v6412_v48 = vadd.f32 %v6375_v2, %v6190_v62  ;;  %15624 = vmatprep.mubr.bf16.mxu0 %v6461_v5  ;;  %v6451_v40 = vmax.f32 %v6435_v29, 0.0 }
 0x63a   : > { %v15602_v50 = vpop.f32.mrf.mxu1  ;;  %15625 = vmatmul.mubr.bf16.gmra.mxu0 %v6462_v17 }
 0x63b   : > { %v6436_v30 = vadd.f32 %v18540_v55, %v6412_v48  ;;  %15641 = vmatpush3.bf16.msra.mxu0 %v18483_v0  ;;  %v6454_v25 = vmax.f32 %v6438_v1, 0.0  ;;  %v6417_v52 = vadd.f32 %v15602_v50, %v6211_v57 }
 0x63c   : > { %v6388_v6 = vpop.f32.mrf.mxu1  ;;  %15642 = vmatprep.subr.bf16.mxu0 %v18494_v42 }
 0x63d   : > { %v6452_v51 = vmax.f32 %v6436_v30, 0.0  ;;  %v6415_v18 = vadd.f32 %v6388_v6, %v6203_v3  ;;  %v6464_v32 = vpack.c.bf16 %v6454_v25, %v6453_v36  ;;  %v6441_v7 = vadd.f32 %v18540_v55, %v6417_v52 }
 0x63e   : > { %v15603_v37 = vpop.f32.mrf.mxu1 }
 0x63f   : > { %v6418_v24 = vadd.f32 %v15603_v37, %v6214_v47  ;;  %15643 = vmatpush3.bf16.msra.mxu0 %v18494_v42  ;;  %v6463_v0 = vpack.c.bf16 %v6452_v51, %v6451_v40  ;;  %v6439_v13 = vadd.f32 %v18540_v55, %v6415_v18  ;;  %v6457_v44 = vmax.f32 %v6441_v7, 0.0 }
 0x640   : > { %v6391_v43 = vpop.f32.mrf.mxu1  ;;  %15644 = vmatprep.subr.bf16.mxu0 %v18500_v8 }
 0x641   : > { %v6442_v34 = vadd.f32 %v18540_v55, %v6418_v24  ;;  %v6416_v41 = vadd.f32 %v6391_v43, %v6206_v28  ;;  %15628 = vmatprep.mubr.bf16.mxu0 %v6463_v0  ;;  %15660 = vmatprep.mubr.bf16.mxu1 %v6463_v0  ;;  %v6455_v22 = vmax.f32 %v6439_v13, 0.0 }
 0x642   : > { %15629 = vmatmul.mubr.bf16.gmra.mxu0 %v6464_v32  ;;  %15661 = vmatmul.mubr.bf16.vlgmr.msra.gmra.mxu1 %v6464_v32 }
 0x643   : > { %v6440_v53 = vadd.f32 %v18540_v55, %v6416_v41  ;;  %15645 = vmatpush3.bf16.msra.mxu0 %v18500_v8  ;;  %v6458_v42 = vmax.f32 %v6442_v34, 0.0 }
 0x644   : > { %15646 = vmatprep.subr.bf16.mxu0 %v18509_v16 }
 0x645   : > { %v6456_v38 = vmax.f32 %v6440_v53, 0.0  ;;  %v6466_v12 = vpack.c.bf16 %v6458_v42, %v6457_v44 }
 0x647   : > { %15647 = vmatpush3.bf16.msra.mxu0 %v18509_v16  ;;  %v6465_v54 = vpack.c.bf16 %v6456_v38, %v6455_v22 }
 0x648   : > { %15648 = vmatprep.subr.bf16.mxu0 %v18515_v46 }
 0x649   : > { %15632 = vmatprep.mubr.bf16.mxu0 %v6465_v54  ;;  %15664 = vmatprep.mubr.bf16.mxu1 %v6465_v54 }
 0x64a   : > { %15633 = vmatmul.mubr.bf16.gmra.mxu0 %v6466_v12  ;;  %15665 = vmatmul.mubr.bf16.gmra.mxu1 %v6466_v12 }
 0x64b   : > { %15649 = vmatpush3.bf16.msra.mxu0 %v18515_v46  ;;  %15652 = vmatprep.mubr.bf16.mxu0 %v18546_v33 }
 0x64c   : > { %15650 = vmatprep.subr.bf16.mxu0 %v18523_v45 }
 0x64f   : > { %15651 = vmatpush3.bf16.msra.mxu0 %v18523_v45 }
 0x652   : > { %15653 = vmatmul.mubr.bf16.vlgmr.msra.gmra.mxu0 %v18548_v58 }
 0x653   : > { %15656 = vmatprep.mubr.bf16.mxu0 %v6461_v5 }
 0x65a   : > { %15657 = vmatmul.mubr.bf16.gmra.mxu0 %v6462_v17 }
 0x6f2   : > { %v18586_v8 = vpop.f32.mrf.mxu0 }
 0x6f4   : > { %v18588_v16 = vpop.f32.mrf.mxu0 }
 0x6f6   : > { %v18590_v55 = vpop.f32.mrf.mxu0 }
 0x6f8   : > { %v18592_v9 = vpop.f32.mrf.mxu0 }
 0x6fa   : > { %v18594_v11 = vpop.f32.mrf.mxu0 }
 0x6fc   : > { %v18596_v46 = vpop.f32.mrf.mxu0 }
 0x6fe   : > { %v18598_v33 = vpop.f32.mrf.mxu0 }
 0x700   : > { %v18600_v61 = vpop.f32.mrf.mxu0 }
 0x702   : > { %v15630_v45 = vpop.f32.mrf.mxu0  ;;  %v15662_v58 = vpop.f32.mrf.mxu1 }
 0x703   : > { %v6800_v35 = vmax.f32 %v15630_v45, %v15662_v58 }
 0x704   : > { %v6597_v14 = vpop.f32.mrf.mxu0  ;;  %v6759_v63 = vpop.f32.mrf.mxu1 }
 0x705   : > { %v6992_v20 = vcombine.high %v6800_v35, %v6800_v35  ;;  %v6999_v23 = vrot.slane %v6800_v35, %v17799_v49  ;;  %v6798_v15 = vmax.f32 %v6597_v14, %v6759_v63 }
 0x706   : > { %v15631_v21 = vpop.f32.mrf.mxu0  ;;  %v15663_v59 = vpop.f32.mrf.mxu1 }
 0x707   : > { %v7006_v60 = vrot.slane %v6992_v20, %v17799_v49  ;;  %v7007_v27 = vcombine.high %v6999_v23, %v6999_v23  ;;  %v7438_v39 = vsel %vm4031_vm3, %v6999_v23, -inf  ;;  %v6958_v26 = vcombine.high %v6798_v15, %v6798_v15 }
 0x708   : > { %v7439_v62 = vrot.slane %v7438_v39, 4  ;;  %v6965_v31 = vrot.slane %v6798_v15, %v17799_v49  ;;  %v6801_v5 = vmax.f32 %v15631_v21, %v15663_v59 }
 0x709   : > { %v7008_v10 = vcombine.high %v7006_v60, %v7006_v60  ;;  %v7445_v17 = vsel %vm4031_vm3, %v7007_v27, -inf  ;;  %v7452_v2 = vsel %vm4031_vm3, %v7006_v60, -inf  ;;  %v6972_v29 = vrot.slane %v6958_v26, %v17799_v49 }
 0x70a   : > { %v7440_v1 = vmax.f32 %v7438_v39, %v7439_v62  ;;  %v7446_v48 = vrot.slane %v7445_v17, 4  ;;  %v7453_v56 = vrot.slane %v7452_v2, 4  ;;  %v6973_v50 = vcombine.high %v6965_v31, %v6965_v31 }
 0x70b   : > { %v7459_v3 = vsel %vm4031_vm3, %v7008_v10, -inf  ;;  %v6974_v30 = vcombine.high %v6972_v29, %v6972_v29  ;;  %v7382_v57 = vsel %vm4031_vm3, %v6965_v31, -inf  ;;  %v7396_v19 = vsel %vm4031_vm3, %v6972_v29, -inf  ;;  %v6600_v31 = vpop.f32.mrf.mxu0  ;;  %v6762_v10 = vpop.f32.mrf.mxu1 }
 0x70c   : > { %v7441_v25 = vrot.slane %v7440_v1, 2  ;;  %v7447_v6 = vmax.f32 %v7445_v17, %v7446_v48  ;;  %v7454_v47 = vmax.f32 %v7452_v2, %v7453_v56  ;;  %v7460_v40 = vrot.slane %v7459_v3, 4 }
 0x70d   : > { %v7383_v51 = vrot.slane %v7382_v57, 4  ;;  %v7389_v18 = vsel %vm4031_vm3, %v6973_v50, -inf  ;;  %v7397_v36 = vrot.slane %v7396_v19, 4  ;;  %v7403_v52 = vsel %vm4031_vm3, %v6974_v30, -inf }
 0x70e   : > { %v7442_v37 = vmax.f32 %v7440_v1, %v7441_v25  ;;  %v7448_v28 = vrot.slane %v7447_v6, 2  ;;  %v7455_v24 = vrot.slane %v7454_v47, 2  ;;  %v7461_v0 = vmax.f32 %v7459_v3, %v7460_v40 }
 0x70f   : > { %v7384_v32 = vmax.f32 %v7382_v57, %v7383_v51  ;;  %v7390_v43 = vrot.slane %v7389_v18, 4  ;;  %v7398_v13 = vmax.f32 %v7396_v19, %v7397_v36  ;;  %v7404_v34 = vrot.slane %v7403_v52, 4 }
 0x710   : > { %v7443_v41 = vrot.slane %v7442_v37, 1  ;;  %v7449_v7 = vmax.f32 %v7447_v6, %v7448_v28  ;;  %v7456_v53 = vmax.f32 %v7454_v47, %v7455_v24  ;;  %v7462_v42 = vrot.slane %v7461_v0, 2 }
 0x711   : > { %v7385_v22 = vrot.slane %v7384_v32, 2  ;;  %v7391_v38 = vmax.f32 %v7389_v18, %v7390_v43  ;;  %v7399_v44 = vrot.slane %v7398_v13, 2  ;;  %v7405_v54 = vmax.f32 %v7403_v52, %v7404_v34  ;;  %v15666_v18 = vpop.f32.mrf.mxu1  ;;  %v16438_v34 = vld [vmem:[%s20199_s25 + $0x18] sm:$0xff]  }
 0x712   : > { %v7444_v12 = vmax.f32 %v7442_v37, %v7443_v41  ;;  %v7450_v45 = vrot.slane %v7449_v7, 1  ;;  %v7457_v58 = vrot.slane %v7456_v53, 1  ;;  %v7463_v35 = vmax.f32 %v7461_v0, %v7462_v42  ;;  %15684 = vmatprep.subr.bf16.mxu1 %v16438_v34 }
 0x713   : > { %v7386_v14 = vmax.f32 %v7384_v32, %v7385_v22  ;;  %v7392_v63 = vrot.slane %v7391_v38, 2  ;;  %v7400_v20 = vmax.f32 %v7398_v13, %v7399_v44  ;;  %v7406_v23 = vrot.slane %v7405_v54, 2  ;;  %v16437_v13 = vld [vmem:[%s20198_s28 + $0x38] sm:$0xff]   ;;  %15685 = vmatpush3.bf16.msra.mxu1 %v16438_v34 }
 0x714   : > { %v7451_v15 = vmax.f32 %v7449_v7, %v7450_v45  ;;  %v7458_v21 = vmax.f32 %v7456_v53, %v7457_v58  ;;  %v7464_v59 = vrot.slane %v7463_v35, 1  ;;  %v7009_v60 = vcombine.high %v6801_v5, %v6801_v5  ;;  %15668 = vmatprep.subr.bf16.mxu0 %v16437_v13 }
 0x715   : > { %v7387_v27 = vrot.slane %v7386_v14, 1  ;;  %v7393_v39 = vmax.f32 %v7391_v38, %v7392_v63  ;;  %v7401_v26 = vrot.slane %v7400_v20, 1  ;;  %v7407_v62 = vmax.f32 %v7405_v54, %v7406_v23  ;;  %15669 = vmatpush3.bf16.msra.mxu0 %v16437_v13 }
 0x716   : > { %v7465_v17 = vmax.f32 %v7463_v35, %v7464_v59  ;;  %v7721_v2 = vsel %vm5073_vm4, %v7451_v15, %v7444_v12  ;;  %v7016_v29 = vrot.slane %v6801_v5, %v17799_v49  ;;  %v7023_v1 = vrot.slane %v7009_v60, %v17799_v49  ;;  %v15634_v5 = vpop.f32.mrf.mxu0  ;;  %v16439_v15 = vld [vmem:[%s20199_s25 + $0x30] sm:$0xff]  }
 0x717   : > { %v7722_v48 = vsel %vm5075_vm5, %v7458_v21, %v7721_v2  ;;  %v7388_v56 = vmax.f32 %v7386_v14, %v7387_v27  ;;  %v7394_v50 = vrot.slane %v7393_v39, 1  ;;  %v7402_v3 = vmax.f32 %v7400_v20, %v7401_v26  ;;  %v16440_v21 = vld [vmem:[%s20199_s25 + $0x10] sm:$0xff]   ;;  %15670 = vmatprep.subr.bf16.mxu0 %v16439_v15 }
 0x718   : > { %v7408_v30 = vrot.slane %v7407_v62, 1  ;;  %v7024_v57 = vcombine.high %v7016_v29, %v7016_v29  ;;  %v7025_v19 = vcombine.high %v7023_v1, %v7023_v1  ;;  %v7466_v25 = vsel %vm4031_vm3, %v7016_v29, -inf  ;;  %15686 = vmatprep.subr.bf16.mxu1 %v16440_v21 }
 0x719   : > { %v7395_v6 = vmax.f32 %v7393_v39, %v7394_v50  ;;  %v7467_v47 = vrot.slane %v7466_v25, 4  ;;  %v7480_v40 = vsel %vm4031_vm3, %v7023_v1, -inf  ;;  %v18621_v51 = vsel %vm5077_vm6, %v7465_v17, %v7722_v48  ;;  %15671 = vmatpush3.bf16.msra.mxu0 %v16439_v15  ;;  %15687 = vmatpush3.bf16.msra.mxu1 %v16440_v21  ;;  %v16441_v48 = vld [vmem:[%s20199_s25 + $0x28] sm:$0xff]  }
 0x71a   : > { %v7409_v36 = vmax.f32 %v7407_v62, %v7408_v30  ;;  %v7473_v52 = vsel %vm4031_vm3, %v7024_v57, -inf  ;;  %v7481_v37 = vrot.slane %v7480_v40, 4  ;;  %v7487_v28 = vsel %vm4031_vm3, %v7025_v19, -inf  ;;  %v16443_v19 = vld [vmem:[%s20199_s25 + $0x20] sm:$0xff]   ;;  %15672 = vmatprep.subr.bf16.mxu0 %v16441_v48 }
 0x71b   : > { %v7714_v24 = vsel %vm5073_vm4, %v7395_v6, %v7388_v56  ;;  %v7468_v0 = vmax.f32 %v7466_v25, %v7467_v47  ;;  %v7474_v32 = vrot.slane %v7473_v52, 4  ;;  %v7488_v43 = vrot.slane %v7487_v28, 4  ;;  %v16442_v56 = vld [vmem:[%s20199_s25 + $0x8] sm:$0xff]   ;;  %v16444_v25 = vld [vmem:[%s20199_s25] sm:$0xff]  }
 0x71c   : > { %v7715_v41 = vsel %vm5075_vm5, %v7402_v3, %v7714_v24  ;;  %v7482_v7 = vmax.f32 %v7480_v40, %v7481_v37  ;;  %v6799_v53 = vmax.f32 %v6600_v31, %v6762_v10  ;;  %v6804_v42 = vmax.f32 %v15634_v5, %v15666_v18  ;;  %15688 = vmatprep.subr.bf16.mxu1 %v16442_v56 }
 0x71d   : > { %v7469_v22 = vrot.slane %v7468_v0, 2  ;;  %v7475_v38 = vmax.f32 %v7473_v52, %v7474_v32  ;;  %v7489_v44 = vmax.f32 %v7487_v28, %v7488_v43  ;;  %v18634_v54 = vsel %vm5077_vm6, %v7409_v36, %v7715_v41  ;;  %15673 = vmatpush3.bf16.msra.mxu0 %v16441_v48  ;;  %15689 = vmatpush3.bf16.msra.mxu1 %v16442_v56 }
 0x71e   : > { %v7483_v12 = vrot.slane %v7482_v7, 2  ;;  %v6975_v45 = vcombine.high %v6799_v53, %v6799_v53  ;;  %v6982_v58 = vrot.slane %v6799_v53, %v17799_v49  ;;  %v7060_v35 = vcombine.high %v6804_v42, %v6804_v42  ;;  %15674 = vmatprep.subr.bf16.mxu0 %v16443_v19  ;;  %15690 = vmatprep.subr.bf16.mxu1 %v16444_v25 }
 0x71f   : > { %v7470_v14 = vmax.f32 %v7468_v0, %v7469_v22  ;;  %v7476_v63 = vrot.slane %v7475_v38, 2  ;;  %v7490_v20 = vrot.slane %v7489_v44, 2  ;;  %v18638_v23 = vrot.slane %v6804_v42, %v17799_v49 }
 0x720   : > { %v7484_v59 = vmax.f32 %v7482_v7, %v7483_v12  ;;  %v6989_v60 = vrot.slane %v6975_v45, %v17799_v49  ;;  %v6990_v27 = vcombine.high %v6982_v58, %v6982_v58  ;;  %v7410_v39 = vsel %vm4031_vm3, %v6982_v58, -inf  ;;  %v6613_v45 = vpop.f32.mrf.mxu0  ;;  %v6775_v58 = vpop.f32.mrf.mxu1 }
 0x721   : > { %v7471_v26 = vrot.slane %v7470_v14, 1  ;;  %v7477_v62 = vmax.f32 %v7475_v38, %v7476_v63  ;;  %v7491_v31 = vmax.f32 %v7489_v44, %v7490_v20  ;;  %v7411_v10 = vrot.slane %v7410_v39, 4  ;;  %15675 = vmatpush3.bf16.msra.mxu0 %v16443_v19  ;;  %15691 = vmatpush3.bf16.msra.mxu1 %v16444_v25 }
 0x722   : > { %v7485_v17 = vrot.slane %v7484_v59, 1  ;;  %v6991_v2 = vcombine.high %v6989_v60, %v6989_v60  ;;  %v7417_v29 = vsel %vm4031_vm3, %v6990_v27, -inf  ;;  %v7424_v1 = vsel %vm4031_vm3, %v6989_v60, -inf  ;;  %v16445_v60 = vld [vmem:[%s20199_s25 + $0x58] sm:$0xff]  }
 0x723   : > { %v7472_v50 = vmax.f32 %v7470_v14, %v7471_v26  ;;  %v7478_v3 = vrot.slane %v7477_v62, 1  ;;  %v7492_v30 = vrot.slane %v7491_v31, 1  ;;  %v7412_v57 = vmax.f32 %v7410_v39, %v7411_v10  ;;  %15700 = vmatprep.subr.bf16.mxu0 %v16445_v60 }
 0x724   : > { %v7486_v6 = vmax.f32 %v7484_v59, %v7485_v17  ;;  %v7418_v47 = vrot.slane %v7417_v29, 4  ;;  %v7425_v40 = vrot.slane %v7424_v1, 4  ;;  %v7431_v5 = vsel %vm4031_vm3, %v6991_v2, -inf }
 0x725   : > { %v7479_v18 = vmax.f32 %v7477_v62, %v7478_v3  ;;  %v7493_v36 = vmax.f32 %v7491_v31, %v7492_v30  ;;  %v7724_v52 = vsel %vm5079_vm7, %v7472_v50, %v18621_v51  ;;  %v7413_v37 = vrot.slane %v7412_v57, 2 }
 0x726   : > { %v7419_v28 = vmax.f32 %v7417_v29, %v7418_v47  ;;  %v7426_v24 = vmax.f32 %v7424_v1, %v7425_v40  ;;  %v7432_v0 = vrot.slane %v7431_v5, 4  ;;  %v7074_v32 = vrot.slane %v7060_v35, %v17799_v49  ;;  %v15635_v29 = vpop.f32.mrf.mxu0  ;;  %v15667_v1 = vpop.f32.mrf.mxu1 }
 0x727   : > { %v7725_v43 = vsel %vm5081_vm8, %v7479_v18, %v7724_v52  ;;  %v7414_v13 = vmax.f32 %v7412_v57, %v7413_v37  ;;  %v7075_v34 = vcombine.high %v18638_v23, %v18638_v23  ;;  %v7550_v41 = vsel %vm4031_vm3, %v18638_v23, -inf }
 0x728   : > { %v7726_v51 = vsel %vm5083_vm9, %v7486_v6, %v7725_v43  ;;  %v7420_v7 = vrot.slane %v7419_v28, 2  ;;  %v7427_v53 = vrot.slane %v7426_v24, 2  ;;  %v7433_v42 = vmax.f32 %v7431_v5, %v7432_v0 }
 0x729   : > { %v7727_v22 = vsel %vm5085_vm10, %v7493_v36, %v7726_v51  ;;  %v7415_v38 = vrot.slane %v7414_v13, 1  ;;  %v7076_v44 = vcombine.high %v7074_v32, %v7074_v32  ;;  %v7551_v12 = vrot.slane %v7550_v41, 4 }
 0x72a   : > { %7755 = vst.msk [vmem:[#allocation2 + $0xc9] sm:$0xff] %vm5208_vm11, %v7727_v22  ;;  %v7421_v35 = vmax.f32 %v7419_v28, %v7420_v7  ;;  %v7428_v14 = vmax.f32 %v7426_v24, %v7427_v53  ;;  %v7434_v63 = vrot.slane %v7433_v42, 2  ;;  %v7557_v20 = vsel %vm4031_vm3, %v7075_v34, -inf }
 0x72b   : > { %v7416_v23 = vmax.f32 %v7414_v13, %v7415_v38  ;;  %v7552_v15 = vmax.f32 %v7550_v41, %v7551_v12  ;;  %v7558_v21 = vrot.slane %v7557_v20, 4  ;;  %v7564_v59 = vsel %vm4031_vm3, %v7074_v32, -inf }
 0x72c   : > { %v7422_v27 = vrot.slane %v7421_v35, 1  ;;  %v7429_v39 = vrot.slane %v7428_v14, 1  ;;  %v7435_v26 = vmax.f32 %v7433_v42, %v7434_v63  ;;  %v7565_v62 = vrot.slane %v7564_v59, 4 }
 0x72d   : > { %v7717_v31 = vsel %vm5079_vm7, %v7416_v23, %v18634_v54  ;;  %v7553_v10 = vrot.slane %v7552_v15, 2  ;;  %v7559_v17 = vmax.f32 %v7557_v20, %v7558_v21  ;;  %v7571_v2 = vsel %vm4031_vm3, %v7076_v44, -inf }
 0x72e   : > { %v7423_v48 = vmax.f32 %v7421_v35, %v7422_v27  ;;  %v7430_v56 = vmax.f32 %v7428_v14, %v7429_v39  ;;  %v7436_v50 = vrot.slane %v7435_v26, 1  ;;  %v7566_v3 = vmax.f32 %v7564_v59, %v7565_v62 }
 0x72f   : > { %v7554_v30 = vmax.f32 %v7552_v15, %v7553_v10  ;;  %v7560_v57 = vrot.slane %v7559_v17, 2  ;;  %v7572_v19 = vrot.slane %v7571_v2, 4  ;;  %v6802_v25 = vmax.f32 %v6613_v45, %v6775_v58 }
 0x730   : > { %v7437_v6 = vmax.f32 %v7435_v26, %v7436_v50  ;;  %v7718_v47 = vsel %vm5081_vm8, %v7423_v48, %v7717_v31  ;;  %v7567_v40 = vrot.slane %v7566_v3, 2  ;;  %v6805_v54 = vmax.f32 %v15635_v29, %v15667_v1 }
 0x731   : > { %v7719_v5 = vsel %vm5083_vm9, %v7430_v56, %v7718_v47  ;;  %v7555_v18 = vrot.slane %v7554_v30, 1  ;;  %v7561_v36 = vmax.f32 %v7559_v17, %v7560_v57  ;;  %v7573_v52 = vmax.f32 %v7571_v2, %v7572_v19  ;;  %v18684_v37 = vld [vmem:[#allocation2 + $0xc8] sm:$0xff] }
 0x732   : > { %v18686_v28 = vld [vmem:[#allocation2 + $0xca] sm:$0xff]  ;;  %v7720_v24 = vsel %vm5085_vm10, %v7437_v6, %v7719_v5  ;;  %v7568_v0 = vmax.f32 %v7566_v3, %v7567_v40  ;;  %v7026_v32 = vcombine.high %v6802_v25, %v6802_v25  ;;  %v7033_v43 = vrot.slane %v6802_v25, %v17799_v49  ;;  %8160 = vst [vmem:[#allocation2 + $0xc8] sm:$0x1] %v20196_v4 }
 0x733   : > { %8168 = vst [vmem:[#allocation2 + $0xd1] sm:$0x1] %v20196_v4  ;;  %7754 = vst.msk [vmem:[#allocation2 + $0xa1] sm:$0xff] %vm5208_vm11, %v7720_v24  ;;  %v7556_v13 = vmax.f32 %v7554_v30, %v7555_v18  ;;  %v7562_v34 = vrot.slane %v7561_v36, 1  ;;  %v7574_v41 = vrot.slane %v7573_v52, 2  ;;  %v7077_v51 = vcombine.high %v6805_v54, %v6805_v54 }
 0x734   : > { %v7569_v7 = vrot.slane %v7568_v0, 1  ;;  %v7040_v53 = vrot.slane %v7026_v32, %v17799_v49  ;;  %v7041_v42 = vcombine.high %v7033_v43, %v7033_v43  ;;  %v7494_v22 = vsel %vm4031_vm3, %v7033_v43, -inf }
 0x735   : > { %v7563_v38 = vmax.f32 %v7561_v36, %v7562_v34  ;;  %v7575_v44 = vmax.f32 %v7573_v52, %v7574_v41  ;;  %v7495_v12 = vrot.slane %v7494_v22, 4  ;;  %v7084_v45 = vrot.slane %v6805_v54, %v17799_v49  ;;  %v6616_v41 = vpop.f32.mrf.mxu0 }
 0x736   : > { %v7570_v58 = vmax.f32 %v7568_v0, %v7569_v7  ;;  %v7042_v35 = vcombine.high %v7040_v53, %v7040_v53  ;;  %v7501_v14 = vsel %vm4031_vm3, %v7041_v42, -inf  ;;  %v7508_v63 = vsel %vm4031_vm3, %v7040_v53, -inf }
 0x737   : > { %v7576_v20 = vrot.slane %v7575_v44, 1  ;;  %v7735_v23 = vsel %vm5073_vm4, %v7563_v38, %v7556_v13  ;;  %v7496_v15 = vmax.f32 %v7494_v22, %v7495_v12  ;;  %v7502_v21 = vrot.slane %v7501_v14, 4  ;;  %v6778_v22 = vpop.f32.mrf.mxu1 }
 0x738   : > { %v7736_v59 = vsel %vm5075_vm5, %v7570_v58, %v7735_v23  ;;  %v7509_v60 = vrot.slane %v7508_v63, 4  ;;  %v7515_v27 = vsel %vm4031_vm3, %v7042_v35, -inf  ;;  %v7091_v39 = vrot.slane %v7077_v51, %v17799_v49 }
 0x739   : > { %v7577_v26 = vmax.f32 %v7575_v44, %v7576_v20  ;;  %v7497_v62 = vrot.slane %v7496_v15, 2  ;;  %v7503_v31 = vmax.f32 %v7501_v14, %v7502_v21  ;;  %v7516_v10 = vrot.slane %v7515_v27, 4 }
 0x73a   : > { %v7510_v17 = vmax.f32 %v7508_v63, %v7509_v60  ;;  %v7092_v2 = vcombine.high %v7084_v45, %v7084_v45  ;;  %v7093_v29 = vcombine.high %v7091_v39, %v7091_v39  ;;  %v7578_v1 = vsel %vm4031_vm3, %v7084_v45, -inf  ;;  %v18703_v48 = vld [vmem:[#allocation2 + $0xa0] sm:$0xff]  ;;  %v15654_v60 = vpop.f32.mrf.mxu0 }
 0x73b   : > { %v18705_v56 = vld [vmem:[#allocation2 + $0xa2] sm:$0xff]  ;;  %v7498_v50 = vmax.f32 %v7496_v15, %v7497_v62  ;;  %v7504_v3 = vrot.slane %v7503_v31, 2  ;;  %v7517_v30 = vmax.f32 %v7515_v27, %v7516_v10  ;;  %v7579_v57 = vrot.slane %v7578_v1, 4  ;;  %8159 = vst [vmem:[#allocation2 + $0xa0] sm:$0x1] %v20196_v4 }
 0x73c   : > { %8167 = vst [vmem:[#allocation2 + $0xa9] sm:$0x1] %v20196_v4  ;;  %v7511_v19 = vrot.slane %v7510_v17, 2  ;;  %v7585_v25 = vsel %vm4031_vm3, %v7092_v2, -inf  ;;  %v7592_v6 = vsel %vm4031_vm3, %v7091_v39, -inf  ;;  %v7599_v47 = vsel %vm4031_vm3, %v7093_v29, -inf }
 0x73d   : > { %v7499_v40 = vrot.slane %v7498_v50, 1  ;;  %v7505_v54 = vmax.f32 %v7503_v31, %v7504_v3  ;;  %v7518_v5 = vrot.slane %v7517_v30, 2  ;;  %v7580_v18 = vmax.f32 %v7578_v1, %v7579_v57 }
 0x73e   : > { %v7512_v36 = vmax.f32 %v7510_v17, %v7511_v19  ;;  %v7586_v52 = vrot.slane %v7585_v25, 4  ;;  %v7593_v24 = vrot.slane %v7592_v6, 4  ;;  %v7600_v0 = vrot.slane %v7599_v47, 4 }
 0x73f   : > { %v7500_v32 = vmax.f32 %v7498_v50, %v7499_v40  ;;  %v7506_v43 = vrot.slane %v7505_v54, 1  ;;  %v7519_v13 = vmax.f32 %v7517_v30, %v7518_v5  ;;  %v7581_v34 = vrot.slane %v7580_v18, 2 }
 0x740   : > { %v7513_v51 = vrot.slane %v7512_v36, 1  ;;  %v7587_v7 = vmax.f32 %v7585_v25, %v7586_v52  ;;  %v7594_v53 = vmax.f32 %v7592_v6, %v7593_v24  ;;  %v7601_v42 = vmax.f32 %v7599_v47, %v7600_v0 }
 0x741   : > { %v7507_v38 = vmax.f32 %v7505_v54, %v7506_v43  ;;  %v7520_v44 = vrot.slane %v7519_v13, 1  ;;  %v7582_v12 = vmax.f32 %v7580_v18, %v7581_v34  ;;  %v7737_v45 = vsel %vm5077_vm6, %v7577_v26, %v7736_v59 }
 0x742   : > { %v7514_v58 = vmax.f32 %v7512_v36, %v7513_v51  ;;  %v7588_v35 = vrot.slane %v7587_v7, 2  ;;  %v7595_v14 = vrot.slane %v7594_v53, 2  ;;  %v7602_v63 = vrot.slane %v7601_v42, 2 }
 0x743   : > { %v7521_v20 = vmax.f32 %v7519_v13, %v7520_v44  ;;  %v7728_v23 = vsel %vm5073_vm4, %v7507_v38, %v7500_v32  ;;  %v7583_v15 = vrot.slane %v7582_v12, 1  ;;  %v6803_v21 = vmax.f32 %v6616_v41, %v6778_v22 }
 0x744   : > { %v7729_v27 = vsel %vm5075_vm5, %v7514_v58, %v7728_v23  ;;  %v7589_v39 = vmax.f32 %v7587_v7, %v7588_v35  ;;  %v7596_v62 = vmax.f32 %v7594_v53, %v7595_v14  ;;  %v7603_v31 = vmax.f32 %v7601_v42, %v7602_v63 }
 0x745   : > { %v7584_v10 = vmax.f32 %v7582_v12, %v7583_v15  ;;  %v7043_v17 = vcombine.high %v6803_v21, %v6803_v21  ;;  %v7050_v2 = vrot.slane %v6803_v21, %v17799_v49  ;;  %v18717_v59 = vsel %vm5077_vm6, %v7521_v20, %v7729_v27  ;;  %v6727_v15 = vpop.f32.mrf.mxu0 }
 0x746   : > { %v7590_v26 = vrot.slane %v7589_v39, 1  ;;  %v7597_v29 = vrot.slane %v7596_v62, 1  ;;  %v7604_v1 = vrot.slane %v7603_v31, 1  ;;  %v6792_v50 = vmax.f32 %v18586_v8, %v15654_v60 }
 0x747   : > { %v7738_v3 = vsel %vm5079_vm7, %v7584_v10, %v7737_v45  ;;  %v7057_v30 = vrot.slane %v7043_v17, %v17799_v49  ;;  %v7058_v57 = vcombine.high %v7050_v2, %v7050_v2  ;;  %v7522_v19 = vsel %vm4031_vm3, %v7050_v2, -inf }
 0x748   : > { %v7591_v25 = vmax.f32 %v7589_v39, %v7590_v26  ;;  %v7598_v6 = vmax.f32 %v7596_v62, %v7597_v29  ;;  %v7605_v47 = vmax.f32 %v7603_v31, %v7604_v1  ;;  %v7523_v40 = vrot.slane %v7522_v19, 4 }
 0x749   : > { %v7059_v54 = vcombine.high %v7057_v30, %v7057_v30  ;;  %v7529_v5 = vsel %vm4031_vm3, %v7058_v57, -inf  ;;  %v7536_v18 = vsel %vm4031_vm3, %v7057_v30, -inf  ;;  %v6856_v36 = vcombine.high %v6792_v50, %v6792_v50 }
 0x74a   : > { %v7739_v52 = vsel %vm5081_vm8, %v7591_v25, %v7738_v3  ;;  %v7524_v8 = vmax.f32 %v7522_v19, %v7523_v40  ;;  %v7530_v24 = vrot.slane %v7529_v5, 4  ;;  %v7537_v0 = vrot.slane %v7536_v18, 4  ;;  %v15655_v19 = vpop.f32.mrf.mxu0 }
 0x74b   : > { %v7740_v32 = vsel %vm5083_vm9, %v7598_v6, %v7739_v52  ;;  %v7543_v43 = vsel %vm4031_vm3, %v7059_v54, -inf  ;;  %v6863_v13 = vrot.slane %v6792_v50, %v17799_v49  ;;  %v6870_v34 = vrot.slane %v6856_v36, %v17799_v49 }
 0x74c   : > { %v7741_v41 = vsel %vm5085_vm10, %v7605_v47, %v7740_v32  ;;  %v7525_v51 = vrot.slane %v7524_v8, 2  ;;  %v7531_v7 = vmax.f32 %v7529_v5, %v7530_v24  ;;  %v7538_v53 = vmax.f32 %v7536_v18, %v7537_v0 }
 0x74d   : > { %7757 = vst.msk [vmem:[#allocation2 + $0x119] sm:$0xff] %vm5208_vm11, %v7741_v41  ;;  %v7544_v42 = vrot.slane %v7543_v43, 4  ;;  %v6871_v22 = vcombine.high %v6863_v13, %v6863_v13  ;;  %v6872_v38 = vcombine.high %v6870_v34, %v6870_v34  ;;  %v7214_v44 = vsel %vm4031_vm3, %v6863_v13, -inf }
 0x74e   : > { %v7526_v12 = vmax.f32 %v7524_v8, %v7525_v51  ;;  %v7532_v45 = vrot.slane %v7531_v7, 2  ;;  %v7539_v58 = vrot.slane %v7538_v53, 2  ;;  %v7215_v35 = vrot.slane %v7214_v44, 4 }
 0x74f   : > { %v7545_v14 = vmax.f32 %v7543_v43, %v7544_v42  ;;  %v7221_v63 = vsel %vm4031_vm3, %v6871_v22, -inf  ;;  %v7228_v20 = vsel %vm4031_vm3, %v6870_v34, -inf  ;;  %v7235_v23 = vsel %vm4031_vm3, %v6872_v38, -inf }
 0x750   : > { %v7527_v21 = vrot.slane %v7526_v12, 1  ;;  %v7533_v60 = vmax.f32 %v7531_v7, %v7532_v45  ;;  %v7540_v27 = vmax.f32 %v7538_v53, %v7539_v58  ;;  %v7216_v39 = vmax.f32 %v7214_v44, %v7215_v35 }
 0x751   : > { %v7546_v62 = vrot.slane %v7545_v14, 2  ;;  %v7222_v31 = vrot.slane %v7221_v63, 4  ;;  %v7229_v10 = vrot.slane %v7228_v20, 4  ;;  %v7236_v17 = vrot.slane %v7235_v23, 4 }
 0x752   : > { %v7528_v2 = vmax.f32 %v7526_v12, %v7527_v21  ;;  %v7534_v26 = vrot.slane %v7533_v60, 1  ;;  %v7541_v29 = vrot.slane %v7540_v27, 1  ;;  %v7217_v1 = vrot.slane %v7216_v39, 2 }
 0x753   : > { %v7547_v50 = vmax.f32 %v7545_v14, %v7546_v62  ;;  %v7223_v3 = vmax.f32 %v7221_v63, %v7222_v31  ;;  %v7230_v30 = vmax.f32 %v7228_v20, %v7229_v10  ;;  %v7237_v57 = vmax.f32 %v7235_v23, %v7236_v17 }
 0x754   : > { %v7535_v25 = vmax.f32 %v7533_v60, %v7534_v26  ;;  %v7542_v6 = vmax.f32 %v7540_v27, %v7541_v29  ;;  %v7731_v47 = vsel %vm5079_vm7, %v7528_v2, %v18717_v59  ;;  %v7218_v40 = vmax.f32 %v7216_v39, %v7217_v1  ;;  %v18738_v54 = vld [vmem:[#allocation2 + $0x118] sm:$0xff] }
 0x755   : > { %v18740_v5 = vld [vmem:[#allocation2 + $0x11a] sm:$0xff]  ;;  %v7548_v18 = vrot.slane %v7547_v50, 1  ;;  %v7224_v36 = vrot.slane %v7223_v3, 2  ;;  %v7231_v52 = vrot.slane %v7230_v30, 2  ;;  %v7238_v8 = vrot.slane %v7237_v57, 2 }
 0x756   : > { %8162 = vst [vmem:[#allocation2 + $0x118] sm:$0x1] %v20196_v4  ;;  %8170 = vst [vmem:[#allocation2 + $0x121] sm:$0x1] %v20196_v4  ;;  %v7732_v24 = vsel %vm5081_vm8, %v7535_v25, %v7731_v47  ;;  %v7219_v0 = vrot.slane %v7218_v40, 1  ;;  %v6790_v32 = vmax.f32 %v18588_v16, %v6727_v15  ;;  %v6793_v59 = vmax.f32 %v18590_v55, %v15655_v19 }
 0x757   : > { %v7549_v43 = vmax.f32 %v7547_v50, %v7548_v18  ;;  %v7733_v13 = vsel %vm5083_vm9, %v7542_v6, %v7732_v24  ;;  %v7225_v34 = vmax.f32 %v7223_v3, %v7224_v36  ;;  %v7232_v41 = vmax.f32 %v7230_v30, %v7231_v52 }
 0x758   : > { %v7220_v51 = vmax.f32 %v7218_v40, %v7219_v0  ;;  %v7239_v7 = vmax.f32 %v7237_v57, %v7238_v8  ;;  %v6822_v53 = vcombine.high %v6790_v32, %v6790_v32  ;;  %v6829_v42 = vrot.slane %v6790_v32, %v17799_v49 }
 0x759   : > { %v7734_v22 = vsel %vm5085_vm10, %v7549_v43, %v7733_v13  ;;  %v7226_v38 = vrot.slane %v7225_v34, 1  ;;  %v7233_v44 = vrot.slane %v7232_v41, 1  ;;  %v6873_v12 = vcombine.high %v6793_v59, %v6793_v59 }
 0x75a   : > { %7756 = vst.msk [vmem:[#allocation2 + $0xf1] sm:$0xff] %vm5208_vm11, %v7734_v22  ;;  %v7240_v16 = vrot.slane %v7239_v7, 1  ;;  %v6836_v55 = vrot.slane %v6822_v53, %v17799_v49  ;;  %v6837_v45 = vcombine.high %v6829_v42, %v6829_v42  ;;  %v7158_v58 = vsel %vm4031_vm3, %v6829_v42, -inf }
 0x75b   : > { %v7227_v35 = vmax.f32 %v7225_v34, %v7226_v38  ;;  %v7234_v14 = vmax.f32 %v7232_v41, %v7233_v44  ;;  %v7159_v63 = vrot.slane %v7158_v58, 4  ;;  %v6880_v20 = vrot.slane %v6793_v59, %v17799_v49  ;;  %v6730_v59 = vpop.f32.mrf.mxu0 }
 0x75c   : > { %v7241_v23 = vmax.f32 %v7239_v7, %v7240_v16  ;;  %v6838_v15 = vcombine.high %v6836_v55, %v6836_v55  ;;  %v7165_v21 = vsel %vm4031_vm3, %v6837_v45, -inf  ;;  %v7172_v60 = vsel %vm4031_vm3, %v6836_v55, -inf }
 0x75d   : > { %v7693_v27 = vsel %vm5073_vm4, %v7227_v35, %v7220_v51  ;;  %v7160_v39 = vmax.f32 %v7158_v58, %v7159_v63  ;;  %v7166_v62 = vrot.slane %v7165_v21, 4  ;;  %v7173_v31 = vrot.slane %v7172_v60, 4  ;;  %v15658_v35 = vpop.f32.mrf.mxu0 }
 0x75e   : > { %v7694_v10 = vsel %vm5075_vm5, %v7234_v14, %v7693_v27  ;;  %v7179_v17 = vsel %vm4031_vm3, %v6838_v15, -inf  ;;  %v6887_v2 = vrot.slane %v6873_v12, %v17799_v49  ;;  %v6888_v26 = vcombine.high %v6880_v20, %v6880_v20 }
 0x75f   : > { %v7161_v29 = vrot.slane %v7160_v39, 2  ;;  %v7167_v1 = vmax.f32 %v7165_v21, %v7166_v62  ;;  %v7174_v50 = vmax.f32 %v7172_v60, %v7173_v31  ;;  %v7180_v3 = vrot.slane %v7179_v17, 4 }
 0x760   : > { %v6889_v30 = vcombine.high %v6887_v2, %v6887_v2  ;;  %v7242_v57 = vsel %vm4031_vm3, %v6880_v20, -inf  ;;  %v7249_v19 = vsel %vm4031_vm3, %v6888_v26, -inf  ;;  %v7256_v25 = vsel %vm4031_vm3, %v6887_v2, -inf }
 0x761   : > { %v7162_v6 = vmax.f32 %v7160_v39, %v7161_v29  ;;  %v7168_v47 = vrot.slane %v7167_v1, 2  ;;  %v7175_v40 = vrot.slane %v7174_v50, 2  ;;  %v7181_v18 = vmax.f32 %v7179_v17, %v7180_v3  ;;  %v18763_v36 = vld [vmem:[#allocation2 + $0xf0] sm:$0xff] }
 0x762   : > { %v18765_v52 = vld [vmem:[#allocation2 + $0xf2] sm:$0xff]  ;;  %v7243_v8 = vrot.slane %v7242_v57, 4  ;;  %v7250_v24 = vrot.slane %v7249_v19, 4  ;;  %v7257_v0 = vrot.slane %v7256_v25, 4  ;;  %v7263_v32 = vsel %vm4031_vm3, %v6889_v30, -inf }
 0x763   : > { %8161 = vst [vmem:[#allocation2 + $0xf0] sm:$0x1] %v20196_v4  ;;  %8169 = vst [vmem:[#allocation2 + $0xf9] sm:$0x1] %v20196_v4  ;;  %v7163_v43 = vrot.slane %v7162_v6, 1  ;;  %v7169_v13 = vmax.f32 %v7167_v1, %v7168_v47  ;;  %v7176_v34 = vmax.f32 %v7174_v50, %v7175_v40  ;;  %v7182_v41 = vrot.slane %v7181_v18, 2 }
 0x764   : > { %v7244_v51 = vmax.f32 %v7242_v57, %v7243_v8  ;;  %v7251_v7 = vmax.f32 %v7249_v19, %v7250_v24  ;;  %v7258_v53 = vmax.f32 %v7256_v25, %v7257_v0  ;;  %v7264_v42 = vrot.slane %v7263_v32, 4 }
 0x765   : > { %v7164_v22 = vmax.f32 %v7162_v6, %v7163_v43  ;;  %v7170_v38 = vrot.slane %v7169_v13, 1  ;;  %v7177_v44 = vrot.slane %v7176_v34, 1  ;;  %v7183_v12 = vmax.f32 %v7181_v18, %v7182_v41 }
 0x766   : > { %v7245_v16 = vrot.slane %v7244_v51, 2  ;;  %v7252_v55 = vrot.slane %v7251_v7, 2  ;;  %v7259_v45 = vrot.slane %v7258_v53, 2  ;;  %v7265_v58 = vmax.f32 %v7263_v32, %v7264_v42 }
 0x767   : > { %v7171_v14 = vmax.f32 %v7169_v13, %v7170_v38  ;;  %v7178_v63 = vmax.f32 %v7176_v34, %v7177_v44  ;;  %v7184_v20 = vrot.slane %v7183_v12, 1  ;;  %v7695_v15 = vsel %vm5077_vm6, %v7241_v23, %v7694_v10 }
 0x768   : > { %v7246_v21 = vmax.f32 %v7244_v51, %v7245_v16  ;;  %v7253_v60 = vmax.f32 %v7251_v7, %v7252_v55  ;;  %v7260_v27 = vmax.f32 %v7258_v53, %v7259_v45  ;;  %v7266_v39 = vrot.slane %v7265_v58, 2 }
 0x769   : > { %v7185_v62 = vmax.f32 %v7183_v12, %v7184_v20  ;;  %v7686_v31 = vsel %vm5073_vm4, %v7171_v14, %v7164_v22  ;;  %v6791_v17 = vmax.f32 %v18592_v9, %v6730_v59  ;;  %v6796_v2 = vmax.f32 %v18594_v11, %v15658_v35 }
 0x76a   : > { %v7687_v26 = vsel %vm5075_vm5, %v7178_v63, %v7686_v31  ;;  %v7247_v29 = vrot.slane %v7246_v21, 1  ;;  %v7254_v1 = vrot.slane %v7253_v60, 1  ;;  %v7261_v50 = vrot.slane %v7260_v27, 1 }
 0x76b   : > { %v7267_v3 = vmax.f32 %v7265_v58, %v7266_v39  ;;  %v6839_v30 = vcombine.high %v6791_v17, %v6791_v17  ;;  %v6846_v23 = vrot.slane %v6791_v17, %v17799_v49  ;;  %v18777_v10 = vsel %vm5077_vm6, %v7185_v62, %v7687_v26 }
 0x76c   : > { %v7248_v57 = vmax.f32 %v7246_v21, %v7247_v29  ;;  %v7255_v19 = vmax.f32 %v7253_v60, %v7254_v1  ;;  %v7262_v25 = vmax.f32 %v7260_v27, %v7261_v50  ;;  %v6924_v6 = vcombine.high %v6796_v2, %v6796_v2 }
 0x76d   : > { %v7268_v47 = vrot.slane %v7267_v3, 1  ;;  %v6853_v9 = vrot.slane %v6839_v30, %v17799_v49  ;;  %v6854_v11 = vcombine.high %v6846_v23, %v6846_v23  ;;  %v7186_v40 = vsel %vm4031_vm3, %v6846_v23, -inf  ;;  %v6743_v30 = vpop.f32.mrf.mxu0 }
 0x76e   : > { %v7696_v18 = vsel %vm5079_vm7, %v7248_v57, %v7695_v15  ;;  %v7187_v8 = vrot.slane %v7186_v40, 4  ;;  %v6931_v24 = vrot.slane %v6796_v2, %v17799_v49  ;;  %v6938_v0 = vrot.slane %v6924_v6, %v17799_v49 }
 0x76f   : > { %v7269_v32 = vmax.f32 %v7267_v3, %v7268_v47  ;;  %v7697_v59 = vsel %vm5081_vm8, %v7255_v19, %v7696_v18  ;;  %v6855_v43 = vcombine.high %v6853_v9, %v6853_v9  ;;  %v7193_v13 = vsel %vm4031_vm3, %v6854_v11, -inf }
 0x770   : > { %v7698_v34 = vsel %vm5083_vm9, %v7262_v25, %v7697_v59  ;;  %v7188_v41 = vmax.f32 %v7186_v40, %v7187_v8  ;;  %v7194_v51 = vrot.slane %v7193_v13, 4  ;;  %v7200_v7 = vsel %vm4031_vm3, %v6853_v9, -inf }
 0x771   : > { %v7699_v53 = vsel %vm5085_vm10, %v7269_v32, %v7698_v34  ;;  %v7201_v42 = vrot.slane %v7200_v7, 4  ;;  %v7207_v22 = vsel %vm4031_vm3, %v6855_v43, -inf  ;;  %v6939_v38 = vcombine.high %v6931_v24, %v6931_v24 }
 0x772   : > { %7751 = vst.msk [vmem:[#allocation2 + $0x29] sm:$0xff] %vm5208_vm11, %v7699_v53  ;;  %v7189_v44 = vrot.slane %v7188_v41, 2  ;;  %v7195_v12 = vmax.f32 %v7193_v13, %v7194_v51  ;;  %v7208_v16 = vrot.slane %v7207_v22, 4  ;;  %v6940_v55 = vcombine.high %v6938_v0, %v6938_v0 }
 0x773   : > { %v7202_v45 = vmax.f32 %v7200_v7, %v7201_v42  ;;  %v7326_v58 = vsel %vm4031_vm3, %v6931_v24, -inf  ;;  %v7333_v35 = vsel %vm4031_vm3, %v6939_v38, -inf  ;;  %v7340_v14 = vsel %vm4031_vm3, %v6938_v0, -inf }
 0x774   : > { %v7190_v63 = vmax.f32 %v7188_v41, %v7189_v44  ;;  %v7196_v20 = vrot.slane %v7195_v12, 2  ;;  %v7209_v15 = vmax.f32 %v7207_v22, %v7208_v16  ;;  %v7327_v21 = vrot.slane %v7326_v58, 4  ;;  %v15659_v41 = vpop.f32.mrf.mxu0 }
 0x775   : > { %v7203_v60 = vrot.slane %v7202_v45, 2  ;;  %v7334_v27 = vrot.slane %v7333_v35, 4  ;;  %v7341_v39 = vrot.slane %v7340_v14, 4  ;;  %v7347_v62 = vsel %vm4031_vm3, %v6940_v55, -inf }
 0x776   : > { %v7191_v31 = vrot.slane %v7190_v63, 1  ;;  %v7197_v17 = vmax.f32 %v7195_v12, %v7196_v20  ;;  %v7210_v2 = vrot.slane %v7209_v15, 2  ;;  %v7328_v26 = vmax.f32 %v7326_v58, %v7327_v21 }
 0x777   : > { %v7204_v29 = vmax.f32 %v7202_v45, %v7203_v60  ;;  %v7335_v1 = vmax.f32 %v7333_v35, %v7334_v27  ;;  %v7342_v50 = vmax.f32 %v7340_v14, %v7341_v39  ;;  %v7348_v3 = vrot.slane %v7347_v62, 4 }
 0x778   : > { %v7192_v23 = vmax.f32 %v7190_v63, %v7191_v31  ;;  %v7198_v57 = vrot.slane %v7197_v17, 1  ;;  %v7211_v19 = vmax.f32 %v7209_v15, %v7210_v2  ;;  %v7329_v25 = vrot.slane %v7328_v26, 2  ;;  %v6746_v63 = vpop.f32.mrf.mxu0 }
 0x779   : > { %v7205_v6 = vrot.slane %v7204_v29, 1  ;;  %v7336_v47 = vrot.slane %v7335_v1, 2  ;;  %v7343_v9 = vrot.slane %v7342_v50, 2  ;;  %v7349_v11 = vmax.f32 %v7347_v62, %v7348_v3  ;;  %v18795_v40 = vld [vmem:[#allocation2 + $0x28] sm:$0xff] }
 0x77a   : > { %v18797_v18 = vld [vmem:[#allocation2 + $0x2a] sm:$0xff]  ;;  %v7199_v8 = vmax.f32 %v7197_v17, %v7198_v57  ;;  %v7212_v24 = vrot.slane %v7211_v19, 1  ;;  %v7689_v0 = vsel %vm5079_vm7, %v7192_v23, %v18777_v10  ;;  %v7330_v32 = vmax.f32 %v7328_v26, %v7329_v25  ;;  %8156 = vst [vmem:[#allocation2 + $0x28] sm:$0x1] %v20196_v4 }
 0x77b   : > { %8164 = vst [vmem:[#allocation2 + $0x31] sm:$0x1] %v20196_v4  ;;  %v7206_v59 = vmax.f32 %v7204_v29, %v7205_v6  ;;  %v7337_v43 = vmax.f32 %v7335_v1, %v7336_v47  ;;  %v7344_v13 = vmax.f32 %v7342_v50, %v7343_v9  ;;  %v7350_v34 = vrot.slane %v7349_v11, 2 }
 0x77c   : > { %v7213_v51 = vmax.f32 %v7211_v19, %v7212_v24  ;;  %v7690_v7 = vsel %vm5081_vm8, %v7199_v8, %v7689_v0  ;;  %v7331_v53 = vrot.slane %v7330_v32, 1  ;;  %v6794_v42 = vmax.f32 %v18596_v46, %v6743_v30 }
 0x77d   : > { %v7691_v22 = vsel %vm5083_vm9, %v7206_v59, %v7690_v7  ;;  %v7338_v38 = vrot.slane %v7337_v43, 1  ;;  %v7345_v10 = vrot.slane %v7344_v13, 1  ;;  %v7351_v44 = vmax.f32 %v7349_v11, %v7350_v34 }
 0x77e   : > { %v7692_v12 = vsel %vm5085_vm10, %v7213_v51, %v7691_v22  ;;  %v6890_v16 = vcombine.high %v6794_v42, %v6794_v42  ;;  %v6897_v55 = vrot.slane %v6794_v42, %v17799_v49  ;;  %v7332_v45 = vmax.f32 %v7330_v32, %v7331_v53 }
 0x77f   : > { %7750 = vst.msk [vmem:[#allocation2 + $0x1] sm:$0xff] %vm5208_vm11, %v7692_v12  ;;  %v7339_v58 = vmax.f32 %v7337_v43, %v7338_v38  ;;  %v7346_v35 = vmax.f32 %v7344_v13, %v7345_v10  ;;  %v6797_v14 = vmax.f32 %v18598_v33, %v15659_v41  ;;  %v7352_v20 = vrot.slane %v7351_v44, 1 }
 0x780   : > { %v6904_v46 = vrot.slane %v6890_v16, %v17799_v49  ;;  %v6905_v15 = vcombine.high %v6897_v55, %v6897_v55  ;;  %v7270_v21 = vsel %vm4031_vm3, %v6897_v55, -inf  ;;  %v6795_v2 = vmax.f32 %v18600_v61, %v6746_v63 }
 0x781   : > { %v7707_v60 = vsel %vm5073_vm4, %v7339_v58, %v7332_v45  ;;  %v7271_v27 = vrot.slane %v7270_v21, 4  ;;  %v6941_v39 = vcombine.high %v6797_v14, %v6797_v14  ;;  %v6948_v1 = vrot.slane %v6797_v14, %v17799_v49 }
 0x782   : > { %v6906_v62 = vcombine.high %v6904_v46, %v6904_v46  ;;  %v7277_v31 = vsel %vm4031_vm3, %v6905_v15, -inf  ;;  %v7284_v17 = vsel %vm4031_vm3, %v6904_v46, -inf  ;;  %v7353_v50 = vmax.f32 %v7351_v44, %v7352_v20 }
 0x783   : > { %v7272_v26 = vmax.f32 %v7270_v21, %v7271_v27  ;;  %v7278_v33 = vrot.slane %v7277_v31, 4  ;;  %v7285_v29 = vrot.slane %v7284_v17, 4  ;;  %v7708_v3 = vsel %vm5075_vm5, %v7346_v35, %v7707_v60 }
 0x784   : > { %v7291_v30 = vsel %vm4031_vm3, %v6906_v62, -inf  ;;  %v6955_v23 = vrot.slane %v6941_v39, %v17799_v49  ;;  %v6956_v47 = vcombine.high %v6948_v1, %v6948_v1  ;;  %v7354_v61 = vsel %vm4031_vm3, %v6948_v1, -inf }
 0x785   : > { %v7273_v57 = vrot.slane %v7272_v26, 2  ;;  %v7279_v19 = vmax.f32 %v7277_v31, %v7278_v33  ;;  %v7286_v25 = vmax.f32 %v7284_v17, %v7285_v29  ;;  %v7292_v6 = vrot.slane %v7291_v30, 4 }
 0x786   : > { %v6957_v9 = vcombine.high %v6955_v23, %v6955_v23  ;;  %v7368_v11 = vsel %vm4031_vm3, %v6955_v23, -inf  ;;  %v18822_v8 = vld [vmem:[#allocation2] sm:$0xff]  ;;  %v7355_v13 = vrot.slane %v7354_v61, 4  ;;  %v7361_v34 = vsel %vm4031_vm3, %v6956_v47, -inf }
 0x787   : > { %v18824_v24 = vld [vmem:[#allocation2 + $0x2] sm:$0xff]  ;;  %v7274_v0 = vmax.f32 %v7272_v26, %v7273_v57  ;;  %v7280_v32 = vrot.slane %v7279_v19, 2  ;;  %v7287_v59 = vrot.slane %v7286_v25, 2  ;;  %v7293_v43 = vmax.f32 %v7291_v30, %v7292_v6  ;;  %8155 = vst [vmem:[#allocation2] sm:$0x1] %v20196_v4 }
 0x788   : > { %8163 = vst [vmem:[#allocation2 + $0x9] sm:$0x1] %v20196_v4  ;;  %v7369_v41 = vrot.slane %v7368_v11, 4  ;;  %v7375_v51 = vsel %vm4031_vm3, %v6957_v9, -inf  ;;  %v7356_v38 = vmax.f32 %v7354_v61, %v7355_v13  ;;  %v7362_v10 = vrot.slane %v7361_v34, 4 }
 0x789   : > { %v7275_v7 = vrot.slane %v7274_v0, 1  ;;  %v7281_v53 = vmax.f32 %v7279_v19, %v7280_v32  ;;  %v7288_v42 = vmax.f32 %v7286_v25, %v7287_v59  ;;  %v7294_v22 = vrot.slane %v7293_v43, 2  ;;  %v7778_v59 = vld [vmem:[#allocation2 + $0x1] sm:$0xff] }
 0x78a   : > { %v7370_v44 = vmax.f32 %v7368_v11, %v7369_v41  ;;  %v7376_v12 = vrot.slane %v7375_v51, 4  ;;  %v6907_v58 = vcombine.high %v6795_v2, %v6795_v2  ;;  %v7357_v35 = vrot.slane %v7356_v38, 2 }
 0x78b   : > { %v7282_v16 = vrot.slane %v7281_v53, 1  ;;  %v7289_v55 = vrot.slane %v7288_v42, 1  ;;  %v7295_v45 = vmax.f32 %v7293_v43, %v7294_v22  ;;  %v7363_v14 = vmax.f32 %v7361_v34, %v7362_v10  ;;  %v7779_v22 = vld [vmem:[#allocation2 + $0x29] sm:$0xff] }
 0x78c   : > { %v7371_v63 = vrot.slane %v7370_v44, 2  ;;  %v7377_v20 = vmax.f32 %v7375_v51, %v7376_v12  ;;  %v7276_v46 = vmax.f32 %v7274_v0, %v7275_v7  ;;  %v7709_v21 = vsel %vm5077_vm6, %v7353_v50, %v7708_v3 }
 0x78d   : > { %v7296_v15 = vrot.slane %v7295_v45, 1  ;;  %v6914_v60 = vrot.slane %v6795_v2, %v17799_v49  ;;  %v7358_v27 = vmax.f32 %v7356_v38, %v7357_v35  ;;  %v7364_v39 = vrot.slane %v7363_v14, 2 }
 0x78e   : > { %v7372_v62 = vmax.f32 %v7370_v44, %v7371_v63  ;;  %v7378_v31 = vrot.slane %v7377_v20, 2  ;;  %v7283_v17 = vmax.f32 %v7281_v53, %v7282_v16  ;;  %v7290_v26 = vmax.f32 %v7288_v42, %v7289_v55 }
 0x78f   : > { %v6921_v33 = vrot.slane %v6907_v58, %v17799_v49  ;;  %v6922_v29 = vcombine.high %v6914_v60, %v6914_v60  ;;  %v7297_v1 = vmax.f32 %v7295_v45, %v7296_v15  ;;  %v7359_v30 = vrot.slane %v7358_v27, 1 }
 0x790   : > { %v7365_v23 = vmax.f32 %v7363_v14, %v7364_v39  ;;  %v7373_v57 = vrot.slane %v7372_v62, 1  ;;  %v7379_v19 = vmax.f32 %v7377_v20, %v7378_v31  ;;  %v7298_v6 = vsel %vm4031_vm3, %v6914_v60, -inf }
 0x791   : > { %v6923_v25 = vcombine.high %v6921_v33, %v6921_v33  ;;  %v7305_v50 = vsel %vm4031_vm3, %v6922_v29, -inf  ;;  %v7360_v2 = vmax.f32 %v7358_v27, %v7359_v30  ;;  %v7299_v9 = vrot.slane %v7298_v6, 4 }
 0x792   : > { %v7366_v3 = vrot.slane %v7365_v23, 1  ;;  %v7374_v47 = vmax.f32 %v7372_v62, %v7373_v57  ;;  %v7380_v61 = vrot.slane %v7379_v19, 1  ;;  %v7306_v11 = vrot.slane %v7305_v50, 4 }
 0x793   : > { %v7312_v0 = vsel %vm4031_vm3, %v6921_v33, -inf  ;;  %v7319_v32 = vsel %vm4031_vm3, %v6923_v25, -inf  ;;  %v7710_v13 = vsel %vm5079_vm7, %v7360_v2, %v7709_v21  ;;  %v7300_v34 = vmax.f32 %v7298_v6, %v7299_v9  ;;  %v7782_v6 = vld [vmem:[#allocation2 + $0xa1] sm:$0xff] }
 0x794   : > { %v7367_v43 = vmax.f32 %v7365_v23, %v7366_v3  ;;  %v7313_v41 = vrot.slane %v7312_v0, 4  ;;  %v7700_v51 = vsel %vm5073_vm4, %v7283_v17, %v7276_v46  ;;  %v7381_v7 = vmax.f32 %v7379_v19, %v7380_v61  ;;  %v7783_v61 = vld [vmem:[#allocation2 + $0xc9] sm:$0xff] }
 0x795   : > { %v7307_v53 = vmax.f32 %v7305_v50, %v7306_v11  ;;  %v7320_v42 = vrot.slane %v7319_v32, 4  ;;  %v7301_v10 = vrot.slane %v7300_v34, 2  ;;  %v7786_v12 = vpack.c.bf16 %v7779_v22, %v7778_v59  ;;  %v16715_v59 = vld [vmem:[%s20199_s25 + $0x58] sm:$0xff]   ;;  %v16459_v22 = vld [vmem:[%s20200_s8 + $0x50] sm:$0xff]  }
 0x796   : > { %v7711_v38 = vsel %vm5081_vm8, %v7367_v43, %v7710_v13  ;;  %v7314_v44 = vmax.f32 %v7312_v0, %v7313_v41  ;;  %v7766_v58 = vpack.c.bf16 %v18795_v40, %v18822_v8  ;;  %v7701_v35 = vsel %vm5075_vm5, %v7290_v26, %v7700_v51  ;;  %v7784_v43 = vld [vmem:[#allocation2 + $0xf1] sm:$0xff]  ;;  %v16448_v51 = vld [vmem:[%s20199_s25 + $0x40] sm:$0xff]  }
 0x797   : > { %v7712_v16 = vsel %vm5083_vm9, %v7374_v47, %v7711_v38  ;;  %v7308_v55 = vrot.slane %v7307_v53, 2  ;;  %v7321_v45 = vmax.f32 %v7319_v32, %v7320_v42  ;;  %v7302_v63 = vmax.f32 %v7300_v34, %v7301_v10  ;;  %15676 = vmatprep.mubr.msk.bf16.mxu0 %vm5208_vm11, %v7786_v12  ;;  %v16446_v32 = vld [vmem:[%s20199_s25 + $0x50] sm:$0xff]   ;;  %v16454_v42 = vld [vmem:[%s20200_s8 + $0x28] sm:$0xff]   ;;  %v16456_v38 = vld [vmem:[%s20200_s8 + $0x20] sm:$0xff]  }
 0x798   : > { %v7713_v14 = vsel %vm5085_vm10, %v7381_v7, %v7712_v16  ;;  %v7315_v20 = vrot.slane %v7314_v44, 2  ;;  %15692 = vmatprep.mubr.msk.bf16.mxu1 %vm5208_vm11, %v7766_v58  ;;  %v7702_v40 = vsel %vm5077_vm6, %v7297_v1, %v7701_v35  ;;  %v7788_v11 = vpack.c.bf16 %v7783_v61, %v7782_v6  ;;  %v16461_v10 = vld [vmem:[%s20200_s8 + $0x48] sm:$0xff]   ;;  %v16463_v12 = vld [vmem:[%s20200_s8 + $0x40] sm:$0xff]   ;;  %v16460_v16 = vld [vmem:[%s20200_s8 + $0x10] sm:$0xff]  }
 0x799   : > { %7753 = vst.msk [vmem:[#allocation2 + $0x79] sm:$0xff] %vm5208_vm11, %v7713_v14  ;;  %v7309_v46 = vmax.f32 %v7307_v53, %v7308_v55  ;;  %v7322_v15 = vrot.slane %v7321_v45, 2  ;;  %v7303_v21 = vrot.slane %v7302_v63, 1  ;;  %v7768_v0 = vpack.c.bf16 %v18684_v37, %v18703_v48  ;;  %v16447_v37 = vld [vmem:[%s20199_s25 + $0x48] sm:$0xff]   ;;  %v7785_v48 = vld [vmem:[#allocation2 + $0x119] sm:$0xff] }
 0x79a   : > { %v7316_v60 = vmax.f32 %v7314_v44, %v7315_v20  ;;  %v7789_v13 = vpack.c.bf16 %v7785_v48, %v7784_v43  ;;  %v7769_v34 = vpack.c.bf16 %v18738_v54, %v18763_v36  ;;  %v8009_v41 = vpack.c.bf16 %v18797_v18, %v18824_v24  ;;  %v16449_v18 = vld [vmem:[%s20200_s8 + $0x78] sm:$0xff]   ;;  %v16462_v55 = vld [vmem:[%s20200_s8 + $0x8] sm:$0xff]   ;;  %v16464_v58 = vld [vmem:[%s20200_s8] sm:$0xff]  }
 0x79b   : > { %v7310_v27 = vrot.slane %v7309_v46, 1  ;;  %v7323_v39 = vmax.f32 %v7321_v45, %v7322_v15  ;;  %v7304_v8 = vmax.f32 %v7302_v63, %v7303_v21  ;;  %v8011_v54 = vpack.c.bf16 %v18686_v28, %v18705_v56  ;;  %15716 = vmatprep.subr.bf16.mxu1 %v16449_v18  ;;  %v16450_v24 = vld [vmem:[%s20200_s8 + $0x38] sm:$0xff]   ;;  %v16451_v28 = vld [vmem:[%s20200_s8 + $0x70] sm:$0xff]  }
 0x79c   : > { %v7317_v62 = vrot.slane %v7316_v60, 1  ;;  %v8012_v36 = vpack.c.bf16 %v18740_v5, %v18765_v52  ;;  %v16452_v56 = vld [vmem:[%s20200_s8 + $0x30] sm:$0xff]   ;;  %v16453_v5 = vld [vmem:[%s20200_s8 + $0x68] sm:$0xff]   ;;  %v16455_v52 = vld [vmem:[%s20200_s8 + $0x60] sm:$0xff]  }
 0x79d   : > { %v7311_v31 = vmax.f32 %v7309_v46, %v7310_v27  ;;  %v7324_v17 = vrot.slane %v7323_v39, 1  ;;  %v7703_v33 = vsel %vm5079_vm7, %v7304_v8, %v7702_v40  ;;  %v16457_v53 = vld [vmem:[%s20200_s8 + $0x58] sm:$0xff]  }
 0x79e   : > { %v7318_v26 = vmax.f32 %v7316_v60, %v7317_v62  ;;  %v16458_v44 = vld [vmem:[%s20200_s8 + $0x18] sm:$0xff]  }
 0x79f   : > { %v7325_v29 = vmax.f32 %v7323_v39, %v7324_v17  ;;  %v7704_v30 = vsel %vm5081_vm8, %v7311_v31, %v7703_v33  ;;  %v18938_v45 = vld [vmem:[%s20200_s8 + $0xb8] sm:$0xff]  }
 0x7a0   : > { %v7705_v23 = vsel %vm5083_vm9, %v7318_v26, %v7704_v30  ;;  %v7761_v57 = vld [vmem:[#allocation2 + $0x78] sm:$0xff]  ;;  %v14006_v26 = vld [vmem:[%s20125_s14 + $0x4] ss:$0 sm:$0xff] }
 0x7a1   : > { %v8004_v19 = vld [vmem:[#allocation2 + $0x7a] sm:$0xff]  ;;  %v7706_v25 = vsel %vm5085_vm10, %v7325_v29, %v7705_v23  ;;  %8158 = vst [vmem:[#allocation2 + $0x78] sm:$0x1] %v20196_v4 }
 0x7a2   : > { %8166 = vst [vmem:[#allocation2 + $0x81] sm:$0x1] %v20196_v4  ;;  %7752 = vst.msk [vmem:[#allocation2 + $0x51] sm:$0xff] %vm5208_vm11, %v7706_v25  ;;  %v7781_v1 = vld [vmem:[#allocation2 + $0x79] sm:$0xff] }
 0x7a9   : > { %v7760_v50 = vld [vmem:[#allocation2 + $0x50] sm:$0xff] }
 0x7aa   : > { %v7780_v2 = vld [vmem:[#allocation2 + $0x51] sm:$0xff]  ;;  %8157 = vst [vmem:[#allocation2 + $0x50] sm:$0x1] %v20196_v4  ;;  %v7767_v9 = vpack.c.bf16 %v7761_v57, %v7760_v50 }
 0x7ab   : > { %v8003_v3 = vld [vmem:[#allocation2 + $0x52] sm:$0xff]  ;;  %v7787_v47 = vpack.c.bf16 %v7781_v1, %v7780_v2 }
 0x7ac   : > { %8165 = vst [vmem:[#allocation2 + $0x59] sm:$0x1] %v20196_v4  ;;  %15693 = vmatmul.mubr.msk.bf16.vlgmr.msra.gmra.mxu1 %vm5208_vm11, %v7767_v9  ;;  %v8010_v7 = vpack.c.bf16 %v8004_v19, %v8003_v3 }
 0x7ad   : > { %15677 = vmatmul.mubr.msk.bf16.vlgmr.msra.gmra.mxu0 %vm5208_vm11, %v7787_v47  ;;  %15696 = vmatprep.mubr.msk.bf16.mxu1 %vm5208_vm11, %v7768_v0 }
 0x7ae   : > { %15680 = vmatprep.mubr.msk.bf16.mxu0 %vm5208_vm11, %v7788_v11  ;;  %15701 = vmatpush3.bf16.msra.mxu0 %v16715_v59 }
 0x7af   : > { %15702 = vmatprep.subr.bf16.mxu0 %v16446_v32  ;;  %15717 = vmatpush3.bf16.msra.mxu1 %v16449_v18 }
 0x7b0   : > { %15718 = vmatprep.subr.bf16.mxu1 %v16451_v28 }
 0x7b2   : > { %15703 = vmatpush3.bf16.msra.mxu0 %v16446_v32 }
 0x7b3   : > { %15704 = vmatprep.subr.bf16.mxu0 %v16447_v37  ;;  %15719 = vmatpush3.bf16.msra.mxu1 %v16451_v28 }
 0x7b4   : > { %15697 = vmatmul.mubr.msk.bf16.gmra.mxu1 %vm5208_vm11, %v7769_v34  ;;  %15720 = vmatprep.subr.bf16.mxu1 %v16453_v5 }
 0x7b5   : > { %15681 = vmatmul.mubr.msk.bf16.gmra.mxu0 %vm5208_vm11, %v7789_v13 }
 0x7b6   : > { %15708 = vmatprep.mubr.msk.bf16.mxu0 %vm5208_vm11, %v8009_v41  ;;  %15705 = vmatpush3.bf16.msra.mxu0 %v16447_v37 }
 0x7b7   : > { %15706 = vmatprep.subr.bf16.mxu0 %v16448_v51  ;;  %15721 = vmatpush3.bf16.msra.mxu1 %v16453_v5 }
 0x7b8   : > { %15722 = vmatprep.subr.bf16.mxu1 %v16455_v52 }
 0x7ba   : > { %15707 = vmatpush3.bf16.msra.mxu0 %v16448_v51 }
 0x7bb   : > { %15740 = vmatprep.subr.bf16.mxu0 %v16450_v24  ;;  %15723 = vmatpush3.bf16.msra.mxu1 %v16455_v52 }
 0x7bc   : > { %15724 = vmatprep.subr.bf16.mxu1 %v16457_v53 }
 0x7bd   : > { %15709 = vmatmul.mubr.msk.bf16.vlgmr.msra.gmra.mxu0 %vm5208_vm11, %v8010_v7 }
 0x7be   : > { %15712 = vmatprep.mubr.msk.bf16.mxu0 %vm5208_vm11, %v8011_v54  ;;  %15741 = vmatpush3.bf16.msra.mxu0 %v16450_v24 }
 0x7bf   : > { %15742 = vmatprep.subr.bf16.mxu0 %v16452_v56  ;;  %15725 = vmatpush3.bf16.msra.mxu1 %v16457_v53 }
 0x7c0   : > { %15726 = vmatprep.subr.bf16.mxu1 %v16459_v22 }
 0x7c2   : > { %15743 = vmatpush3.bf16.msra.mxu0 %v16452_v56 }
 0x7c3   : > { %15744 = vmatprep.subr.bf16.mxu0 %v16454_v42  ;;  %15727 = vmatpush3.bf16.msra.mxu1 %v16459_v22 }
 0x7c4   : > { %15728 = vmatprep.subr.bf16.mxu1 %v16461_v10 }
 0x7c5   : > { %15713 = vmatmul.mubr.msk.bf16.gmra.mxu0 %vm5208_vm11, %v8012_v36 }
 0x7c6   : > { %15745 = vmatpush3.bf16.msra.mxu0 %v16454_v42 }
 0x7c7   : > { %15746 = vmatprep.subr.bf16.mxu0 %v16456_v38  ;;  %15729 = vmatpush3.bf16.msra.mxu1 %v16461_v10 }
 0x7c8   : > { %15730 = vmatprep.subr.bf16.mxu1 %v16463_v12 }
 0x7ca   : > { %15747 = vmatpush3.bf16.msra.mxu0 %v16456_v38  ;;  %v16466_v38 = vld [vmem:[%s20200_s8 + $0xb0] sm:$0xff]  }
 0x7cb   : > { %15748 = vmatprep.subr.bf16.mxu0 %v16458_v44  ;;  %15731 = vmatpush3.bf16.msra.mxu1 %v16463_v12 }
 0x7cc   : > { %15764 = vmatprep.subr.bf16.mxu1 %v18938_v45 }
 0x7ce   : > { %15749 = vmatpush3.bf16.msra.mxu0 %v16458_v44 }
 0x7cf   : > { %15750 = vmatprep.subr.bf16.mxu0 %v16460_v16 }
 0x7d2   : > { %15751 = vmatpush3.bf16.msra.mxu0 %v16460_v16 }
 0x7d3   : > { %15752 = vmatprep.subr.bf16.mxu0 %v16462_v55 }
 0x7d6   : > { %15753 = vmatpush3.bf16.msra.mxu0 %v16462_v55 }
 0x7d7   : > { %15754 = vmatprep.subr.bf16.mxu0 %v16464_v58 }
 0x7da   : > { %15755 = vmatpush3.bf16.msra.mxu0 %v16464_v58 }
 0x86c   : > { %v15694_v14 = vpop.f32.mrf.mxu1 }
 0x86d   : > { %v15678_v35 = vpop.f32.mrf.mxu0 }
 0x86e   : > { %v7970_v20 = vpop.f32.mrf.mxu1  ;;  %v7979_v31 = vadd.f32 %v15694_v14, %v15678_v35 }
 0x86f   : > { %v7869_v63 = vpop.f32.mrf.mxu0 }
 0x870   : > { %v15695_v15 = vpop.f32.mrf.mxu1  ;;  %v7971_v33 = vadd.f32 %v7970_v20, %v7869_v63  ;;  %v16467_v20 = vld [vmem:[%s20200_s8 + $0xa8] sm:$0xff]  }
 0x871   : > { %v15679_v46 = vpop.f32.mrf.mxu0 }
 0x872   : > { %v7973_v27 = vpop.f32.mrf.mxu1  ;;  %v7982_v57 = vadd.f32 %v15695_v15, %v15679_v46 }
 0x873   : > { %v7872_v21 = vpop.f32.mrf.mxu0 }
 0x874   : > { %v15698_v8 = vpop.f32.mrf.mxu1  ;;  %v7974_v6 = vadd.f32 %v7973_v27, %v7872_v21 }
 0x875   : > { %v15682_v60 = vpop.f32.mrf.mxu0 }
 0x876   : > { %v7986_v29 = vpop.f32.mrf.mxu1  ;;  %v7995_v61 = vadd.f32 %v15698_v8, %v15682_v60 }
 0x877   : > { %v7885_v39 = vpop.f32.mrf.mxu0 }
 0x878   : > { %v15699_v50 = vpop.f32.mrf.mxu1  ;;  %v7987_v43 = vadd.f32 %v7986_v29, %v7885_v39 }
 0x879   : > { %v15683_v40 = vpop.f32.mrf.mxu0 }
 0x87a   : > { %v7989_v37 = vpop.f32.mrf.mxu1  ;;  %v7998_v51 = vadd.f32 %v15699_v50, %v15683_v40  ;;  %v16471_v50 = vld [vmem:[%s20200_s8 + $0x88] sm:$0xff]  }
 0x87b   : > { %v7888_v62 = vpop.f32.mrf.mxu0 }
 0x87c   : > { %v7990_v18 = vadd.f32 %v7989_v37, %v7888_v62  ;;  %v16468_v62 = vld [vmem:[%s20200_s8 + $0xa0] sm:$0xff]   ;;  %v16481_v37 = vld [vmem:[%s20201_s4 + $0x58] sm:$0xff]  }
 0x87d   : > { %v15710_v17 = vpop.f32.mrf.mxu0 }
 0x87e   : > { %v8125_v30 = vadd.f32 %v15710_v17, %v7979_v31 }
 0x87f   : > { %v8092_v23 = vpop.f32.mrf.mxu0 }
 0x880   : > { %v8141_v19 = vadd.f32 %v14006_v26, %v8125_v30  ;;  %v8123_v25 = vadd.f32 %v8092_v23, %v7971_v33  ;;  %v16469_v30 = vld [vmem:[%s20200_s8 + $0x98] sm:$0xff]  }
 0x881   : > { %v15711_v1 = vpop.f32.mrf.mxu0 }
 0x882   : > { %v8149_v2 = vmax.f32 %v8141_v19, 0.0  ;;  %v8139_v3 = vadd.f32 %v14006_v26, %v8123_v25  ;;  %v8126_v47 = vadd.f32 %v15711_v1, %v7982_v57 }
 0x883   : > { %v8095_v9 = vpop.f32.mrf.mxu0 }
 0x884   : > { %8173 = vst [vmem:[#allocation2 + $0x51] sm:$0xff] %v8149_v2  ;;  %v8147_v11 = vmax.f32 %v8139_v3, 0.0  ;;  %v8142_v0 = vadd.f32 %v14006_v26, %v8126_v47  ;;  %v8124_v32 = vadd.f32 %v8095_v9, %v7974_v6  ;;  %v16470_v6 = vld [vmem:[%s20200_s8 + $0x90] sm:$0xff]  }
 0x885   : > { %v15714_v59 = vpop.f32.mrf.mxu0 }
 0x886   : > { %8171 = vst [vmem:[#allocation2 + $0x1] sm:$0xff] %v8147_v11  ;;  %v8150_v48 = vmax.f32 %v8142_v0, 0.0  ;;  %v8140_v13 = vadd.f32 %v14006_v26, %v8124_v32  ;;  %v8129_v34 = vadd.f32 %v15714_v59, %v7995_v61  ;;  %v16473_v61 = vld [vmem:[%s20201_s4 + $0x78] sm:$0xff]   ;;  %v16475_v0 = vld [vmem:[%s20201_s4 + $0x70] sm:$0xff]   ;;  %v16477_v59 = vld [vmem:[%s20201_s4 + $0x68] sm:$0xff]  }
 0x887   : > { %v8108_v41 = vpop.f32.mrf.mxu0  ;;  %15788 = vmatprep.subr.bf16.mxu0 %v16473_v61  ;;  %v16476_v32 = vld [vmem:[%s20201_s4 + $0x30] sm:$0xff]  }
 0x888   : > { %8174 = vst [vmem:[#allocation2 + $0x79] sm:$0xff] %v8150_v48  ;;  %v8148_v7 = vmax.f32 %v8140_v13, 0.0  ;;  %v8145_v54 = vadd.f32 %v14006_v26, %v8129_v34  ;;  %v8127_v36 = vadd.f32 %v8108_v41, %v7987_v43  ;;  %v8216_v22 = vpack.c.bf16 %v8150_v48, %v8149_v2  ;;  %v16472_v2 = vld [vmem:[%s20200_s8 + $0x80] sm:$0xff]   ;;  %v16478_v48 = vld [vmem:[%s20201_s4 + $0x28] sm:$0xff]   ;;  %v16483_v13 = vld [vmem:[%s20201_s4 + $0x50] sm:$0xff]  }
 0x889   : > { %v15715_v24 = vpop.f32.mrf.mxu0  ;;  %v16479_v43 = vld [vmem:[%s20201_s4 + $0x60] sm:$0xff]   ;;  %v16485_v41 = vld [vmem:[%s20201_s4 + $0x48] sm:$0xff]  }
 0x88a   : > { %8172 = vst [vmem:[#allocation2 + $0x29] sm:$0xff] %v8148_v7  ;;  %v8153_v28 = vmax.f32 %v8145_v54, 0.0  ;;  %v8143_v56 = vadd.f32 %v14006_v26, %v8127_v36  ;;  %v8130_v5 = vadd.f32 %v15715_v24, %v7998_v51  ;;  %v8215_v52 = vpack.c.bf16 %v8148_v7, %v8147_v11  ;;  %v16474_v11 = vld [vmem:[%s20201_s4 + $0x38] sm:$0xff]   ;;  %v16480_v34 = vld [vmem:[%s20201_s4 + $0x20] sm:$0xff]   ;;  %v16484_v54 = vld [vmem:[%s20201_s4 + $0x10] sm:$0xff]  }
 0x88b   : > { %v8111_v53 = vpop.f32.mrf.mxu0  ;;  %v8181_v42 = vld [vmem:[#allocation2 + $0x50] sm:$0xff]  ;;  %v16482_v51 = vld [vmem:[%s20201_s4 + $0x18] sm:$0xff]   ;;  %v16487_v7 = vld [vmem:[%s20201_s4 + $0x40] sm:$0xff]  }
 0x88c   : > { %v18950_v10 = vld [vmem:[#allocation2 + $0x52] sm:$0xff]  ;;  %8177 = vst [vmem:[#allocation2 + $0xf1] sm:$0xff] %v8153_v28  ;;  %v8151_v44 = vmax.f32 %v8143_v56, 0.0  ;;  %v8146_v12 = vadd.f32 %v14006_v26, %v8130_v5  ;;  %v8128_v16 = vadd.f32 %v8111_v53, %v7990_v18  ;;  %15732 = vmatprep.mubr.bf16.mxu1 %v8215_v52  ;;  %8638 = vst [vmem:[#allocation2 + $0x50] sm:$0x1] %v20196_v4  ;;  %v16486_v18 = vld [vmem:[%s20201_s4 + $0x8] sm:$0xff]  }
 0x88d   : > { %8646 = vst [vmem:[#allocation2 + $0x59] sm:$0x1] %v20196_v4  ;;  %v8179_v55 = vld [vmem:[#allocation2] sm:$0xff]  ;;  %15733 = vmatmul.mubr.bf16.vlgmr.msra.gmra.mxu1 %v8216_v22  ;;  %v19033_v36 = vld [vmem:[%s20201_s4 + $0xb8] sm:$0xff]  }
 0x88e   : > { %v8462_v58 = vld [vmem:[#allocation2 + $0x2] sm:$0xff]  ;;  %8175 = vst [vmem:[#allocation2 + $0xa1] sm:$0xff] %v8151_v44  ;;  %v8154_v35 = vmax.f32 %v8146_v12, 0.0  ;;  %v8144_v14 = vadd.f32 %v14006_v26, %v8128_v16  ;;  %8636 = vst [vmem:[#allocation2] sm:$0x1] %v20196_v4  ;;  %15765 = vmatpush3.bf16.msra.mxu1 %v18938_v45 }
 0x88f   : > { %8644 = vst [vmem:[#allocation2 + $0x9] sm:$0x1] %v20196_v4  ;;  %v8182_v63 = vld [vmem:[#allocation2 + $0x78] sm:$0xff]  ;;  %15766 = vmatprep.subr.bf16.mxu1 %v16466_v38  ;;  %v16488_v24 = vld [vmem:[%s20201_s4] sm:$0xff]  }
 0x890   : > { %v8465_v46 = vld [vmem:[#allocation2 + $0x7a] sm:$0xff]  ;;  %8178 = vst [vmem:[#allocation2 + $0x119] sm:$0xff] %v8154_v35  ;;  %v8152_v15 = vmax.f32 %v8144_v14, 0.0  ;;  %8639 = vst [vmem:[#allocation2 + $0x78] sm:$0x1] %v20196_v4  ;;  %v8188_v39 = vpack.c.bf16 %v8182_v63, %v8181_v42  ;;  %v8218_v8 = vpack.c.bf16 %v8154_v35, %v8153_v28 }
 0x891   : > { %8647 = vst [vmem:[#allocation2 + $0x81] sm:$0x1] %v20196_v4  ;;  %v8180_v21 = vld [vmem:[#allocation2 + $0x28] sm:$0xff]  ;;  %v8471_v3 = vpack.c.bf16 %v8465_v46, %v18950_v10  ;;  %v14064_v14 = vld [vmem:[%s20125_s14 + $0x5] ss:$0 sm:$0xff] }
 0x892   : > { %v8463_v60 = vld [vmem:[#allocation2 + $0x2a] sm:$0xff]  ;;  %8176 = vst [vmem:[#allocation2 + $0xc9] sm:$0xff] %v8152_v15  ;;  %8637 = vst [vmem:[#allocation2 + $0x28] sm:$0x1] %v20196_v4  ;;  %v8187_v45 = vpack.c.bf16 %v8180_v21, %v8179_v55  ;;  %15767 = vmatpush3.bf16.msra.mxu1 %v16466_v38  ;;  %v8217_v27 = vpack.c.bf16 %v8152_v15, %v8151_v44 }
 0x893   : > { %8645 = vst [vmem:[#allocation2 + $0x31] sm:$0x1] %v20196_v4  ;;  %15768 = vmatprep.subr.bf16.mxu1 %v16467_v20  ;;  %v8185_v40 = vld [vmem:[#allocation2 + $0xf0] sm:$0xff]  ;;  %v8470_v17 = vpack.c.bf16 %v8463_v60, %v8462_v58 }
 0x894   : > { %v8468_v31 = vld [vmem:[#allocation2 + $0xf2] sm:$0xff]  ;;  %15756 = vmatprep.mubr.bf16.mxu0 %v8187_v45  ;;  %15736 = vmatprep.mubr.bf16.mxu1 %v8217_v27  ;;  %8642 = vst [vmem:[#allocation2 + $0xf0] sm:$0x1] %v20196_v4 }
 0x895   : > { %8650 = vst [vmem:[#allocation2 + $0xf9] sm:$0x1] %v20196_v4  ;;  %15757 = vmatmul.mubr.bf16.vlgmr.msra.gmra.mxu0 %v8188_v39  ;;  %v8183_v26 = vld [vmem:[#allocation2 + $0xa0] sm:$0xff]  ;;  %15737 = vmatmul.mubr.bf16.gmra.mxu1 %v8218_v8 }
 0x896   : > { %v8466_v33 = vld [vmem:[#allocation2 + $0xa2] sm:$0xff]  ;;  %8640 = vst [vmem:[#allocation2 + $0xa0] sm:$0x1] %v20196_v4  ;;  %15769 = vmatpush3.bf16.msra.mxu1 %v16467_v20  ;;  %15780 = vmatprep.mubr.bf16.mxu1 %v8470_v17 }
 0x897   : > { %8648 = vst [vmem:[#allocation2 + $0xa9] sm:$0x1] %v20196_v4  ;;  %v8186_v29 = vld [vmem:[#allocation2 + $0x118] sm:$0xff]  ;;  %15770 = vmatprep.subr.bf16.mxu1 %v16468_v62  ;;  %15789 = vmatpush3.bf16.msra.mxu0 %v16473_v61 }
 0x898   : > { %v8469_v23 = vld [vmem:[#allocation2 + $0x11a] sm:$0xff]  ;;  %8643 = vst [vmem:[#allocation2 + $0x118] sm:$0x1] %v20196_v4  ;;  %v8190_v1 = vpack.c.bf16 %v8186_v29, %v8185_v40  ;;  %15790 = vmatprep.subr.bf16.mxu0 %v16475_v0 }
 0x899   : > { %8651 = vst [vmem:[#allocation2 + $0x121] sm:$0x1] %v20196_v4  ;;  %v8184_v57 = vld [vmem:[#allocation2 + $0xc8] sm:$0xff]  ;;  %v8473_v9 = vpack.c.bf16 %v8469_v23, %v8468_v31 }
 0x89a   : > { %v8467_v19 = vld [vmem:[#allocation2 + $0xca] sm:$0xff]  ;;  %8641 = vst [vmem:[#allocation2 + $0xc8] sm:$0x1] %v20196_v4  ;;  %v8189_v25 = vpack.c.bf16 %v8184_v57, %v8183_v26  ;;  %15771 = vmatpush3.bf16.msra.mxu1 %v16468_v62 }
 0x89b   : > { %8649 = vst [vmem:[#allocation2 + $0xd1] sm:$0x1] %v20196_v4  ;;  %15772 = vmatprep.subr.bf16.mxu1 %v16469_v30  ;;  %v8472_v47 = vpack.c.bf16 %v8467_v19, %v8466_v33  ;;  %15791 = vmatpush3.bf16.msra.mxu0 %v16475_v0 }
 0x89c   : > { %15760 = vmatprep.mubr.bf16.mxu0 %v8189_v25  ;;  %15792 = vmatprep.subr.bf16.mxu0 %v16477_v59 }
 0x89d   : > { %15761 = vmatmul.mubr.bf16.gmra.mxu0 %v8190_v1 }
 0x89e   : > { %15773 = vmatpush3.bf16.msra.mxu1 %v16469_v30 }
 0x89f   : > { %15774 = vmatprep.subr.bf16.mxu1 %v16470_v6  ;;  %15793 = vmatpush3.bf16.msra.mxu0 %v16477_v59 }
 0x8a0   : > { %15794 = vmatprep.subr.bf16.mxu0 %v16479_v43 }
 0x8a2   : > { %15775 = vmatpush3.bf16.msra.mxu1 %v16470_v6 }
 0x8a3   : > { %15776 = vmatprep.subr.bf16.mxu1 %v16471_v50  ;;  %15795 = vmatpush3.bf16.msra.mxu0 %v16479_v43 }
 0x8a4   : > { %15796 = vmatprep.subr.bf16.mxu0 %v16481_v37 }
 0x8a6   : > { %15777 = vmatpush3.bf16.msra.mxu1 %v16471_v50 }
 0x8a7   : > { %15778 = vmatprep.subr.bf16.mxu1 %v16472_v2  ;;  %15797 = vmatpush3.bf16.msra.mxu0 %v16481_v37 }
 0x8a8   : > { %15798 = vmatprep.subr.bf16.mxu0 %v16483_v13 }
 0x8aa   : > { %15779 = vmatpush3.bf16.msra.mxu1 %v16472_v2 }
 0x8ab   : > { %15812 = vmatprep.subr.bf16.mxu1 %v16474_v11  ;;  %15799 = vmatpush3.bf16.msra.mxu0 %v16483_v13 }
 0x8ac   : > { %15800 = vmatprep.subr.bf16.mxu0 %v16485_v41 }
 0x8ad   : > { %15781 = vmatmul.mubr.bf16.vlgmr.msra.gmra.mxu1 %v8471_v3 }
 0x8ae   : > { %15784 = vmatprep.mubr.bf16.mxu1 %v8472_v47  ;;  %15813 = vmatpush3.bf16.msra.mxu1 %v16474_v11 }
 0x8af   : > { %15814 = vmatprep.subr.bf16.mxu1 %v16476_v32  ;;  %15801 = vmatpush3.bf16.msra.mxu0 %v16485_v41 }
 0x8b0   : > { %15802 = vmatprep.subr.bf16.mxu0 %v16487_v7 }
 0x8b2   : > { %15815 = vmatpush3.bf16.msra.mxu1 %v16476_v32 }
 0x8b3   : > { %15816 = vmatprep.subr.bf16.mxu1 %v16478_v48  ;;  %15803 = vmatpush3.bf16.msra.mxu0 %v16487_v7 }
 0x8b4   : > { %15836 = vmatprep.subr.bf16.mxu0 %v19033_v36 }
 0x8b5   : > { %15785 = vmatmul.mubr.bf16.gmra.mxu1 %v8473_v9 }
 0x8b6   : > { %15817 = vmatpush3.bf16.msra.mxu1 %v16478_v48 }
 0x8b7   : > { %15818 = vmatprep.subr.bf16.mxu1 %v16480_v34 }
 0x8ba   : > { %15819 = vmatpush3.bf16.msra.mxu1 %v16480_v34  ;;  %v16490_v34 = vld [vmem:[%s20201_s4 + $0xb0] sm:$0xff]  }
 0x8bb   : > { %15820 = vmatprep.subr.bf16.mxu1 %v16482_v51 }
 0x8be   : > { %15821 = vmatpush3.bf16.msra.mxu1 %v16482_v51 }
 0x8bf   : > { %15822 = vmatprep.subr.bf16.mxu1 %v16484_v54 }
 0x8c2   : > { %15823 = vmatpush3.bf16.msra.mxu1 %v16484_v54 }
 0x8c3   : > { %15824 = vmatprep.subr.bf16.mxu1 %v16486_v18 }
 0x8c6   : > { %15825 = vmatpush3.bf16.msra.mxu1 %v16486_v18 }
 0x8c7   : > { %15826 = vmatprep.subr.bf16.mxu1 %v16488_v24 }
 0x8ca   : > { %15827 = vmatpush3.bf16.msra.mxu1 %v16488_v24 }
 0x94d   : > { %v15734_v28 = vpop.f32.mrf.mxu1 }
 0x94f   : > { %v8318_v56 = vpop.f32.mrf.mxu1 }
 0x951   : > { %v15735_v5 = vpop.f32.mrf.mxu1 }
 0x953   : > { %v8321_v53 = vpop.f32.mrf.mxu1 }
 0x955   : > { %v15758_v52 = vpop.f32.mrf.mxu0  ;;  %v15738_v22 = vpop.f32.mrf.mxu1 }
 0x956   : > { %v8440_v58 = vadd.f32 %v15758_v52, %v15734_v28  ;;  %v16491_v52 = vld [vmem:[%s20201_s4 + $0xa8] sm:$0xff]  }
 0x957   : > { %v8431_v42 = vpop.f32.mrf.mxu0  ;;  %v8334_v10 = vpop.f32.mrf.mxu1 }
 0x958   : > { %v8432_v63 = vadd.f32 %v8431_v42, %v8318_v56 }
 0x959   : > { %v15759_v38 = vpop.f32.mrf.mxu0  ;;  %v15739_v12 = vpop.f32.mrf.mxu1 }
 0x95a   : > { %v8443_v21 = vadd.f32 %v15759_v38, %v15735_v5 }
 0x95b   : > { %v8434_v44 = vpop.f32.mrf.mxu0  ;;  %v8337_v55 = vpop.f32.mrf.mxu1 }
 0x95c   : > { %v8435_v39 = vadd.f32 %v8434_v44, %v8321_v53 }
 0x95d   : > { %v15762_v16 = vpop.f32.mrf.mxu0 }
 0x95e   : > { %v8456_v26 = vadd.f32 %v15762_v16, %v15738_v22 }
 0x95f   : > { %v8447_v20 = vpop.f32.mrf.mxu0 }
 0x960   : > { %v8448_v57 = vadd.f32 %v8447_v20, %v8334_v10 }
 0x961   : > { %v15763_v40 = vpop.f32.mrf.mxu0 }
 0x962   : > { %v8459_v2 = vadd.f32 %v15763_v40, %v15739_v12  ;;  %v16495_v40 = vld [vmem:[%s20201_s4 + $0x88] sm:$0xff]  }
 0x963   : > { %v8450_v19 = vpop.f32.mrf.mxu0 }
 0x964   : > { %v8451_v61 = vadd.f32 %v8450_v19, %v8337_v55  ;;  %v16492_v55 = vld [vmem:[%s20201_s4 + $0xa0] sm:$0xff]  }
 0x965   : > { %v16503_v19 = vld [vmem:[%s20128_s17 + $0x20] sm:$0xff]  }
 0x96d   : > { %v15782_v35 = vpop.f32.mrf.mxu1 }
 0x96e   : > { %v8606_v46 = vadd.f32 %v15782_v35, %v8440_v58 }
 0x96f   : > { %v8573_v15 = vpop.f32.mrf.mxu1 }
 0x970   : > { %v8622_v60 = vadd.f32 %v14064_v14, %v8606_v46  ;;  %v8604_v45 = vadd.f32 %v8573_v15, %v8432_v63  ;;  %v16493_v46 = vld [vmem:[%s20201_s4 + $0x98] sm:$0xff]  }
 0x971   : > { %v15783_v27 = vpop.f32.mrf.mxu1 }
 0x972   : > { %v8630_v8 = vmax.f32 %v8622_v60, 0.0  ;;  %v8620_v62 = vadd.f32 %v14064_v14, %v8604_v45  ;;  %v8607_v31 = vadd.f32 %v15783_v27, %v8443_v21 }
 0x973   : > { %v8576_v17 = vpop.f32.mrf.mxu1 }
 0x974   : > { %8654 = vst [vmem:[#allocation2 + $0x51] sm:$0xff] %v8630_v8  ;;  %v8628_v33 = vmax.f32 %v8620_v62, 0.0  ;;  %v8623_v29 = vadd.f32 %v14064_v14, %v8607_v31  ;;  %v8605_v30 = vadd.f32 %v8576_v17, %v8435_v39  ;;  %v16494_v39 = vld [vmem:[%s20201_s4 + $0x90] sm:$0xff]  }
 0x975   : > { %v15786_v23 = vpop.f32.mrf.mxu1 }
 0x976   : > { %8652 = vst [vmem:[#allocation2 + $0x1] sm:$0xff] %v8628_v33  ;;  %v8631_v25 = vmax.f32 %v8623_v29, 0.0  ;;  %v8621_v1 = vadd.f32 %v14064_v14, %v8605_v30  ;;  %v8610_v6 = vadd.f32 %v15786_v23, %v8456_v26  ;;  %v16497_v26 = vld [vmem:[%s20128_s17 + $0x38] sm:$0xff]   ;;  %v16499_v29 = vld [vmem:[%s20128_s17 + $0x30] sm:$0xff]   ;;  %v16501_v23 = vld [vmem:[%s20128_s17 + $0x28] sm:$0xff]  }
 0x977   : > { %v8589_v50 = vpop.f32.mrf.mxu1  ;;  %15860 = vmatprep.subr.bf16.mxu1 %v16497_v26  ;;  %v16500_v30 = vld [vmem:[%s20128_s17 + $0x70] sm:$0xff]  }
 0x978   : > { %8655 = vst [vmem:[#allocation2 + $0x79] sm:$0xff] %v8631_v25  ;;  %v8629_v3 = vmax.f32 %v8621_v1, 0.0  ;;  %v8626_v47 = vadd.f32 %v14064_v14, %v8610_v6  ;;  %v8608_v9 = vadd.f32 %v8589_v50, %v8448_v57  ;;  %v8697_v48 = vpack.c.bf16 %v8631_v25, %v8630_v8  ;;  %v16496_v8 = vld [vmem:[%s20201_s4 + $0x80] sm:$0xff]   ;;  %v16502_v57 = vld [vmem:[%s20128_s17 + $0x68] sm:$0xff]   ;;  %v16505_v1 = vld [vmem:[%s20128_s17 + $0x18] sm:$0xff]   ;;  %s19995_s4 = scalar_lea.vmem [#allocation3], %s20159_s5 }
 0x979   : > { %v15787_v11 = vpop.f32.mrf.mxu1  ;;  %v16504_v25 = vld [vmem:[%s20128_s17 + $0x60] sm:$0xff]   ;;  %v16506_v6 = vld [vmem:[%s20128_s17 + $0x58] sm:$0xff]   ;;  %v16507_v50 = vld [vmem:[%s20128_s17 + $0x10] sm:$0xff]   ;;  %s13527_s7 = sshll.u32 %s19995_s4, 4  ;;  %s13509_s5 = scalar_lea.sflag [#allocation4], %s19981_s27  ;;  %s13528_s7 = int_to_ptr.vmem [resolvable:$true] %s13527_s7 }
 0x97a   : > { %8653 = vst [vmem:[#allocation2 + $0x29] sm:$0xff] %v8629_v3  ;;  %v8634_v0 = vmax.f32 %v8626_v47, 0.0  ;;  %v8624_v32 = vadd.f32 %v14064_v14, %v8608_v9  ;;  %v8611_v59 = vadd.f32 %v15787_v11, %v8459_v2  ;;  %v8696_v43 = vpack.c.bf16 %v8629_v3, %v8628_v33  ;;  %v16498_v33 = vld [vmem:[%s20128_s17 + $0x78] sm:$0xff]   ;;  %v16508_v2 = vld [vmem:[%s20128_s17 + $0x50] sm:$0xff]   ;;  %v16509_v3 = vld [vmem:[%s20128_s17 + $0x8] sm:$0xff]   ;;  %s16716_s8 = scalar_lea.vmem %s13528_s7, 128 }
 0x97b   : > { %v8592_v37 = vpop.f32.mrf.mxu1  ;;  %v8662_v13 = vld [vmem:[#allocation2 + $0x50] sm:$0xff]  ;;  %v16510_v47 = vld [vmem:[%s20128_s17 + $0x48] sm:$0xff]   ;;  %v16511_v9 = vld [vmem:[%s20128_s17] sm:$0xff]   ;;  %p16717_p11 = scmp.ne.s32.totalorder %s13528_s7, %s16716_s8 }
 0x97c   : > { %v19048_v41 = vld [vmem:[#allocation2 + $0x52] sm:$0xff]  ;;  %8658 = vst [vmem:[#allocation2 + $0xf1] sm:$0xff] %v8634_v0  ;;  %v8632_v51 = vmax.f32 %v8624_v32, 0.0  ;;  %v8627_v7 = vadd.f32 %v14064_v14, %v8611_v59  ;;  %v8609_v54 = vadd.f32 %v8592_v37, %v8451_v61  ;;  %15804 = vmatprep.mubr.bf16.mxu0 %v8696_v43  ;;  %9790 = vst.msk [vmem:[#allocation2 + $0x50] sm:$0x1] %vm4928_vm2, %v20196_v4  ;;  %v16512_v61 = vld [vmem:[%s20128_s17 + $0x40] sm:$0xff]  }
 0x97d   : > { %9798 = vst.msk [vmem:[#allocation2 + $0x55] sm:$0x1] %vm4928_vm2, %v20196_v4  ;;  %v8660_v18 = vld [vmem:[#allocation2] sm:$0xff]  ;;  %15805 = vmatmul.mubr.bf16.vlgmr.msra.gmra.mxu0 %v8697_v48  ;;  %p16718_p12 = pnand %p16717_p11, %p16976_p5 }
 0x97e   : > { %v8943_v24 = vld [vmem:[#allocation2 + $0x2] sm:$0xff]  ;;  %8656 = vst [vmem:[#allocation2 + $0xa1] sm:$0xff] %v8632_v51  ;;  %v8635_v28 = vmax.f32 %v8627_v7, 0.0  ;;  %v8625_v56 = vadd.f32 %v14064_v14, %v8609_v54  ;;  %9788 = vst.msk [vmem:[#allocation2] sm:$0x1] %vm4928_vm2, %v20196_v4  ;;  %15837 = vmatpush3.bf16.msra.mxu0 %v19033_v36 }
 0x97f   : > { %9796 = vst.msk [vmem:[#allocation2 + $0x5] sm:$0x1] %vm4928_vm2, %v20196_v4  ;;  %v8663_v5 = vld [vmem:[#allocation2 + $0x78] sm:$0xff]  ;;  %15838 = vmatprep.subr.bf16.mxu0 %v16490_v34  ;;  %p16719_p13 = pneg %p16718_p12 }
 0x980   : > { %v8946_v53 = vld [vmem:[#allocation2 + $0x7a] sm:$0xff]  ;;  %8659 = vst [vmem:[#allocation2 + $0x119] sm:$0xff] %v8635_v28  ;;  %v8633_v42 = vmax.f32 %v8625_v56, 0.0  ;;  %9791 = vst.msk [vmem:[#allocation2 + $0x78] sm:$0x1] %vm4928_vm2, %v20196_v4  ;;  %v8669_v44 = vpack.c.bf16 %v8663_v5, %v8662_v13  ;;  %v8699_v12 = vpack.c.bf16 %v8635_v28, %v8634_v0 }
 0x981   : > { %9799 = vst.msk [vmem:[#allocation2 + $0x7d] sm:$0x1] %vm4928_vm2, %v20196_v4  ;;  %v8661_v22 = vld [vmem:[#allocation2 + $0x28] sm:$0xff]  ;;  %v8952_v62 = vpack.c.bf16 %v8946_v53, %v19048_v41 }
 0x982   : > { %v8944_v36 = vld [vmem:[#allocation2 + $0x2a] sm:$0xff]  ;;  %8657 = vst [vmem:[#allocation2 + $0xc9] sm:$0xff] %v8633_v42  ;;  %v8668_v38 = vpack.c.bf16 %v8661_v22, %v8660_v18  ;;  %9789 = vst.msk [vmem:[#allocation2 + $0x28] sm:$0x1] %vm4928_vm2, %v20196_v4  ;;  %15839 = vmatpush3.bf16.msra.mxu0 %v16490_v34  ;;  %v8698_v10 = vpack.c.bf16 %v8633_v42, %v8632_v51 }
 0x983   : > { %9797 = vst.msk [vmem:[#allocation2 + $0x2d] sm:$0x1] %vm4928_vm2, %v20196_v4  ;;  %15840 = vmatprep.subr.bf16.mxu0 %v16491_v52  ;;  %v8666_v16 = vld [vmem:[#allocation2 + $0xf0] sm:$0xff]  ;;  %v8951_v35 = vpack.c.bf16 %v8944_v36, %v8943_v24 }
 0x984   : > { %v8949_v58 = vld [vmem:[#allocation2 + $0xf2] sm:$0xff]  ;;  %15828 = vmatprep.mubr.bf16.mxu1 %v8668_v38  ;;  %15808 = vmatprep.mubr.bf16.mxu0 %v8698_v10  ;;  %9794 = vst.msk [vmem:[#allocation2 + $0xf0] sm:$0x1] %vm4928_vm2, %v20196_v4  ;;  %v14122_v38 = vld [vmem:[%s20125_s14 + $0x6] ss:$0 sm:$0xff] }
 0x985   : > { %9802 = vst.msk [vmem:[#allocation2 + $0xf5] sm:$0x1] %vm4928_vm2, %v20196_v4  ;;  %15829 = vmatmul.mubr.bf16.vlgmr.msra.gmra.mxu1 %v8669_v44  ;;  %v8664_v14 = vld [vmem:[#allocation2 + $0xa0] sm:$0xff]  ;;  %15809 = vmatmul.mubr.bf16.gmra.mxu0 %v8699_v12 }
 0x986   : > { %v8947_v63 = vld [vmem:[#allocation2 + $0xa2] sm:$0xff]  ;;  %9792 = vst.msk [vmem:[#allocation2 + $0xa0] sm:$0x1] %vm4928_vm2, %v20196_v4  ;;  %15841 = vmatpush3.bf16.msra.mxu0 %v16491_v52  ;;  %15852 = vmatprep.mubr.bf16.mxu0 %v8951_v35 }
 0x987   : > { %9800 = vst.msk [vmem:[#allocation2 + $0xa5] sm:$0x1] %vm4928_vm2, %v20196_v4  ;;  %v8667_v20 = vld [vmem:[#allocation2 + $0x118] sm:$0xff]  ;;  %15842 = vmatprep.subr.bf16.mxu0 %v16492_v55  ;;  %15861 = vmatpush3.bf16.msra.mxu1 %v16497_v26 }
 0x988   : > { %v8950_v15 = vld [vmem:[#allocation2 + $0x11a] sm:$0xff]  ;;  %9795 = vst.msk [vmem:[#allocation2 + $0x118] sm:$0x1] %vm4928_vm2, %v20196_v4  ;;  %v8671_v27 = vpack.c.bf16 %v8667_v20, %v8666_v16  ;;  %15862 = vmatprep.subr.bf16.mxu1 %v16499_v29 }
 0x989   : > { %9803 = vst.msk [vmem:[#allocation2 + $0x11d] sm:$0x1] %vm4928_vm2, %v20196_v4  ;;  %v8665_v21 = vld [vmem:[#allocation2 + $0xc8] sm:$0xff]  ;;  %v8954_v17 = vpack.c.bf16 %v8950_v15, %v8949_v58 }
 0x98a   : > { %v8948_v60 = vld [vmem:[#allocation2 + $0xca] sm:$0xff]  ;;  %v8670_v45 = vpack.c.bf16 %v8665_v21, %v8664_v14  ;;  %9793 = vst.msk [vmem:[#allocation2 + $0xc8] sm:$0x1] %vm4928_vm2, %v20196_v4  ;;  %15843 = vmatpush3.bf16.msra.mxu0 %v16492_v55 }
 0x98b   : > { %9801 = vst.msk [vmem:[#allocation2 + $0xcd] sm:$0x1] %vm4928_vm2, %v20196_v4  ;;  %15844 = vmatprep.subr.bf16.mxu0 %v16493_v46  ;;  %v8953_v31 = vpack.c.bf16 %v8948_v60, %v8947_v63  ;;  %15863 = vmatpush3.bf16.msra.mxu1 %v16499_v29 }
 0x98c   : > { %15832 = vmatprep.mubr.bf16.mxu1 %v8670_v45  ;;  %15864 = vmatprep.subr.bf16.mxu1 %v16501_v23 }
 0x98d   : > { %15833 = vmatmul.mubr.bf16.gmra.mxu1 %v8671_v27 }
 0x98e   : > { %15845 = vmatpush3.bf16.msra.mxu0 %v16493_v46 }
 0x98f   : > { %15846 = vmatprep.subr.bf16.mxu0 %v16494_v39  ;;  %15865 = vmatpush3.bf16.msra.mxu1 %v16501_v23 }
 0x990   : > { %15866 = vmatprep.subr.bf16.mxu1 %v16503_v19 }
 0x992   : > { %15847 = vmatpush3.bf16.msra.mxu0 %v16494_v39 }
 0x993   : > { %15848 = vmatprep.subr.bf16.mxu0 %v16495_v40  ;;  %15867 = vmatpush3.bf16.msra.mxu1 %v16503_v19 }
 0x994   : > { %15868 = vmatprep.subr.bf16.mxu1 %v16505_v1 }
 0x996   : > { %15849 = vmatpush3.bf16.msra.mxu0 %v16495_v40 }
 0x997   : > { %15850 = vmatprep.subr.bf16.mxu0 %v16496_v8  ;;  %15869 = vmatpush3.bf16.msra.mxu1 %v16505_v1 }
 0x998   : > { %15870 = vmatprep.subr.bf16.mxu1 %v16507_v50 }
 0x99a   : > { %15851 = vmatpush3.bf16.msra.mxu0 %v16496_v8 }
 0x99b   : > { %15884 = vmatprep.subr.bf16.mxu0 %v16498_v33  ;;  %15871 = vmatpush3.bf16.msra.mxu1 %v16507_v50 }
 0x99c   : > { %15872 = vmatprep.subr.bf16.mxu1 %v16509_v3 }
 0x99d   : > { %15853 = vmatmul.mubr.bf16.vlgmr.msra.gmra.mxu0 %v8952_v62 }
 0x99e   : > { %15856 = vmatprep.mubr.bf16.mxu0 %v8953_v31  ;;  %15885 = vmatpush3.bf16.msra.mxu0 %v16498_v33 }
 0x99f   : > { %15886 = vmatprep.subr.bf16.mxu0 %v16500_v30  ;;  %15873 = vmatpush3.bf16.msra.mxu1 %v16509_v3 }
 0x9a0   : > { %15874 = vmatprep.subr.bf16.mxu1 %v16511_v9 }
 0x9a2   : > { %15887 = vmatpush3.bf16.msra.mxu0 %v16500_v30 }
 0x9a3   : > { %15888 = vmatprep.subr.bf16.mxu0 %v16502_v57  ;;  %15875 = vmatpush3.bf16.msra.mxu1 %v16511_v9 }
 0x9a5   : > { %15857 = vmatmul.mubr.bf16.gmra.mxu0 %v8954_v17 }
 0x9a6   : > { %15889 = vmatpush3.bf16.msra.mxu0 %v16502_v57 }
 0x9a7   : > { %15890 = vmatprep.subr.bf16.mxu0 %v16504_v25 }
 0x9aa   : > { %15891 = vmatpush3.bf16.msra.mxu0 %v16504_v25 }
 0x9ab   : > { %15892 = vmatprep.subr.bf16.mxu0 %v16506_v6 }
 0x9ae   : > { %15893 = vmatpush3.bf16.msra.mxu0 %v16506_v6 }
 0x9af   : > { %15894 = vmatprep.subr.bf16.mxu0 %v16508_v2 }
 0x9b2   : > { %15895 = vmatpush3.bf16.msra.mxu0 %v16508_v2 }
 0x9b3   : > { %15896 = vmatprep.subr.bf16.mxu0 %v16510_v47 }
 0x9b6   : > { %15897 = vmatpush3.bf16.msra.mxu0 %v16510_v47 }
 0x9b7   : > { %15898 = vmatprep.subr.bf16.mxu0 %v16512_v61 }
 0x9ba   : > { %15899 = vmatpush3.bf16.msra.mxu0 %v16512_v61  ;;  %v16513_v61 = vld [vmem:[%s20202_s2 + $0x38] sm:$0xff]  }
 0x9bb   : > { %15908 = vmatprep.subr.bf16.mxu1 %v16513_v61 }
 0xa3d   : > { %v15806_v11 = vpop.f32.mrf.mxu0 }
 0xa3f   : > { %v8799_v0 = vpop.f32.mrf.mxu0 }
 0xa41   : > { %v15807_v32 = vpop.f32.mrf.mxu0 }
 0xa43   : > { %v8802_v43 = vpop.f32.mrf.mxu0 }
 0xa45   : > { %v15830_v59 = vpop.f32.mrf.mxu1  ;;  %v15810_v48 = vpop.f32.mrf.mxu0 }
 0xa46   : > { %v8921_v28 = vadd.f32 %v15830_v59, %v15806_v11  ;;  %v16514_v11 = vld [vmem:[%s20202_s2 + $0x18] sm:$0xff]   ;;  %v16517_v59 = vld [vmem:[%s20202_s2 + $0x28] sm:$0xff]  }
 0xa47   : > { %v8912_v37 = vpop.f32.mrf.mxu1  ;;  %v8815_v34 = vpop.f32.mrf.mxu0  ;;  %15920 = vmatprep.subr.bf16.mxu0 %v16514_v11 }
 0xa48   : > { %v8913_v24 = vadd.f32 %v8912_v37, %v8799_v0  ;;  %v16515_v0 = vld [vmem:[%s20202_s2 + $0x30] sm:$0xff]   ;;  %v16523_v37 = vld [vmem:[%s20202_s2 + $0x20] sm:$0xff]  }
 0xa49   : > { %v15831_v13 = vpop.f32.mrf.mxu1  ;;  %v15811_v51 = vpop.f32.mrf.mxu0 }
 0xa4a   : > { %v8924_v52 = vadd.f32 %v15831_v13, %v15807_v32  ;;  %v16516_v32 = vld [vmem:[%s20202_s2 + $0x10] sm:$0xff]   ;;  %v19180_v13 = vld [vmem:[%s20202_s2 + $0x58] sm:$0xff]  }
 0xa4b   : > { %v8915_v41 = vpop.f32.mrf.mxu1  ;;  %v8818_v54 = vpop.f32.mrf.mxu0 }
 0xa4c   : > { %v8916_v36 = vadd.f32 %v8915_v41, %v8802_v43  ;;  %v16520_v43 = vld [vmem:[%s20202_s2 + $0x8] sm:$0xff]  }
 0xa4d   : > { %v15834_v7 = vpop.f32.mrf.mxu1 }
 0xa4e   : > { %v8937_v46 = vadd.f32 %v15834_v7, %v15810_v48  ;;  %v16524_v48 = vld [vmem:[%s20202_s2] sm:$0xff]  }
 0xa4f   : > { %v8928_v56 = vpop.f32.mrf.mxu1 }
 0xa50   : > { %v8929_v63 = vadd.f32 %v8928_v56, %v8815_v34 }
 0xa51   : > { %v15835_v44 = vpop.f32.mrf.mxu1 }
 0xa52   : > { %v8940_v45 = vadd.f32 %v15835_v44, %v15811_v51 }
 0xa53   : > { %v8931_v15 = vpop.f32.mrf.mxu1 }
 0xa54   : > { %v8932_v17 = vadd.f32 %v8931_v15, %v8818_v54 }
 0xa5d   : > { %v15854_v18 = vpop.f32.mrf.mxu0 }
 0xa5e   : > { %v9087_v42 = vadd.f32 %v15854_v18, %v8921_v28 }
 0xa5f   : > { %v9054_v5 = vpop.f32.mrf.mxu0 }
 0xa60   : > { %v9085_v53 = vadd.f32 %v9054_v5, %v8913_v24  ;;  %v9103_v35 = vadd.f32 %v14122_v38, %v9087_v42 }
 0xa61   : > { %v15855_v22 = vpop.f32.mrf.mxu0 }
 0xa62   : > { %v9088_v10 = vadd.f32 %v15855_v22, %v8924_v52  ;;  %v9101_v16 = vadd.f32 %v14122_v38, %v9085_v53  ;;  %v9111_v8 = vmax.f32 %v9103_v35, 0.0 }
 0xa63   : > { %v9057_v12 = vpop.f32.mrf.mxu0 }
 0xa64   : > { %v9104_v55 = vadd.f32 %v14122_v38, %v9088_v10  ;;  %v9086_v58 = vadd.f32 %v9057_v12, %v8916_v36  ;;  %v9109_v27 = vmax.f32 %v9101_v16, 0.0 }
 0xa65   : > { %v15858_v14 = vpop.f32.mrf.mxu0 }
 0xa66   : > { %v9102_v20 = vadd.f32 %v14122_v38, %v9086_v58  ;;  %v9112_v21 = vmax.f32 %v9104_v55, 0.0  ;;  %v9091_v62 = vadd.f32 %v15858_v14, %v8937_v46 }
 0xa67   : > { %v9070_v60 = vpop.f32.mrf.mxu0 }
 0xa68   : > { %v9110_v39 = vmax.f32 %v9102_v20, 0.0  ;;  %v9089_v40 = vadd.f32 %v9070_v60, %v8929_v63  ;;  %v9118_v29 = vpack.c.bf16 %v9112_v21, %v9111_v8  ;;  %v9107_v25 = vadd.f32 %v14122_v38, %v9091_v62 }
 0xa69   : > { %v15859_v31 = vpop.f32.mrf.mxu0 }
 0xa6a   : > { %v9092_v26 = vadd.f32 %v15859_v31, %v8940_v45  ;;  %v9117_v33 = vpack.c.bf16 %v9110_v39, %v9109_v27  ;;  %v9105_v23 = vadd.f32 %v14122_v38, %v9089_v40  ;;  %v9115_v3 = vmax.f32 %v9107_v25, 0.0 }
 0xa6b   : > { %v9073_v30 = vpop.f32.mrf.mxu0 }
 0xa6c   : > { %v9108_v57 = vadd.f32 %v14122_v38, %v9092_v26  ;;  %v9090_v19 = vadd.f32 %v9073_v30, %v8932_v17  ;;  %15876 = vmatprep.mubr.bf16.mxu1 %v9117_v33  ;;  %15900 = vmatprep.mubr.bf16.mxu0 %v9117_v33  ;;  %v9113_v50 = vmax.f32 %v9105_v23, 0.0 }
 0xa6d   : > { %15877 = vmatmul.mubr.bf16.vlgmr.msra.gmra.mxu1 %v9118_v29  ;;  %15901 = vmatmul.mubr.bf16.vlgmr.msra.gmra.mxu0 %v9118_v29 }
 0xa6e   : > { %v9106_v1 = vadd.f32 %v14122_v38, %v9090_v19  ;;  %v9116_v6 = vmax.f32 %v9108_v57, 0.0  ;;  %15909 = vmatpush3.bf16.msra.mxu1 %v16513_v61  ;;  %15921 = vmatpush3.bf16.msra.mxu0 %v16514_v11 }
 0xa6f   : > { %15910 = vmatprep.subr.bf16.mxu1 %v16515_v0  ;;  %15922 = vmatprep.subr.bf16.mxu0 %v16516_v32 }
 0xa70   : > { %v9114_v2 = vmax.f32 %v9106_v1, 0.0  ;;  %v9120_v9 = vpack.c.bf16 %v9116_v6, %v9115_v3 }
 0xa72   : > { %v9119_v47 = vpack.c.bf16 %v9114_v2, %v9113_v50  ;;  %15911 = vmatpush3.bf16.msra.mxu1 %v16515_v0  ;;  %15923 = vmatpush3.bf16.msra.mxu0 %v16516_v32 }
 0xa73   : > { %15912 = vmatprep.subr.bf16.mxu1 %v16517_v59  ;;  %15924 = vmatprep.subr.bf16.mxu0 %v16520_v43 }
 0xa74   : > { %15880 = vmatprep.mubr.bf16.mxu1 %v9119_v47  ;;  %15904 = vmatprep.mubr.bf16.mxu0 %v9119_v47 }
 0xa75   : > { %15881 = vmatmul.mubr.bf16.gmra.mxu1 %v9120_v9  ;;  %15905 = vmatmul.mubr.bf16.gmra.mxu0 %v9120_v9 }
 0xa76   : > { %15913 = vmatpush3.bf16.msra.mxu1 %v16517_v59  ;;  %15925 = vmatpush3.bf16.msra.mxu0 %v16520_v43 }
 0xa77   : > { %15914 = vmatprep.subr.bf16.mxu1 %v16523_v37  ;;  %15926 = vmatprep.subr.bf16.mxu0 %v16524_v48 }
 0xa7a   : > { %15915 = vmatpush3.bf16.msra.mxu1 %v16523_v37  ;;  %15927 = vmatpush3.bf16.msra.mxu0 %v16524_v48 }
 0xa7b   : > { %15932 = vmatprep.subr.bf16.mxu1 %v19180_v13 }
 0xb2d   : > { %v15878_v34 = vpop.f32.mrf.mxu1  ;;  %v15902_v41 = vpop.f32.mrf.mxu0 }
 0xb2e   : > { %v9382_v51 = vmax.f32 %v15878_v34, %v15902_v41 }
 0xb2f   : > { %v9219_v7 = vpop.f32.mrf.mxu1  ;;  %v9349_v54 = vpop.f32.mrf.mxu0 }
 0xb30   : > { %v9430_v18 = vcombine.high %v9382_v51, %v9382_v51  ;;  %v9437_v24 = vrot.slane %v9382_v51, %v17799_v49  ;;  %v9380_v28 = vmax.f32 %v9219_v7, %v9349_v54 }
 0xb31   : > { %v15879_v56 = vpop.f32.mrf.mxu1  ;;  %v15903_v5 = vpop.f32.mrf.mxu0 }
 0xb32   : > { %v9444_v52 = vrot.slane %v9430_v18, %v17799_v49  ;;  %v9445_v53 = vcombine.high %v9437_v24, %v9437_v24  ;;  %v9620_v42 = vsel %vm4031_vm3, %v9437_v24, -inf  ;;  %v9396_v22 = vcombine.high %v9380_v28, %v9380_v28 }
 0xb33   : > { %v9621_v36 = vrot.slane %v9620_v42, 4  ;;  %v9403_v38 = vrot.slane %v9380_v28, %v17799_v49  ;;  %v9383_v10 = vmax.f32 %v15879_v56, %v15903_v5 }
 0xb34   : > { %v9446_v44 = vcombine.high %v9444_v52, %v9444_v52  ;;  %v9627_v12 = vsel %vm4031_vm3, %v9445_v53, -inf  ;;  %v9634_v16 = vsel %vm4031_vm3, %v9444_v52, -inf  ;;  %v9410_v55 = vrot.slane %v9396_v22, %v17799_v49  ;;  %v9352_v22 = vpop.f32.mrf.mxu0 }
 0xb35   : > { %v9622_v58 = vmax.f32 %v9620_v42, %v9621_v36  ;;  %v9628_v35 = vrot.slane %v9627_v12, 4  ;;  %v9635_v14 = vrot.slane %v9634_v16, 4  ;;  %v9411_v63 = vcombine.high %v9403_v38, %v9403_v38  ;;  %v9222_v42 = vpop.f32.mrf.mxu1 }
 0xb36   : > { %v9641_v20 = vsel %vm4031_vm3, %v9446_v44, -inf  ;;  %v9412_v46 = vcombine.high %v9410_v55, %v9410_v55  ;;  %v9564_v15 = vsel %vm4031_vm3, %v9403_v38, -inf  ;;  %v9578_v21 = vsel %vm4031_vm3, %v9410_v55, -inf }
 0xb37   : > { %v9623_v60 = vrot.slane %v9622_v58, 2  ;;  %v9629_v45 = vmax.f32 %v9627_v12, %v9628_v35  ;;  %v9636_v27 = vmax.f32 %v9634_v16, %v9635_v14  ;;  %v9642_v39 = vrot.slane %v9641_v20, 4 }
 0xb38   : > { %v9565_v40 = vrot.slane %v9564_v15, 4  ;;  %v9571_v8 = vsel %vm4031_vm3, %v9411_v63, -inf  ;;  %v9579_v62 = vrot.slane %v9578_v21, 4  ;;  %v9585_v31 = vsel %vm4031_vm3, %v9412_v46, -inf }
 0xb39   : > { %v9624_v17 = vmax.f32 %v9622_v58, %v9623_v60  ;;  %v9630_v26 = vrot.slane %v9629_v45, 2  ;;  %v9637_v33 = vrot.slane %v9636_v27, 2  ;;  %v9643_v29 = vmax.f32 %v9641_v20, %v9642_v39 }
 0xb3a   : > { %v9566_v30 = vmax.f32 %v9564_v15, %v9565_v40  ;;  %v9572_v23 = vrot.slane %v9571_v8, 4  ;;  %v9580_v57 = vmax.f32 %v9578_v21, %v9579_v62  ;;  %v9586_v19 = vrot.slane %v9585_v31, 4  ;;  %v15906_v62 = vpop.f32.mrf.mxu0 }
 0xb3b   : > { %v9625_v25 = vrot.slane %v9624_v17, 1  ;;  %v9631_v1 = vmax.f32 %v9629_v45, %v9630_v26  ;;  %v9638_v6 = vmax.f32 %v9636_v27, %v9637_v33  ;;  %v9644_v50 = vrot.slane %v9643_v29, 2 }
 0xb3c   : > { %v9567_v2 = vrot.slane %v9566_v30, 2  ;;  %v9573_v3 = vmax.f32 %v9571_v8, %v9572_v23  ;;  %v9581_v47 = vrot.slane %v9580_v57, 2  ;;  %v9587_v9 = vmax.f32 %v9585_v31, %v9586_v19  ;;  %v15882_v8 = vpop.f32.mrf.mxu1 }
 0xb3d   : > { %v9626_v61 = vmax.f32 %v9624_v17, %v9625_v25  ;;  %v9632_v11 = vrot.slane %v9631_v1, 1  ;;  %v9639_v0 = vrot.slane %v9638_v6, 1  ;;  %v9645_v32 = vmax.f32 %v9643_v29, %v9644_v50 }
 0xb3e   : > { %v9568_v59 = vmax.f32 %v9566_v30, %v9567_v2  ;;  %v9574_v43 = vrot.slane %v9573_v3, 2  ;;  %v9582_v37 = vmax.f32 %v9580_v57, %v9581_v47  ;;  %v9588_v48 = vrot.slane %v9587_v9, 2 }
 0xb3f   : > { %v9633_v34 = vmax.f32 %v9631_v1, %v9632_v11  ;;  %v9640_v41 = vmax.f32 %v9638_v6, %v9639_v0  ;;  %v9646_v51 = vrot.slane %v9645_v32, 1  ;;  %v9447_v7 = vcombine.high %v9383_v10, %v9383_v10 }
 0xb40   : > { %v9569_v54 = vrot.slane %v9568_v59, 1  ;;  %v9575_v18 = vmax.f32 %v9573_v3, %v9574_v43  ;;  %v9583_v24 = vrot.slane %v9582_v37, 1  ;;  %v9589_v28 = vmax.f32 %v9587_v9, %v9588_v48 }
 0xb41   : > { %v9647_v56 = vmax.f32 %v9645_v32, %v9646_v51  ;;  %v9842_v5 = vsel %vm5073_vm4, %v9633_v34, %v9626_v61  ;;  %v9454_v52 = vrot.slane %v9383_v10, %v17799_v49  ;;  %v9461_v53 = vrot.slane %v9447_v7, %v17799_v49 }
 0xb42   : > { %v9843_v36 = vsel %vm5075_vm5, %v9640_v41, %v9842_v5  ;;  %v9570_v38 = vmax.f32 %v9568_v59, %v9569_v54  ;;  %v9576_v44 = vrot.slane %v9575_v18, 1  ;;  %v9584_v12 = vmax.f32 %v9582_v37, %v9583_v24 }
 0xb43   : > { %v9844_v16 = vsel %vm5077_vm6, %v9647_v56, %v9843_v36  ;;  %v9590_v55 = vrot.slane %v9589_v28, 1  ;;  %v9462_v58 = vcombine.high %v9454_v52, %v9454_v52  ;;  %v9463_v35 = vcombine.high %v9461_v53, %v9461_v53 }
 0xb44   : > { %v9577_v14 = vmax.f32 %v9575_v18, %v9576_v44  ;;  %v9648_v63 = vsel %vm4031_vm3, %v9454_v52, -inf  ;;  %v9662_v20 = vsel %vm4031_vm3, %v9461_v53, -inf  ;;  %v9381_v10 = vmax.f32 %v9222_v42, %v9352_v22  ;;  %9871 = vst.msk [vmem:[#allocation2 + $0x51] sm:$0xf] %vm9868_vm12, %v9844_v16 }
 0xb45   : > { %v9591_v46 = vmax.f32 %v9589_v28, %v9590_v55  ;;  %v9649_v15 = vrot.slane %v9648_v63, 4  ;;  %v9655_v21 = vsel %vm4031_vm3, %v9462_v58, -inf  ;;  %v9663_v60 = vrot.slane %v9662_v20, 4 }
 0xb46   : > { %v9836_v45 = vsel %vm5073_vm4, %v9577_v14, %v9570_v38  ;;  %v9656_v27 = vrot.slane %v9655_v21, 4  ;;  %v9669_v39 = vsel %vm4031_vm3, %v9463_v35, -inf  ;;  %v9413_v40 = vcombine.high %v9381_v10, %v9381_v10 }
 0xb47   : > { %v9837_v31 = vsel %vm5075_vm5, %v9584_v12, %v9836_v45  ;;  %v9650_v17 = vmax.f32 %v9648_v63, %v9649_v15  ;;  %v9664_v26 = vmax.f32 %v9662_v20, %v9663_v60  ;;  %v9670_v33 = vrot.slane %v9669_v39, 4  ;;  %v9235_v15 = vpop.f32.mrf.mxu1 }
 0xb48   : > { %v9838_v29 = vsel %vm5077_vm6, %v9591_v46, %v9837_v31  ;;  %v9657_v30 = vmax.f32 %v9655_v21, %v9656_v27  ;;  %v9420_v23 = vrot.slane %v9381_v10, %v17799_v49  ;;  %v9427_v57 = vrot.slane %v9413_v40, %v17799_v49  ;;  %v9365_v21 = vpop.f32.mrf.mxu0 }
 0xb49   : > { %v9651_v19 = vrot.slane %v9650_v17, 2  ;;  %v9665_v25 = vrot.slane %v9664_v26, 2  ;;  %v9671_v1 = vmax.f32 %v9669_v39, %v9670_v33  ;;  %v9386_v6 = vmax.f32 %v15882_v8, %v15906_v62  ;;  %9869 = vst.msk [vmem:[#allocation2 + $0x1] sm:$0xf] %vm9868_vm12, %v9838_v29 }
 0xb4a   : > { %v9658_v50 = vrot.slane %v9657_v30, 2  ;;  %v9428_v2 = vcombine.high %v9420_v23, %v9420_v23  ;;  %v9429_v3 = vcombine.high %v9427_v57, %v9427_v57  ;;  %v9592_v47 = vsel %vm4031_vm3, %v9420_v23, -inf }
 0xb4b   : > { %v9652_v9 = vmax.f32 %v9650_v17, %v9651_v19  ;;  %v9666_v61 = vmax.f32 %v9664_v26, %v9665_v25  ;;  %v9672_v11 = vrot.slane %v9671_v1, 2  ;;  %v9593_v0 = vrot.slane %v9592_v47, 4  ;;  %v15883_v25 = vpop.f32.mrf.mxu1 }
 0xb4c   : > { %v9659_v32 = vmax.f32 %v9657_v30, %v9658_v50  ;;  %v9599_v59 = vsel %vm4031_vm3, %v9428_v2, -inf  ;;  %v9606_v43 = vsel %vm4031_vm3, %v9427_v57, -inf  ;;  %v9613_v37 = vsel %vm4031_vm3, %v9429_v3, -inf }
 0xb4d   : > { %v9653_v48 = vrot.slane %v9652_v9, 1  ;;  %v9667_v34 = vrot.slane %v9666_v61, 1  ;;  %v9673_v41 = vmax.f32 %v9671_v1, %v9672_v11  ;;  %v9594_v51 = vmax.f32 %v9592_v47, %v9593_v0  ;;  %v15907_v1 = vpop.f32.mrf.mxu0 }
 0xb4e   : > { %v9660_v7 = vrot.slane %v9659_v32, 1  ;;  %v9600_v54 = vrot.slane %v9599_v59, 4  ;;  %v9607_v18 = vrot.slane %v9606_v43, 4  ;;  %v9614_v24 = vrot.slane %v9613_v37, 4 }
 0xb4f   : > { %v9654_v28 = vmax.f32 %v9652_v9, %v9653_v48  ;;  %v9668_v56 = vmax.f32 %v9666_v61, %v9667_v34  ;;  %v9674_v5 = vrot.slane %v9673_v41, 1  ;;  %v9595_v52 = vrot.slane %v9594_v51, 2 }
 0xb50   : > { %v9661_v53 = vmax.f32 %v9659_v32, %v9660_v7  ;;  %v9601_v42 = vmax.f32 %v9599_v59, %v9600_v54  ;;  %v9608_v22 = vmax.f32 %v9606_v43, %v9607_v18  ;;  %v9615_v36 = vmax.f32 %v9613_v37, %v9614_v24 }
 0xb51   : > { %v9675_v38 = vmax.f32 %v9673_v41, %v9674_v5  ;;  %v9596_v44 = vmax.f32 %v9594_v51, %v9595_v52  ;;  %v9498_v12 = vcombine.high %v9386_v6, %v9386_v6  ;;  %v9505_v16 = vrot.slane %v9386_v6, %v17799_v49 }
 0xb52   : > { %v9845_v55 = vsel %vm5073_vm4, %v9661_v53, %v9654_v28  ;;  %v9602_v58 = vrot.slane %v9601_v42, 2  ;;  %v9609_v35 = vrot.slane %v9608_v22, 2  ;;  %v9616_v14 = vrot.slane %v9615_v36, 2 }
 0xb53   : > { %v9846_v63 = vsel %vm5075_vm5, %v9668_v56, %v9845_v55  ;;  %v9597_v20 = vrot.slane %v9596_v44, 1  ;;  %v9512_v10 = vrot.slane %v9498_v12, %v17799_v49  ;;  %v9513_v46 = vcombine.high %v9505_v16, %v9505_v16 }
 0xb54   : > { %v9847_v60 = vsel %vm5077_vm6, %v9675_v38, %v9846_v63  ;;  %v9603_v45 = vmax.f32 %v9601_v42, %v9602_v58  ;;  %v9610_v27 = vmax.f32 %v9608_v22, %v9609_v35  ;;  %v9617_v39 = vmax.f32 %v9615_v36, %v9616_v14 }
 0xb55   : > { %v9598_v40 = vmax.f32 %v9596_v44, %v9597_v20  ;;  %v9514_v8 = vcombine.high %v9512_v10, %v9512_v10  ;;  %v9732_v62 = vsel %vm4031_vm3, %v9505_v16, -inf  ;;  %v9739_v31 = vsel %vm4031_vm3, %v9513_v46, -inf  ;;  %9872 = vst.msk [vmem:[#allocation2 + $0x79] sm:$0xf] %vm9868_vm12, %v9847_v60 }
 0xb56   : > { %v9604_v17 = vrot.slane %v9603_v45, 1  ;;  %v9611_v26 = vrot.slane %v9610_v27, 1  ;;  %v9618_v33 = vrot.slane %v9617_v39, 1  ;;  %v9733_v29 = vrot.slane %v9732_v62, 4 }
 0xb57   : > { %v9740_v30 = vrot.slane %v9739_v31, 4  ;;  %v9746_v23 = vsel %vm4031_vm3, %v9512_v10, -inf  ;;  %v9753_v57 = vsel %vm4031_vm3, %v9514_v8, -inf  ;;  %v9384_v19 = vmax.f32 %v9235_v15, %v9365_v21 }
 0xb58   : > { %v9605_v6 = vmax.f32 %v9603_v45, %v9604_v17  ;;  %v9612_v50 = vmax.f32 %v9610_v27, %v9611_v26  ;;  %v9619_v2 = vmax.f32 %v9617_v39, %v9618_v33  ;;  %v9734_v3 = vmax.f32 %v9732_v62, %v9733_v29  ;;  %v9238_v39 = vpop.f32.mrf.mxu1 }
 0xb59   : > { %v9741_v47 = vmax.f32 %v9739_v31, %v9740_v30  ;;  %v9747_v9 = vrot.slane %v9746_v23, 4  ;;  %v9754_v61 = vrot.slane %v9753_v57, 4  ;;  %v9464_v11 = vcombine.high %v9384_v19, %v9384_v19 }
 0xb5a   : > { %v9839_v0 = vsel %vm5073_vm4, %v9605_v6, %v9598_v40  ;;  %v9735_v32 = vrot.slane %v9734_v3, 2  ;;  %v9471_v59 = vrot.slane %v9384_v19, %v17799_v49  ;;  %v9387_v43 = vmax.f32 %v15883_v25, %v15907_v1  ;;  %v9368_v40 = vpop.f32.mrf.mxu0 }
 0xb5b   : > { %v9840_v37 = vsel %vm5075_vm5, %v9612_v50, %v9839_v0  ;;  %v9742_v48 = vrot.slane %v9741_v47, 2  ;;  %v9748_v34 = vmax.f32 %v9746_v23, %v9747_v9  ;;  %v9755_v41 = vmax.f32 %v9753_v57, %v9754_v61 }
 0xb5c   : > { %v9841_v51 = vsel %vm5077_vm6, %v9619_v2, %v9840_v37  ;;  %v9736_v7 = vmax.f32 %v9734_v3, %v9735_v32  ;;  %v9478_v54 = vrot.slane %v9464_v11, %v17799_v49  ;;  %v9479_v18 = vcombine.high %v9471_v59, %v9471_v59  ;;  %v19232_v52 = vld [vmem:[#allocation2 + $0x50] ss:$40 sps:$4 sm:$0xff]  }
 0xb5d   : > { %v9743_v24 = vmax.f32 %v9741_v47, %v9742_v48  ;;  %v9749_v28 = vrot.slane %v9748_v34, 2  ;;  %v9756_v56 = vrot.slane %v9755_v41, 2  ;;  %v9676_v5 = vsel %vm4031_vm3, %v9471_v59, -inf  ;;  %9870 = vst.msk [vmem:[#allocation2 + $0x29] sm:$0xf] %vm9868_vm12, %v9841_v51 }
 0xb5e   : > { %v9737_v53 = vrot.slane %v9736_v7, 1  ;;  %v9480_v42 = vcombine.high %v9478_v54, %v9478_v54  ;;  %v9677_v22 = vrot.slane %v9676_v5, 4  ;;  %v9683_v36 = vsel %vm4031_vm3, %v9479_v18, -inf  ;;  %10252 = vst [vmem:[#allocation2 + $0x50] sm:$0x1] %v20196_v4 }
 0xb5f   : > { %10253 = vst [vmem:[#allocation2 + $0x78] sm:$0x1] %v20196_v4  ;;  %v9744_v38 = vrot.slane %v9743_v24, 1  ;;  %v9750_v44 = vmax.f32 %v9748_v34, %v9749_v28  ;;  %v9757_v12 = vmax.f32 %v9755_v41, %v9756_v56  ;;  %v9684_v16 = vrot.slane %v9683_v36, 4  ;;  %v19237_v55 = vld [vmem:[#allocation2 + $0x52] ss:$40 sps:$4 sm:$0xff]  }
 0xb60   : > { %v9738_v58 = vmax.f32 %v9736_v7, %v9737_v53  ;;  %v9678_v35 = vmax.f32 %v9676_v5, %v9677_v22  ;;  %v9690_v14 = vsel %vm4031_vm3, %v9478_v54, -inf  ;;  %v9697_v63 = vsel %vm4031_vm3, %v9480_v42, -inf  ;;  %10260 = vst [vmem:[#allocation2 + $0x55] sm:$0x1] %v20196_v4  ;;  %10261 = vst [vmem:[#allocation2 + $0x7d] sm:$0x1] %v20196_v4 }
 0xb61   : > { %v9745_v20 = vmax.f32 %v9743_v24, %v9744_v38  ;;  %v9751_v10 = vrot.slane %v9750_v44, 1  ;;  %v9758_v46 = vrot.slane %v9757_v12, 1  ;;  %v9685_v15 = vmax.f32 %v9683_v36, %v9684_v16 }
 0xb62   : > { %v9679_v21 = vrot.slane %v9678_v35, 2  ;;  %v9691_v60 = vrot.slane %v9690_v14, 4  ;;  %v9698_v45 = vrot.slane %v9697_v63, 4  ;;  %v9515_v27 = vcombine.high %v9387_v43, %v9387_v43 }
 0xb63   : > { %v9752_v8 = vmax.f32 %v9750_v44, %v9751_v10  ;;  %v9759_v62 = vmax.f32 %v9757_v12, %v9758_v46  ;;  %v9854_v31 = vsel %vm5073_vm4, %v9745_v20, %v9738_v58  ;;  %v9686_v17 = vrot.slane %v9685_v15, 2  ;;  %v16519_v12 = vld [vmem:[#allocation2 + $0x51] ss:$40 sps:$4 sm:$0xff]  }
 0xb64   : > { %v9680_v26 = vmax.f32 %v9678_v35, %v9679_v21  ;;  %v9692_v33 = vmax.f32 %v9690_v14, %v9691_v60  ;;  %v9699_v29 = vmax.f32 %v9697_v63, %v9698_v45  ;;  %v9522_v30 = vrot.slane %v9387_v43, %v17799_v49  ;;  %v19247_v1 = vld [vmem:[#allocation2] ss:$40 sps:$4 sm:$0xff]  }
 0xb65   : > { %v9855_v23 = vsel %vm5075_vm5, %v9752_v8, %v9854_v31  ;;  %v9687_v57 = vmax.f32 %v9685_v15, %v9686_v17  ;;  %v9529_v19 = vrot.slane %v9515_v27, %v17799_v49  ;;  %v9385_v25 = vmax.f32 %v9238_v39, %v9368_v40  ;;  %v19249_v6 = vld [vmem:[#allocation2 + $0x2] ss:$40 sps:$4 sm:$0xff]   ;;  %10250 = vst [vmem:[#allocation2] sm:$0x1] %v20196_v4 }
 0xb66   : > { %v9856_v50 = vsel %vm5077_vm6, %v9759_v62, %v9855_v23  ;;  %v9681_v2 = vrot.slane %v9680_v26, 1  ;;  %v9693_v3 = vrot.slane %v9692_v33, 2  ;;  %v9700_v47 = vrot.slane %v9699_v29, 2  ;;  %10251 = vst [vmem:[#allocation2 + $0x28] sm:$0x1] %v20196_v4 }
 0xb67   : > { %10258 = vst [vmem:[#allocation2 + $0x5] sm:$0x1] %v20196_v4  ;;  %10259 = vst [vmem:[#allocation2 + $0x2d] sm:$0x1] %v20196_v4  ;;  %v9688_v9 = vrot.slane %v9687_v57, 1  ;;  %v9530_v61 = vcombine.high %v9522_v30, %v9522_v30  ;;  %v9531_v11 = vcombine.high %v9529_v19, %v9529_v19  ;;  %v9760_v0 = vsel %vm4031_vm3, %v9522_v30, -inf }
 0xb68   : > { %9875 = vst.msk [vmem:[#allocation2 + $0xf1] sm:$0xf] %vm9868_vm12, %v9856_v50  ;;  %v9682_v32 = vmax.f32 %v9680_v26, %v9681_v2  ;;  %v9694_v59 = vmax.f32 %v9692_v33, %v9693_v3  ;;  %v9701_v43 = vmax.f32 %v9699_v29, %v9700_v47  ;;  %v9761_v37 = vrot.slane %v9760_v0, 4  ;;  %v16518_v28 = vld [vmem:[#allocation2 + $0x1] ss:$40 sps:$4 sm:$0xff]  }
 0xb69   : > { %v9689_v48 = vmax.f32 %v9687_v57, %v9688_v9  ;;  %v9767_v34 = vsel %vm4031_vm3, %v9530_v61, -inf  ;;  %v9774_v41 = vsel %vm4031_vm3, %v9529_v19, -inf  ;;  %v9781_v51 = vsel %vm4031_vm3, %v9531_v11, -inf }
 0xb6a   : > { %v9695_v7 = vrot.slane %v9694_v59, 1  ;;  %v9702_v54 = vrot.slane %v9701_v43, 1  ;;  %v9762_v18 = vmax.f32 %v9760_v0, %v9761_v37  ;;  %v9768_v24 = vrot.slane %v9767_v34, 4 }
 0xb6b   : > { %v9848_v56 = vsel %vm5073_vm4, %v9689_v48, %v9682_v32  ;;  %v9775_v5 = vrot.slane %v9774_v41, 4  ;;  %v9782_v53 = vrot.slane %v9781_v51, 4  ;;  %v9481_v42 = vcombine.high %v9385_v25, %v9385_v25 }
 0xb6c   : > { %v9696_v22 = vmax.f32 %v9694_v59, %v9695_v7  ;;  %v9703_v36 = vmax.f32 %v9701_v43, %v9702_v54  ;;  %v9763_v38 = vrot.slane %v9762_v18, 2  ;;  %v9769_v44 = vmax.f32 %v9767_v34, %v9768_v24 }
 0xb6d   : > { %v9776_v16 = vmax.f32 %v9774_v41, %v9775_v5  ;;  %v9783_v58 = vmax.f32 %v9781_v51, %v9782_v53  ;;  %v9488_v35 = vrot.slane %v9385_v25, %v17799_v49  ;;  %v9495_v14 = vrot.slane %v9481_v42, %v17799_v49 }
 0xb6e   : > { %v9849_v63 = vsel %vm5075_vm5, %v9696_v22, %v9848_v56  ;;  %v9764_v20 = vmax.f32 %v9762_v18, %v9763_v38  ;;  %v9770_v10 = vrot.slane %v9769_v44, 2  ;;  %v9935_v46 = vpack.c.bf16 %v16519_v12, %v16518_v28 }
 0xb6f   : > { %v9850_v15 = vsel %vm5077_vm6, %v9703_v36, %v9849_v63  ;;  %v9777_v21 = vrot.slane %v9776_v16, 2  ;;  %v9784_v60 = vrot.slane %v9783_v58, 2  ;;  %v9496_v45 = vcombine.high %v9488_v35, %v9488_v35 }
 0xb70   : > { %v9765_v27 = vrot.slane %v9764_v20, 1  ;;  %v9771_v39 = vmax.f32 %v9769_v44, %v9770_v10  ;;  %v9497_v40 = vcombine.high %v9495_v14, %v9495_v14  ;;  %v9704_v8 = vsel %vm4031_vm3, %v9488_v35, -inf  ;;  %15916 = vmatprep.mubr.msk.bf16.mxu1 %vm5208_vm11, %v9935_v46  ;;  %9873 = vst.msk [vmem:[#allocation2 + $0xa1] sm:$0xf] %vm9868_vm12, %v9850_v15  ;;  %v16532_v46 = vld [vmem:[%s20202_s2 + $0x50] sm:$0xff]  }
 0xb71   : > { %v9778_v62 = vmax.f32 %v9776_v16, %v9777_v21  ;;  %v9785_v31 = vmax.f32 %v9783_v58, %v9784_v60  ;;  %v9705_v17 = vrot.slane %v9704_v8, 4  ;;  %v9711_v26 = vsel %vm4031_vm3, %v9496_v45, -inf  ;;  %v16533_v60 = vld [vmem:[%s20202_s2 + $0x48] sm:$0xff]   ;;  %v16534_v45 = vld [vmem:[%s20202_s2 + $0x40] sm:$0xff]   ;;  %s16720_s2 = sshll.u32 %s16811_s29, 4  ;;  %s16721_s2 = int_to_ptr.vmem [resolvable:$false] %s16720_s2 }
 0xb72   : > { %v9766_v33 = vmax.f32 %v9764_v20, %v9765_v27  ;;  %v9772_v29 = vrot.slane %v9771_v39, 1  ;;  %v9712_v30 = vrot.slane %v9711_v26, 4  ;;  %v9718_v23 = vsel %vm4031_vm3, %v9495_v14, -inf  ;;  %v16539_v27 = vld [vmem:[%s20203_s9 + $0x70] sm:$0xff]   ;;  %p16723_p0 = scmp.lt.s32.totalorder %s13528_s7, %s16721_s2 }
 0xb73   : > { %v9779_v57 = vrot.slane %v9778_v62, 1  ;;  %v9786_v19 = vrot.slane %v9785_v31, 1  ;;  %v9706_v25 = vmax.f32 %v9704_v8, %v9705_v17  ;;  %v9719_v50 = vrot.slane %v9718_v23, 4  ;;  %v16542_v8 = vld [vmem:[%s20203_s9 + $0x28] sm:$0xff]   ;;  %v16545_v17 = vld [vmem:[%s20203_s9 + $0x58] sm:$0xff]  }
 0xb74   : > { %v9773_v2 = vmax.f32 %v9771_v39, %v9772_v29  ;;  %v9713_v3 = vmax.f32 %v9711_v26, %v9712_v30  ;;  %v9725_v47 = vsel %vm4031_vm3, %v9497_v40, -inf  ;;  %v9901_v9 = vpack.c.bf16 %v19232_v52, %v19247_v1  ;;  %v16540_v39 = vld [vmem:[%s20203_s9 + $0x30] sm:$0xff]   ;;  %v16541_v40 = vld [vmem:[%s20203_s9 + $0x68] sm:$0xff]   ;;  %v16546_v26 = vld [vmem:[%s20203_s9 + $0x18] sm:$0xff]  }
 0xb75   : > { %v9780_v61 = vmax.f32 %v9778_v62, %v9779_v57  ;;  %v9787_v11 = vmax.f32 %v9785_v31, %v9786_v19  ;;  %v9707_v0 = vrot.slane %v9706_v25, 2  ;;  %v9720_v32 = vmax.f32 %v9718_v23, %v9719_v50  ;;  %v16543_v62 = vld [vmem:[%s20203_s9 + $0x60] sm:$0xff]   ;;  %v16548_v29 = vld [vmem:[%s20203_s9 + $0x10] sm:$0xff]   ;;  %v16549_v30 = vld [vmem:[%s20203_s9 + $0x48] sm:$0xff]  }
 0xb76   : > { %v9857_v59 = vsel %vm5073_vm4, %v9773_v2, %v9766_v33  ;;  %v9714_v43 = vrot.slane %v9713_v3, 2  ;;  %v9726_v37 = vrot.slane %v9725_v47, 4  ;;  %15928 = vmatprep.mubr.msk.bf16.mxu0 %vm5208_vm11, %v9901_v9  ;;  %v10128_v21 = vpack.c.bf16 %v19237_v55, %v19249_v6  ;;  %v16538_v6 = vld [vmem:[%s20203_s9 + $0x38] sm:$0xff]   ;;  %v16544_v31 = vld [vmem:[%s20203_s9 + $0x20] sm:$0xff]   ;;  %v16547_v33 = vld [vmem:[%s20203_s9 + $0x50] sm:$0xff]  }
 0xb77   : > { %v9858_v48 = vsel %vm5075_vm5, %v9780_v61, %v9857_v59  ;;  %v9708_v34 = vmax.f32 %v9706_v25, %v9707_v0  ;;  %v9721_v41 = vrot.slane %v9720_v32, 2  ;;  %v16550_v23 = vld [vmem:[%s20203_s9 + $0x8] sm:$0xff]   ;;  %v16551_v57 = vld [vmem:[%s20203_s9 + $0x40] sm:$0xff]   ;;  %v19358_v25 = vld [vmem:[%s20203_s9 + $0xb8] sm:$0xff]  }
 0xb78   : > { %v9859_v51 = vsel %vm5077_vm6, %v9787_v11, %v9858_v48  ;;  %v9715_v7 = vmax.f32 %v9713_v3, %v9714_v43  ;;  %v9727_v54 = vmax.f32 %v9725_v47, %v9726_v37  ;;  %v16552_v19 = vld [vmem:[%s20203_s9] sm:$0xff]  }
 0xb79   : > { %v9709_v18 = vrot.slane %v9708_v34, 1  ;;  %v9722_v52 = vmax.f32 %v9720_v32, %v9721_v41  ;;  %9876 = vst.msk [vmem:[#allocation2 + $0x119] sm:$0xf] %vm9868_vm12, %v9859_v51  ;;  %v14190_v59 = vld [vmem:[%s20125_s14 + $0x7] ss:$0 sm:$0xff] }
 0xb7a   : > { %v9716_v1 = vrot.slane %v9715_v7, 1  ;;  %v9728_v24 = vrot.slane %v9727_v54, 2 }
 0xb7b   : > { %v9723_v28 = vrot.slane %v9722_v52, 1  ;;  %v9710_v56 = vmax.f32 %v9708_v34, %v9709_v18 }
 0xb7c   : > { %v9717_v5 = vmax.f32 %v9715_v7, %v9716_v1  ;;  %v9729_v53 = vmax.f32 %v9727_v54, %v9728_v24 }
 0xb7d   : > { %v9724_v42 = vmax.f32 %v9722_v52, %v9723_v28 }
 0xb7e   : > { %v9730_v22 = vrot.slane %v9729_v53, 1  ;;  %v9851_v36 = vsel %vm5073_vm4, %v9717_v5, %v9710_v56 }
 0xb7f   : > { %v9852_v38 = vsel %vm5075_vm5, %v9724_v42, %v9851_v36 }
 0xb80   : > { %v9731_v44 = vmax.f32 %v9729_v53, %v9730_v22  ;;  %v16529_v12 = vld [vmem:[#allocation2 + $0xf0] ss:$40 sps:$4 sm:$0xff]  }
 0xb81   : > { %v16536_v16 = vld [vmem:[#allocation2 + $0xf2] ss:$40 sps:$4 sm:$0xff]   ;;  %10256 = vst [vmem:[#allocation2 + $0xf0] sm:$0x1] %v20196_v4  ;;  %10257 = vst [vmem:[#allocation2 + $0x118] sm:$0x1] %v20196_v4 }
 0xb82   : > { %v9853_v58 = vsel %vm5077_vm6, %v9731_v44, %v9852_v38  ;;  %10264 = vst [vmem:[#allocation2 + $0xf5] sm:$0x1] %v20196_v4  ;;  %10265 = vst [vmem:[#allocation2 + $0x11d] sm:$0x1] %v20196_v4  ;;  %v16527_v35 = vld [vmem:[#allocation2 + $0xf1] ss:$40 sps:$4 sm:$0xff]  }
 0xb83   : > { %9874 = vst.msk [vmem:[#allocation2 + $0xc9] sm:$0xf] %vm9868_vm12, %v9853_v58 }
 0xb8a   : > { %v16526_v14 = vld [vmem:[#allocation2 + $0xa1] ss:$40 sps:$4 sm:$0xff]  }
 0xb8b   : > { %v16528_v63 = vld [vmem:[#allocation2 + $0xa0] ss:$40 sps:$4 sm:$0xff]   ;;  %v9936_v10 = vpack.c.bf16 %v16527_v35, %v16526_v14 }
 0xb8c   : > { %v16535_v20 = vld [vmem:[#allocation2 + $0xa2] ss:$40 sps:$4 sm:$0xff]   ;;  %10254 = vst [vmem:[#allocation2 + $0xa0] sm:$0x1] %v20196_v4  ;;  %10255 = vst [vmem:[#allocation2 + $0xc8] sm:$0x1] %v20196_v4  ;;  %v9902_v15 = vpack.c.bf16 %v16529_v12, %v16528_v63 }
 0xb8d   : > { %10262 = vst [vmem:[#allocation2 + $0xa5] sm:$0x1] %v20196_v4  ;;  %10263 = vst [vmem:[#allocation2 + $0xcd] sm:$0x1] %v20196_v4  ;;  %15917 = vmatmul.mubr.msk.bf16.vlgmr.msra.gmra.mxu1 %vm5208_vm11, %v9936_v10  ;;  %v10129_v55 = vpack.c.bf16 %v16536_v16, %v16535_v20 }
 0xb8e   : > { %15929 = vmatmul.mubr.msk.bf16.vlgmr.msra.gmra.mxu0 %vm5208_vm11, %v9902_v15  ;;  %15933 = vmatpush3.bf16.msra.mxu1 %v19180_v13  ;;  %v16537_v13 = vld [vmem:[%s20203_s9 + $0x78] sm:$0xff]  }
 0xb8f   : > { %15940 = vmatprep.mubr.msk.bf16.mxu1 %vm5208_vm11, %v10128_v21  ;;  %15934 = vmatprep.subr.bf16.mxu1 %v16532_v46  ;;  %v16564_v21 = vld [vmem:[%s20203_s9 + $0xb0] sm:$0xff]  }
 0xb90   : > { %15944 = vmatprep.subr.bf16.mxu0 %v16537_v13 }
 0xb91   : > { %15945 = vmatpush3.bf16.msra.mxu0 %v16537_v13 }
 0xb92   : > { %15935 = vmatpush3.bf16.msra.mxu1 %v16532_v46  ;;  %15946 = vmatprep.subr.bf16.mxu0 %v16539_v27 }
 0xb93   : > { %15936 = vmatprep.subr.bf16.mxu1 %v16533_v60 }
 0xb95   : > { %15947 = vmatpush3.bf16.msra.mxu0 %v16539_v27 }
 0xb96   : > { %15937 = vmatpush3.bf16.msra.mxu1 %v16533_v60  ;;  %15948 = vmatprep.subr.bf16.mxu0 %v16541_v40 }
 0xb97   : > { %15938 = vmatprep.subr.bf16.mxu1 %v16534_v45 }
 0xb99   : > { %15949 = vmatpush3.bf16.msra.mxu0 %v16541_v40 }
 0xb9a   : > { %15939 = vmatpush3.bf16.msra.mxu1 %v16534_v45  ;;  %15950 = vmatprep.subr.bf16.mxu0 %v16543_v62 }
 0xb9b   : > { %15964 = vmatprep.subr.bf16.mxu1 %v16538_v6 }
 0xb9d   : > { %15941 = vmatmul.mubr.msk.bf16.vlgmr.msra.gmra.mxu1 %vm5208_vm11, %v10129_v55  ;;  %15951 = vmatpush3.bf16.msra.mxu0 %v16543_v62  ;;  %v16565_v62 = vld [vmem:[%s20203_s9 + $0xa8] sm:$0xff]  }
 0xb9e   : > { %15965 = vmatpush3.bf16.msra.mxu1 %v16538_v6  ;;  %15952 = vmatprep.subr.bf16.mxu0 %v16545_v17 }
 0xb9f   : > { %15966 = vmatprep.subr.bf16.mxu1 %v16540_v39 }
 0xba1   : > { %15953 = vmatpush3.bf16.msra.mxu0 %v16545_v17  ;;  %v16567_v17 = vld [vmem:[%s20203_s9 + $0x98] sm:$0xff]  }
 0xba2   : > { %15967 = vmatpush3.bf16.msra.mxu1 %v16540_v39  ;;  %15954 = vmatprep.subr.bf16.mxu0 %v16547_v33 }
 0xba3   : > { %15968 = vmatprep.subr.bf16.mxu1 %v16542_v8 }
 0xba5   : > { %15955 = vmatpush3.bf16.msra.mxu0 %v16547_v33  ;;  %v16569_v33 = vld [vmem:[%s20203_s9 + $0x88] sm:$0xff]  }
 0xba6   : > { %15969 = vmatpush3.bf16.msra.mxu1 %v16542_v8  ;;  %15956 = vmatprep.subr.bf16.mxu0 %v16549_v30 }
 0xba7   : > { %15970 = vmatprep.subr.bf16.mxu1 %v16544_v31 }
 0xba9   : > { %15957 = vmatpush3.bf16.msra.mxu0 %v16549_v30 }
 0xbaa   : > { %15971 = vmatpush3.bf16.msra.mxu1 %v16544_v31  ;;  %15958 = vmatprep.subr.bf16.mxu0 %v16551_v57  ;;  %v16566_v31 = vld [vmem:[%s20203_s9 + $0xa0] sm:$0xff]  }
 0xbab   : > { %15972 = vmatprep.subr.bf16.mxu1 %v16546_v26 }
 0xbad   : > { %15959 = vmatpush3.bf16.msra.mxu0 %v16551_v57  ;;  %v16574_v57 = vld [vmem:[%s20204_s10 + $0x38] sm:$0xff]  }
 0xbae   : > { %15973 = vmatpush3.bf16.msra.mxu1 %v16546_v26  ;;  %15984 = vmatprep.subr.bf16.mxu0 %v19358_v25  ;;  %v16568_v26 = vld [vmem:[%s20203_s9 + $0x90] sm:$0xff]  }
 0xbaf   : > { %15974 = vmatprep.subr.bf16.mxu1 %v16548_v29 }
 0xbb2   : > { %15975 = vmatpush3.bf16.msra.mxu1 %v16548_v29  ;;  %v16570_v29 = vld [vmem:[%s20203_s9 + $0x80] sm:$0xff]   ;;  %s16722_s9 = scalar_lea.vmem %s16721_s2, 256 }
 0xbb3   : > { %15976 = vmatprep.subr.bf16.mxu1 %v16550_v23  ;;  %p16724_p1 = scmp.lt.s32.totalorder %s16722_s9, %s16716_s8 }
 0xbb5   : > { %p16725_p2 = por %p16724_p1, %p16723_p0 }
 0xbb6   : > { %15977 = vmatpush3.bf16.msra.mxu1 %v16550_v23  ;;  %v16573_v23 = vld [vmem:[%s20204_s10 + $0x78] sm:$0xff]  }
 0xbb7   : > { %15978 = vmatprep.subr.bf16.mxu1 %v16552_v19  ;;  %p16726_p3 = pnand %p16725_p2, %p16719_p13 }
 0xbba   : > { %15979 = vmatpush3.bf16.msra.mxu1 %v16552_v19  ;;  %v16575_v19 = vld [vmem:[%s20204_s10 + $0x70] sm:$0xff]  }
 0xbbb   : > { %16004 = vmatprep.subr.bf16.mxu1 %v16573_v23 }
 0xc4d   : > { %v15918_v50 = vpop.f32.mrf.mxu1 }
 0xc4e   : > { %v15930_v2 = vpop.f32.mrf.mxu0 }
 0xc4f   : > { %v10010_v3 = vpop.f32.mrf.mxu1  ;;  %v10098_v0 = vadd.f32 %v15930_v2, %v15918_v50  ;;  %v16577_v50 = vld [vmem:[%s20204_s10 + $0x68] sm:$0xff]  }
 0xc50   : > { %v10089_v47 = vpop.f32.mrf.mxu0  ;;  %v16578_v2 = vld [vmem:[%s20204_s10 + $0x28] sm:$0xff]  }
 0xc51   : > { %v15919_v9 = vpop.f32.mrf.mxu1  ;;  %v10090_v43 = vadd.f32 %v10089_v47, %v10010_v3  ;;  %v16579_v3 = vld [vmem:[%s20204_s10 + $0x60] sm:$0xff]  }
 0xc52   : > { %v15931_v61 = vpop.f32.mrf.mxu0  ;;  %v16580_v47 = vld [vmem:[%s20204_s10 + $0x20] sm:$0xff]  }
 0xc53   : > { %v10013_v11 = vpop.f32.mrf.mxu1  ;;  %v10101_v41 = vadd.f32 %v15931_v61, %v15919_v9  ;;  %v16581_v9 = vld [vmem:[%s20204_s10 + $0x58] sm:$0xff]  }
 0xc54   : > { %v10092_v48 = vpop.f32.mrf.mxu0  ;;  %v16582_v61 = vld [vmem:[%s20204_s10 + $0x18] sm:$0xff]  }
 0xc55   : > { %v10093_v18 = vadd.f32 %v10092_v48, %v10013_v11  ;;  %v16583_v11 = vld [vmem:[%s20204_s10 + $0x50] sm:$0xff]   ;;  %v19453_v48 = vld [vmem:[%s20204_s10 + $0xb8] sm:$0xff]  }
 0xc5d   : > { %v15942_v32 = vpop.f32.mrf.mxu1 }
 0xc5e   : > { %v10220_v37 = vadd.f32 %v15942_v32, %v10098_v0  ;;  %v16584_v0 = vld [vmem:[%s20204_s10 + $0x10] sm:$0xff]   ;;  %v16585_v32 = vld [vmem:[%s20204_s10 + $0x48] sm:$0xff]  }
 0xc5f   : > { %v10203_v34 = vpop.f32.mrf.mxu1 }
 0xc60   : > { %v10232_v51 = vadd.f32 %v14190_v59, %v10220_v37  ;;  %v10218_v7 = vadd.f32 %v10203_v34, %v10090_v43  ;;  %v16587_v43 = vld [vmem:[%s20204_s10 + $0x40] sm:$0xff]  }
 0xc61   : > { %v15943_v54 = vpop.f32.mrf.mxu1  ;;  %v16588_v37 = vld [vmem:[%s20204_s10] sm:$0xff]  }
 0xc62   : > { %v10236_v52 = vmax.f32 %v10232_v51, 0.0  ;;  %v10230_v1 = vadd.f32 %v14190_v59, %v10218_v7  ;;  %v10221_v24 = vadd.f32 %v15943_v54, %v10101_v41 }
 0xc63   : > { %v10206_v28 = vpop.f32.mrf.mxu1 }
 0xc64   : > { %v10244_v56 = vcombine.high %v10236_v52, %v10236_v52  ;;  %10270 = vst [vmem:[#allocation2 + $0xa1] sm:$0xf] %v10236_v52  ;;  %v10234_v5 = vmax.f32 %v10230_v1, 0.0  ;;  %v10233_v53 = vadd.f32 %v14190_v59, %v10221_v24  ;;  %v10219_v42 = vadd.f32 %v10206_v28, %v10093_v18  ;;  %v14248_v28 = vld [vmem:[%s20125_s14 + $0x8] ss:$0 sm:$0xff] }
 0xc66   : > { %10271 = vst [vmem:[#allocation2 + $0xc9] sm:$0xf] %v10244_v56  ;;  %v10242_v22 = vcombine.high %v10234_v5, %v10234_v5  ;;  %10266 = vst [vmem:[#allocation2 + $0x1] sm:$0xf] %v10234_v5  ;;  %v10237_v36 = vmax.f32 %v10233_v53, 0.0  ;;  %v10231_v38 = vadd.f32 %v14190_v59, %v10219_v42  ;;  %v16586_v59 = vld [vmem:[%s20204_s10 + $0x8] sm:$0xff]  }
 0xc68   : > { %10267 = vst [vmem:[#allocation2 + $0x29] sm:$0xf] %v10242_v22  ;;  %v10245_v44 = vcombine.high %v10237_v36, %v10237_v36  ;;  %10272 = vst [vmem:[#allocation2 + $0xf1] sm:$0xf] %v10237_v36  ;;  %v10235_v12 = vmax.f32 %v10231_v38, 0.0 }
 0xc6a   : > { %10273 = vst [vmem:[#allocation2 + $0x119] sm:$0xf] %v10245_v44  ;;  %v10243_v16 = vcombine.high %v10235_v12, %v10235_v12  ;;  %10268 = vst [vmem:[#allocation2 + $0x51] sm:$0xf] %v10235_v12 }
 0xc6c   : > { %10269 = vst [vmem:[#allocation2 + $0x79] sm:$0xf] %v10243_v16 }
 0xc6d   : > { %v16560_v58 = vld [vmem:[#allocation2 + $0xa0] ss:$40 sps:$4 sm:$0xff]  }
 0xc6e   : > { %10729 = vst [vmem:[#allocation2 + $0xa0] sm:$0x1] %v20196_v4  ;;  %10730 = vst [vmem:[#allocation2 + $0xc8] sm:$0x1] %v20196_v4  ;;  %v16558_v63 = vld [vmem:[#allocation2 + $0xa1] ss:$40 sps:$4 sm:$0xff]  }
 0xc6f   : > { %v16555_v35 = vld [vmem:[#allocation2] ss:$40 sps:$4 sm:$0xff]  }
 0xc70   : > { %v16553_v14 = vld [vmem:[#allocation2 + $0x1] ss:$40 sps:$4 sm:$0xff]   ;;  %10725 = vst [vmem:[#allocation2] sm:$0x1] %v20196_v4  ;;  %10726 = vst [vmem:[#allocation2 + $0x28] sm:$0x1] %v20196_v4 }
 0xc71   : > { %v16559_v20 = vld [vmem:[#allocation2 + $0xf1] ss:$40 sps:$4 sm:$0xff]   ;;  %v16562_v45 = vld [vmem:[#allocation2 + $0x2] ss:$40 sps:$4 sm:$0xff]  }
 0xc72   : > { %v16561_v10 = vld [vmem:[#allocation2 + $0xf0] ss:$40 sps:$4 sm:$0xff]   ;;  %v10341_v13 = vpack.c.bf16 %v16559_v20, %v16558_v63  ;;  %10733 = vst [vmem:[#allocation2 + $0x5] sm:$0x1] %v20196_v4  ;;  %10734 = vst [vmem:[#allocation2 + $0x2d] sm:$0x1] %v20196_v4 }
 0xc73   : > { %v16554_v46 = vld [vmem:[#allocation2 + $0x51] ss:$40 sps:$4 sm:$0xff]   ;;  %10731 = vst [vmem:[#allocation2 + $0xf0] sm:$0x1] %v20196_v4  ;;  %10732 = vst [vmem:[#allocation2 + $0x118] sm:$0x1] %v20196_v4  ;;  %v10299_v27 = vpack.c.bf16 %v16561_v10, %v16560_v58 }
 0xc74   : > { %v16556_v15 = vld [vmem:[#allocation2 + $0x50] ss:$40 sps:$4 sm:$0xff]   ;;  %v10340_v60 = vpack.c.bf16 %v16554_v46, %v16553_v14  ;;  %v16571_v39 = vld [vmem:[#allocation2 + $0xa2] ss:$40 sps:$4 sm:$0xff]  }
 0xc75   : > { %10727 = vst [vmem:[#allocation2 + $0x50] sm:$0x1] %v20196_v4  ;;  %10728 = vst [vmem:[#allocation2 + $0x78] sm:$0x1] %v20196_v4  ;;  %v10298_v55 = vpack.c.bf16 %v16556_v15, %v16555_v35  ;;  %v16563_v6 = vld [vmem:[#allocation2 + $0x52] ss:$40 sps:$4 sm:$0xff]  }
 0xc76   : > { %15960 = vmatprep.mubr.bf16.mxu0 %v10340_v60  ;;  %10735 = vst [vmem:[#allocation2 + $0x55] sm:$0x1] %v20196_v4  ;;  %10736 = vst [vmem:[#allocation2 + $0x7d] sm:$0x1] %v20196_v4  ;;  %v16572_v40 = vld [vmem:[#allocation2 + $0xf2] ss:$40 sps:$4 sm:$0xff]   ;;  %v10577_v8 = vpack.c.bf16 %v16563_v6, %v16562_v45 }
 0xc77   : > { %15980 = vmatprep.mubr.bf16.mxu1 %v10298_v55  ;;  %15961 = vmatmul.mubr.bf16.vlgmr.msra.gmra.mxu0 %v10341_v13  ;;  %10737 = vst [vmem:[#allocation2 + $0xa5] sm:$0x1] %v20196_v4  ;;  %10738 = vst [vmem:[#allocation2 + $0xcd] sm:$0x1] %v20196_v4  ;;  %v10578_v30 = vpack.c.bf16 %v16572_v40, %v16571_v39 }
 0xc78   : > { %10739 = vst [vmem:[#allocation2 + $0xf5] sm:$0x1] %v20196_v4  ;;  %10740 = vst [vmem:[#allocation2 + $0x11d] sm:$0x1] %v20196_v4  ;;  %15981 = vmatmul.mubr.bf16.vlgmr.msra.gmra.mxu1 %v10299_v27  ;;  %15985 = vmatpush3.bf16.msra.mxu0 %v19358_v25  ;;  %v16576_v25 = vld [vmem:[%s20204_s10 + $0x30] sm:$0xff]  }
 0xc79   : > { %16000 = vmatprep.mubr.bf16.mxu0 %v10577_v8  ;;  %15986 = vmatprep.subr.bf16.mxu0 %v16564_v21 }
 0xc7a   : > { %16005 = vmatpush3.bf16.msra.mxu1 %v16573_v23 }
 0xc7b   : > { %16006 = vmatprep.subr.bf16.mxu1 %v16575_v19 }
 0xc7c   : > { %15987 = vmatpush3.bf16.msra.mxu0 %v16564_v21 }
 0xc7d   : > { %15988 = vmatprep.subr.bf16.mxu0 %v16565_v62 }
 0xc7e   : > { %16007 = vmatpush3.bf16.msra.mxu1 %v16575_v19 }
 0xc7f   : > { %16008 = vmatprep.subr.bf16.mxu1 %v16577_v50 }
 0xc80   : > { %15989 = vmatpush3.bf16.msra.mxu0 %v16565_v62 }
 0xc81   : > { %15990 = vmatprep.subr.bf16.mxu0 %v16566_v31 }
 0xc82   : > { %16009 = vmatpush3.bf16.msra.mxu1 %v16577_v50 }
 0xc83   : > { %16010 = vmatprep.subr.bf16.mxu1 %v16579_v3 }
 0xc84   : > { %15991 = vmatpush3.bf16.msra.mxu0 %v16566_v31 }
 0xc85   : > { %15992 = vmatprep.subr.bf16.mxu0 %v16567_v17 }
 0xc86   : > { %16011 = vmatpush3.bf16.msra.mxu1 %v16579_v3  ;;  %v16601_v3 = vld [vmem:[%s20204_s10 + $0xa8] sm:$0xff]  }
 0xc87   : > { %16012 = vmatprep.subr.bf16.mxu1 %v16581_v9 }
 0xc88   : > { %15993 = vmatpush3.bf16.msra.mxu0 %v16567_v17 }
 0xc89   : > { %15994 = vmatprep.subr.bf16.mxu0 %v16568_v26 }
 0xc8a   : > { %16013 = vmatpush3.bf16.msra.mxu1 %v16581_v9  ;;  %v16603_v9 = vld [vmem:[%s20204_s10 + $0x98] sm:$0xff]  }
 0xc8b   : > { %16014 = vmatprep.subr.bf16.mxu1 %v16583_v11 }
 0xc8c   : > { %15995 = vmatpush3.bf16.msra.mxu0 %v16568_v26  ;;  %v16600_v26 = vld [vmem:[%s20204_s10 + $0xb0] sm:$0xff]  }
 0xc8d   : > { %15996 = vmatprep.subr.bf16.mxu0 %v16569_v33 }
 0xc8e   : > { %16015 = vmatpush3.bf16.msra.mxu1 %v16583_v11  ;;  %v16605_v11 = vld [vmem:[%s20204_s10 + $0x88] sm:$0xff]  }
 0xc8f   : > { %16016 = vmatprep.subr.bf16.mxu1 %v16585_v32 }
 0xc90   : > { %15997 = vmatpush3.bf16.msra.mxu0 %v16569_v33 }
 0xc91   : > { %15998 = vmatprep.subr.bf16.mxu0 %v16570_v29 }
 0xc92   : > { %16017 = vmatpush3.bf16.msra.mxu1 %v16585_v32 }
 0xc93   : > { %16018 = vmatprep.subr.bf16.mxu1 %v16587_v43 }
 0xc94   : > { %15999 = vmatpush3.bf16.msra.mxu0 %v16570_v29 }
 0xc95   : > { %16024 = vmatprep.subr.bf16.mxu0 %v16574_v57 }
 0xc96   : > { %16019 = vmatpush3.bf16.msra.mxu1 %v16587_v43  ;;  %v16610_v43 = vld [vmem:[%s20129_s18 + $0x78] sm:$0xff]  }
 0xc97   : > { %16001 = vmatmul.mubr.bf16.vlgmr.msra.gmra.mxu0 %v10578_v30  ;;  %16044 = vmatprep.subr.bf16.mxu1 %v19453_v48 }
 0xc98   : > { %16025 = vmatpush3.bf16.msra.mxu0 %v16574_v57 }
 0xc99   : > { %16026 = vmatprep.subr.bf16.mxu0 %v16576_v25 }
 0xc9c   : > { %16027 = vmatpush3.bf16.msra.mxu0 %v16576_v25 }
 0xc9d   : > { %16028 = vmatprep.subr.bf16.mxu0 %v16578_v2 }
 0xca0   : > { %16029 = vmatpush3.bf16.msra.mxu0 %v16578_v2 }
 0xca1   : > { %16030 = vmatprep.subr.bf16.mxu0 %v16580_v47 }
 0xca4   : > { %16031 = vmatpush3.bf16.msra.mxu0 %v16580_v47  ;;  %v16602_v47 = vld [vmem:[%s20204_s10 + $0xa0] sm:$0xff]  }
 0xca5   : > { %16032 = vmatprep.subr.bf16.mxu0 %v16582_v61 }
 0xca8   : > { %16033 = vmatpush3.bf16.msra.mxu0 %v16582_v61  ;;  %v16604_v61 = vld [vmem:[%s20204_s10 + $0x90] sm:$0xff]  }
 0xca9   : > { %16034 = vmatprep.subr.bf16.mxu0 %v16584_v0 }
 0xcac   : > { %16035 = vmatpush3.bf16.msra.mxu0 %v16584_v0  ;;  %v16606_v0 = vld [vmem:[%s20204_s10 + $0x80] sm:$0xff]  }
 0xcad   : > { %16036 = vmatprep.subr.bf16.mxu0 %v16586_v59 }
 0xcb0   : > { %16037 = vmatpush3.bf16.msra.mxu0 %v16586_v59  ;;  %v16609_v59 = vld [vmem:[%s20129_s18 + $0x38] sm:$0xff]  }
 0xcb1   : > { %16038 = vmatprep.subr.bf16.mxu0 %v16588_v37 }
 0xcb4   : > { %16039 = vmatpush3.bf16.msra.mxu0 %v16588_v37  ;;  %v16611_v37 = vld [vmem:[%s20129_s18 + $0x30] sm:$0xff]  }
 0xcb5   : > { %16064 = vmatprep.subr.bf16.mxu0 %v16609_v59 }
 0xd37   : > { %v15962_v34 = vpop.f32.mrf.mxu0 }
 0xd38   : > { %v15982_v41 = vpop.f32.mrf.mxu1 }
 0xd39   : > { %v10441_v51 = vpop.f32.mrf.mxu0  ;;  %v10547_v1 = vadd.f32 %v15982_v41, %v15962_v34  ;;  %v16613_v34 = vld [vmem:[%s20129_s18 + $0x28] sm:$0xff]  }
 0xd3a   : > { %v10538_v7 = vpop.f32.mrf.mxu1  ;;  %v16614_v41 = vld [vmem:[%s20129_s18 + $0x68] sm:$0xff]  }
 0xd3b   : > { %v15963_v54 = vpop.f32.mrf.mxu0  ;;  %v10539_v56 = vadd.f32 %v10538_v7, %v10441_v51  ;;  %v16615_v51 = vld [vmem:[%s20129_s18 + $0x20] sm:$0xff]  }
 0xd3c   : > { %v15983_v18 = vpop.f32.mrf.mxu1  ;;  %v16616_v7 = vld [vmem:[%s20129_s18 + $0x60] sm:$0xff]  }
 0xd3d   : > { %v10444_v52 = vpop.f32.mrf.mxu0  ;;  %v10550_v22 = vadd.f32 %v15983_v18, %v15963_v54  ;;  %v16617_v54 = vld [vmem:[%s20129_s18 + $0x18] sm:$0xff]  }
 0xd3e   : > { %v10541_v53 = vpop.f32.mrf.mxu1  ;;  %v16618_v18 = vld [vmem:[%s20129_s18 + $0x58] sm:$0xff]  }
 0xd3f   : > { %v10542_v12 = vadd.f32 %v10541_v53, %v10444_v52  ;;  %v16619_v52 = vld [vmem:[%s20129_s18 + $0x10] sm:$0xff]  }
 0xd57   : > { %v16002_v24 = vpop.f32.mrf.mxu0 }
 0xd58   : > { %v10695_v5 = vadd.f32 %v16002_v24, %v10547_v1  ;;  %v16620_v1 = vld [vmem:[%s20129_s18 + $0x50] sm:$0xff]   ;;  %v16621_v24 = vld [vmem:[%s20129_s18 + $0x8] sm:$0xff]  }
 0xd59   : > { %v10678_v42 = vpop.f32.mrf.mxu0 }
 0xd5a   : > { %v10707_v36 = vadd.f32 %v14248_v28, %v10695_v5  ;;  %v10693_v38 = vadd.f32 %v10678_v42, %v10539_v56  ;;  %v16623_v56 = vld [vmem:[%s20129_s18] sm:$0xff]  }
 0xd5b   : > { %v16003_v44 = vpop.f32.mrf.mxu0  ;;  %v16624_v5 = vld [vmem:[%s20129_s18 + $0x40] sm:$0xff]  }
 0xd5c   : > { %v10711_v16 = vmax.f32 %v10707_v36, 0.0  ;;  %v10705_v58 = vadd.f32 %v14248_v28, %v10693_v38  ;;  %v10696_v35 = vadd.f32 %v16003_v44, %v10550_v22 }
 0xd5d   : > { %v10681_v14 = vpop.f32.mrf.mxu0 }
 0xd5e   : > { %v10719_v63 = vcombine.high %v10711_v16, %v10711_v16  ;;  %10745 = vst [vmem:[#allocation2 + $0xa1] sm:$0xf] %v10711_v16  ;;  %v10709_v20 = vmax.f32 %v10705_v58, 0.0  ;;  %v10708_v10 = vadd.f32 %v14248_v28, %v10696_v35  ;;  %v10694_v46 = vadd.f32 %v10681_v14, %v10542_v12 }
 0xd60   : > { %10746 = vst [vmem:[#allocation2 + $0xc9] sm:$0xf] %v10719_v63  ;;  %v10717_v15 = vcombine.high %v10709_v20, %v10709_v20  ;;  %10741 = vst [vmem:[#allocation2 + $0x1] sm:$0xf] %v10709_v20  ;;  %v10712_v21 = vmax.f32 %v10708_v10, 0.0  ;;  %v10706_v60 = vadd.f32 %v14248_v28, %v10694_v46  ;;  %v16622_v28 = vld [vmem:[%s20129_s18 + $0x48] sm:$0xff]  }
 0xd62   : > { %10742 = vst [vmem:[#allocation2 + $0x29] sm:$0xf] %v10717_v15  ;;  %v10720_v45 = vcombine.high %v10712_v21, %v10712_v21  ;;  %10747 = vst [vmem:[#allocation2 + $0xf1] sm:$0xf] %v10712_v21  ;;  %v10710_v55 = vmax.f32 %v10706_v60, 0.0 }
 0xd63   : > { %v14306_v60 = vld [vmem:[%s20125_s14 + $0x9] ss:$0 sm:$0xff] }
 0xd64   : > { %10748 = vst [vmem:[#allocation2 + $0x119] sm:$0xf] %v10720_v45  ;;  %v10718_v13 = vcombine.high %v10710_v55, %v10710_v55  ;;  %10743 = vst [vmem:[#allocation2 + $0x51] sm:$0xf] %v10710_v55 }
 0xd66   : > { %10744 = vst [vmem:[#allocation2 + $0x79] sm:$0xf] %v10718_v13 }
 0xd67   : > { %v16596_v6 = vld [vmem:[#allocation2 + $0xa0] ss:$40 sps:$4 sm:$0xff]  }
 0xd68   : > { %11625 = vst.msk [vmem:[#allocation2 + $0xa0] sm:$0x1] %vm4928_vm2, %v20196_v4  ;;  %11626 = vst.msk [vmem:[#allocation2 + $0xc8] sm:$0x1] %vm4928_vm2, %v20196_v4  ;;  %v16594_v40 = vld [vmem:[#allocation2 + $0xa1] ss:$40 sps:$4 sm:$0xff]  }
 0xd69   : > { %v16591_v27 = vld [vmem:[#allocation2] ss:$40 sps:$4 sm:$0xff]  }
 0xd6a   : > { %v16589_v39 = vld [vmem:[#allocation2 + $0x1] ss:$40 sps:$4 sm:$0xff]   ;;  %11621 = vst.msk [vmem:[#allocation2] sm:$0x1] %vm4928_vm2, %v20196_v4  ;;  %11622 = vst.msk [vmem:[#allocation2 + $0x28] sm:$0x1] %vm4928_vm2, %v20196_v4 }
 0xd6b   : > { %v16595_v8 = vld [vmem:[#allocation2 + $0xf1] ss:$40 sps:$4 sm:$0xff]   ;;  %v16598_v29 = vld [vmem:[#allocation2 + $0x2] ss:$40 sps:$4 sm:$0xff]  }
 0xd6c   : > { %v16597_v62 = vld [vmem:[#allocation2 + $0xf0] ss:$40 sps:$4 sm:$0xff]   ;;  %v10816_v23 = vpack.c.bf16 %v16595_v8, %v16594_v40  ;;  %11629 = vst.msk [vmem:[#allocation2 + $0x3] sm:$0x1] %vm4928_vm2, %v20196_v4  ;;  %11630 = vst.msk [vmem:[#allocation2 + $0x2b] sm:$0x1] %vm4928_vm2, %v20196_v4 }
 0xd6d   : > { %v16590_v31 = vld [vmem:[#allocation2 + $0x51] ss:$40 sps:$4 sm:$0xff]   ;;  %11627 = vst.msk [vmem:[#allocation2 + $0xf0] sm:$0x1] %vm4928_vm2, %v20196_v4  ;;  %11628 = vst.msk [vmem:[#allocation2 + $0x118] sm:$0x1] %vm4928_vm2, %v20196_v4  ;;  %v10774_v19 = vpack.c.bf16 %v16597_v62, %v16596_v6 }
 0xd6e   : > { %v16592_v17 = vld [vmem:[#allocation2 + $0x50] ss:$40 sps:$4 sm:$0xff]   ;;  %v10815_v33 = vpack.c.bf16 %v16590_v31, %v16589_v39  ;;  %v16607_v25 = vld [vmem:[#allocation2 + $0xa2] ss:$40 sps:$4 sm:$0xff]  }
 0xd6f   : > { %11623 = vst.msk [vmem:[#allocation2 + $0x50] sm:$0x1] %vm4928_vm2, %v20196_v4  ;;  %11624 = vst.msk [vmem:[#allocation2 + $0x78] sm:$0x1] %vm4928_vm2, %v20196_v4  ;;  %v10773_v30 = vpack.c.bf16 %v16592_v17, %v16591_v27  ;;  %v16599_v57 = vld [vmem:[#allocation2 + $0x52] ss:$40 sps:$4 sm:$0xff]  }
 0xd70   : > { %16020 = vmatprep.mubr.bf16.mxu1 %v10815_v33  ;;  %11631 = vst.msk [vmem:[#allocation2 + $0x53] sm:$0x1] %vm4928_vm2, %v20196_v4  ;;  %11632 = vst.msk [vmem:[#allocation2 + $0x7b] sm:$0x1] %vm4928_vm2, %v20196_v4  ;;  %v16608_v50 = vld [vmem:[#allocation2 + $0xf2] ss:$40 sps:$4 sm:$0xff]   ;;  %v11052_v2 = vpack.c.bf16 %v16599_v57, %v16598_v29 }
 0xd71   : > { %16040 = vmatprep.mubr.bf16.mxu0 %v10773_v30  ;;  %16021 = vmatmul.mubr.bf16.vlgmr.msra.gmra.mxu1 %v10816_v23  ;;  %11633 = vst.msk [vmem:[#allocation2 + $0xa3] sm:$0x1] %vm4928_vm2, %v20196_v4  ;;  %11634 = vst.msk [vmem:[#allocation2 + $0xcb] sm:$0x1] %vm4928_vm2, %v20196_v4  ;;  %v11053_v32 = vpack.c.bf16 %v16608_v50, %v16607_v25  ;;  %v16625_v29 = vld [vmem:[%s20205_s11 + $0x38] sm:$0xff]   ;;  %v16627_v23 = vld [vmem:[%s20205_s11 + $0x30] sm:$0xff]  }
 0xd72   : > { %11635 = vst.msk [vmem:[#allocation2 + $0xf3] sm:$0x1] %vm4928_vm2, %v20196_v4  ;;  %11636 = vst.msk [vmem:[#allocation2 + $0x11b] sm:$0x1] %vm4928_vm2, %v20196_v4  ;;  %16041 = vmatmul.mubr.bf16.vlgmr.msra.gmra.mxu0 %v10774_v19  ;;  %16045 = vmatpush3.bf16.msra.mxu1 %v19453_v48  ;;  %v16612_v48 = vld [vmem:[%s20129_s18 + $0x70] sm:$0xff]   ;;  %v16626_v30 = vld [vmem:[%s20205_s11 + $0x18] sm:$0xff]  }
 0xd73   : > { %16060 = vmatprep.mubr.bf16.mxu1 %v11052_v2  ;;  %16046 = vmatprep.subr.bf16.mxu1 %v16600_v26  ;;  %v16628_v57 = vld [vmem:[%s20205_s11 + $0x10] sm:$0xff]   ;;  %v16629_v19 = vld [vmem:[%s20205_s11 + $0x28] sm:$0xff]   ;;  %v16631_v50 = vld [vmem:[%s20205_s11 + $0x20] sm:$0xff]  }
 0xd74   : > { %16065 = vmatpush3.bf16.msra.mxu0 %v16609_v59  ;;  %v16630_v25 = vld [vmem:[%s20205_s11 + $0x8] sm:$0xff]   ;;  %v16632_v2 = vld [vmem:[%s20205_s11] sm:$0xff]  }
 0xd75   : > { %16066 = vmatprep.subr.bf16.mxu0 %v16611_v37 }
 0xd76   : > { %16047 = vmatpush3.bf16.msra.mxu1 %v16600_v26 }
 0xd77   : > { %16048 = vmatprep.subr.bf16.mxu1 %v16601_v3 }
 0xd78   : > { %16067 = vmatpush3.bf16.msra.mxu0 %v16611_v37 }
 0xd79   : > { %16068 = vmatprep.subr.bf16.mxu0 %v16613_v34 }
 0xd7a   : > { %16049 = vmatpush3.bf16.msra.mxu1 %v16601_v3 }
 0xd7b   : > { %16050 = vmatprep.subr.bf16.mxu1 %v16602_v47 }
 0xd7c   : > { %16069 = vmatpush3.bf16.msra.mxu0 %v16613_v34 }
 0xd7d   : > { %16070 = vmatprep.subr.bf16.mxu0 %v16615_v51 }
 0xd7e   : > { %16051 = vmatpush3.bf16.msra.mxu1 %v16602_v47 }
 0xd7f   : > { %16052 = vmatprep.subr.bf16.mxu1 %v16603_v9 }
 0xd80   : > { %16071 = vmatpush3.bf16.msra.mxu0 %v16615_v51 }
 0xd81   : > { %16072 = vmatprep.subr.bf16.mxu0 %v16617_v54 }
 0xd82   : > { %16053 = vmatpush3.bf16.msra.mxu1 %v16603_v9 }
 0xd83   : > { %16054 = vmatprep.subr.bf16.mxu1 %v16604_v61 }
 0xd84   : > { %16073 = vmatpush3.bf16.msra.mxu0 %v16617_v54 }
 0xd85   : > { %16074 = vmatprep.subr.bf16.mxu0 %v16619_v52 }
 0xd86   : > { %16055 = vmatpush3.bf16.msra.mxu1 %v16604_v61 }
 0xd87   : > { %16056 = vmatprep.subr.bf16.mxu1 %v16605_v11 }
 0xd88   : > { %16075 = vmatpush3.bf16.msra.mxu0 %v16619_v52 }
 0xd89   : > { %16076 = vmatprep.subr.bf16.mxu0 %v16621_v24 }
 0xd8a   : > { %16057 = vmatpush3.bf16.msra.mxu1 %v16605_v11 }
 0xd8b   : > { %16058 = vmatprep.subr.bf16.mxu1 %v16606_v0 }
 0xd8c   : > { %16077 = vmatpush3.bf16.msra.mxu0 %v16621_v24 }
 0xd8d   : > { %16078 = vmatprep.subr.bf16.mxu0 %v16623_v56 }
 0xd8e   : > { %16059 = vmatpush3.bf16.msra.mxu1 %v16606_v0 }
 0xd8f   : > { %16084 = vmatprep.subr.bf16.mxu1 %v16610_v43 }
 0xd90   : > { %16079 = vmatpush3.bf16.msra.mxu0 %v16623_v56 }
 0xd91   : > { %16061 = vmatmul.mubr.bf16.vlgmr.msra.gmra.mxu1 %v11053_v32  ;;  %16104 = vmatprep.subr.bf16.mxu0 %v20196_v4 }
 0xd92   : > { %16085 = vmatpush3.bf16.msra.mxu1 %v16610_v43 }
 0xd93   : > { %16086 = vmatprep.subr.bf16.mxu1 %v16612_v48 }
 0xd96   : > { %16087 = vmatpush3.bf16.msra.mxu1 %v16612_v48 }
 0xd97   : > { %16088 = vmatprep.subr.bf16.mxu1 %v16614_v41 }
 0xd9a   : > { %16089 = vmatpush3.bf16.msra.mxu1 %v16614_v41 }
 0xd9b   : > { %16090 = vmatprep.subr.bf16.mxu1 %v16616_v7 }
 0xd9e   : > { %16091 = vmatpush3.bf16.msra.mxu1 %v16616_v7 }
 0xd9f   : > { %16092 = vmatprep.subr.bf16.mxu1 %v16618_v18 }
 0xda2   : > { %16093 = vmatpush3.bf16.msra.mxu1 %v16618_v18 }
 0xda3   : > { %16094 = vmatprep.subr.bf16.mxu1 %v16620_v1 }
 0xda6   : > { %16095 = vmatpush3.bf16.msra.mxu1 %v16620_v1 }
 0xda7   : > { %16096 = vmatprep.subr.bf16.mxu1 %v16622_v28 }
 0xdaa   : > { %16097 = vmatpush3.bf16.msra.mxu1 %v16622_v28 }
 0xdab   : > { %16098 = vmatprep.subr.bf16.mxu1 %v16624_v5 }
 0xdae   : > { %16099 = vmatpush3.bf16.msra.mxu1 %v16624_v5 }
 0xdaf   : > { %16116 = vmatprep.subr.bf16.mxu1 %v20196_v4 }
 0xe31   : > { %v16022_v53 = vpop.f32.mrf.mxu1 }
 0xe32   : > { %v16042_v42 = vpop.f32.mrf.mxu0 }
 0xe33   : > { %v10916_v22 = vpop.f32.mrf.mxu1  ;;  %v11022_v35 = vadd.f32 %v16042_v42, %v16022_v53 }
 0xe34   : > { %v11013_v36 = vpop.f32.mrf.mxu0 }
 0xe35   : > { %v16023_v38 = vpop.f32.mrf.mxu1  ;;  %v11014_v58 = vadd.f32 %v11013_v36, %v10916_v22 }
 0xe36   : > { %v16043_v44 = vpop.f32.mrf.mxu0 }
 0xe37   : > { %v10919_v12 = vpop.f32.mrf.mxu1  ;;  %v11025_v20 = vadd.f32 %v16043_v44, %v16023_v38 }
 0xe38   : > { %v11016_v14 = vpop.f32.mrf.mxu0 }
 0xe39   : > { %v11017_v21 = vadd.f32 %v11016_v14, %v10919_v12 }
 0xe51   : > { %v16062_v16 = vpop.f32.mrf.mxu1 }
 0xe52   : > { %v11170_v46 = vadd.f32 %v16062_v16, %v11022_v35 }
 0xe53   : > { %v11153_v63 = vpop.f32.mrf.mxu1 }
 0xe54   : > { %v11168_v10 = vadd.f32 %v11153_v63, %v11014_v58  ;;  %v11182_v39 = vadd.f32 %v14306_v60, %v11170_v46 }
 0xe55   : > { %v16063_v15 = vpop.f32.mrf.mxu1 }
 0xe56   : > { %v11171_v45 = vadd.f32 %v16063_v15, %v11025_v20  ;;  %v11180_v13 = vadd.f32 %v14306_v60, %v11168_v10  ;;  %v11186_v17 = vmax.f32 %v11182_v39, 0.0 }
 0xe57   : > { %v11156_v55 = vpop.f32.mrf.mxu1 }
 0xe58   : > { %v11183_v6 = vadd.f32 %v14306_v60, %v11171_v45  ;;  %v11169_v27 = vadd.f32 %v11156_v55, %v11017_v21  ;;  %v11184_v62 = vmax.f32 %v11180_v13, 0.0 }
 0xe5a   : > { %v11181_v40 = vadd.f32 %v14306_v60, %v11169_v27  ;;  %v11187_v8 = vmax.f32 %v11183_v6, 0.0 }
 0xe5c   : > { %v11185_v31 = vmax.f32 %v11181_v40, 0.0  ;;  %v11189_v33 = vpack.c.bf16 %v11187_v8, %v11186_v17 }
 0xe5e   : > { %v11188_v26 = vpack.c.bf16 %v11185_v31, %v11184_v62 }
 0xe60   : > { %16080 = vmatprep.mubr.bf16.mxu0 %v11188_v26  ;;  %16100 = vmatprep.mubr.bf16.mxu1 %v11188_v26 }
 0xe61   : > { %16081 = vmatmul.mubr.bf16.vlgmr.msra.gmra.mxu0 %v11189_v33  ;;  %16101 = vmatmul.mubr.bf16.vlgmr.msra.gmra.mxu1 %v11189_v33 }
 0xe62   : > { %16105 = vmatpush3.bf16.msra.mxu0 %v16625_v29  ;;  %16117 = vmatpush3.bf16.msra.mxu1 %v16626_v30 }
 0xe63   : > { %16106 = vmatprep.subr.bf16.mxu0 %v20196_v4  ;;  %16118 = vmatprep.subr.bf16.mxu1 %v20196_v4 }
 0xe64   : > { %16112 = vmatprep.mubr.msk.bf16.mxu0 %vm16810_vm13, %v20196_v4  ;;  %16124 = vmatprep.mubr.msk.bf16.mxu1 %vm16810_vm13, %v20196_v4 }
 0xe66   : > { %16107 = vmatpush3.bf16.msra.mxu0 %v16627_v23  ;;  %16119 = vmatpush3.bf16.msra.mxu1 %v16628_v57 }
 0xe67   : > { %16108 = vmatprep.subr.bf16.mxu0 %v20196_v4  ;;  %16120 = vmatprep.subr.bf16.mxu1 %v20196_v4 }
 0xe6a   : > { %16109 = vmatpush3.bf16.msra.mxu0 %v16629_v19  ;;  %16121 = vmatpush3.bf16.msra.mxu1 %v16630_v25 }
 0xe6b   : > { %16110 = vmatprep.subr.bf16.mxu0 %v20196_v4  ;;  %16122 = vmatprep.subr.bf16.mxu1 %v20196_v4 }
 0xe6e   : > { %16111 = vmatpush3.bf16.msra.mxu0 %v16631_v50  ;;  %16123 = vmatpush3.bf16.msra.mxu1 %v16632_v2 }
 0xe6f   : > { %16128 = vmatprep.subr.bf16.mxu0 %v20196_v4  ;;  %16140 = vmatprep.subr.bf16.mxu1 %v20196_v4 }
 0xf21   : > { %v16082_v3 = vpop.f32.mrf.mxu0  ;;  %v16102_v47 = vpop.f32.mrf.mxu1 }
 0xf22   : > { %v11419_v9 = vmax.f32 %v16082_v3, %v16102_v47 }
 0xf23   : > { %v11288_v61 = vpop.f32.mrf.mxu0  ;;  %v11402_v11 = vpop.f32.mrf.mxu1 }
 0xf24   : > { %v11459_v0 = vcombine.high %v11419_v9, %v11419_v9  ;;  %v11466_v32 = vrot.slane %v11419_v9, %v17799_v49  ;;  %v11417_v59 = vmax.f32 %v11288_v61, %v11402_v11 }
 0xf25   : > { %v16083_v43 = vpop.f32.mrf.mxu0  ;;  %v16103_v37 = vpop.f32.mrf.mxu1 }
 0xf26   : > { %v11473_v48 = vrot.slane %v11459_v0, %v17799_v49  ;;  %v11474_v34 = vcombine.high %v11466_v32, %v11466_v32  ;;  %v11565_v41 = vsel %vm4031_vm3, %v11466_v32, -inf  ;;  %v11425_v51 = vcombine.high %v11417_v59, %v11417_v59 }
 0xf27   : > { %v11566_v7 = vrot.slane %v11565_v41, 4  ;;  %v11432_v54 = vrot.slane %v11417_v59, %v17799_v49  ;;  %v11420_v18 = vmax.f32 %v16083_v43, %v16103_v37 }
 0xf28   : > { %v11475_v52 = vcombine.high %v11473_v48, %v11473_v48  ;;  %v11572_v1 = vsel %vm4031_vm3, %v11474_v34, -inf  ;;  %v11579_v24 = vsel %vm4031_vm3, %v11473_v48, -inf  ;;  %v11439_v28 = vrot.slane %v11425_v51, %v17799_v49 }
 0xf29   : > { %v11567_v56 = vmax.f32 %v11565_v41, %v11566_v7  ;;  %v11573_v5 = vrot.slane %v11572_v1, 4  ;;  %v11580_v53 = vrot.slane %v11579_v24, 4  ;;  %v11440_v42 = vcombine.high %v11432_v54, %v11432_v54 }
 0xf2a   : > { %v11586_v22 = vsel %vm4031_vm3, %v11475_v52, -inf  ;;  %v11441_v36 = vcombine.high %v11439_v28, %v11439_v28  ;;  %v11509_v38 = vsel %vm4031_vm3, %v11432_v54, -inf  ;;  %v11523_v44 = vsel %vm4031_vm3, %v11439_v28, -inf  ;;  %v11291_v54 = vpop.f32.mrf.mxu0  ;;  %v11405_v52 = vpop.f32.mrf.mxu1 }
 0xf2b   : > { %v11568_v12 = vrot.slane %v11567_v56, 2  ;;  %v11574_v16 = vmax.f32 %v11572_v1, %v11573_v5  ;;  %v11581_v58 = vmax.f32 %v11579_v24, %v11580_v53  ;;  %v11587_v35 = vrot.slane %v11586_v22, 4 }
 0xf2c   : > { %v11510_v14 = vrot.slane %v11509_v38, 4  ;;  %v11516_v63 = vsel %vm4031_vm3, %v11440_v42, -inf  ;;  %v11524_v20 = vrot.slane %v11523_v44, 4  ;;  %v11530_v10 = vsel %vm4031_vm3, %v11441_v36, -inf }
 0xf2d   : > { %v11569_v46 = vmax.f32 %v11567_v56, %v11568_v12  ;;  %v11575_v15 = vrot.slane %v11574_v16, 2  ;;  %v11582_v21 = vrot.slane %v11581_v58, 2  ;;  %v11588_v60 = vmax.f32 %v11586_v22, %v11587_v35 }
 0xf2e   : > { %v11511_v45 = vmax.f32 %v11509_v38, %v11510_v14  ;;  %v11517_v55 = vrot.slane %v11516_v63, 4  ;;  %v11525_v13 = vmax.f32 %v11523_v44, %v11524_v20  ;;  %v11531_v6 = vrot.slane %v11530_v10, 4 }
 0xf2f   : > { %v11570_v27 = vrot.slane %v11569_v46, 1  ;;  %v11576_v39 = vmax.f32 %v11574_v16, %v11575_v15  ;;  %v11583_v40 = vmax.f32 %v11581_v58, %v11582_v21  ;;  %v11589_v8 = vrot.slane %v11588_v60, 2 }
 0xf30   : > { %v11512_v62 = vrot.slane %v11511_v45, 2  ;;  %v11518_v31 = vmax.f32 %v11516_v63, %v11517_v55  ;;  %v11526_v17 = vrot.slane %v11525_v13, 2  ;;  %v11532_v26 = vmax.f32 %v11530_v10, %v11531_v6 }
 0xf31   : > { %v11571_v33 = vmax.f32 %v11569_v46, %v11570_v27  ;;  %v11577_v29 = vrot.slane %v11576_v39, 1  ;;  %v11584_v30 = vrot.slane %v11583_v40, 1  ;;  %v11590_v23 = vmax.f32 %v11588_v60, %v11589_v8 }
 0xf32   : > { %v11513_v57 = vmax.f32 %v11511_v45, %v11512_v62  ;;  %v11519_v19 = vrot.slane %v11518_v31, 2  ;;  %v11527_v25 = vmax.f32 %v11525_v13, %v11526_v17  ;;  %v11533_v50 = vrot.slane %v11532_v26, 2 }
 0xf33   : > { %v11578_v2 = vmax.f32 %v11576_v39, %v11577_v29  ;;  %v11585_v3 = vmax.f32 %v11583_v40, %v11584_v30  ;;  %v11591_v47 = vrot.slane %v11590_v23, 1  ;;  %v11476_v9 = vcombine.high %v11420_v18, %v11420_v18 }
 0xf34   : > { %v11514_v61 = vrot.slane %v11513_v57, 1  ;;  %v11520_v11 = vmax.f32 %v11518_v31, %v11519_v19  ;;  %v11528_v0 = vrot.slane %v11527_v25, 1  ;;  %v11534_v32 = vmax.f32 %v11532_v26, %v11533_v50 }
 0xf35   : > { %v11592_v59 = vmax.f32 %v11590_v23, %v11591_v47  ;;  %v11657_v43 = vsel %vm5073_vm4, %v11578_v2, %v11571_v33  ;;  %v11483_v37 = vrot.slane %v11420_v18, %v17799_v49  ;;  %v11490_v48 = vrot.slane %v11476_v9, %v17799_v49 }
 0xf36   : > { %11673 = vst.msk [vmem:[#allocation2 + $0xa1] sm:$0x3] %vm4031_vm3, %v11657_v43  ;;  %v11515_v34 = vmax.f32 %v11513_v57, %v11514_v61  ;;  %v11521_v41 = vrot.slane %v11520_v11, 1  ;;  %v11529_v51 = vmax.f32 %v11527_v25, %v11528_v0  ;;  %v11535_v7 = vrot.slane %v11534_v32, 1 }
 0xf37   : > { %v11658_v1 = vsel %vm5073_vm4, %v11592_v59, %v11585_v3  ;;  %v11491_v24 = vcombine.high %v11483_v37, %v11483_v37  ;;  %v11492_v28 = vcombine.high %v11490_v48, %v11490_v48  ;;  %v11593_v56 = vsel %vm4031_vm3, %v11483_v37, -inf }
 0xf38   : > { %11674 = vst.msk [vmem:[#allocation2 + $0xc9] sm:$0x3] %vm4031_vm3, %v11658_v1  ;;  %v11522_v5 = vmax.f32 %v11520_v11, %v11521_v41  ;;  %v11536_v18 = vmax.f32 %v11534_v32, %v11535_v7  ;;  %v11594_v53 = vrot.slane %v11593_v56, 4  ;;  %v11607_v42 = vsel %vm4031_vm3, %v11490_v48, -inf }
 0xf39   : > { %v11600_v22 = vsel %vm4031_vm3, %v11491_v24, -inf  ;;  %v11608_v36 = vrot.slane %v11607_v42, 4  ;;  %v11614_v38 = vsel %vm4031_vm3, %v11492_v28, -inf  ;;  %v11418_v44 = vmax.f32 %v11291_v54, %v11405_v52 }
 0xf3a   : > { %v11653_v12 = vsel %vm5073_vm4, %v11522_v5, %v11515_v34  ;;  %v11654_v16 = vsel %vm5073_vm4, %v11536_v18, %v11529_v51  ;;  %v11595_v58 = vmax.f32 %v11593_v56, %v11594_v53  ;;  %v11601_v35 = vrot.slane %v11600_v22, 4 }
 0xf3b   : > { %11669 = vst.msk [vmem:[#allocation2 + $0x1] sm:$0x3] %vm4031_vm3, %v11653_v12  ;;  %11670 = vst.msk [vmem:[#allocation2 + $0x29] sm:$0x3] %vm4031_vm3, %v11654_v16  ;;  %v11609_v14 = vmax.f32 %v11607_v42, %v11608_v36  ;;  %v11615_v63 = vrot.slane %v11614_v38, 4  ;;  %v11442_v20 = vcombine.high %v11418_v44, %v11418_v44  ;;  %v11449_v10 = vrot.slane %v11418_v44, %v17799_v49 }
 0xf3c   : > { %v11596_v46 = vrot.slane %v11595_v58, 2  ;;  %v11602_v15 = vmax.f32 %v11600_v22, %v11601_v35 }
 0xf3d   : > { %v11610_v21 = vrot.slane %v11609_v14, 2  ;;  %v11616_v60 = vmax.f32 %v11614_v38, %v11615_v63  ;;  %v11456_v45 = vrot.slane %v11442_v20, %v17799_v49  ;;  %v11457_v55 = vcombine.high %v11449_v10, %v11449_v10 }
 0xf3e   : > { %v11597_v13 = vmax.f32 %v11595_v58, %v11596_v46  ;;  %v11603_v6 = vrot.slane %v11602_v15, 2  ;;  %v11537_v27 = vsel %vm4031_vm3, %v11449_v10, -inf }
 0xf3f   : > { %v11611_v39 = vmax.f32 %v11609_v14, %v11610_v21  ;;  %v11617_v40 = vrot.slane %v11616_v60, 2  ;;  %v11458_v8 = vcombine.high %v11456_v45, %v11456_v45  ;;  %v11538_v62 = vrot.slane %v11537_v27, 4  ;;  %v19633_v19 = vld [vmem:[#allocation2 + $0xa0] ss:$40 sps:$4 sm:$0x33]  }
 0xf40   : > { %v11598_v31 = vrot.slane %v11597_v13, 1  ;;  %v11604_v17 = vmax.f32 %v11602_v15, %v11603_v6  ;;  %v11544_v26 = vsel %vm4031_vm3, %v11457_v55, -inf  ;;  %v11551_v33 = vsel %vm4031_vm3, %v11456_v45, -inf  ;;  %12128 = vst.msk [vmem:[#allocation2 + $0xa0] sm:$0x1] %vm4928_vm2, %v20196_v4 }
 0xf41   : > { %v11612_v29 = vrot.slane %v11611_v39, 1  ;;  %v11618_v30 = vmax.f32 %v11616_v60, %v11617_v40  ;;  %v11539_v23 = vmax.f32 %v11537_v27, %v11538_v62  ;;  %v11545_v57 = vrot.slane %v11544_v26, 4  ;;  %12129 = vst.msk [vmem:[#allocation2 + $0xc8] sm:$0x1] %vm4928_vm2, %v20196_v4 }
 0xf42   : > { %v11605_v25 = vrot.slane %v11604_v17, 1  ;;  %v11552_v50 = vrot.slane %v11551_v33, 4  ;;  %v11558_v2 = vsel %vm4031_vm3, %v11458_v8, -inf  ;;  %v11599_v61 = vmax.f32 %v11597_v13, %v11598_v31  ;;  %v16637_v34 = vld [vmem:[#allocation2] ss:$40 sps:$4 sm:$0x33]  }
 0xf43   : > { %v11619_v3 = vrot.slane %v11618_v30, 1  ;;  %v11540_v47 = vrot.slane %v11539_v23, 2  ;;  %v11546_v9 = vmax.f32 %v11544_v26, %v11545_v57  ;;  %v11559_v32 = vrot.slane %v11558_v2, 4  ;;  %12124 = vst.msk [vmem:[#allocation2] sm:$0x1] %vm4928_vm2, %v20196_v4  ;;  %v16641_v26 = vld [vmem:[%s20205_s11 + $0x58] sm:$0xff]  }
 0xf44   : > { %v11606_v11 = vmax.f32 %v11604_v17, %v11605_v25  ;;  %v11553_v0 = vmax.f32 %v11551_v33, %v11552_v50  ;;  %v11613_v59 = vmax.f32 %v11611_v39, %v11612_v29  ;;  %12125 = vst.msk [vmem:[#allocation2 + $0x28] sm:$0x1] %vm4928_vm2, %v20196_v4  ;;  %v19647_v24 = vld [vmem:[#allocation2 + $0x2] ss:$40 sps:$4 sm:$0x33]   ;;  %v11701_v27 = vrot.slane %v16637_v34, %v17799_v49 }
 0xf45   : > { %v11620_v43 = vmax.f32 %v11618_v30, %v11619_v3  ;;  %v11541_v37 = vmax.f32 %v11539_v23, %v11540_v47  ;;  %v11547_v48 = vrot.slane %v11546_v9, 2  ;;  %v11560_v7 = vmax.f32 %v11558_v2, %v11559_v32  ;;  %v19650_v5 = vld [vmem:[#allocation2 + $0xa2] ss:$40 sps:$4 sm:$0x33]   ;;  %12132 = vst.msk [vmem:[#allocation2 + $0x3] sm:$0x1] %vm4928_vm2, %v20196_v4 }
 0xf46   : > { %v11659_v41 = vsel %vm5073_vm4, %v11606_v11, %v11599_v61  ;;  %v11554_v51 = vrot.slane %v11553_v0, 2  ;;  %12133 = vst.msk [vmem:[#allocation2 + $0x2b] sm:$0x1] %vm4928_vm2, %v20196_v4  ;;  %12136 = vst.msk [vmem:[#allocation2 + $0xa3] sm:$0x1] %vm4928_vm2, %v20196_v4  ;;  %v11718_v40 = vrot.slane %v19633_v19, %v17799_v49  ;;  %v16642_v30 = vld [vmem:[%s20205_s11 + $0x50] sm:$0xff]   ;;  %v11960_v19 = vrot.slane %v19647_v24, %v17799_v49 }
 0xf47   : > { %v11660_v54 = vsel %vm5073_vm4, %v11620_v43, %v11613_v59  ;;  %11675 = vst.msk [vmem:[#allocation2 + $0xf1] sm:$0x3] %vm4031_vm3, %v11659_v41  ;;  %v11542_v52 = vrot.slane %v11541_v37, 1  ;;  %v11548_v1 = vmax.f32 %v11546_v9, %v11547_v48  ;;  %v11561_v56 = vrot.slane %v11560_v7, 2  ;;  %v16643_v23 = vld [vmem:[%s20205_s11 + $0x48] sm:$0xff]   ;;  %v16644_v50 = vld [vmem:[%s20205_s11 + $0x40] sm:$0xff]  }
 0xf48   : > { %11676 = vst.msk [vmem:[#allocation2 + $0x119] sm:$0x3] %vm4031_vm3, %v11660_v54  ;;  %v11555_v28 = vmax.f32 %v11553_v0, %v11554_v51  ;;  %v16633_v20 = vld [vmem:[#allocation2 + $0x1] ss:$40 sps:$4 sm:$0x33]   ;;  %v11977_v3 = vrot.slane %v19650_v5, %v17799_v49  ;;  %v16649_v61 = vld [vmem:[%s20123_s12 + $0x38] sm:$0xff]  }
 0xf49   : > { %v11549_v18 = vrot.slane %v11548_v1, 1  ;;  %12137 = vst.msk [vmem:[#allocation2 + $0xcb] sm:$0x1] %vm4928_vm2, %v20196_v4  ;;  %v11562_v42 = vmax.f32 %v11560_v7, %v11561_v56  ;;  %v11543_v22 = vmax.f32 %v11541_v37, %v11542_v52  ;;  %v16635_v10 = vld [vmem:[#allocation2 + $0xa1] ss:$40 sps:$4 sm:$0x33]   ;;  %v11762_v45 = vrot.slane %v16633_v20, %v17799_v49 }
 0xf4a   : > { %v11556_v53 = vrot.slane %v11555_v28, 1  ;;  %v11779_v13 = vrot.slane %v16635_v10, %v17799_v49  ;;  %v16650_v11 = vld [vmem:[%s20123_s12 + $0x18] sm:$0xff]   ;;  %v16651_v0 = vld [vmem:[%s20123_s12 + $0x30] sm:$0xff]   ;;  %v16653_v59 = vld [vmem:[%s20123_s12 + $0x28] sm:$0xff]  }
 0xf4b   : > { %v11550_v36 = vmax.f32 %v11548_v1, %v11549_v18  ;;  %v11563_v38 = vrot.slane %v11562_v42, 1  ;;  %v16652_v32 = vld [vmem:[%s20123_s12 + $0x10] sm:$0xff]   ;;  %v16654_v43 = vld [vmem:[%s20123_s12 + $0x8] sm:$0xff]   ;;  %v16655_v37 = vld [vmem:[%s20123_s12 + $0x20] sm:$0xff]  }
 0xf4c   : > { %v11557_v12 = vmax.f32 %v11555_v28, %v11556_v53  ;;  %v16656_v48 = vld [vmem:[%s20123_s12] sm:$0xff]   ;;  %v14371_v5 = vld [vmem:[%s20125_s14 + $0xa] ss:$0 sm:$0xff] }
 0xf4d   : > { %v11655_v44 = vsel %vm5073_vm4, %v11550_v36, %v11543_v22  ;;  %v11564_v16 = vmax.f32 %v11562_v42, %v11563_v38 }
 0xf4e   : > { %11671 = vst.msk [vmem:[#allocation2 + $0x51] sm:$0x3] %vm4031_vm3, %v11655_v44 }
 0xf4f   : > { %v11656_v58 = vsel %vm5073_vm4, %v11564_v16, %v11557_v12  ;;  %v16640_v35 = vld [vmem:[#allocation2 + $0xf0] ss:$40 sps:$4 sm:$0x33]   ;;  %v16648_v14 = vld [vmem:[#allocation2 + $0xf2] ss:$40 sps:$4 sm:$0x33]  }
 0xf50   : > { %11672 = vst.msk [vmem:[#allocation2 + $0x79] sm:$0x3] %vm4031_vm3, %v11656_v58  ;;  %v16636_v63 = vld [vmem:[#allocation2 + $0xf1] ss:$40 sps:$4 sm:$0x33]   ;;  %v11725_v60 = vrot.slane %v16640_v35, %v17799_v49  ;;  %v11984_v25 = vrot.slane %v16648_v14, %v17799_v49 }
 0xf51   : > { %12130 = vst.msk [vmem:[#allocation2 + $0xf0] sm:$0x1] %vm4928_vm2, %v20196_v4  ;;  %12131 = vst.msk [vmem:[#allocation2 + $0x118] sm:$0x1] %vm4928_vm2, %v20196_v4  ;;  %v11786_v15 = vrot.slane %v16636_v63, %v17799_v49 }
 0xf52   : > { %12138 = vst.msk [vmem:[#allocation2 + $0xf3] sm:$0x1] %vm4928_vm2, %v20196_v4  ;;  %12139 = vst.msk [vmem:[#allocation2 + $0x11b] sm:$0x1] %vm4928_vm2, %v20196_v4  ;;  %v11726_v17 = vcombine.low %v11718_v40, %v11725_v60  ;;  %v11985_v47 = vcombine.low %v11977_v3, %v11984_v25 }
 0xf53   : > { %v11787_v62 = vcombine.low %v11779_v13, %v11786_v15 }
 0xf57   : > { %v16634_v46 = vld [vmem:[#allocation2 + $0x51] ss:$40 sps:$4 sm:$0x33]  }
 0xf58   : > { %v16638_v21 = vld [vmem:[#allocation2 + $0x50] ss:$40 sps:$4 sm:$0x33]   ;;  %v11769_v55 = vrot.slane %v16634_v46, %v17799_v49  ;;  %v16646_v6 = vld [vmem:[#allocation2 + $0x52] ss:$40 sps:$4 sm:$0x33]  }
 0xf59   : > { %12126 = vst.msk [vmem:[#allocation2 + $0x50] sm:$0x1] %vm4928_vm2, %v20196_v4  ;;  %12127 = vst.msk [vmem:[#allocation2 + $0x78] sm:$0x1] %vm4928_vm2, %v20196_v4  ;;  %v11708_v39 = vrot.slane %v16638_v21, %v17799_v49  ;;  %v11967_v57 = vrot.slane %v16646_v6, %v17799_v49 }
 0xf5a   : > { %12134 = vst.msk [vmem:[#allocation2 + $0x53] sm:$0x1] %vm4928_vm2, %v20196_v4  ;;  %12135 = vst.msk [vmem:[#allocation2 + $0x7b] sm:$0x1] %vm4928_vm2, %v20196_v4  ;;  %v11770_v8 = vcombine.low %v11762_v45, %v11769_v55 }
 0xf5b   : > { %v11709_v31 = vcombine.low %v11701_v27, %v11708_v39  ;;  %v11968_v2 = vcombine.low %v11960_v19, %v11967_v57 }
 0xf5c   : > { %v11790_v33 = vpack.c.bf16 %v11787_v62, %v11770_v8 }
 0xf5d   : > { %v11729_v29 = vpack.c.bf16 %v11726_v17, %v11709_v31  ;;  %v11988_v9 = vpack.c.bf16 %v11985_v47, %v11968_v2 }
 0xf5e   : > { %16113 = vmatmul.mubr.msk.bf16.vlgmr.msra.gmra.mxu0 %vm5208_vm11, %v11790_v33 }
 0xf5f   : > { %16125 = vmatmul.mubr.msk.bf16.vlgmr.msra.gmra.mxu1 %vm5208_vm11, %v11729_v29  ;;  %16129 = vmatpush3.bf16.msra.mxu0 %v16641_v26  ;;  %v16665_v29 = vld [vmem:[%s20123_s12 + $0x58] sm:$0xff]  }
 0xf60   : > { %16130 = vmatprep.subr.bf16.mxu0 %v20196_v4  ;;  %16136 = vmatprep.mubr.msk.bf16.mxu0 %vm16810_vm13, %v20196_v4 }
 0xf61   : > { %16148 = vmatprep.mubr.msk.bf16.mxu1 %vm16810_vm13, %v20196_v4  ;;  %16141 = vmatpush3.bf16.msra.mxu1 %v16649_v61 }
 0xf62   : > { %16142 = vmatprep.subr.bf16.mxu1 %v20196_v4 }
 0xf63   : > { %16131 = vmatpush3.bf16.msra.mxu0 %v16642_v30 }
 0xf64   : > { %16132 = vmatprep.subr.bf16.mxu0 %v20196_v4 }
 0xf65   : > { %16143 = vmatpush3.bf16.msra.mxu1 %v16651_v0 }
 0xf66   : > { %16144 = vmatprep.subr.bf16.mxu1 %v20196_v4 }
 0xf67   : > { %16133 = vmatpush3.bf16.msra.mxu0 %v16643_v23 }
 0xf68   : > { %16134 = vmatprep.subr.bf16.mxu0 %v20196_v4 }
 0xf69   : > { %16145 = vmatpush3.bf16.msra.mxu1 %v16653_v59  ;;  %v16666_v59 = vld [vmem:[%s20123_s12 + $0x50] sm:$0xff]  }
 0xf6a   : > { %16146 = vmatprep.subr.bf16.mxu1 %v20196_v4 }
 0xf6b   : > { %16135 = vmatpush3.bf16.msra.mxu0 %v16644_v50 }
 0xf6c   : > { %16152 = vmatprep.subr.bf16.mxu0 %v20196_v4 }
 0xf6d   : > { %16147 = vmatpush3.bf16.msra.mxu1 %v16655_v37 }
 0xf6e   : > { %16137 = vmatmul.mubr.msk.bf16.vlgmr.msra.gmra.mxu0 %vm5208_vm11, %v11988_v9  ;;  %16164 = vmatprep.subr.bf16.mxu1 %v20196_v4 }
 0xf6f   : > { %16160 = vmatprep.mubr.msk.bf16.mxu0 %vm16810_vm13, %v20196_v4  ;;  %16153 = vmatpush3.bf16.msra.mxu0 %v16650_v11 }
 0xf70   : > { %16154 = vmatprep.subr.bf16.mxu0 %v20196_v4 }
 0xf73   : > { %16155 = vmatpush3.bf16.msra.mxu0 %v16652_v32 }
 0xf74   : > { %16156 = vmatprep.subr.bf16.mxu0 %v20196_v4 }
 0xf77   : > { %16157 = vmatpush3.bf16.msra.mxu0 %v16654_v43  ;;  %v16667_v43 = vld [vmem:[%s20123_s12 + $0x48] sm:$0xff]  }
 0xf78   : > { %16158 = vmatprep.subr.bf16.mxu0 %v20196_v4 }
 0xf7b   : > { %16159 = vmatpush3.bf16.msra.mxu0 %v16656_v48 }
 0xf7c   : > { %16176 = vmatprep.subr.bf16.mxu0 %v20196_v4 }
0x101e   : > { %v11861_v34 = vpop.f32.mrf.mxu0 }
0x101f   : > { %v11929_v41 = vpop.f32.mrf.mxu1 }
0x1020   : > { %v16114_v51 = vpop.f32.mrf.mxu0  ;;  %v11930_v28 = vadd.f32 %v11929_v41, %v11861_v34  ;;  %v16668_v41 = vld [vmem:[%s20123_s12 + $0x40] sm:$0xff]  }
0x1021   : > { %v16126_v7 = vpop.f32.mrf.mxu1 }
0x1022   : > { %v11864_v54 = vpop.f32.mrf.mxu0 }
0x1023   : > { %v11932_v52 = vpop.f32.mrf.mxu1 }
0x1024   : > { %v16115_v1 = vpop.f32.mrf.mxu0  ;;  %v11933_v42 = vadd.f32 %v11932_v52, %v11864_v54 }
0x1025   : > { %v16127_v24 = vpop.f32.mrf.mxu1  ;;  %v16673_v1 = vld [vmem:[%s20124_s13 + $0x38] sm:$0xff]  }
0x1026   : > { %v16674_v24 = vld [vmem:[%s20124_s13 + $0x18] sm:$0xff]  }
0x102e   : > { %v12059_v56 = vpop.f32.mrf.mxu0 }
0x102f   : > { %v12066_v18 = vadd.f32 %v12059_v56, %v11930_v28  ;;  %v16675_v28 = vld [vmem:[%s20124_s13 + $0x30] sm:$0xff]  }
0x1030   : > { %v16138_v53 = vpop.f32.mrf.mxu0  ;;  %v16676_v56 = vld [vmem:[%s20124_s13 + $0x10] sm:$0xff]  }
0x1031   : > { %v12076_v22 = vadd.f32 %v14371_v5, %v12066_v18  ;;  %v16678_v18 = vld [vmem:[%s20124_s13 + $0x8] sm:$0xff]   ;;  %v16679_v53 = vld [vmem:[%s20124_s13 + $0x20] sm:$0xff]  }
0x1032   : > { %v12062_v36 = vpop.f32.mrf.mxu0 }
0x1033   : > { %v12078_v38 = vmax.f32 %v12076_v22, 0.0  ;;  %v12067_v44 = vadd.f32 %v12062_v36, %v11933_v42  ;;  %v16680_v42 = vld [vmem:[%s20124_s13] sm:$0xff]  }
0x1034   : > { %v16139_v12 = vpop.f32.mrf.mxu0 }
0x1035   : > { %v12082_v16 = vcombine.high %v12078_v38, %v12078_v38  ;;  %v12089_v58 = vrot.slane %v12078_v38, %v17799_v49  ;;  %v12077_v35 = vadd.f32 %v14371_v5, %v12067_v44  ;;  %v16677_v5 = vld [vmem:[%s20124_s13 + $0x28] sm:$0xff]  }
0x1037   : > { %v12096_v14 = vrot.slane %v12082_v16, %v17799_v49  ;;  %v12097_v63 = vcombine.high %v12089_v58, %v12089_v58  ;;  %12140 = vst.msk [vmem:[#allocation2 + $0x1] sm:$0x3] %vm4031_vm3, %v12089_v58  ;;  %v12079_v20 = vmax.f32 %v12077_v35, 0.0 }
0x1039   : > { %v12098_v10 = vcombine.high %v12096_v14, %v12096_v14  ;;  %12141 = vst.msk [vmem:[#allocation2 + $0x29] sm:$0x3] %vm4031_vm3, %v12097_v63  ;;  %12142 = vst.msk [vmem:[#allocation2 + $0x51] sm:$0x3] %vm4031_vm3, %v12096_v14  ;;  %v12099_v46 = vcombine.high %v12079_v20, %v12079_v20  ;;  %v12106_v15 = vrot.slane %v12079_v20, %v17799_v49  ;;  %v14404_v20 = vld [vmem:[%s20125_s14 + $0xb] ss:$0 sm:$0xff] }
0x103b   : > { %12143 = vst.msk [vmem:[#allocation2 + $0x79] sm:$0x3] %vm4031_vm3, %v12098_v10  ;;  %v12113_v21 = vrot.slane %v12099_v46, %v17799_v49  ;;  %v12114_v60 = vcombine.high %v12106_v15, %v12106_v15  ;;  %12144 = vst.msk [vmem:[#allocation2 + $0xa1] sm:$0x3] %vm4031_vm3, %v12106_v15 }
0x103d   : > { %v12115_v45 = vcombine.high %v12113_v21, %v12113_v21  ;;  %12145 = vst.msk [vmem:[#allocation2 + $0xc9] sm:$0x3] %vm4031_vm3, %v12114_v60  ;;  %12146 = vst.msk [vmem:[#allocation2 + $0xf1] sm:$0x3] %vm4031_vm3, %v12113_v21 }
0x103f   : > { %12147 = vst.msk [vmem:[#allocation2 + $0x119] sm:$0x3] %vm4031_vm3, %v12115_v45 }
0x1040   : > { %v16657_v55 = vld [vmem:[#allocation2 + $0x1] ss:$40 sps:$4 sm:$0x33]  }
0x1041   : > { %v16661_v40 = vld [vmem:[#allocation2] ss:$40 sps:$4 sm:$0x33]   ;;  %v12233_v8 = vrot.slane %v16657_v55, %v17799_v49  ;;  %v16669_v3 = vld [vmem:[#allocation2 + $0x2] ss:$40 sps:$4 sm:$0x33]  }
0x1042   : > { %v16658_v13 = vld [vmem:[#allocation2 + $0x51] ss:$40 sps:$4 sm:$0x33]   ;;  %12595 = vst.msk [vmem:[#allocation2] sm:$0x1] %vm4928_vm2, %v20196_v4  ;;  %v12172_v19 = vrot.slane %v16661_v40, %v17799_v49  ;;  %v12431_v51 = vrot.slane %v16669_v3, %v17799_v49 }
0x1043   : > { %v12240_v27 = vrot.slane %v16658_v13, %v17799_v49  ;;  %v16662_v17 = vld [vmem:[#allocation2 + $0x50] ss:$40 sps:$4 sm:$0x33]   ;;  %12596 = vst.msk [vmem:[#allocation2 + $0x28] sm:$0x1] %vm4928_vm2, %v20196_v4 }
0x1044   : > { %v16659_v6 = vld [vmem:[#allocation2 + $0xa1] ss:$40 sps:$4 sm:$0x33]   ;;  %12597 = vst.msk [vmem:[#allocation2 + $0x50] sm:$0x1] %vm4928_vm2, %v20196_v4  ;;  %v12179_v57 = vrot.slane %v16662_v17, %v17799_v49 }
0x1045   : > { %v12250_v62 = vrot.slane %v16659_v6, %v17799_v49  ;;  %v16663_v26 = vld [vmem:[#allocation2 + $0xa0] ss:$40 sps:$4 sm:$0x33]   ;;  %12598 = vst.msk [vmem:[#allocation2 + $0x78] sm:$0x1] %vm4928_vm2, %v20196_v4  ;;  %v12241_v30 = vcombine.low %v12233_v8, %v12240_v27 }
0x1046   : > { %v16660_v39 = vld [vmem:[#allocation2 + $0xf1] ss:$40 sps:$4 sm:$0x33]   ;;  %12599 = vst.msk [vmem:[#allocation2 + $0xa0] sm:$0x1] %vm4928_vm2, %v20196_v4  ;;  %v12189_v25 = vrot.slane %v16663_v26, %v17799_v49  ;;  %v12180_v9 = vcombine.low %v12172_v19, %v12179_v57 }
0x1047   : > { %v12257_v31 = vrot.slane %v16660_v39, %v17799_v49  ;;  %v16664_v33 = vld [vmem:[#allocation2 + $0xf0] ss:$40 sps:$4 sm:$0x33]   ;;  %12600 = vst.msk [vmem:[#allocation2 + $0xc8] sm:$0x1] %vm4928_vm2, %v20196_v4 }
0x1048   : > { %12601 = vst.msk [vmem:[#allocation2 + $0xf0] sm:$0x1] %vm4928_vm2, %v20196_v4  ;;  %12602 = vst.msk [vmem:[#allocation2 + $0x118] sm:$0x1] %vm4928_vm2, %v20196_v4  ;;  %v12196_v50 = vrot.slane %v16664_v33, %v17799_v49 }
0x1049   : > { %v12258_v23 = vcombine.low %v12250_v62, %v12257_v31  ;;  %v16670_v47 = vld [vmem:[#allocation2 + $0x52] ss:$40 sps:$4 sm:$0x33]   ;;  %v16671_v11 = vld [vmem:[#allocation2 + $0xa2] ss:$40 sps:$4 sm:$0x33]  }
0x104a   : > { %v12197_v61 = vcombine.low %v12189_v25, %v12196_v50  ;;  %v16672_v0 = vld [vmem:[#allocation2 + $0xf2] ss:$40 sps:$4 sm:$0x33]   ;;  %12603 = vst.msk [vmem:[#allocation2 + $0x3] sm:$0x1] %vm4928_vm2, %v20196_v4  ;;  %v12438_v48 = vrot.slane %v16670_v47, %v17799_v49  ;;  %v12448_v34 = vrot.slane %v16671_v11, %v17799_v49 }
0x104b   : > { %v12261_v2 = vpack.c.bf16 %v12258_v23, %v12241_v30  ;;  %12604 = vst.msk [vmem:[#allocation2 + $0x2b] sm:$0x1] %vm4928_vm2, %v20196_v4  ;;  %12605 = vst.msk [vmem:[#allocation2 + $0x53] sm:$0x1] %vm4928_vm2, %v20196_v4  ;;  %v12455_v37 = vrot.slane %v16672_v0, %v17799_v49 }
0x104c   : > { %12606 = vst.msk [vmem:[#allocation2 + $0x7b] sm:$0x1] %vm4928_vm2, %v20196_v4  ;;  %12607 = vst.msk [vmem:[#allocation2 + $0xa3] sm:$0x1] %vm4928_vm2, %v20196_v4  ;;  %v12200_v32 = vpack.c.bf16 %v12197_v61, %v12180_v9  ;;  %v12439_v54 = vcombine.low %v12431_v51, %v12438_v48 }
0x104d   : > { %16149 = vmatmul.mubr.msk.bf16.vlgmr.msra.gmra.mxu1 %vm5208_vm11, %v12261_v2  ;;  %12608 = vst.msk [vmem:[#allocation2 + $0xcb] sm:$0x1] %vm4928_vm2, %v20196_v4  ;;  %12609 = vst.msk [vmem:[#allocation2 + $0xf3] sm:$0x1] %vm4928_vm2, %v20196_v4  ;;  %v12456_v7 = vcombine.low %v12448_v34, %v12455_v37 }
0x104e   : > { %12610 = vst.msk [vmem:[#allocation2 + $0x11b] sm:$0x1] %vm4928_vm2, %v20196_v4  ;;  %16165 = vmatpush3.bf16.msra.mxu1 %v16665_v29  ;;  %16172 = vmatprep.mubr.msk.bf16.mxu1 %vm16810_vm13, %v20196_v4 }
0x104f   : > { %16166 = vmatprep.subr.bf16.mxu1 %v20196_v4  ;;  %16161 = vmatmul.mubr.msk.bf16.vlgmr.msra.gmra.mxu0 %vm5208_vm11, %v12200_v32  ;;  %v12459_v52 = vpack.c.bf16 %v12456_v7, %v12439_v54  ;;  %v16689_v32 = vld [vmem:[%s20124_s13 + $0x58] sm:$0xff]  }
0x1050   : > { %16184 = vmatprep.mubr.msk.bf16.mxu0 %vm16810_vm13, %v20196_v4  ;;  %16177 = vmatpush3.bf16.msra.mxu0 %v16673_v1  ;;  %v16690_v1 = vld [vmem:[%s20124_s13 + $0x50] sm:$0xff]  }
0x1051   : > { %16178 = vmatprep.subr.bf16.mxu0 %v20196_v4 }
0x1052   : > { %16167 = vmatpush3.bf16.msra.mxu1 %v16666_v59 }
0x1053   : > { %16168 = vmatprep.subr.bf16.mxu1 %v20196_v4 }
0x1054   : > { %16179 = vmatpush3.bf16.msra.mxu0 %v16675_v28 }
0x1055   : > { %16180 = vmatprep.subr.bf16.mxu0 %v20196_v4 }
0x1056   : > { %16169 = vmatpush3.bf16.msra.mxu1 %v16667_v43 }
0x1057   : > { %16170 = vmatprep.subr.bf16.mxu1 %v20196_v4 }
0x1058   : > { %16181 = vmatpush3.bf16.msra.mxu0 %v16677_v5  ;;  %v16691_v5 = vld [vmem:[%s20124_s13 + $0x48] sm:$0xff]  }
0x1059   : > { %16182 = vmatprep.subr.bf16.mxu0 %v20196_v4 }
0x105a   : > { %16171 = vmatpush3.bf16.msra.mxu1 %v16668_v41 }
0x105b   : > { %16188 = vmatprep.subr.bf16.mxu1 %v20196_v4 }
0x105c   : > { %16183 = vmatpush3.bf16.msra.mxu0 %v16679_v53 }
0x105d   : > { %16173 = vmatmul.mubr.msk.bf16.vlgmr.msra.gmra.mxu1 %vm5208_vm11, %v12459_v52  ;;  %16200 = vmatprep.subr.bf16.mxu0 %v20196_v4 }
0x105e   : > { %16196 = vmatprep.mubr.msk.bf16.mxu1 %vm16810_vm13, %v20196_v4  ;;  %16189 = vmatpush3.bf16.msra.mxu1 %v16674_v24 }
0x105f   : > { %16190 = vmatprep.subr.bf16.mxu1 %v20196_v4 }
0x1062   : > { %16191 = vmatpush3.bf16.msra.mxu1 %v16676_v56 }
0x1063   : > { %16192 = vmatprep.subr.bf16.mxu1 %v20196_v4 }
0x1066   : > { %16193 = vmatpush3.bf16.msra.mxu1 %v16678_v18 }
0x1067   : > { %16194 = vmatprep.subr.bf16.mxu1 %v20196_v4 }
0x106a   : > { %16195 = vmatpush3.bf16.msra.mxu1 %v16680_v42 }
0x106b   : > { %16212 = vmatprep.subr.bf16.mxu1 %v20196_v4 }
0x110d   : > { %v12332_v22 = vpop.f32.mrf.mxu1 }
0x110f   : > { %v16150_v36 = vpop.f32.mrf.mxu1  ;;  %v12400_v38 = vpop.f32.mrf.mxu0 }
0x1110   : > { %v12401_v14 = vadd.f32 %v12400_v38, %v12332_v22  ;;  %v16692_v36 = vld [vmem:[%s20124_s13 + $0x40] sm:$0xff]  }
0x1111   : > { %v12335_v44 = vpop.f32.mrf.mxu1  ;;  %v16162_v12 = vpop.f32.mrf.mxu0 }
0x1113   : > { %v16151_v16 = vpop.f32.mrf.mxu1  ;;  %v12403_v58 = vpop.f32.mrf.mxu0 }
0x1114   : > { %v12404_v15 = vadd.f32 %v12403_v58, %v12335_v44  ;;  %v16697_v58 = vld [vmem:[%s20130_s19 + $0x18] sm:$0xff]  }
0x1115   : > { %v16163_v35 = vpop.f32.mrf.mxu0 }
0x1116   : > { %v16698_v35 = vld [vmem:[%s20130_s19 + $0x38] sm:$0xff]  }
0x111d   : > { %v12530_v63 = vpop.f32.mrf.mxu1 }
0x111e   : > { %v12537_v10 = vadd.f32 %v12530_v63, %v12401_v14  ;;  %v16699_v14 = vld [vmem:[%s20130_s19 + $0x10] sm:$0xff]  }
0x111f   : > { %v16174_v46 = vpop.f32.mrf.mxu1  ;;  %v16700_v63 = vld [vmem:[%s20130_s19 + $0x30] sm:$0xff]  }
0x1120   : > { %v12547_v21 = vadd.f32 %v14404_v20, %v12537_v10  ;;  %v16702_v10 = vld [vmem:[%s20130_s19 + $0x28] sm:$0xff]   ;;  %v16703_v46 = vld [vmem:[%s20130_s19] sm:$0xff]  }
0x1121   : > { %v12533_v60 = vpop.f32.mrf.mxu1 }
0x1122   : > { %v12549_v45 = vmax.f32 %v12547_v21, 0.0  ;;  %v12538_v55 = vadd.f32 %v12533_v60, %v12404_v15  ;;  %v16704_v15 = vld [vmem:[%s20130_s19 + $0x20] sm:$0xff]  }
0x1123   : > { %v16175_v13 = vpop.f32.mrf.mxu1 }
0x1124   : > { %v12553_v6 = vcombine.high %v12549_v45, %v12549_v45  ;;  %v12560_v27 = vrot.slane %v12549_v45, %v17799_v49  ;;  %v12548_v39 = vadd.f32 %v14404_v20, %v12538_v55  ;;  %v16701_v20 = vld [vmem:[%s20130_s19 + $0x8] sm:$0xff]  }
0x1126   : > { %v12567_v40 = vrot.slane %v12553_v6, %v17799_v49  ;;  %v12568_v8 = vcombine.high %v12560_v27, %v12560_v27  ;;  %12611 = vst.msk [vmem:[#allocation2 + $0x1] sm:$0x3] %vm4031_vm3, %v12560_v27  ;;  %v12550_v62 = vmax.f32 %v12548_v39, 0.0 }
0x1128   : > { %v12569_v31 = vcombine.high %v12567_v40, %v12567_v40  ;;  %12612 = vst.msk [vmem:[#allocation2 + $0x29] sm:$0x3] %vm4031_vm3, %v12568_v8  ;;  %12613 = vst.msk [vmem:[#allocation2 + $0x51] sm:$0x3] %vm4031_vm3, %v12567_v40  ;;  %v12570_v17 = vcombine.high %v12550_v62, %v12550_v62  ;;  %v12577_v26 = vrot.slane %v12550_v62, %v17799_v49 }
0x112a   : > { %12614 = vst.msk [vmem:[#allocation2 + $0x79] sm:$0x3] %vm4031_vm3, %v12569_v31  ;;  %v12584_v33 = vrot.slane %v12570_v17, %v17799_v49  ;;  %v12585_v29 = vcombine.high %v12577_v26, %v12577_v26  ;;  %12615 = vst.msk [vmem:[#allocation2 + $0xa1] sm:$0x3] %vm4031_vm3, %v12577_v26  ;;  %v14437_v31 = vld [vmem:[%s20125_s14 + $0xc] ss:$0 sm:$0xff] }
0x112c   : > { %v12586_v30 = vcombine.high %v12584_v33, %v12584_v33  ;;  %12616 = vst.msk [vmem:[#allocation2 + $0xc9] sm:$0x3] %vm4031_vm3, %v12585_v29  ;;  %12617 = vst.msk [vmem:[#allocation2 + $0xf1] sm:$0x3] %vm4031_vm3, %v12584_v33 }
0x112e   : > { %12618 = vst.msk [vmem:[#allocation2 + $0x119] sm:$0x3] %vm4031_vm3, %v12586_v30 }
0x112f   : > { %v16681_v23 = vld [vmem:[#allocation2 + $0x1] ss:$40 sps:$4 sm:$0x33]  }
0x1130   : > { %v16685_v2 = vld [vmem:[#allocation2] ss:$40 sps:$4 sm:$0x33]   ;;  %v12704_v3 = vrot.slane %v16681_v23, %v17799_v49  ;;  %v16693_v18 = vld [vmem:[#allocation2 + $0x2] ss:$40 sps:$4 sm:$0x33]  }
0x1131   : > { %v16682_v57 = vld [vmem:[#allocation2 + $0x51] ss:$40 sps:$4 sm:$0x33]   ;;  %v12643_v48 = vrot.slane %v16685_v2, %v17799_v49  ;;  %v12902_v38 = vrot.slane %v16693_v18, %v17799_v49  ;;  %v16705_v2 = vld [vmem:[%s20131_s20 + $0x8] sm:$0xff]  }
0x1132   : > { %v12711_v25 = vrot.slane %v16682_v57, %v17799_v49  ;;  %v16686_v61 = vld [vmem:[#allocation2 + $0x50] ss:$40 sps:$4 sm:$0x33]   ;;  %v16694_v28 = vld [vmem:[#allocation2 + $0x52] ss:$40 sps:$4 sm:$0x33]  }
0x1133   : > { %v16683_v19 = vld [vmem:[#allocation2 + $0xa1] ss:$40 sps:$4 sm:$0x33]   ;;  %v12650_v37 = vrot.slane %v16686_v61, %v17799_v49  ;;  %v12909_v42 = vrot.slane %v16694_v28, %v17799_v49 }
0x1134   : > { %v12721_v47 = vrot.slane %v16683_v19, %v17799_v49  ;;  %v16687_v11 = vld [vmem:[#allocation2 + $0xa0] ss:$40 sps:$4 sm:$0x33]   ;;  %v12712_v59 = vcombine.low %v12704_v3, %v12711_v25  ;;  %v16695_v56 = vld [vmem:[#allocation2 + $0xa2] ss:$40 sps:$4 sm:$0x33]  }
0x1135   : > { %v16684_v50 = vld [vmem:[#allocation2 + $0xf1] ss:$40 sps:$4 sm:$0x33]   ;;  %v12660_v34 = vrot.slane %v16687_v11, %v17799_v49  ;;  %v12651_v7 = vcombine.low %v12643_v48, %v12650_v37  ;;  %v12919_v22 = vrot.slane %v16695_v56, %v17799_v49  ;;  %v12910_v12 = vcombine.low %v12902_v38, %v12909_v42  ;;  %v16706_v3 = vld [vmem:[%s20131_s20] sm:$0xff]  }
0x1136   : > { %v12728_v9 = vrot.slane %v16684_v50, %v17799_v49  ;;  %v16688_v0 = vld [vmem:[#allocation2 + $0xf0] ss:$40 sps:$4 sm:$0x33]   ;;  %v16696_v24 = vld [vmem:[#allocation2 + $0xf2] ss:$40 sps:$4 sm:$0x33]  }
0x1137   : > { %v12667_v41 = vrot.slane %v16688_v0, %v17799_v49  ;;  %v12926_v53 = vrot.slane %v16696_v24, %v17799_v49 }
0x1138   : > { %v12729_v43 = vcombine.low %v12721_v47, %v12728_v9 }
0x1139   : > { %v12668_v54 = vcombine.low %v12660_v34, %v12667_v41  ;;  %v12927_v44 = vcombine.low %v12919_v22, %v12926_v53 }
0x113a   : > { %v12732_v51 = vpack.c.bf16 %v12729_v43, %v12712_v59 }
0x113b   : > { %v12671_v52 = vpack.c.bf16 %v12668_v54, %v12651_v7  ;;  %v12930_v16 = vpack.c.bf16 %v12927_v44, %v12910_v12 }
0x113c   : > { %16185 = vmatmul.mubr.msk.bf16.vlgmr.msra.gmra.mxu0 %vm5208_vm11, %v12732_v51 }
0x113d   : > { %16201 = vmatpush3.bf16.msra.mxu0 %v16689_v32  ;;  %16208 = vmatprep.mubr.msk.bf16.mxu0 %vm16810_vm13, %v20196_v4 }
0x113e   : > { %16202 = vmatprep.subr.bf16.mxu0 %v20196_v4  ;;  %16197 = vmatmul.mubr.msk.bf16.vlgmr.msra.gmra.mxu1 %vm5208_vm11, %v12671_v52 }
0x113f   : > { %16220 = vmatprep.mubr.msk.bf16.mxu1 %vm16810_vm13, %v20196_v4  ;;  %16213 = vmatpush3.bf16.msra.mxu1 %v16697_v58 }
0x1140   : > { %16214 = vmatprep.subr.bf16.mxu1 %v20196_v4 }
0x1141   : > { %16203 = vmatpush3.bf16.msra.mxu0 %v16690_v1 }
0x1142   : > { %16204 = vmatprep.subr.bf16.mxu0 %v20196_v4 }
0x1143   : > { %16215 = vmatpush3.bf16.msra.mxu1 %v16699_v14 }
0x1144   : > { %16216 = vmatprep.subr.bf16.mxu1 %v20196_v4 }
0x1145   : > { %16205 = vmatpush3.bf16.msra.mxu0 %v16691_v5 }
0x1146   : > { %16206 = vmatprep.subr.bf16.mxu0 %v20196_v4 }
0x1147   : > { %16217 = vmatpush3.bf16.msra.mxu1 %v16701_v20 }
0x1148   : > { %16218 = vmatprep.subr.bf16.mxu1 %v20196_v4 }
0x1149   : > { %16207 = vmatpush3.bf16.msra.mxu0 %v16692_v36 }
0x114a   : > { %16224 = vmatprep.subr.bf16.mxu0 %v20196_v4 }
0x114b   : > { %16219 = vmatpush3.bf16.msra.mxu1 %v16703_v46 }
0x114c   : > { %16209 = vmatmul.mubr.msk.bf16.vlgmr.msra.gmra.mxu0 %vm5208_vm11, %v12930_v16  ;;  %16236 = vmatprep.subr.bf16.mxu1 %v20196_v4 }
0x114d   : > { %16232 = vmatprep.mubr.msk.bf16.mxu0 %vm16810_vm13, %v20196_v4  ;;  %16225 = vmatpush3.bf16.msra.mxu0 %v16698_v35 }
0x114e   : > { %16226 = vmatprep.subr.bf16.mxu0 %v20196_v4 }
0x1151   : > { %16227 = vmatpush3.bf16.msra.mxu0 %v16700_v63 }
0x1152   : > { %16228 = vmatprep.subr.bf16.mxu0 %v20196_v4 }
0x1155   : > { %16229 = vmatpush3.bf16.msra.mxu0 %v16702_v10 }
0x1156   : > { %16230 = vmatprep.subr.bf16.mxu0 %v20196_v4 }
0x1159   : > { %16231 = vmatpush3.bf16.msra.mxu0 %v16704_v15 }
0x11fc   : > { %v12803_v21 = vpop.f32.mrf.mxu0 }
0x11fe   : > { %v16186_v60 = vpop.f32.mrf.mxu0  ;;  %v12871_v45 = vpop.f32.mrf.mxu1 }
0x11ff   : > { %v12872_v40 = vadd.f32 %v12871_v45, %v12803_v21 }
0x1200   : > { %v12806_v55 = vpop.f32.mrf.mxu0  ;;  %v16198_v13 = vpop.f32.mrf.mxu1 }
0x1202   : > { %v16187_v6 = vpop.f32.mrf.mxu0  ;;  %v12874_v27 = vpop.f32.mrf.mxu1 }
0x1203   : > { %v12875_v26 = vadd.f32 %v12874_v27, %v12806_v55 }
0x1204   : > { %v16199_v39 = vpop.f32.mrf.mxu1 }
0x120c   : > { %v13001_v8 = vpop.f32.mrf.mxu0 }
0x120d   : > { %v13008_v62 = vadd.f32 %v13001_v8, %v12872_v40 }
0x120e   : > { %v16210_v17 = vpop.f32.mrf.mxu0 }
0x120f   : > { %v13018_v29 = vadd.f32 %v14437_v31, %v13008_v62 }
0x1210   : > { %v13004_v33 = vpop.f32.mrf.mxu0 }
0x1211   : > { %v13009_v30 = vadd.f32 %v13004_v33, %v12875_v26  ;;  %v13020_v19 = vmax.f32 %v13018_v29, 0.0 }
0x1212   : > { %v16211_v23 = vpop.f32.mrf.mxu0 }
0x1213   : > { %v13019_v57 = vadd.f32 %v14437_v31, %v13009_v30 }
0x1215   : > { %v13021_v25 = vmax.f32 %v13019_v57, 0.0 }
0x1217   : > { %v13022_v50 = vpack.c.bf16 %v13021_v25, %v13020_v19 }
0x1219   : > { %16221 = vmatmul.mubr.msk.bf16.vlgmr.msra.gmra.mxu1 %vm5208_vm11, %v13022_v50  ;;  %16233 = vmatmul.mubr.msk.bf16.vlgmr.msra.gmra.mxu0 %vm5208_vm11, %v13022_v50 }
0x121a   : > { %16240 = vmatprep.mubr.msk.bf16.mxu1 %vm16810_vm13, %v20196_v4  ;;  %16237 = vmatpush3.bf16.msra.mxu1 %v16705_v2 }
0x121b   : > { %16238 = vmatprep.subr.bf16.mxu1 %v20196_v4 }
0x121e   : > { %16239 = vmatpush3.bf16.msra.mxu1 %v16706_v3 }
0x121f   : > { %16244 = vmatprep.subr.bf16.mxu1 %v20196_v4 }
0x12d9   : > { %v13092_v47 = vpop.f32.mrf.mxu1  ;;  %v13166_v9 = vpop.f32.mrf.mxu0 }
0x12da   : > { %v13173_v61 = vmax.f32 %v13092_v47, %v13166_v9 }
0x12db   : > { %v16222_v11 = vpop.f32.mrf.mxu1  ;;  %v16234_v0 = vpop.f32.mrf.mxu0 }
0x12dc   : > { %v13177_v32 = vcombine.high %v13173_v61, %v13173_v61  ;;  %v13184_v59 = vrot.slane %v13173_v61, %v17799_v49 }
0x12dd   : > { %v13095_v43 = vpop.f32.mrf.mxu1  ;;  %v13169_v37 = vpop.f32.mrf.mxu0 }
0x12de   : > { %v13191_v48 = vrot.slane %v13177_v32, %v17799_v49  ;;  %v13192_v34 = vcombine.high %v13184_v59, %v13184_v59  ;;  %v13220_v41 = vsel %vm13219_vm14, %v13184_v59, -inf  ;;  %v13174_v51 = vmax.f32 %v13095_v43, %v13169_v37 }
0x12df   : > { %v13221_v7 = vrot.slane %v13220_v41, 4  ;;  %v16223_v54 = vpop.f32.mrf.mxu1  ;;  %v16235_v52 = vpop.f32.mrf.mxu0 }
0x12e0   : > { %v13193_v1 = vcombine.high %v13191_v48, %v13191_v48  ;;  %v13227_v24 = vsel %vm13219_vm14, %v13192_v34, -inf  ;;  %v13234_v28 = vsel %vm13219_vm14, %v13191_v48, -inf  ;;  %v13194_v56 = vcombine.high %v13174_v51, %v13174_v51 }
0x12e1   : > { %v13222_v5 = vmax.f32 %v13220_v41, %v13221_v7  ;;  %v13228_v18 = vrot.slane %v13227_v24, 4  ;;  %v13235_v53 = vrot.slane %v13234_v28, 4  ;;  %v13201_v42 = vrot.slane %v13174_v51, %v17799_v49 }
0x12e2   : > { %v13241_v22 = vsel %vm13219_vm14, %v13193_v1, -inf  ;;  %v13208_v36 = vrot.slane %v13194_v56, %v17799_v49 }
0x12e3   : > { %v13223_v38 = vrot.slane %v13222_v5, 2  ;;  %v13229_v44 = vmax.f32 %v13227_v24, %v13228_v18  ;;  %v13236_v12 = vmax.f32 %v13234_v28, %v13235_v53  ;;  %v13242_v16 = vrot.slane %v13241_v22, 4 }
0x12e4   : > { %v13209_v58 = vcombine.high %v13201_v42, %v13201_v42  ;;  %v13210_v35 = vcombine.high %v13208_v36, %v13208_v36  ;;  %v13248_v14 = vsel %vm13219_vm14, %v13201_v42, -inf  ;;  %v13262_v63 = vsel %vm13219_vm14, %v13208_v36, -inf }
0x12e5   : > { %v13224_v20 = vmax.f32 %v13222_v5, %v13223_v38  ;;  %v13230_v10 = vrot.slane %v13229_v44, 2  ;;  %v13237_v46 = vrot.slane %v13236_v12, 2  ;;  %v13243_v15 = vmax.f32 %v13241_v22, %v13242_v16 }
0x12e6   : > { %v13249_v21 = vrot.slane %v13248_v14, 4  ;;  %v13255_v60 = vsel %vm13219_vm14, %v13209_v58, -inf  ;;  %v13263_v45 = vrot.slane %v13262_v63, 4  ;;  %v13269_v49 = vsel %vm13219_vm14, %v13210_v35, -inf }
0x12e7   : > { %v13225_v55 = vrot.slane %v13224_v20, 1  ;;  %v13231_v13 = vmax.f32 %v13229_v44, %v13230_v10  ;;  %v13238_v6 = vmax.f32 %v13236_v12, %v13237_v46  ;;  %v13244_v27 = vrot.slane %v13243_v15, 2 }
0x12e8   : > { %v13250_v39 = vmax.f32 %v13248_v14, %v13249_v21  ;;  %v13256_v40 = vrot.slane %v13255_v60, 4  ;;  %v13264_v8 = vmax.f32 %v13262_v63, %v13263_v45  ;;  %v13270_v62 = vrot.slane %v13269_v49, 4 }
0x12e9   : > { %v13226_v31 = vmax.f32 %v13224_v20, %v13225_v55  ;;  %v13232_v17 = vrot.slane %v13231_v13, 1  ;;  %v13239_v26 = vrot.slane %v13238_v6, 1  ;;  %v13245_v33 = vmax.f32 %v13243_v15, %v13244_v27  ;;  %v16708_v27 = vld [vmem:[%s20132_s21 + $0x30] sm:$0xff]  }
0x12ea   : > { %v13251_v29 = vrot.slane %v13250_v39, 2  ;;  %v13257_v30 = vmax.f32 %v13255_v60, %v13256_v40  ;;  %v13265_v23 = vrot.slane %v13264_v8, 2  ;;  %v13271_v57 = vmax.f32 %v13269_v49, %v13270_v62  ;;  %v16710_v40 = vld [vmem:[%s20132_s21 + $0x20] sm:$0xff]   ;;  %v16712_v62 = vld [vmem:[%s20132_s21 + $0x10] sm:$0xff]  }
0x12eb   : > { %v13233_v19 = vmax.f32 %v13231_v13, %v13232_v17  ;;  %v13240_v25 = vmax.f32 %v13238_v6, %v13239_v26  ;;  %v13246_v50 = vrot.slane %v13245_v33, 1  ;;  %v13294_v2 = vpack.c.bf16 %v13226_v31, %v13226_v31  ;;  %v16707_v13 = vld [vmem:[%s20132_s21 + $0x38] sm:$0xff]   ;;  %v16714_v17 = vld [vmem:[%s20132_s21] sm:$0xff]  }
0x12ec   : > { %v13252_v3 = vmax.f32 %v13250_v39, %v13251_v29  ;;  %v13258_v47 = vrot.slane %v13257_v30, 2  ;;  %v13266_v9 = vmax.f32 %v13264_v8, %v13265_v23  ;;  %v13272_v61 = vrot.slane %v13271_v57, 2  ;;  %v16709_v39 = vld [vmem:[%s20132_s21 + $0x28] sm:$0xff]   ;;  %v16711_v8 = vld [vmem:[%s20132_s21 + $0x18] sm:$0xff]   ;;  %v14456_v26 = vld [vmem:[%s20133_s22] ss:$0 sm:$0xff] }
0x12ed   : > { %v13247_v11 = vmax.f32 %v13245_v33, %v13246_v50  ;;  %v13284_v0 = vsel %vm5073_vm4, %v13233_v19, %v13226_v31  ;;  %v13295_v32 = vpack.c.bf16 %v13233_v19, %v13233_v19  ;;  %v13296_v59 = vpack.c.bf16 %v13240_v25, %v13240_v25  ;;  %v16713_v31 = vld [vmem:[%s20132_s21 + $0x8] sm:$0xff]  }
0x12ee   : > { %v13285_v43 = vsel %vm5075_vm5, %v13240_v25, %v13284_v0  ;;  %v13321_v37 = vunpack.c.l.b16 %v13294_v2  ;;  %v13253_v48 = vrot.slane %v13252_v3, 1  ;;  %v13259_v34 = vmax.f32 %v13257_v30, %v13258_v47 }
0x12ef   : > { %v13297_v41 = vpack.c.bf16 %v13247_v11, %v13247_v11  ;;  %v13322_v51 = vunpack.c.l.b16 %v13295_v32  ;;  %v13323_v7 = vunpack.c.l.b16 %v13296_v59  ;;  %v13267_v54 = vrot.slane %v13266_v9, 1 }
0x12f0   : > { %v13254_v52 = vmax.f32 %v13252_v3, %v13253_v48  ;;  %v13260_v1 = vrot.slane %v13259_v34, 1  ;;  %v13273_v24 = vmax.f32 %v13271_v57, %v13272_v61  ;;  %v13286_v28 = vsel %vm5077_vm6, %v13247_v11, %v13285_v43 }
0x12f1   : > { %v13324_v56 = vunpack.c.l.b16 %v13297_v41  ;;  %v13329_v5 = vsel %vm5073_vm4, %v13322_v51, %v13321_v37  ;;  %v13268_v18 = vmax.f32 %v13266_v9, %v13267_v54 }
0x12f2   : > { %v13330_v53 = vsel %vm5075_vm5, %v13323_v7, %v13329_v5  ;;  %v13261_v42 = vmax.f32 %v13259_v34, %v13260_v1  ;;  %v13274_v22 = vrot.slane %v13273_v24, 1  ;;  %v13298_v36 = vpack.c.bf16 %v13254_v52, %v13254_v52 }
0x12f3   : > { %v13300_v38 = vpack.c.bf16 %v13268_v18, %v13268_v18  ;;  %v13331_v44 = vsel %vm5077_vm6, %v13324_v56, %v13330_v53  ;;  %v13287_v12 = vsel %vm5079_vm7, %v13254_v52, %v13286_v28 }
0x12f4   : > { %v13275_v16 = vmax.f32 %v13273_v24, %v13274_v22  ;;  %v13299_v58 = vpack.c.bf16 %v13261_v42, %v13261_v42  ;;  %v13325_v35 = vunpack.c.l.b16 %v13298_v36  ;;  %v13288_v14 = vsel %vm5081_vm8, %v13261_v42, %v13287_v12 }
0x12f5   : > { %v13327_v63 = vunpack.c.l.b16 %v13300_v38  ;;  %v13289_v20 = vsel %vm5083_vm9, %v13268_v18, %v13288_v14 }
0x12f6   : > { %v13301_v10 = vpack.c.bf16 %v13275_v16, %v13275_v16  ;;  %v13326_v46 = vunpack.c.l.b16 %v13299_v58  ;;  %v13332_v15 = vsel %vm5079_vm7, %v13325_v35, %v13331_v44  ;;  %v13290_v21 = vsel %vm5085_vm10, %v13275_v16, %v13289_v20 }
0x12f7   : > { %13293 = vst.msk [vmem:[%s19995_s4] sm:$0xff] %vm13292_vm15, %v13290_v21 }
0x12f8   : > { %v13328_v60 = vunpack.c.l.b16 %v13301_v10  ;;  %v13333_v45 = vsel %vm5081_vm8, %v13326_v46, %v13332_v15 }
0x12f9   : > { %v13334_v49 = vsel %vm5083_vm9, %v13327_v63, %v13333_v45 }
0x12fa   : > { %v13335_v55 = vsel %vm5085_vm10, %v13328_v60, %v13334_v49 }
0x12fb   : > { %v13336_v6 = vpack.c.b16 %v13335_v55, %v13335_v55 }
0x12fd   : > { %16241 = vmatmul.mubr.msk.bf16.vlgmr.msra.gmra.mxu1 %vm13292_vm15, %v13336_v6 }
0x12fe   : > { %16245 = vmatpush3.bf16.msra.mxu1 %v16707_v13  ;;  %16260 = vmatprep.mubr.msk.bf16.mxu1 %vm16810_vm13, %v20196_v4 }
0x12ff   : > { %16246 = vmatprep.subr.bf16.mxu1 %v20196_v4 }
0x1302   : > { %16247 = vmatpush3.bf16.msra.mxu1 %v16708_v27 }
0x1303   : > { %16248 = vmatprep.subr.bf16.mxu1 %v20196_v4 }
0x1306   : > { %16249 = vmatpush3.bf16.msra.mxu1 %v16709_v39 }
0x1307   : > { %16250 = vmatprep.subr.bf16.mxu1 %v20196_v4 }
0x130a   : > { %16251 = vmatpush3.bf16.msra.mxu1 %v16710_v40 }
0x130b   : > { %16252 = vmatprep.subr.bf16.mxu1 %v20196_v4 }
0x130e   : > { %16253 = vmatpush3.bf16.msra.mxu1 %v16711_v8 }
0x130f   : > { %16254 = vmatprep.subr.bf16.mxu1 %v20196_v4 }
0x1312   : > { %16255 = vmatpush3.bf16.msra.mxu1 %v16712_v62 }
0x1313   : > { %16256 = vmatprep.subr.bf16.mxu1 %v20196_v4 }
0x1316   : > { %16257 = vmatpush3.bf16.msra.mxu1 %v16713_v31 }
0x1317   : > { %16258 = vmatprep.subr.bf16.mxu1 %v20196_v4 }
0x131a   : > { %16259 = vmatpush3.bf16.msra.mxu1 %v16714_v17 }
0x13bd   : > { %v13386_v33 = vpop.f32.mrf.mxu1 }
0x13be   : > { %v13387_v29 = vadd.f32 %v14456_v26, %v13386_v33 }
0x13bf   : > { %v16242_v30 = vpop.f32.mrf.mxu1 }
0x13c0   : > { %v13392_v23 = vmax.f32 %v13387_v29, 0.0 }
0x13c1   : > { %v13389_v57 = vpop.f32.mrf.mxu1 }
0x13c2   : > { %v13393_v19 = vpack.c.bf16 %v13392_v23, %v13392_v23 }
0x13c3   : > { %v16243_v25 = vpop.f32.mrf.mxu1 }
0x13c4   : > { %16261 = vmatmul.mubr.bf16.vlgmr.msra.gmra.mxu1 %v13393_v19 }
0x13c5   : > { %16729 = shalt.err (!%p16726_p3)
}
0x13c6   : > { %s16730_s10 = scalar_lea.hbm %s13525_s0, 128  ;;  %s16734_s28 = scalar_lea.hbm %s20134_s23, 256 }
0x13c7   : > { %p16731_p4 = scmp.ne.s32.totalorder %s13525_s0, %s16730_s10  ;;  %p16735_p9 = scmp.lt.s32.totalorder %s13525_s0, %s20134_s23 }
0x13c8   : > { %p16736_p10 = scmp.lt.s32.totalorder %s16734_s28, %s16730_s10 }
0x13c9   : > { %p16732_p7 = pnand %p16731_p4, %p16976_p5 }
0x13ca   : > { %p16737_p11 = por %p16736_p10, %p16735_p9 }
0x13cb   : > { %p16733_p8 = pneg %p16732_p7 }
0x13cd   : > { %p16738_p12 = pnand %p16737_p11, %p16733_p8 }
0x13cf   : > { %16741 = shalt.err (!%p16738_p12)
}
0x13d0   : > { %16280 = dma.vmem_to_hbm [thread:$0]  (%p16976_p5), %s13528_s7, 128, %s13525_s0, %s13509_s5   ;;  %v14461_v4 = vld [vmem:[%s20133_s22 + $0x1] ss:$0 sm:$0xff] }
0x13d1   : > { %s20206_s8 = sshll.u32 %s19981_s27, 3  ;;  %s20207_s10 = sshll.u32 %s16959_s6, 7 }
0x13d2   : > { %s744_s29 = scalar_lea.vmem [#allocation5], %s20206_s8  ;;  %s20208_s1 = sld [smem:[#allocation29_spill]] }
0x13d3   : > { %s13540_s11 = sshll.u32 %s744_s29, 4  ;;  %s13514_s5 = scalar_lea.sflag [#allocation6], %s19981_s27  ;;  %s20071_s11 = int_to_ptr.vmem [resolvable:$true] %s13540_s11 }
0x13d4   : > { %s16742_s0 = scalar_lea.vmem %s20071_s11, 128  ;;  %s16812_s6 = smov [#allocation5]  }
0x13d5   : > { %p16743_p13 = scmp.ne.s32.totalorder %s20071_s11, %s16742_s0  ;;  %s16746_s7 = sshll.u32 %s16812_s6, 4  ;;  %s16747_s7 = int_to_ptr.vmem [resolvable:$false] %s16746_s7 }
0x13d6   : > { %s16748_s9 = scalar_lea.vmem %s16747_s7, 256  ;;  %p16749_p2 = scmp.lt.s32.totalorder %s20071_s11, %s16747_s7 }
0x13d7   : > { %p16744_p0 = pnand %p16743_p13, %p16976_p5  ;;  %p16750_p3 = scmp.lt.s32.totalorder %s16748_s9, %s16742_s0 }
0x13d8   : > { %s20069_s28 = scalar_lea.hbm %s20208_s1, %s20207_s10 }
0x13d9   : > { %p16745_p1 = pneg %p16744_p0  ;;  %p16751_p4 = por %p16750_p3, %p16749_p2 }
0x13db   : > { %p16752_p7 = pnand %p16751_p4, %p16745_p1 }
0x1484   : > { %v13500_v50 = vpop.f32.mrf.mxu1 }
0x1485   : > { %v13501_v2 = vadd.f32 %v14461_v4, %v13500_v50 }
0x1486   : > { %v16262_v3 = vpop.f32.mrf.mxu1 }
0x1487   : > { %v13506_v47 = vmax.f32 %v13501_v2, 0.0 }
0x1488   : > { %v13503_v9 = vpop.f32.mrf.mxu1 }
0x1489   : > { %13507 = vst [vmem:[%s744_s29] sm:$0xff] %v13506_v47 }
0x148a   : > { %v16263_v61 = vpop.f32.mrf.mxu1 }
0x148b   : > { %16755 = shalt.err (!%p16752_p7)
}
0x148c   : > { %s16756_s2 = scalar_lea.hbm %s20069_s28, 128  ;;  %s16760_s29 = scalar_lea.hbm %s20208_s1, 256 }
0x148d   : > { %p16757_p8 = scmp.ne.s32.totalorder %s20069_s28, %s16756_s2  ;;  %p16761_p11 = scmp.lt.s32.totalorder %s20069_s28, %s20208_s1 }
0x148e   : > { %p16762_p12 = scmp.lt.s32.totalorder %s16760_s29, %s16756_s2 }
0x148f   : > { %p16758_p9 = pnand %p16757_p8, %p16976_p5 }
0x1490   : > { %p16763_p13 = por %p16762_p12, %p16761_p11 }
0x1491   : > { %p16759_p10 = pneg %p16758_p9 }
0x1493   : > { %p16764_p0 = pnand %p16763_p13, %p16759_p10 }
0x1495   : > { %16767 = shalt.err (!%p16764_p0)
}
0x1496   : > { %16281 = dma.vmem_to_hbm [thread:$0]  (%p16976_p5), %s20071_s11, 128, %s20069_s28, %s13514_s5  }
0x1497 PF: > { %s20209_s4 = sld [smem:[#allocation11_spill]] }
0x1498   : > { %s20210_s0 = sld [smem:[#allocation9_spill]] }
0x149d   : > { %p16291_p1 = scmp.ge.s32.totalorder %s20209_s4, 2 }
0x149e   : > { %s13552_s7 = sand.u32 1, %s20210_s0  }
0x149f   : > { %p16285_p2 = pnand %p16291_p1, %p16980_p6  ;;  %s13553_s9 = scalar_lea.sflag [#allocation4], %s13552_s7 }
0x14a1   : > { %p16286_p3 = pneg %p16285_p2 }
0x14a3   : > { %16785 = dma.done.wait (%p16286_p3), %s13553_s9, 128  }
0x14a4   : > { %16787 = vsyncadd (%p16286_p3), %s13553_s9, 4294967168  ;;  %s13562_s2 = scalar_lea.sflag [#allocation6], %s13552_s7 }
0x14a5   : > { %16789 = dma.done.wait (%p16286_p3), %s13562_s2, 128  }
0x14a6   : > { %16791 = vsyncadd (%p16286_p3), %s13562_s2, 4294967168  ;;  %s20212_s28 = sld [smem:[#allocation12_spill]]  ;;  %s20215_s5 = smov %s16798_s26 }
0x14a7   : > { %s20213_s3 = sld [smem:[#allocation10_spill]] }
0x14a8   : > { %s20214_s27 = sld [smem:[#allocation13_spill]] }
0x14ac   : > { %p38_p5 = scmp.ge.s32.totalorder %s20212_s28, 4  }
0x14ad   : > { %s20216_s26 = smov %s20213_s3 }
0x14ae   :  { %40 = sbr.rel (!%p38_p5) target bundleno = 19 (0x13), region = 208 }
0x14b3   :  { %13567 = vsyncpa [#allocation4], 1 }
0x14b4   :  { %13569 = vsyncpa [#allocation4 + $0x1], 1 }
0x14b5   :  { %13570 = vsyncpa [#allocation6], 1 }
0x14b6   :  { %13572 = vsyncpa [#allocation6 + $0x1], 1 }

</bundles_post_ra>
